<compile_context>
chip_gen: v7x
topology: tpu7x:2x2x1
jax: 0.10.0
libtpu: 0.0.40
codegen_flags: <defaults>
</compile_context>

<pallas_src>
import jax
import jax.numpy as jnp
from jax import lax, random
from jax.experimental import pallas as pl
from jax.experimental.pallas import tpu as pltpu  # noqa: F401 (TPU backend)

EPS = 1e-8


# ---------------------------------------------------------------------------
# Kernel 1: fused input transform + 2-layer LSTM (single invocation, no grid)
# ---------------------------------------------------------------------------
def _rnn_fused_kernel(xflat_ref, wcat_ref, bcat_ref,
                      wih0_ref, whh0_ref, b0_ref,
                      wih1_ref, whh1_ref, b1_ref,
                      h0_ref, c0_ref,
                      y_ref, hT_ref, cT_ref):
    _, B, HP = h0_ref.shape               # HP = 128-lane-padded hidden size
    TB = y_ref.shape[0]
    T = TB // B

    # fused input transform on all T*B tokens at once (time-major flat rows)
    rnn_in = jnp.tanh(
        jnp.dot(xflat_ref[...], wcat_ref[...],
                preferred_element_type=jnp.float32)
        + bcat_ref[...])                                        # (T*B, E) f32

    # layer-0 input->hidden gate projection hoisted out of the recurrence:
    # one matmul at M=T*B instead of T serial matmuls at M=B.
    gih0 = (jnp.dot(rnn_in.astype(jnp.bfloat16), wih0_ref[...],
                    preferred_element_type=jnp.float32)
            + b0_ref[...])                                      # (T*B, 4*HP)

    def gates_to_hc(g, c):
        # per-gate slabs are 128-lane aligned -> no cross-lane shuffles
        i_g = jax.nn.sigmoid(g[:, 0 * HP:1 * HP])
        f_g = jax.nn.sigmoid(g[:, 1 * HP:2 * HP])
        g_g = jnp.tanh(g[:, 2 * HP:3 * HP])
        o_g = jax.nn.sigmoid(g[:, 3 * HP:4 * HP])
        c_new = f_g * c + i_g * g_g
        h_new = o_g * jnp.tanh(c_new)
        return h_new, c_new

    h0 = h0_ref[0]
    c0 = c0_ref[0]
    h1 = h0_ref[1]
    c1 = c0_ref[1]

    # serial recurrence; T is small & static -> fully unrolled, static indices.
    # Only 3 matmuls per step remain on the latency-critical chain.
    for t in range(T):
        g0 = gih0[t * B:(t + 1) * B, :] + jnp.dot(
            h0.astype(jnp.bfloat16), whh0_ref[...],
            preferred_element_type=jnp.float32)
        h0, c0 = gates_to_hc(g0, c0)
        # eval-mode: nn.LSTM inter-layer dropout is identity
        g1 = (jnp.dot(h0.astype(jnp.bfloat16), wih1_ref[...],
                      preferred_element_type=jnp.float32)
              + jnp.dot(h1.astype(jnp.bfloat16), whh1_ref[...],
                        preferred_element_type=jnp.float32)
              + b1_ref[...])
        h1, c1 = gates_to_hc(g1, c1)
        # one contiguous (B, HP) bf16 store per timestep (time-major rows)
        y_ref[pl.ds(t * B, B), :] = h1.astype(jnp.bfloat16)

    # lane-dense (HP-padded) final states; wrapper slices back to H
    hT_ref[0] = h0
    hT_ref[1] = h1
    cT_ref[0] = c0
    cT_ref[1] = c1


def rnn_forward(xflat_tm, pp, h0p, c0p):
    TB = xflat_tm.shape[0]
    _, B, HP = h0p.shape
    return pl.pallas_call(
        _rnn_fused_kernel,
        out_shape=(jax.ShapeDtypeStruct((TB, HP), jnp.bfloat16),   # y (T*B,HP)
                   jax.ShapeDtypeStruct((2, B, HP), jnp.float32),  # h_T padded
                   jax.ShapeDtypeStruct((2, B, HP), jnp.float32)), # c_T padded
    )(xflat_tm, pp['wcat'], pp['bcat'],
      pp['wih0'], pp['whh0'], pp['b0'],
      pp['wih1'], pp['whh1'], pp['b1'],
      h0p, c0p)


# ---------------------------------------------------------------------------
# Kernel 2: fused global attention + readout + softmax + pointer generator
#           (single gridless invocation, batch flattened into M = B*T rows)
# ---------------------------------------------------------------------------
def _attn_readout_kernel(q_ref, mem_ref, bias_ref, emb_ref,
                         ph_ids_ref, ph_mask_ref,
                         wa_ref, woc_ref, woq_ref, wr_ref, br_ref,
                         wpc_ref, wpz_ref, wpy_ref, bpc_ref,
                         attn_ref, readout_ref, dist_ref):
    BT, HP = q_ref.shape
    B, S, K = mem_ref.shape
    T = BT // B
    V = wr_ref.shape[1]
    L = ph_ids_ref.shape[2]

    q16 = q_ref[...]                        # (B*T, HP) bf16, batch-major rows
    mem16 = mem_ref[...]                    # (B, S, K) bf16

    # ---- global attention ("general"): scores, length mask, softmax ----
    qw = jnp.dot(q16, wa_ref[...], preferred_element_type=jnp.float32)  # (B*T,K)
    qw_b = qw.reshape(B, T, K).astype(jnp.bfloat16)
    scores = jnp.einsum('btk,bsk->bts', qw_b, mem16,
                        preferred_element_type=jnp.float32)             # (B,T,S)
    scores = scores + bias_ref[...]         # additive length mask (B,1,S)
    m = jnp.max(scores, axis=-1, keepdims=True)
    e = jnp.exp(scores - m)
    attn = e / jnp.sum(e, axis=-1, keepdims=True)                       # (B,T,S)
    attn_ref[...] = attn

    ctx = jnp.einsum('bts,bsk->btk', attn.astype(jnp.bfloat16), mem16,
                     preferred_element_type=jnp.float32)                # (B,T,K)
    ctx2 = ctx.reshape(BT, K)
    dec = jnp.tanh(
        jnp.dot(ctx2.astype(jnp.bfloat16), woc_ref[...],
                preferred_element_type=jnp.float32)
        + jnp.dot(q16, woq_ref[...],
                  preferred_element_type=jnp.float32))                  # (B*T,HP)

    # ---- readout + softmax ----
    readouts = (jnp.dot(dec.astype(jnp.bfloat16), wr_ref[...],
                        preferred_element_type=jnp.float32)
                + br_ref[...])                                          # (B*T,V)
    readout_ref[...] = readouts.reshape(B, T, V)
    mm = jnp.max(readouts, axis=-1, keepdims=True)
    ee = jnp.exp(readouts - mm)
    vocab_dist = ee / jnp.sum(ee, axis=-1, keepdims=True)               # (B*T,V)

    # ---- pointer generator ----
    p_gen = jax.nn.sigmoid(
        jnp.sum(ctx2 * wpc_ref[...], axis=-1, keepdims=True)
        + jnp.sum(q16.astype(jnp.float32) * wpz_ref[...], axis=-1, keepdims=True)
        + jnp.sum(emb_ref[...] * wpy_ref[...], axis=-1, keepdims=True)
        + bpc_ref[...])                                                 # (B*T,1)
    vocab_dist_ = (p_gen * vocab_dist).reshape(B, T, V)
    attn_dist_ = (1.0 - p_gen).reshape(B, T, 1) * attn                  # (B,T,S)

    # phrase-bank scatter_add as a one-hot GEMM
    ph_ids = ph_ids_ref[...]                # (B, S, L) int32
    ph_mask = ph_mask_ref[...]              # (B, S, L) f32
    inv_len = 1.0 / (jnp.sum(ph_mask, axis=-1, keepdims=True) + EPS)
    mask_scaled = ph_mask * inv_len         # (B, S, L)
    iota_v = lax.broadcasted_iota(jnp.int32, (B, S, V), 2)
    m_scatter = jnp.zeros((B, S, V), jnp.float32)
    for l in range(L):                      # L small & static
        m_scatter = m_scatter + mask_scaled[:, :, l:l + 1] * (
            ph_ids[:, :, l:l + 1] == iota_v).astype(jnp.float32)
    add = jnp.einsum('bts,bsv->btv',
                     attn_dist_.astype(jnp.bfloat16),
                     m_scatter.astype(jnp.bfloat16),
                     preferred_element_type=jnp.float32)                # (B,T,V)
    dist_ref[...] = vocab_dist_ + add


def attn_readout(q2d, mem16, attn_bias, emb2d, ph_ids, ph_mask, pp, B, T):
    S = mem16.shape[1]
    V = pp['wr'].shape[-1]
    return pl.pallas_call(
        _attn_readout_kernel,
        out_shape=(jax.ShapeDtypeStruct((B, T, S), jnp.float32),
                   jax.ShapeDtypeStruct((B, T, V), jnp.float32),
                   jax.ShapeDtypeStruct((B, T, V), jnp.float32)),
    )(q2d, mem16, attn_bias, emb2d, ph_ids, ph_mask,
      pp['wa'], pp['woc'], pp['woq'], pp['wr'], pp['br'],
      pp['wpc'], pp['wpz'], pp['wpy'], pp['bpc'])


# ---------------------------------------------------------------------------
# WordDecoder.forward (pointer_generator=True, task='wikigen', stype=None)
# ---------------------------------------------------------------------------
def word_decoder_forward(pp, state_hidden, word_inputs_emb,
                         sent_planner_output, sent_id_tensor, sent_mask_tensor,
                         memory_bank, memory_len, ph_bank_word_ids,
                         ph_bank_word_mask, stype_one_hot=None):
    B, T, E = word_inputs_emb.shape
    Hp = sent_planner_output.shape[-1]
    h0, c0 = state_hidden                          # each (2, B, H)
    H = h0.shape[-1]
    HP = pp['whh0'].shape[0]
    S = memory_bank.shape[1]

    # token-distributed planner output (gather + mask) -- tiny XLA glue
    idx = jnp.broadcast_to(sent_id_tensor[:, :, None], (B, T, Hp))
    token_planner = jnp.take_along_axis(sent_planner_output, idx, axis=1)
    planner_masked = sent_mask_tensor[:, :, None] * token_planner
    # TODO(synk): stype_one_hot gather / type-conditional attention path not
    # exercised here (stype_one_hot=None); GlobalAttention source unavailable.

    # fused concat + (transpose, reshape) of the tiny raw input; bf16 feed
    xcat = jnp.concatenate([word_inputs_emb, planner_masked], axis=-1)
    xflat_tm = jnp.transpose(xcat, (1, 0, 2)).reshape(T * B, E + Hp)
    xflat_tm = xflat_tm.astype(jnp.bfloat16)

    # zero-padding keeps padded hidden/cell lanes exactly zero in the kernel
    h0p = jnp.pad(h0, ((0, 0), (0, 0), (0, HP - H)))
    c0p = jnp.pad(c0, ((0, 0), (0, 0), (0, HP - H)))

    y_tm, hTp, cTp = rnn_forward(xflat_tm, pp, h0p, c0p)
    dec_state = (hTp[..., :H], cTp[..., :H])       # slice padded lanes (free)

    # batch-major re-layout of the bf16 RNN output: ~4 KiB of layout plumbing
    q2d = jnp.transpose(y_tm.reshape(T, B, HP), (1, 0, 2)).reshape(B * T, HP)

    # additive attention length mask, precomputed once in XLA
    attn_bias = jnp.where(
        jnp.arange(S)[None, None, :] < memory_len[:, None, None],
        0.0, -1e9).astype(jnp.float32)             # (B, 1, S)

    emb2d = word_inputs_emb.reshape(B * T, E)

    enc_attn, readouts, vocab_pred_dist = attn_readout(
        q2d, memory_bank.astype(jnp.bfloat16), attn_bias, emb2d,
        ph_bank_word_ids, ph_bank_word_mask, pp, B, T)

    return dec_state, enc_attn, vocab_pred_dist, readouts


# ---------------------------------------------------------------------------
# Parameter construction (PyTorch-equivalent layout) and kernel-layout prep
# ---------------------------------------------------------------------------
def make_params(key, E, H, K, V):
    ks = random.split(key, 20)
    n = lambda k, s: (0.1 * random.normal(k, s)).astype(jnp.float32)
    return {
        'ww': n(ks[0], (E, E)), 'bw': n(ks[1], (1, E)),
        'wp': n(ks[2], (H, E)), 'bp': n(ks[3], (1, E)),
        'wih0': n(ks[4], (E, 4 * H)), 'whh0': n(ks[5], (H, 4 * H)),
        'b0': n(ks[6], (1, 4 * H)),
        'wih1': n(ks[7], (H, 4 * H)), 'whh1': n(ks[8], (H, 4 * H)),
        'b1': n(ks[9], (1, 4 * H)),
        'wa': n(ks[10], (H, K)),
        'woc': n(ks[11], (K, H)), 'woq': n(ks[12], (H, H)),
        'wr': n(ks[13], (H, V)), 'br': n(ks[14], (1, V)),
        'wpc': n(ks[15], (1, K)), 'bpc': n(ks[16], (1, 1)),
        'wpz': n(ks[17], (1, H)), 'wpy': n(ks[18], (1, E)),
    }


def prepare_params(p, H):
    """Pad hidden/gate dims to 128 lanes, fuse input-transform weights, cast
    matmul weights to bf16 (f32 accumulation in-kernel).

    NOTE: all padding is zeros; together with zero-padded h0/c0 this keeps the
    padded hidden/cell lanes exactly zero throughout the recurrence."""
    HP = ((H + 127) // 128) * 128
    assert HP % 128 == 0 and HP >= H
    bf = lambda w: w.astype(jnp.bfloat16)

    def pad_gate_cols(w):                    # (I, 4H) -> (I, 4*HP), per-gate pad
        i = w.shape[0]
        w4 = jnp.pad(w.reshape(i, 4, H), ((0, 0), (0, 0), (0, HP - H)))
        return w4.reshape(i, 4 * HP)

    def pad_rows(w):
        return jnp.pad(w, ((0, HP - w.shape[0]), (0, 0)))

    def pad_cols(w):
        return jnp.pad(w, ((0, 0), (0, HP - w.shape[1])))

    return {
        'wcat': bf(jnp.concatenate([p['ww'], p['wp']], axis=0)),
        'bcat': p['bw'] + p['bp'],
        'wih0': bf(pad_gate_cols(p['wih0'])),
        'whh0': bf(pad_rows(pad_gate_cols(p['whh0']))),
        'b0': pad_gate_cols(p['b0']),
        'wih1': bf(pad_rows(pad_gate_cols(p['wih1']))),
        'whh1': bf(pad_rows(pad_gate_cols(p['whh1']))),
        'b1': pad_gate_cols(p['b1']),
        'wa': bf(pad_rows(p['wa'])),
        'woc': bf(pad_cols(p['woc'])),
        'woq': bf(pad_rows(pad_cols(p['woq']))),
        'wr': bf(pad_rows(p['wr'])),
        'br': p['br'],
        'wpc': p['wpc'], 'bpc': p['bpc'],
        'wpz': pad_cols(p['wpz']),
        'wpy': p['wpy'],
    }


if __name__ == "__main__":
    B, T, E, H = 2, 8, 300, 32              # batch, tgt len, emb(=300), hidden
    n_sent, S, K, L, V = 4, 6, 300, 3, 128  # sents, mem len, key dim, ph len, vocab

    key = random.PRNGKey(0)
    kp, *ki = random.split(key, 12)
    params = make_params(kp, E, H, K, V)
    pp = prepare_params(params, H)

    word_inputs_emb = random.normal(ki[0], (B, T, E), jnp.float32)
    sent_planner_output = random.normal(ki[1], (B, n_sent, H), jnp.float32)
    sent_id_tensor = random.randint(ki[2], (B, T), 0, n_sent, jnp.int32)
    sent_mask_tensor = (random.uniform(ki[3], (B, T)) > 0.2).astype(jnp.float32)
    memory_bank = random.normal(ki[4], (B, S, K), jnp.float32)
    memory_len = jnp.array([S, S - 2], dtype=jnp.int32)
    ph_bank_word_ids = random.randint(ki[5], (B, S, L), 0, V, jnp.int32)
    ph_bank_word_mask = (random.uniform(ki[6], (B, S, L)) > 0.3).astype(jnp.float32)
    h0 = random.normal(ki[7], (2, B, H), jnp.float32)
    c0 = random.normal(ki[8], (2, B, H), jnp.float32)

    fwd = jax.jit(word_decoder_forward)
    dec_state, enc_attn, vocab_pred_dist, readouts = fwd(
        pp, (h0, c0), word_inputs_emb, sent_planner_output,
        sent_id_tensor, sent_mask_tensor, memory_bank, memory_len,
        ph_bank_word_ids, ph_bank_word_mask)

    jax.block_until_ready((dec_state, enc_attn, vocab_pred_dist, readouts))
    assert enc_attn.shape == (B, T, S)
    assert vocab_pred_dist.shape == (B, T, V)
    assert readouts.shape == (B, T, V)
    assert dec_state[0].shape == (2, B, H) and dec_state[1].shape == (2, B, H)
    assert bool(jnp.all(jnp.isfinite(vocab_pred_dist)))
    assert bool(jnp.all(jnp.isfinite(enc_attn)))
    # exact-division softmax: attention rows normalise to 1
    assert bool(jnp.allclose(jnp.sum(enc_attn, axis=-1), 1.0, atol=2e-3))
    print("KERNEL_OK")
</pallas_src>

<mosaic_0001>
module attributes {stable_mosaic.version = 11 : i64} {
  func.func @_rnn_fused_kernel(%arg0: memref<16x332xbf16, #tpu.memory_space<vmem>>, %arg1: memref<332x300xbf16, #tpu.memory_space<vmem>>, %arg2: memref<1x300xf32, #tpu.memory_space<vmem>>, %arg3: memref<300x512xbf16, #tpu.memory_space<vmem>>, %arg4: memref<128x512xbf16, #tpu.memory_space<vmem>>, %arg5: memref<1x512xf32, #tpu.memory_space<vmem>>, %arg6: memref<128x512xbf16, #tpu.memory_space<vmem>>, %arg7: memref<128x512xbf16, #tpu.memory_space<vmem>>, %arg8: memref<1x512xf32, #tpu.memory_space<vmem>>, %arg9: memref<2x2x128xf32, #tpu.memory_space<vmem>>, %arg10: memref<2x2x128xf32, #tpu.memory_space<vmem>>, %arg11: memref<16x128xbf16, #tpu.memory_space<vmem>>, %arg12: memref<2x2x128xf32, #tpu.memory_space<vmem>>, %arg13: memref<2x2x128xf32, #tpu.memory_space<vmem>>) attributes {dimension_semantics = [], scalar_prefetch = 0 : i64, scratch_operands = 0 : i64, tpu.core_type = #tpu.core_type<tc>} {
    %c0 = arith.constant 0 : index
    %c0_0 = arith.constant 0 : index
    %0 = vector.load %arg0[%c0, %c0_0] : memref<16x332xbf16, #tpu.memory_space<vmem>>, vector<16x332xbf16>
    %c0_1 = arith.constant 0 : index
    %c0_2 = arith.constant 0 : index
    %1 = vector.load %arg1[%c0_1, %c0_2] : memref<332x300xbf16, #tpu.memory_space<vmem>>, vector<332x300xbf16>
    %cst = arith.constant dense<0.000000e+00> : vector<16x300xf32>
    %2 = tpu.matmul %0, %1, %cst {dimension_numbers = #tpu.dot_dimension_numbers<[1], [0], [0], [1], [0, 0, 1, 1], [], []>} : vector<16x332xbf16>, vector<332x300xbf16>, vector<16x300xf32> -> vector<16x300xf32>
    %c0_3 = arith.constant 0 : index
    %c0_4 = arith.constant 0 : index
    %3 = vector.load %arg2[%c0_3, %c0_4] : memref<1x300xf32, #tpu.memory_space<vmem>>, vector<1x300xf32>
    %4 = vector.broadcast %3 : vector<1x300xf32> to vector<16x300xf32>
    %5 = arith.addf %2, %4 : vector<16x300xf32>
    %6 = math.tanh %5 : vector<16x300xf32>
    %7 = arith.truncf %6 : vector<16x300xf32> to vector<16x300xbf16>
    %c0_5 = arith.constant 0 : index
    %c0_6 = arith.constant 0 : index
    %8 = vector.load %arg3[%c0_5, %c0_6] : memref<300x512xbf16, #tpu.memory_space<vmem>>, vector<300x512xbf16>
    %cst_7 = arith.constant dense<0.000000e+00> : vector<16x512xf32>
    %9 = tpu.matmul %7, %8, %cst_7 {dimension_numbers = #tpu.dot_dimension_numbers<[1], [0], [0], [1], [0, 0, 1, 1], [], []>} : vector<16x300xbf16>, vector<300x512xbf16>, vector<16x512xf32> -> vector<16x512xf32>
    %c0_8 = arith.constant 0 : index
    %c0_9 = arith.constant 0 : index
    %10 = vector.load %arg5[%c0_8, %c0_9] : memref<1x512xf32, #tpu.memory_space<vmem>>, vector<1x512xf32>
    %11 = vector.broadcast %10 : vector<1x512xf32> to vector<16x512xf32>
    %12 = arith.addf %9, %11 : vector<16x512xf32>
    %c0_10 = arith.constant 0 : index
    %c0_11 = arith.constant 0 : index
    %c0_12 = arith.constant 0 : index
    %13 = vector.load %arg9[%c0_10, %c0_11, %c0_12] : memref<2x2x128xf32, #tpu.memory_space<vmem>>, vector<1x2x128xf32>
    %14 = vector.shape_cast %13 : vector<1x2x128xf32> to vector<2x128xf32>
    %c0_13 = arith.constant 0 : index
    %c0_14 = arith.constant 0 : index
    %c0_15 = arith.constant 0 : index
    %15 = vector.load %arg10[%c0_13, %c0_14, %c0_15] : memref<2x2x128xf32, #tpu.memory_space<vmem>>, vector<1x2x128xf32>
    %16 = vector.shape_cast %15 : vector<1x2x128xf32> to vector<2x128xf32>
    %c1 = arith.constant 1 : index
    %c0_16 = arith.constant 0 : index
    %c0_17 = arith.constant 0 : index
    %17 = vector.load %arg9[%c1, %c0_16, %c0_17] : memref<2x2x128xf32, #tpu.memory_space<vmem>>, vector<1x2x128xf32>
    %18 = vector.shape_cast %17 : vector<1x2x128xf32> to vector<2x128xf32>
    %c1_18 = arith.constant 1 : index
    %c0_19 = arith.constant 0 : index
    %c0_20 = arith.constant 0 : index
    %19 = vector.load %arg10[%c1_18, %c0_19, %c0_20] : memref<2x2x128xf32, #tpu.memory_space<vmem>>, vector<1x2x128xf32>
    %20 = vector.shape_cast %19 : vector<1x2x128xf32> to vector<2x128xf32>
    %21 = vector.extract_strided_slice %12 {offsets = [0, 0], sizes = [2, 512], strides = [1, 1]} : vector<16x512xf32> to vector<2x512xf32>
    %22 = arith.truncf %14 : vector<2x128xf32> to vector<2x128xbf16>
    %c0_21 = arith.constant 0 : index
    %c0_22 = arith.constant 0 : index
    %23 = vector.load %arg4[%c0_21, %c0_22] : memref<128x512xbf16, #tpu.memory_space<vmem>>, vector<128x512xbf16>
    %cst_23 = arith.constant dense<0.000000e+00> : vector<2x512xf32>
    %24 = tpu.matmul %22, %23, %cst_23 {dimension_numbers = #tpu.dot_dimension_numbers<[1], [0], [0], [1], [0, 0, 1, 1], [], []>} : vector<2x128xbf16>, vector<128x512xbf16>, vector<2x512xf32> -> vector<2x512xf32>
    %25 = arith.addf %21, %24 : vector<2x512xf32>
    %26 = vector.extract_strided_slice %25 {offsets = [0, 0], sizes = [2, 128], strides = [1, 1]} : vector<2x512xf32> to vector<2x128xf32>
    %27 = arith.negf %26 : vector<2x128xf32>
    %28 = math.exp %27 : vector<2x128xf32>
    %cst_24 = arith.constant 1.000000e+00 : f32
    %29 = vector.broadcast %cst_24 : f32 to vector<2x128xf32>
    %30 = arith.addf %29, %28 : vector<2x128xf32>
    %31 = arith.divf %29, %30 : vector<2x128xf32>
    %32 = vector.extract_strided_slice %25 {offsets = [0, 128], sizes = [2, 128], strides = [1, 1]} : vector<2x512xf32> to vector<2x128xf32>
    %33 = arith.negf %32 : vector<2x128xf32>
    %34 = math.exp %33 : vector<2x128xf32>
    %cst_25 = arith.constant 1.000000e+00 : f32
    %35 = vector.broadcast %cst_25 : f32 to vector<2x128xf32>
    %36 = arith.addf %35, %34 : vector<2x128xf32>
    %37 = arith.divf %35, %36 : vector<2x128xf32>
    %38 = vector.extract_strided_slice %25 {offsets = [0, 256], sizes = [2, 128], strides = [1, 1]} : vector<2x512xf32> to vector<2x128xf32>
    %39 = math.tanh %38 : vector<2x128xf32>
    %40 = vector.extract_strided_slice %25 {offsets = [0, 384], sizes = [2, 128], strides = [1, 1]} : vector<2x512xf32> to vector<2x128xf32>
    %41 = arith.negf %40 : vector<2x128xf32>
    %42 = math.exp %41 : vector<2x128xf32>
    %cst_26 = arith.constant 1.000000e+00 : f32
    %43 = vector.broadcast %cst_26 : f32 to vector<2x128xf32>
    %44 = arith.addf %43, %42 : vector<2x128xf32>
    %45 = arith.divf %43, %44 : vector<2x128xf32>
    %46 = arith.mulf %37, %16 : vector<2x128xf32>
    %47 = arith.mulf %31, %39 : vector<2x128xf32>
    %48 = arith.addf %46, %47 : vector<2x128xf32>
    %49 = math.tanh %48 : vector<2x128xf32>
    %50 = arith.mulf %45, %49 : vector<2x128xf32>
    %51 = arith.truncf %50 : vector<2x128xf32> to vector<2x128xbf16>
    %c0_27 = arith.constant 0 : index
    %c0_28 = arith.constant 0 : index
    %52 = vector.load %arg6[%c0_27, %c0_28] : memref<128x512xbf16, #tpu.memory_space<vmem>>, vector<128x512xbf16>
    %cst_29 = arith.constant dense<0.000000e+00> : vector<2x512xf32>
    %53 = tpu.matmul %51, %52, %cst_29 {dimension_numbers = #tpu.dot_dimension_numbers<[1], [0], [0], [1], [0, 0, 1, 1], [], []>} : vector<2x128xbf16>, vector<128x512xbf16>, vector<2x512xf32> -> vector<2x512xf32>
    %54 = arith.truncf %18 : vector<2x128xf32> to vector<2x128xbf16>
    %c0_30 = arith.constant 0 : index
    %c0_31 = arith.constant 0 : index
    %55 = vector.load %arg7[%c0_30, %c0_31] : memref<128x512xbf16, #tpu.memory_space<vmem>>, vector<128x512xbf16>
    %cst_32 = arith.constant dense<0.000000e+00> : vector<2x512xf32>
    %56 = tpu.matmul %54, %55, %cst_32 {dimension_numbers = #tpu.dot_dimension_numbers<[1], [0], [0], [1], [0, 0, 1, 1], [], []>} : vector<2x128xbf16>, vector<128x512xbf16>, vector<2x512xf32> -> vector<2x512xf32>
    %57 = arith.addf %53, %56 : vector<2x512xf32>
    %c0_33 = arith.constant 0 : index
    %c0_34 = arith.constant 0 : index
    %58 = vector.load %arg8[%c0_33, %c0_34] : memref<1x512xf32, #tpu.memory_space<vmem>>, vector<1x512xf32>
    %59 = vector.broadcast %58 : vector<1x512xf32> to vector<2x512xf32>
    %60 = arith.addf %57, %59 : vector<2x512xf32>
    %61 = vector.extract_strided_slice %60 {offsets = [0, 0], sizes = [2, 128], strides = [1, 1]} : vector<2x512xf32> to vector<2x128xf32>
    %62 = arith.negf %61 : vector<2x128xf32>
    %63 = math.exp %62 : vector<2x128xf32>
    %cst_35 = arith.constant 1.000000e+00 : f32
    %64 = vector.broadcast %cst_35 : f32 to vector<2x128xf32>
    %65 = arith.addf %64, %63 : vector<2x128xf32>
    %66 = arith.divf %64, %65 : vector<2x128xf32>
    %67 = vector.extract_strided_slice %60 {offsets = [0, 128], sizes = [2, 128], strides = [1, 1]} : vector<2x512xf32> to vector<2x128xf32>
    %68 = arith.negf %67 : vector<2x128xf32>
    %69 = math.exp %68 : vector<2x128xf32>
    %cst_36 = arith.constant 1.000000e+00 : f32
    %70 = vector.broadcast %cst_36 : f32 to vector<2x128xf32>
    %71 = arith.addf %70, %69 : vector<2x128xf32>
    %72 = arith.divf %70, %71 : vector<2x128xf32>
    %73 = vector.extract_strided_slice %60 {offsets = [0, 256], sizes = [2, 128], strides = [1, 1]} : vector<2x512xf32> to vector<2x128xf32>
    %74 = math.tanh %73 : vector<2x128xf32>
    %75 = vector.extract_strided_slice %60 {offsets = [0, 384], sizes = [2, 128], strides = [1, 1]} : vector<2x512xf32> to vector<2x128xf32>
    %76 = arith.negf %75 : vector<2x128xf32>
    %77 = math.exp %76 : vector<2x128xf32>
    %cst_37 = arith.constant 1.000000e+00 : f32
    %78 = vector.broadcast %cst_37 : f32 to vector<2x128xf32>
    %79 = arith.addf %78, %77 : vector<2x128xf32>
    %80 = arith.divf %78, %79 : vector<2x128xf32>
    %81 = arith.mulf %72, %20 : vector<2x128xf32>
    %82 = arith.mulf %66, %74 : vector<2x128xf32>
    %83 = arith.addf %81, %82 : vector<2x128xf32>
    %84 = math.tanh %83 : vector<2x128xf32>
    %85 = arith.mulf %80, %84 : vector<2x128xf32>
    %86 = arith.truncf %85 : vector<2x128xf32> to vector<2x128xbf16>
    %c0_38 = arith.constant 0 : index
    %c0_39 = arith.constant 0 : index
    %87 = vector.load %arg11[%c0_38, %c0_39] : memref<16x128xbf16, #tpu.memory_space<vmem>>, vector<2x128xbf16>
    tpu.vector_store %arg11[%c0_38, %c0_39], %86 {strides = array<i32>} : memref<16x128xbf16, #tpu.memory_space<vmem>>, vector<2x128xbf16>,
    %88 = vector.extract_strided_slice %12 {offsets = [2, 0], sizes = [2, 512], strides = [1, 1]} : vector<16x512xf32> to vector<2x512xf32>
    %89 = arith.truncf %50 : vector<2x128xf32> to vector<2x128xbf16>
    %c0_40 = arith.constant 0 : index
    %c0_41 = arith.constant 0 : index
    %90 = vector.load %arg4[%c0_40, %c0_41] : memref<128x512xbf16, #tpu.memory_space<vmem>>, vector<128x512xbf16>
    %cst_42 = arith.constant dense<0.000000e+00> : vector<2x512xf32>
    %91 = tpu.matmul %89, %90, %cst_42 {dimension_numbers = #tpu.dot_dimension_numbers<[1], [0], [0], [1], [0, 0, 1, 1], [], []>} : vector<2x128xbf16>, vector<128x512xbf16>, vector<2x512xf32> -> vector<2x512xf32>
    %92 = arith.addf %88, %91 : vector<2x512xf32>
    %93 = vector.extract_strided_slice %92 {offsets = [0, 0], sizes = [2, 128], strides = [1, 1]} : vector<2x512xf32> to vector<2x128xf32>
    %94 = arith.negf %93 : vector<2x128xf32>
    %95 = math.exp %94 : vector<2x128xf32>
    %cst_43 = arith.constant 1.000000e+00 : f32
    %96 = vector.broadcast %cst_43 : f32 to vector<2x128xf32>
    %97 = arith.addf %96, %95 : vector<2x128xf32>
    %98 = arith.divf %96, %97 : vector<2x128xf32>
    %99 = vector.extract_strided_slice %92 {offsets = [0, 128], sizes = [2, 128], strides = [1, 1]} : vector<2x512xf32> to vector<2x128xf32>
    %100 = arith.negf %99 : vector<2x128xf32>
    %101 = math.exp %100 : vector<2x128xf32>
    %cst_44 = arith.constant 1.000000e+00 : f32
    %102 = vector.broadcast %cst_44 : f32 to vector<2x128xf32>
    %103 = arith.addf %102, %101 : vector<2x128xf32>
    %104 = arith.divf %102, %103 : vector<2x128xf32>
    %105 = vector.extract_strided_slice %92 {offsets = [0, 256], sizes = [2, 128], strides = [1, 1]} : vector<2x512xf32> to vector<2x128xf32>
    %106 = math.tanh %105 : vector<2x128xf32>
    %107 = vector.extract_strided_slice %92 {offsets = [0, 384], sizes = [2, 128], strides = [1, 1]} : vector<2x512xf32> to vector<2x128xf32>
    %108 = arith.negf %107 : vector<2x128xf32>
    %109 = math.exp %108 : vector<2x128xf32>
    %cst_45 = arith.constant 1.000000e+00 : f32
    %110 = vector.broadcast %cst_45 : f32 to vector<2x128xf32>
    %111 = arith.addf %110, %109 : vector<2x128xf32>
    %112 = arith.divf %110, %111 : vector<2x128xf32>
    %113 = arith.mulf %104, %48 : vector<2x128xf32>
    %114 = arith.mulf %98, %106 : vector<2x128xf32>
    %115 = arith.addf %113, %114 : vector<2x128xf32>
    %116 = math.tanh %115 : vector<2x128xf32>
    %117 = arith.mulf %112, %116 : vector<2x128xf32>
    %118 = arith.truncf %117 : vector<2x128xf32> to vector<2x128xbf16>
    %c0_46 = arith.constant 0 : index
    %c0_47 = arith.constant 0 : index
    %119 = vector.load %arg6[%c0_46, %c0_47] : memref<128x512xbf16, #tpu.memory_space<vmem>>, vector<128x512xbf16>
    %cst_48 = arith.constant dense<0.000000e+00> : vector<2x512xf32>
    %120 = tpu.matmul %118, %119, %cst_48 {dimension_numbers = #tpu.dot_dimension_numbers<[1], [0], [0], [1], [0, 0, 1, 1], [], []>} : vector<2x128xbf16>, vector<128x512xbf16>, vector<2x512xf32> -> vector<2x512xf32>
    %121 = arith.truncf %85 : vector<2x128xf32> to vector<2x128xbf16>
    %c0_49 = arith.constant 0 : index
    %c0_50 = arith.constant 0 : index
    %122 = vector.load %arg7[%c0_49, %c0_50] : memref<128x512xbf16, #tpu.memory_space<vmem>>, vector<128x512xbf16>
    %cst_51 = arith.constant dense<0.000000e+00> : vector<2x512xf32>
    %123 = tpu.matmul %121, %122, %cst_51 {dimension_numbers = #tpu.dot_dimension_numbers<[1], [0], [0], [1], [0, 0, 1, 1], [], []>} : vector<2x128xbf16>, vector<128x512xbf16>, vector<2x512xf32> -> vector<2x512xf32>
    %124 = arith.addf %120, %123 : vector<2x512xf32>
    %c0_52 = arith.constant 0 : index
    %c0_53 = arith.constant 0 : index
    %125 = vector.load %arg8[%c0_52, %c0_53] : memref<1x512xf32, #tpu.memory_space<vmem>>, vector<1x512xf32>
    %126 = vector.broadcast %125 : vector<1x512xf32> to vector<2x512xf32>
    %127 = arith.addf %124, %126 : vector<2x512xf32>
    %128 = vector.extract_strided_slice %127 {offsets = [0, 0], sizes = [2, 128], strides = [1, 1]} : vector<2x512xf32> to vector<2x128xf32>
    %129 = arith.negf %128 : vector<2x128xf32>
    %130 = math.exp %129 : vector<2x128xf32>
    %cst_54 = arith.constant 1.000000e+00 : f32
    %131 = vector.broadcast %cst_54 : f32 to vector<2x128xf32>
    %132 = arith.addf %131, %130 : vector<2x128xf32>
    %133 = arith.divf %131, %132 : vector<2x128xf32>
    %134 = vector.extract_strided_slice %127 {offsets = [0, 128], sizes = [2, 128], strides = [1, 1]} : vector<2x512xf32> to vector<2x128xf32>
    %135 = arith.negf %134 : vector<2x128xf32>
    %136 = math.exp %135 : vector<2x128xf32>
    %cst_55 = arith.constant 1.000000e+00 : f32
    %137 = vector.broadcast %cst_55 : f32 to vector<2x128xf32>
    %138 = arith.addf %137, %136 : vector<2x128xf32>
    %139 = arith.divf %137, %138 : vector<2x128xf32>
    %140 = vector.extract_strided_slice %127 {offsets = [0, 256], sizes = [2, 128], strides = [1, 1]} : vector<2x512xf32> to vector<2x128xf32>
    %141 = math.tanh %140 : vector<2x128xf32>
    %142 = vector.extract_strided_slice %127 {offsets = [0, 384], sizes = [2, 128], strides = [1, 1]} : vector<2x512xf32> to vector<2x128xf32>
    %143 = arith.negf %142 : vector<2x128xf32>
    %144 = math.exp %143 : vector<2x128xf32>
    %cst_56 = arith.constant 1.000000e+00 : f32
    %145 = vector.broadcast %cst_56 : f32 to vector<2x128xf32>
    %146 = arith.addf %145, %144 : vector<2x128xf32>
    %147 = arith.divf %145, %146 : vector<2x128xf32>
    %148 = arith.mulf %139, %83 : vector<2x128xf32>
    %149 = arith.mulf %133, %141 : vector<2x128xf32>
    %150 = arith.addf %148, %149 : vector<2x128xf32>
    %151 = math.tanh %150 : vector<2x128xf32>
    %152 = arith.mulf %147, %151 : vector<2x128xf32>
    %153 = arith.truncf %152 : vector<2x128xf32> to vector<2x128xbf16>
    %c2 = arith.constant 2 : index
    %c0_57 = arith.constant 0 : index
    %154 = vector.load %arg11[%c2, %c0_57] : memref<16x128xbf16, #tpu.memory_space<vmem>>, vector<2x128xbf16>
    tpu.vector_store %arg11[%c2, %c0_57], %153 {strides = array<i32>} : memref<16x128xbf16, #tpu.memory_space<vmem>>, vector<2x128xbf16>,
    %155 = vector.extract_strided_slice %12 {offsets = [4, 0], sizes = [2, 512], strides = [1, 1]} : vector<16x512xf32> to vector<2x512xf32>
    %156 = arith.truncf %117 : vector<2x128xf32> to vector<2x128xbf16>
    %c0_58 = arith.constant 0 : index
    %c0_59 = arith.constant 0 : index
    %157 = vector.load %arg4[%c0_58, %c0_59] : memref<128x512xbf16, #tpu.memory_space<vmem>>, vector<128x512xbf16>
    %cst_60 = arith.constant dense<0.000000e+00> : vector<2x512xf32>
    %158 = tpu.matmul %156, %157, %cst_60 {dimension_numbers = #tpu.dot_dimension_numbers<[1], [0], [0], [1], [0, 0, 1, 1], [], []>} : vector<2x128xbf16>, vector<128x512xbf16>, vector<2x512xf32> -> vector<2x512xf32>
    %159 = arith.addf %155, %158 : vector<2x512xf32>
    %160 = vector.extract_strided_slice %159 {offsets = [0, 0], sizes = [2, 128], strides = [1, 1]} : vector<2x512xf32> to vector<2x128xf32>
    %161 = arith.negf %160 : vector<2x128xf32>
    %162 = math.exp %161 : vector<2x128xf32>
    %cst_61 = arith.constant 1.000000e+00 : f32
    %163 = vector.broadcast %cst_61 : f32 to vector<2x128xf32>
    %164 = arith.addf %163, %162 : vector<2x128xf32>
    %165 = arith.divf %163, %164 : vector<2x128xf32>
    %166 = vector.extract_strided_slice %159 {offsets = [0, 128], sizes = [2, 128], strides = [1, 1]} : vector<2x512xf32> to vector<2x128xf32>
    %167 = arith.negf %166 : vector<2x128xf32>
    %168 = math.exp %167 : vector<2x128xf32>
    %cst_62 = arith.constant 1.000000e+00 : f32
    %169 = vector.broadcast %cst_62 : f32 to vector<2x128xf32>
    %170 = arith.addf %169, %168 : vector<2x128xf32>
    %171 = arith.divf %169, %170 : vector<2x128xf32>
    %172 = vector.extract_strided_slice %159 {offsets = [0, 256], sizes = [2, 128], strides = [1, 1]} : vector<2x512xf32> to vector<2x128xf32>
    %173 = math.tanh %172 : vector<2x128xf32>
    %174 = vector.extract_strided_slice %159 {offsets = [0, 384], sizes = [2, 128], strides = [1, 1]} : vector<2x512xf32> to vector<2x128xf32>
    %175 = arith.negf %174 : vector<2x128xf32>
    %176 = math.exp %175 : vector<2x128xf32>
    %cst_63 = arith.constant 1.000000e+00 : f32
    %177 = vector.broadcast %cst_63 : f32 to vector<2x128xf32>
    %178 = arith.addf %177, %176 : vector<2x128xf32>
    %179 = arith.divf %177, %178 : vector<2x128xf32>
    %180 = arith.mulf %171, %115 : vector<2x128xf32>
    %181 = arith.mulf %165, %173 : vector<2x128xf32>
    %182 = arith.addf %180, %181 : vector<2x128xf32>
    %183 = math.tanh %182 : vector<2x128xf32>
    %184 = arith.mulf %179, %183 : vector<2x128xf32>
    %185 = arith.truncf %184 : vector<2x128xf32> to vector<2x128xbf16>
    %c0_64 = arith.constant 0 : index
    %c0_65 = arith.constant 0 : index
    %186 = vector.load %arg6[%c0_64, %c0_65] : memref<128x512xbf16, #tpu.memory_space<vmem>>, vector<128x512xbf16>
    %cst_66 = arith.constant dense<0.000000e+00> : vector<2x512xf32>
    %187 = tpu.matmul %185, %186, %cst_66 {dimension_numbers = #tpu.dot_dimension_numbers<[1], [0], [0], [1], [0, 0, 1, 1], [], []>} : vector<2x128xbf16>, vector<128x512xbf16>, vector<2x512xf32> -> vector<2x512xf32>
    %188 = arith.truncf %152 : vector<2x128xf32> to vector<2x128xbf16>
    %c0_67 = arith.constant 0 : index
    %c0_68 = arith.constant 0 : index
    %189 = vector.load %arg7[%c0_67, %c0_68] : memref<128x512xbf16, #tpu.memory_space<vmem>>, vector<128x512xbf16>
    %cst_69 = arith.constant dense<0.000000e+00> : vector<2x512xf32>
    %190 = tpu.matmul %188, %189, %cst_69 {dimension_numbers = #tpu.dot_dimension_numbers<[1], [0], [0], [1], [0, 0, 1, 1], [], []>} : vector<2x128xbf16>, vector<128x512xbf16>, vector<2x512xf32> -> vector<2x512xf32>
    %191 = arith.addf %187, %190 : vector<2x512xf32>
    %c0_70 = arith.constant 0 : index
    %c0_71 = arith.constant 0 : index
    %192 = vector.load %arg8[%c0_70, %c0_71] : memref<1x512xf32, #tpu.memory_space<vmem>>, vector<1x512xf32>
    %193 = vector.broadcast %192 : vector<1x512xf32> to vector<2x512xf32>
    %194 = arith.addf %191, %193 : vector<2x512xf32>
    %195 = vector.extract_strided_slice %194 {offsets = [0, 0], sizes = [2, 128], strides = [1, 1]} : vector<2x512xf32> to vector<2x128xf32>
    %196 = arith.negf %195 : vector<2x128xf32>
    %197 = math.exp %196 : vector<2x128xf32>
    %cst_72 = arith.constant 1.000000e+00 : f32
    %198 = vector.broadcast %cst_72 : f32 to vector<2x128xf32>
    %199 = arith.addf %198, %197 : vector<2x128xf32>
    %200 = arith.divf %198, %199 : vector<2x128xf32>
    %201 = vector.extract_strided_slice %194 {offsets = [0, 128], sizes = [2, 128], strides = [1, 1]} : vector<2x512xf32> to vector<2x128xf32>
    %202 = arith.negf %201 : vector<2x128xf32>
    %203 = math.exp %202 : vector<2x128xf32>
    %cst_73 = arith.constant 1.000000e+00 : f32
    %204 = vector.broadcast %cst_73 : f32 to vector<2x128xf32>
    %205 = arith.addf %204, %203 : vector<2x128xf32>
    %206 = arith.divf %204, %205 : vector<2x128xf32>
    %207 = vector.extract_strided_slice %194 {offsets = [0, 256], sizes = [2, 128], strides = [1, 1]} : vector<2x512xf32> to vector<2x128xf32>
    %208 = math.tanh %207 : vector<2x128xf32>
    %209 = vector.extract_strided_slice %194 {offsets = [0, 384], sizes = [2, 128], strides = [1, 1]} : vector<2x512xf32> to vector<2x128xf32>
    %210 = arith.negf %209 : vector<2x128xf32>
    %211 = math.exp %210 : vector<2x128xf32>
    %cst_74 = arith.constant 1.000000e+00 : f32
    %212 = vector.broadcast %cst_74 : f32 to vector<2x128xf32>
    %213 = arith.addf %212, %211 : vector<2x128xf32>
    %214 = arith.divf %212, %213 : vector<2x128xf32>
    %215 = arith.mulf %206, %150 : vector<2x128xf32>
    %216 = arith.mulf %200, %208 : vector<2x128xf32>
    %217 = arith.addf %215, %216 : vector<2x128xf32>
    %218 = math.tanh %217 : vector<2x128xf32>
    %219 = arith.mulf %214, %218 : vector<2x128xf32>
    %220 = arith.truncf %219 : vector<2x128xf32> to vector<2x128xbf16>
    %c4 = arith.constant 4 : index
    %c0_75 = arith.constant 0 : index
    %221 = vector.load %arg11[%c4, %c0_75] : memref<16x128xbf16, #tpu.memory_space<vmem>>, vector<2x128xbf16>
    tpu.vector_store %arg11[%c4, %c0_75], %220 {strides = array<i32>} : memref<16x128xbf16, #tpu.memory_space<vmem>>, vector<2x128xbf16>,
    %222 = vector.extract_strided_slice %12 {offsets = [6, 0], sizes = [2, 512], strides = [1, 1]} : vector<16x512xf32> to vector<2x512xf32>
    %223 = arith.truncf %184 : vector<2x128xf32> to vector<2x128xbf16>
    %c0_76 = arith.constant 0 : index
    %c0_77 = arith.constant 0 : index
    %224 = vector.load %arg4[%c0_76, %c0_77] : memref<128x512xbf16, #tpu.memory_space<vmem>>, vector<128x512xbf16>
    %cst_78 = arith.constant dense<0.000000e+00> : vector<2x512xf32>
    %225 = tpu.matmul %223, %224, %cst_78 {dimension_numbers = #tpu.dot_dimension_numbers<[1], [0], [0], [1], [0, 0, 1, 1], [], []>} : vector<2x128xbf16>, vector<128x512xbf16>, vector<2x512xf32> -> vector<2x512xf32>
    %226 = arith.addf %222, %225 : vector<2x512xf32>
    %227 = vector.extract_strided_slice %226 {offsets = [0, 0], sizes = [2, 128], strides = [1, 1]} : vector<2x512xf32> to vector<2x128xf32>
    %228 = arith.negf %227 : vector<2x128xf32>
    %229 = math.exp %228 : vector<2x128xf32>
    %cst_79 = arith.constant 1.000000e+00 : f32
    %230 = vector.broadcast %cst_79 : f32 to vector<2x128xf32>
    %231 = arith.addf %230, %229 : vector<2x128xf32>
    %232 = arith.divf %230, %231 : vector<2x128xf32>
    %233 = vector.extract_strided_slice %226 {offsets = [0, 128], sizes = [2, 128], strides = [1, 1]} : vector<2x512xf32> to vector<2x128xf32>
    %234 = arith.negf %233 : vector<2x128xf32>
    %235 = math.exp %234 : vector<2x128xf32>
    %cst_80 = arith.constant 1.000000e+00 : f32
    %236 = vector.broadcast %cst_80 : f32 to vector<2x128xf32>
    %237 = arith.addf %236, %235 : vector<2x128xf32>
    %238 = arith.divf %236, %237 : vector<2x128xf32>
    %239 = vector.extract_strided_slice %226 {offsets = [0, 256], sizes = [2, 128], strides = [1, 1]} : vector<2x512xf32> to vector<2x128xf32>
    %240 = math.tanh %239 : vector<2x128xf32>
    %241 = vector.extract_strided_slice %226 {offsets = [0, 384], sizes = [2, 128], strides = [1, 1]} : vector<2x512xf32> to vector<2x128xf32>
    %242 = arith.negf %241 : vector<2x128xf32>
    %243 = math.exp %242 : vector<2x128xf32>
    %cst_81 = arith.constant 1.000000e+00 : f32
    %244 = vector.broadcast %cst_81 : f32 to vector<2x128xf32>
    %245 = arith.addf %244, %243 : vector<2x128xf32>
    %246 = arith.divf %244, %245 : vector<2x128xf32>
    %247 = arith.mulf %238, %182 : vector<2x128xf32>
    %248 = arith.mulf %232, %240 : vector<2x128xf32>
    %249 = arith.addf %247, %248 : vector<2x128xf32>
    %250 = math.tanh %249 : vector<2x128xf32>
    %251 = arith.mulf %246, %250 : vector<2x128xf32>
    %252 = arith.truncf %251 : vector<2x128xf32> to vector<2x128xbf16>
    %c0_82 = arith.constant 0 : index
    %c0_83 = arith.constant 0 : index
    %253 = vector.load %arg6[%c0_82, %c0_83] : memref<128x512xbf16, #tpu.memory_space<vmem>>, vector<128x512xbf16>
    %cst_84 = arith.constant dense<0.000000e+00> : vector<2x512xf32>
    %254 = tpu.matmul %252, %253, %cst_84 {dimension_numbers = #tpu.dot_dimension_numbers<[1], [0], [0], [1], [0, 0, 1, 1], [], []>} : vector<2x128xbf16>, vector<128x512xbf16>, vector<2x512xf32> -> vector<2x512xf32>
    %255 = arith.truncf %219 : vector<2x128xf32> to vector<2x128xbf16>
    %c0_85 = arith.constant 0 : index
    %c0_86 = arith.constant 0 : index
    %256 = vector.load %arg7[%c0_85, %c0_86] : memref<128x512xbf16, #tpu.memory_space<vmem>>, vector<128x512xbf16>
    %cst_87 = arith.constant dense<0.000000e+00> : vector<2x512xf32>
    %257 = tpu.matmul %255, %256, %cst_87 {dimension_numbers = #tpu.dot_dimension_numbers<[1], [0], [0], [1], [0, 0, 1, 1], [], []>} : vector<2x128xbf16>, vector<128x512xbf16>, vector<2x512xf32> -> vector<2x512xf32>
    %258 = arith.addf %254, %257 : vector<2x512xf32>
    %c0_88 = arith.constant 0 : index
    %c0_89 = arith.constant 0 : index
    %259 = vector.load %arg8[%c0_88, %c0_89] : memref<1x512xf32, #tpu.memory_space<vmem>>, vector<1x512xf32>
    %260 = vector.broadcast %259 : vector<1x512xf32> to vector<2x512xf32>
    %261 = arith.addf %258, %260 : vector<2x512xf32>
    %262 = vector.extract_strided_slice %261 {offsets = [0, 0], sizes = [2, 128], strides = [1, 1]} : vector<2x512xf32> to vector<2x128xf32>
    %263 = arith.negf %262 : vector<2x128xf32>
    %264 = math.exp %263 : vector<2x128xf32>
    %cst_90 = arith.constant 1.000000e+00 : f32
    %265 = vector.broadcast %cst_90 : f32 to vector<2x128xf32>
    %266 = arith.addf %265, %264 : vector<2x128xf32>
    %267 = arith.divf %265, %266 : vector<2x128xf32>
    %268 = vector.extract_strided_slice %261 {offsets = [0, 128], sizes = [2, 128], strides = [1, 1]} : vector<2x512xf32> to vector<2x128xf32>
    %269 = arith.negf %268 : vector<2x128xf32>
    %270 = math.exp %269 : vector<2x128xf32>
    %cst_91 = arith.constant 1.000000e+00 : f32
    %271 = vector.broadcast %cst_91 : f32 to vector<2x128xf32>
    %272 = arith.addf %271, %270 : vector<2x128xf32>
    %273 = arith.divf %271, %272 : vector<2x128xf32>
    %274 = vector.extract_strided_slice %261 {offsets = [0, 256], sizes = [2, 128], strides = [1, 1]} : vector<2x512xf32> to vector<2x128xf32>
    %275 = math.tanh %274 : vector<2x128xf32>
    %276 = vector.extract_strided_slice %261 {offsets = [0, 384], sizes = [2, 128], strides = [1, 1]} : vector<2x512xf32> to vector<2x128xf32>
    %277 = arith.negf %276 : vector<2x128xf32>
    %278 = math.exp %277 : vector<2x128xf32>
    %cst_92 = arith.constant 1.000000e+00 : f32
    %279 = vector.broadcast %cst_92 : f32 to vector<2x128xf32>
    %280 = arith.addf %279, %278 : vector<2x128xf32>
    %281 = arith.divf %279, %280 : vector<2x128xf32>
    %282 = arith.mulf %273, %217 : vector<2x128xf32>
    %283 = arith.mulf %267, %275 : vector<2x128xf32>
    %284 = arith.addf %282, %283 : vector<2x128xf32>
    %285 = math.tanh %284 : vector<2x128xf32>
    %286 = arith.mulf %281, %285 : vector<2x128xf32>
    %287 = arith.truncf %286 : vector<2x128xf32> to vector<2x128xbf16>
    %c6 = arith.constant 6 : index
    %c0_93 = arith.constant 0 : index
    %288 = vector.load %arg11[%c6, %c0_93] : memref<16x128xbf16, #tpu.memory_space<vmem>>, vector<2x128xbf16>
    tpu.vector_store %arg11[%c6, %c0_93], %287 {strides = array<i32>} : memref<16x128xbf16, #tpu.memory_space<vmem>>, vector<2x128xbf16>,
    %289 = vector.extract_strided_slice %12 {offsets = [8, 0], sizes = [2, 512], strides = [1, 1]} : vector<16x512xf32> to vector<2x512xf32>
    %290 = arith.truncf %251 : vector<2x128xf32> to vector<2x128xbf16>
    %c0_94 = arith.constant 0 : index
    %c0_95 = arith.constant 0 : index
    %291 = vector.load %arg4[%c0_94, %c0_95] : memref<128x512xbf16, #tpu.memory_space<vmem>>, vector<128x512xbf16>
    %cst_96 = arith.constant dense<0.000000e+00> : vector<2x512xf32>
    %292 = tpu.matmul %290, %291, %cst_96 {dimension_numbers = #tpu.dot_dimension_numbers<[1], [0], [0], [1], [0, 0, 1, 1], [], []>} : vector<2x128xbf16>, vector<128x512xbf16>, vector<2x512xf32> -> vector<2x512xf32>
    %293 = arith.addf %289, %292 : vector<2x512xf32>
    %294 = vector.extract_strided_slice %293 {offsets = [0, 0], sizes = [2, 128], strides = [1, 1]} : vector<2x512xf32> to vector<2x128xf32>
    %295 = arith.negf %294 : vector<2x128xf32>
    %296 = math.exp %295 : vector<2x128xf32>
    %cst_97 = arith.constant 1.000000e+00 : f32
    %297 = vector.broadcast %cst_97 : f32 to vector<2x128xf32>
    %298 = arith.addf %297, %296 : vector<2x128xf32>
    %299 = arith.divf %297, %298 : vector<2x128xf32>
    %300 = vector.extract_strided_slice %293 {offsets = [0, 128], sizes = [2, 128], strides = [1, 1]} : vector<2x512xf32> to vector<2x128xf32>
    %301 = arith.negf %300 : vector<2x128xf32>
    %302 = math.exp %301 : vector<2x128xf32>
    %cst_98 = arith.constant 1.000000e+00 : f32
    %303 = vector.broadcast %cst_98 : f32 to vector<2x128xf32>
    %304 = arith.addf %303, %302 : vector<2x128xf32>
    %305 = arith.divf %303, %304 : vector<2x128xf32>
    %306 = vector.extract_strided_slice %293 {offsets = [0, 256], sizes = [2, 128], strides = [1, 1]} : vector<2x512xf32> to vector<2x128xf32>
    %307 = math.tanh %306 : vector<2x128xf32>
    %308 = vector.extract_strided_slice %293 {offsets = [0, 384], sizes = [2, 128], strides = [1, 1]} : vector<2x512xf32> to vector<2x128xf32>
    %309 = arith.negf %308 : vector<2x128xf32>
    %310 = math.exp %309 : vector<2x128xf32>
    %cst_99 = arith.constant 1.000000e+00 : f32
    %311 = vector.broadcast %cst_99 : f32 to vector<2x128xf32>
    %312 = arith.addf %311, %310 : vector<2x128xf32>
    %313 = arith.divf %311, %312 : vector<2x128xf32>
    %314 = arith.mulf %305, %249 : vector<2x128xf32>
    %315 = arith.mulf %299, %307 : vector<2x128xf32>
    %316 = arith.addf %314, %315 : vector<2x128xf32>
    %317 = math.tanh %316 : vector<2x128xf32>
    %318 = arith.mulf %313, %317 : vector<2x128xf32>
    %319 = arith.truncf %318 : vector<2x128xf32> to vector<2x128xbf16>
    %c0_100 = arith.constant 0 : index
    %c0_101 = arith.constant 0 : index
    %320 = vector.load %arg6[%c0_100, %c0_101] : memref<128x512xbf16, #tpu.memory_space<vmem>>, vector<128x512xbf16>
    %cst_102 = arith.constant dense<0.000000e+00> : vector<2x512xf32>
    %321 = tpu.matmul %319, %320, %cst_102 {dimension_numbers = #tpu.dot_dimension_numbers<[1], [0], [0], [1], [0, 0, 1, 1], [], []>} : vector<2x128xbf16>, vector<128x512xbf16>, vector<2x512xf32> -> vector<2x512xf32>
    %322 = arith.truncf %286 : vector<2x128xf32> to vector<2x128xbf16>
    %c0_103 = arith.constant 0 : index
    %c0_104 = arith.constant 0 : index
    %323 = vector.load %arg7[%c0_103, %c0_104] : memref<128x512xbf16, #tpu.memory_space<vmem>>, vector<128x512xbf16>
    %cst_105 = arith.constant dense<0.000000e+00> : vector<2x512xf32>
    %324 = tpu.matmul %322, %323, %cst_105 {dimension_numbers = #tpu.dot_dimension_numbers<[1], [0], [0], [1], [0, 0, 1, 1], [], []>} : vector<2x128xbf16>, vector<128x512xbf16>, vector<2x512xf32> -> vector<2x512xf32>
    %325 = arith.addf %321, %324 : vector<2x512xf32>
    %c0_106 = arith.constant 0 : index
    %c0_107 = arith.constant 0 : index
    %326 = vector.load %arg8[%c0_106, %c0_107] : memref<1x512xf32, #tpu.memory_space<vmem>>, vector<1x512xf32>
    %327 = vector.broadcast %326 : vector<1x512xf32> to vector<2x512xf32>
    %328 = arith.addf %325, %327 : vector<2x512xf32>
    %329 = vector.extract_strided_slice %328 {offsets = [0, 0], sizes = [2, 128], strides = [1, 1]} : vector<2x512xf32> to vector<2x128xf32>
    %330 = arith.negf %329 : vector<2x128xf32>
    %331 = math.exp %330 : vector<2x128xf32>
    %cst_108 = arith.constant 1.000000e+00 : f32
    %332 = vector.broadcast %cst_108 : f32 to vector<2x128xf32>
    %333 = arith.addf %332, %331 : vector<2x128xf32>
    %334 = arith.divf %332, %333 : vector<2x128xf32>
    %335 = vector.extract_strided_slice %328 {offsets = [0, 128], sizes = [2, 128], strides = [1, 1]} : vector<2x512xf32> to vector<2x128xf32>
    %336 = arith.negf %335 : vector<2x128xf32>
    %337 = math.exp %336 : vector<2x128xf32>
    %cst_109 = arith.constant 1.000000e+00 : f32
    %338 = vector.broadcast %cst_109 : f32 to vector<2x128xf32>
    %339 = arith.addf %338, %337 : vector<2x128xf32>
    %340 = arith.divf %338, %339 : vector<2x128xf32>
    %341 = vector.extract_strided_slice %328 {offsets = [0, 256], sizes = [2, 128], strides = [1, 1]} : vector<2x512xf32> to vector<2x128xf32>
    %342 = math.tanh %341 : vector<2x128xf32>
    %343 = vector.extract_strided_slice %328 {offsets = [0, 384], sizes = [2, 128], strides = [1, 1]} : vector<2x512xf32> to vector<2x128xf32>
    %344 = arith.negf %343 : vector<2x128xf32>
    %345 = math.exp %344 : vector<2x128xf32>
    %cst_110 = arith.constant 1.000000e+00 : f32
    %346 = vector.broadcast %cst_110 : f32 to vector<2x128xf32>
    %347 = arith.addf %346, %345 : vector<2x128xf32>
    %348 = arith.divf %346, %347 : vector<2x128xf32>
    %349 = arith.mulf %340, %284 : vector<2x128xf32>
    %350 = arith.mulf %334, %342 : vector<2x128xf32>
    %351 = arith.addf %349, %350 : vector<2x128xf32>
    %352 = math.tanh %351 : vector<2x128xf32>
    %353 = arith.mulf %348, %352 : vector<2x128xf32>
    %354 = arith.truncf %353 : vector<2x128xf32> to vector<2x128xbf16>
    %c8 = arith.constant 8 : index
    %c0_111 = arith.constant 0 : index
    %355 = vector.load %arg11[%c8, %c0_111] : memref<16x128xbf16, #tpu.memory_space<vmem>>, vector<2x128xbf16>
    tpu.vector_store %arg11[%c8, %c0_111], %354 {strides = array<i32>} : memref<16x128xbf16, #tpu.memory_space<vmem>>, vector<2x128xbf16>,
    %356 = vector.extract_strided_slice %12 {offsets = [10, 0], sizes = [2, 512], strides = [1, 1]} : vector<16x512xf32> to vector<2x512xf32>
    %357 = arith.truncf %318 : vector<2x128xf32> to vector<2x128xbf16>
    %c0_112 = arith.constant 0 : index
    %c0_113 = arith.constant 0 : index
    %358 = vector.load %arg4[%c0_112, %c0_113] : memref<128x512xbf16, #tpu.memory_space<vmem>>, vector<128x512xbf16>
    %cst_114 = arith.constant dense<0.000000e+00> : vector<2x512xf32>
    %359 = tpu.matmul %357, %358, %cst_114 {dimension_numbers = #tpu.dot_dimension_numbers<[1], [0], [0], [1], [0, 0, 1, 1], [], []>} : vector<2x128xbf16>, vector<128x512xbf16>, vector<2x512xf32> -> vector<2x512xf32>
    %360 = arith.addf %356, %359 : vector<2x512xf32>
    %361 = vector.extract_strided_slice %360 {offsets = [0, 0], sizes = [2, 128], strides = [1, 1]} : vector<2x512xf32> to vector<2x128xf32>
    %362 = arith.negf %361 : vector<2x128xf32>
    %363 = math.exp %362 : vector<2x128xf32>
    %cst_115 = arith.constant 1.000000e+00 : f32
    %364 = vector.broadcast %cst_115 : f32 to vector<2x128xf32>
    %365 = arith.addf %364, %363 : vector<2x128xf32>
    %366 = arith.divf %364, %365 : vector<2x128xf32>
    %367 = vector.extract_strided_slice %360 {offsets = [0, 128], sizes = [2, 128], strides = [1, 1]} : vector<2x512xf32> to vector<2x128xf32>
    %368 = arith.negf %367 : vector<2x128xf32>
    %369 = math.exp %368 : vector<2x128xf32>
    %cst_116 = arith.constant 1.000000e+00 : f32
    %370 = vector.broadcast %cst_116 : f32 to vector<2x128xf32>
    %371 = arith.addf %370, %369 : vector<2x128xf32>
    %372 = arith.divf %370, %371 : vector<2x128xf32>
    %373 = vector.extract_strided_slice %360 {offsets = [0, 256], sizes = [2, 128], strides = [1, 1]} : vector<2x512xf32> to vector<2x128xf32>
    %374 = math.tanh %373 : vector<2x128xf32>
    %375 = vector.extract_strided_slice %360 {offsets = [0, 384], sizes = [2, 128], strides = [1, 1]} : vector<2x512xf32> to vector<2x128xf32>
    %376 = arith.negf %375 : vector<2x128xf32>
    %377 = math.exp %376 : vector<2x128xf32>
    %cst_117 = arith.constant 1.000000e+00 : f32
    %378 = vector.broadcast %cst_117 : f32 to vector<2x128xf32>
    %379 = arith.addf %378, %377 : vector<2x128xf32>
    %380 = arith.divf %378, %379 : vector<2x128xf32>
    %381 = arith.mulf %372, %316 : vector<2x128xf32>
    %382 = arith.mulf %366, %374 : vector<2x128xf32>
    %383 = arith.addf %381, %382 : vector<2x128xf32>
    %384 = math.tanh %383 : vector<2x128xf32>
    %385 = arith.mulf %380, %384 : vector<2x128xf32>
    %386 = arith.truncf %385 : vector<2x128xf32> to vector<2x128xbf16>
    %c0_118 = arith.constant 0 : index
    %c0_119 = arith.constant 0 : index
    %387 = vector.load %arg6[%c0_118, %c0_119] : memref<128x512xbf16, #tpu.memory_space<vmem>>, vector<128x512xbf16>
    %cst_120 = arith.constant dense<0.000000e+00> : vector<2x512xf32>
    %388 = tpu.matmul %386, %387, %cst_120 {dimension_numbers = #tpu.dot_dimension_numbers<[1], [0], [0], [1], [0, 0, 1, 1], [], []>} : vector<2x128xbf16>, vector<128x512xbf16>, vector<2x512xf32> -> vector<2x512xf32>
    %389 = arith.truncf %353 : vector<2x128xf32> to vector<2x128xbf16>
    %c0_121 = arith.constant 0 : index
    %c0_122 = arith.constant 0 : index
    %390 = vector.load %arg7[%c0_121, %c0_122] : memref<128x512xbf16, #tpu.memory_space<vmem>>, vector<128x512xbf16>
    %cst_123 = arith.constant dense<0.000000e+00> : vector<2x512xf32>
    %391 = tpu.matmul %389, %390, %cst_123 {dimension_numbers = #tpu.dot_dimension_numbers<[1], [0], [0], [1], [0, 0, 1, 1], [], []>} : vector<2x128xbf16>, vector<128x512xbf16>, vector<2x512xf32> -> vector<2x512xf32>
    %392 = arith.addf %388, %391 : vector<2x512xf32>
    %c0_124 = arith.constant 0 : index
    %c0_125 = arith.constant 0 : index
    %393 = vector.load %arg8[%c0_124, %c0_125] : memref<1x512xf32, #tpu.memory_space<vmem>>, vector<1x512xf32>
    %394 = vector.broadcast %393 : vector<1x512xf32> to vector<2x512xf32>
    %395 = arith.addf %392, %394 : vector<2x512xf32>
    %396 = vector.extract_strided_slice %395 {offsets = [0, 0], sizes = [2, 128], strides = [1, 1]} : vector<2x512xf32> to vector<2x128xf32>
    %397 = arith.negf %396 : vector<2x128xf32>
    %398 = math.exp %397 : vector<2x128xf32>
    %cst_126 = arith.constant 1.000000e+00 : f32
    %399 = vector.broadcast %cst_126 : f32 to vector<2x128xf32>
    %400 = arith.addf %399, %398 : vector<2x128xf32>
    %401 = arith.divf %399, %400 : vector<2x128xf32>
    %402 = vector.extract_strided_slice %395 {offsets = [0, 128], sizes = [2, 128], strides = [1, 1]} : vector<2x512xf32> to vector<2x128xf32>
    %403 = arith.negf %402 : vector<2x128xf32>
    %404 = math.exp %403 : vector<2x128xf32>
    %cst_127 = arith.constant 1.000000e+00 : f32
    %405 = vector.broadcast %cst_127 : f32 to vector<2x128xf32>
    %406 = arith.addf %405, %404 : vector<2x128xf32>
    %407 = arith.divf %405, %406 : vector<2x128xf32>
    %408 = vector.extract_strided_slice %395 {offsets = [0, 256], sizes = [2, 128], strides = [1, 1]} : vector<2x512xf32> to vector<2x128xf32>
    %409 = math.tanh %408 : vector<2x128xf32>
    %410 = vector.extract_strided_slice %395 {offsets = [0, 384], sizes = [2, 128], strides = [1, 1]} : vector<2x512xf32> to vector<2x128xf32>
    %411 = arith.negf %410 : vector<2x128xf32>
    %412 = math.exp %411 : vector<2x128xf32>
    %cst_128 = arith.constant 1.000000e+00 : f32
    %413 = vector.broadcast %cst_128 : f32 to vector<2x128xf32>
    %414 = arith.addf %413, %412 : vector<2x128xf32>
    %415 = arith.divf %413, %414 : vector<2x128xf32>
    %416 = arith.mulf %407, %351 : vector<2x128xf32>
    %417 = arith.mulf %401, %409 : vector<2x128xf32>
    %418 = arith.addf %416, %417 : vector<2x128xf32>
    %419 = math.tanh %418 : vector<2x128xf32>
    %420 = arith.mulf %415, %419 : vector<2x128xf32>
    %421 = arith.truncf %420 : vector<2x128xf32> to vector<2x128xbf16>
    %c10 = arith.constant 10 : index
    %c0_129 = arith.constant 0 : index
    %422 = vector.load %arg11[%c10, %c0_129] : memref<16x128xbf16, #tpu.memory_space<vmem>>, vector<2x128xbf16>
    tpu.vector_store %arg11[%c10, %c0_129], %421 {strides = array<i32>} : memref<16x128xbf16, #tpu.memory_space<vmem>>, vector<2x128xbf16>,
    %423 = vector.extract_strided_slice %12 {offsets = [12, 0], sizes = [2, 512], strides = [1, 1]} : vector<16x512xf32> to vector<2x512xf32>
    %424 = arith.truncf %385 : vector<2x128xf32> to vector<2x128xbf16>
    %c0_130 = arith.constant 0 : index
    %c0_131 = arith.constant 0 : index
    %425 = vector.load %arg4[%c0_130, %c0_131] : memref<128x512xbf16, #tpu.memory_space<vmem>>, vector<128x512xbf16>
    %cst_132 = arith.constant dense<0.000000e+00> : vector<2x512xf32>
    %426 = tpu.matmul %424, %425, %cst_132 {dimension_numbers = #tpu.dot_dimension_numbers<[1], [0], [0], [1], [0, 0, 1, 1], [], []>} : vector<2x128xbf16>, vector<128x512xbf16>, vector<2x512xf32> -> vector<2x512xf32>
    %427 = arith.addf %423, %426 : vector<2x512xf32>
    %428 = vector.extract_strided_slice %427 {offsets = [0, 0], sizes = [2, 128], strides = [1, 1]} : vector<2x512xf32> to vector<2x128xf32>
    %429 = arith.negf %428 : vector<2x128xf32>
    %430 = math.exp %429 : vector<2x128xf32>
    %cst_133 = arith.constant 1.000000e+00 : f32
    %431 = vector.broadcast %cst_133 : f32 to vector<2x128xf32>
    %432 = arith.addf %431, %430 : vector<2x128xf32>
    %433 = arith.divf %431, %432 : vector<2x128xf32>
    %434 = vector.extract_strided_slice %427 {offsets = [0, 128], sizes = [2, 128], strides = [1, 1]} : vector<2x512xf32> to vector<2x128xf32>
    %435 = arith.negf %434 : vector<2x128xf32>
    %436 = math.exp %435 : vector<2x128xf32>
    %cst_134 = arith.constant 1.000000e+00 : f32
    %437 = vector.broadcast %cst_134 : f32 to vector<2x128xf32>
    %438 = arith.addf %437, %436 : vector<2x128xf32>
    %439 = arith.divf %437, %438 : vector<2x128xf32>
    %440 = vector.extract_strided_slice %427 {offsets = [0, 256], sizes = [2, 128], strides = [1, 1]} : vector<2x512xf32> to vector<2x128xf32>
    %441 = math.tanh %440 : vector<2x128xf32>
    %442 = vector.extract_strided_slice %427 {offsets = [0, 384], sizes = [2, 128], strides = [1, 1]} : vector<2x512xf32> to vector<2x128xf32>
    %443 = arith.negf %442 : vector<2x128xf32>
    %444 = math.exp %443 : vector<2x128xf32>
    %cst_135 = arith.constant 1.000000e+00 : f32
    %445 = vector.broadcast %cst_135 : f32 to vector<2x128xf32>
    %446 = arith.addf %445, %444 : vector<2x128xf32>
    %447 = arith.divf %445, %446 : vector<2x128xf32>
    %448 = arith.mulf %439, %383 : vector<2x128xf32>
    %449 = arith.mulf %433, %441 : vector<2x128xf32>
    %450 = arith.addf %448, %449 : vector<2x128xf32>
    %451 = math.tanh %450 : vector<2x128xf32>
    %452 = arith.mulf %447, %451 : vector<2x128xf32>
    %453 = arith.truncf %452 : vector<2x128xf32> to vector<2x128xbf16>
    %c0_136 = arith.constant 0 : index
    %c0_137 = arith.constant 0 : index
    %454 = vector.load %arg6[%c0_136, %c0_137] : memref<128x512xbf16, #tpu.memory_space<vmem>>, vector<128x512xbf16>
    %cst_138 = arith.constant dense<0.000000e+00> : vector<2x512xf32>
    %455 = tpu.matmul %453, %454, %cst_138 {dimension_numbers = #tpu.dot_dimension_numbers<[1], [0], [0], [1], [0, 0, 1, 1], [], []>} : vector<2x128xbf16>, vector<128x512xbf16>, vector<2x512xf32> -> vector<2x512xf32>
    %456 = arith.truncf %420 : vector<2x128xf32> to vector<2x128xbf16>
    %c0_139 = arith.constant 0 : index
    %c0_140 = arith.constant 0 : index
    %457 = vector.load %arg7[%c0_139, %c0_140] : memref<128x512xbf16, #tpu.memory_space<vmem>>, vector<128x512xbf16>
    %cst_141 = arith.constant dense<0.000000e+00> : vector<2x512xf32>
    %458 = tpu.matmul %456, %457, %cst_141 {dimension_numbers = #tpu.dot_dimension_numbers<[1], [0], [0], [1], [0, 0, 1, 1], [], []>} : vector<2x128xbf16>, vector<128x512xbf16>, vector<2x512xf32> -> vector<2x512xf32>
    %459 = arith.addf %455, %458 : vector<2x512xf32>
    %c0_142 = arith.constant 0 : index
    %c0_143 = arith.constant 0 : index
    %460 = vector.load %arg8[%c0_142, %c0_143] : memref<1x512xf32, #tpu.memory_space<vmem>>, vector<1x512xf32>
    %461 = vector.broadcast %460 : vector<1x512xf32> to vector<2x512xf32>
    %462 = arith.addf %459, %461 : vector<2x512xf32>
    %463 = vector.extract_strided_slice %462 {offsets = [0, 0], sizes = [2, 128], strides = [1, 1]} : vector<2x512xf32> to vector<2x128xf32>
    %464 = arith.negf %463 : vector<2x128xf32>
    %465 = math.exp %464 : vector<2x128xf32>
    %cst_144 = arith.constant 1.000000e+00 : f32
    %466 = vector.broadcast %cst_144 : f32 to vector<2x128xf32>
    %467 = arith.addf %466, %465 : vector<2x128xf32>
    %468 = arith.divf %466, %467 : vector<2x128xf32>
    %469 = vector.extract_strided_slice %462 {offsets = [0, 128], sizes = [2, 128], strides = [1, 1]} : vector<2x512xf32> to vector<2x128xf32>
    %470 = arith.negf %469 : vector<2x128xf32>
    %471 = math.exp %470 : vector<2x128xf32>
    %cst_145 = arith.constant 1.000000e+00 : f32
    %472 = vector.broadcast %cst_145 : f32 to vector<2x128xf32>
    %473 = arith.addf %472, %471 : vector<2x128xf32>
    %474 = arith.divf %472, %473 : vector<2x128xf32>
    %475 = vector.extract_strided_slice %462 {offsets = [0, 256], sizes = [2, 128], strides = [1, 1]} : vector<2x512xf32> to vector<2x128xf32>
    %476 = math.tanh %475 : vector<2x128xf32>
    %477 = vector.extract_strided_slice %462 {offsets = [0, 384], sizes = [2, 128], strides = [1, 1]} : vector<2x512xf32> to vector<2x128xf32>
    %478 = arith.negf %477 : vector<2x128xf32>
    %479 = math.exp %478 : vector<2x128xf32>
    %cst_146 = arith.constant 1.000000e+00 : f32
    %480 = vector.broadcast %cst_146 : f32 to vector<2x128xf32>
    %481 = arith.addf %480, %479 : vector<2x128xf32>
    %482 = arith.divf %480, %481 : vector<2x128xf32>
    %483 = arith.mulf %474, %418 : vector<2x128xf32>
    %484 = arith.mulf %468, %476 : vector<2x128xf32>
    %485 = arith.addf %483, %484 : vector<2x128xf32>
    %486 = math.tanh %485 : vector<2x128xf32>
    %487 = arith.mulf %482, %486 : vector<2x128xf32>
    %488 = arith.truncf %487 : vector<2x128xf32> to vector<2x128xbf16>
    %c12 = arith.constant 12 : index
    %c0_147 = arith.constant 0 : index
    %489 = vector.load %arg11[%c12, %c0_147] : memref<16x128xbf16, #tpu.memory_space<vmem>>, vector<2x128xbf16>
    tpu.vector_store %arg11[%c12, %c0_147], %488 {strides = array<i32>} : memref<16x128xbf16, #tpu.memory_space<vmem>>, vector<2x128xbf16>,
    %490 = vector.extract_strided_slice %12 {offsets = [14, 0], sizes = [2, 512], strides = [1, 1]} : vector<16x512xf32> to vector<2x512xf32>
    %491 = arith.truncf %452 : vector<2x128xf32> to vector<2x128xbf16>
    %c0_148 = arith.constant 0 : index
    %c0_149 = arith.constant 0 : index
    %492 = vector.load %arg4[%c0_148, %c0_149] : memref<128x512xbf16, #tpu.memory_space<vmem>>, vector<128x512xbf16>
    %cst_150 = arith.constant dense<0.000000e+00> : vector<2x512xf32>
    %493 = tpu.matmul %491, %492, %cst_150 {dimension_numbers = #tpu.dot_dimension_numbers<[1], [0], [0], [1], [0, 0, 1, 1], [], []>} : vector<2x128xbf16>, vector<128x512xbf16>, vector<2x512xf32> -> vector<2x512xf32>
    %494 = arith.addf %490, %493 : vector<2x512xf32>
    %495 = vector.extract_strided_slice %494 {offsets = [0, 0], sizes = [2, 128], strides = [1, 1]} : vector<2x512xf32> to vector<2x128xf32>
    %496 = arith.negf %495 : vector<2x128xf32>
    %497 = math.exp %496 : vector<2x128xf32>
    %cst_151 = arith.constant 1.000000e+00 : f32
    %498 = vector.broadcast %cst_151 : f32 to vector<2x128xf32>
    %499 = arith.addf %498, %497 : vector<2x128xf32>
    %500 = arith.divf %498, %499 : vector<2x128xf32>
    %501 = vector.extract_strided_slice %494 {offsets = [0, 128], sizes = [2, 128], strides = [1, 1]} : vector<2x512xf32> to vector<2x128xf32>
    %502 = arith.negf %501 : vector<2x128xf32>
    %503 = math.exp %502 : vector<2x128xf32>
    %cst_152 = arith.constant 1.000000e+00 : f32
    %504 = vector.broadcast %cst_152 : f32 to vector<2x128xf32>
    %505 = arith.addf %504, %503 : vector<2x128xf32>
    %506 = arith.divf %504, %505 : vector<2x128xf32>
    %507 = vector.extract_strided_slice %494 {offsets = [0, 256], sizes = [2, 128], strides = [1, 1]} : vector<2x512xf32> to vector<2x128xf32>
    %508 = math.tanh %507 : vector<2x128xf32>
    %509 = vector.extract_strided_slice %494 {offsets = [0, 384], sizes = [2, 128], strides = [1, 1]} : vector<2x512xf32> to vector<2x128xf32>
    %510 = arith.negf %509 : vector<2x128xf32>
    %511 = math.exp %510 : vector<2x128xf32>
    %cst_153 = arith.constant 1.000000e+00 : f32
    %512 = vector.broadcast %cst_153 : f32 to vector<2x128xf32>
    %513 = arith.addf %512, %511 : vector<2x128xf32>
    %514 = arith.divf %512, %513 : vector<2x128xf32>
    %515 = arith.mulf %506, %450 : vector<2x128xf32>
    %516 = arith.mulf %500, %508 : vector<2x128xf32>
    %517 = arith.addf %515, %516 : vector<2x128xf32>
    %518 = math.tanh %517 : vector<2x128xf32>
    %519 = arith.mulf %514, %518 : vector<2x128xf32>
    %520 = arith.truncf %519 : vector<2x128xf32> to vector<2x128xbf16>
    %c0_154 = arith.constant 0 : index
    %c0_155 = arith.constant 0 : index
    %521 = vector.load %arg6[%c0_154, %c0_155] : memref<128x512xbf16, #tpu.memory_space<vmem>>, vector<128x512xbf16>
    %cst_156 = arith.constant dense<0.000000e+00> : vector<2x512xf32>
    %522 = tpu.matmul %520, %521, %cst_156 {dimension_numbers = #tpu.dot_dimension_numbers<[1], [0], [0], [1], [0, 0, 1, 1], [], []>} : vector<2x128xbf16>, vector<128x512xbf16>, vector<2x512xf32> -> vector<2x512xf32>
    %523 = arith.truncf %487 : vector<2x128xf32> to vector<2x128xbf16>
    %c0_157 = arith.constant 0 : index
    %c0_158 = arith.constant 0 : index
    %524 = vector.load %arg7[%c0_157, %c0_158] : memref<128x512xbf16, #tpu.memory_space<vmem>>, vector<128x512xbf16>
    %cst_159 = arith.constant dense<0.000000e+00> : vector<2x512xf32>
    %525 = tpu.matmul %523, %524, %cst_159 {dimension_numbers = #tpu.dot_dimension_numbers<[1], [0], [0], [1], [0, 0, 1, 1], [], []>} : vector<2x128xbf16>, vector<128x512xbf16>, vector<2x512xf32> -> vector<2x512xf32>
    %526 = arith.addf %522, %525 : vector<2x512xf32>
    %c0_160 = arith.constant 0 : index
    %c0_161 = arith.constant 0 : index
    %527 = vector.load %arg8[%c0_160, %c0_161] : memref<1x512xf32, #tpu.memory_space<vmem>>, vector<1x512xf32>
    %528 = vector.broadcast %527 : vector<1x512xf32> to vector<2x512xf32>
    %529 = arith.addf %526, %528 : vector<2x512xf32>
    %530 = vector.extract_strided_slice %529 {offsets = [0, 0], sizes = [2, 128], strides = [1, 1]} : vector<2x512xf32> to vector<2x128xf32>
    %531 = arith.negf %530 : vector<2x128xf32>
    %532 = math.exp %531 : vector<2x128xf32>
    %cst_162 = arith.constant 1.000000e+00 : f32
    %533 = vector.broadcast %cst_162 : f32 to vector<2x128xf32>
    %534 = arith.addf %533, %532 : vector<2x128xf32>
    %535 = arith.divf %533, %534 : vector<2x128xf32>
    %536 = vector.extract_strided_slice %529 {offsets = [0, 128], sizes = [2, 128], strides = [1, 1]} : vector<2x512xf32> to vector<2x128xf32>
    %537 = arith.negf %536 : vector<2x128xf32>
    %538 = math.exp %537 : vector<2x128xf32>
    %cst_163 = arith.constant 1.000000e+00 : f32
    %539 = vector.broadcast %cst_163 : f32 to vector<2x128xf32>
    %540 = arith.addf %539, %538 : vector<2x128xf32>
    %541 = arith.divf %539, %540 : vector<2x128xf32>
    %542 = vector.extract_strided_slice %529 {offsets = [0, 256], sizes = [2, 128], strides = [1, 1]} : vector<2x512xf32> to vector<2x128xf32>
    %543 = math.tanh %542 : vector<2x128xf32>
    %544 = vector.extract_strided_slice %529 {offsets = [0, 384], sizes = [2, 128], strides = [1, 1]} : vector<2x512xf32> to vector<2x128xf32>
    %545 = arith.negf %544 : vector<2x128xf32>
    %546 = math.exp %545 : vector<2x128xf32>
    %cst_164 = arith.constant 1.000000e+00 : f32
    %547 = vector.broadcast %cst_164 : f32 to vector<2x128xf32>
    %548 = arith.addf %547, %546 : vector<2x128xf32>
    %549 = arith.divf %547, %548 : vector<2x128xf32>
    %550 = arith.mulf %541, %485 : vector<2x128xf32>
    %551 = arith.mulf %535, %543 : vector<2x128xf32>
    %552 = arith.addf %550, %551 : vector<2x128xf32>
    %553 = math.tanh %552 : vector<2x128xf32>
    %554 = arith.mulf %549, %553 : vector<2x128xf32>
    %555 = arith.truncf %554 : vector<2x128xf32> to vector<2x128xbf16>
    %c14 = arith.constant 14 : index
    %c0_165 = arith.constant 0 : index
    %556 = vector.load %arg11[%c14, %c0_165] : memref<16x128xbf16, #tpu.memory_space<vmem>>, vector<2x128xbf16>
    tpu.vector_store %arg11[%c14, %c0_165], %555 {strides = array<i32>} : memref<16x128xbf16, #tpu.memory_space<vmem>>, vector<2x128xbf16>,
    %c0_166 = arith.constant 0 : index
    %c0_167 = arith.constant 0 : index
    %c0_168 = arith.constant 0 : index
    %557 = vector.load %arg12[%c0_166, %c0_167, %c0_168] : memref<2x2x128xf32, #tpu.memory_space<vmem>>, vector<1x2x128xf32>
    %558 = vector.shape_cast %557 : vector<1x2x128xf32> to vector<2x128xf32>
    %559 = vector.shape_cast %519 : vector<2x128xf32> to vector<1x2x128xf32>
    tpu.vector_store %arg12[%c0_166, %c0_167, %c0_168], %559 {strides = array<i32>} : memref<2x2x128xf32, #tpu.memory_space<vmem>>, vector<1x2x128xf32>,
    %c1_169 = arith.constant 1 : index
    %c0_170 = arith.constant 0 : index
    %c0_171 = arith.constant 0 : index
    %560 = vector.load %arg12[%c1_169, %c0_170, %c0_171] : memref<2x2x128xf32, #tpu.memory_space<vmem>>, vector<1x2x128xf32>
    %561 = vector.shape_cast %560 : vector<1x2x128xf32> to vector<2x128xf32>
    %562 = vector.shape_cast %554 : vector<2x128xf32> to vector<1x2x128xf32>
    tpu.vector_store %arg12[%c1_169, %c0_170, %c0_171], %562 {strides = array<i32>} : memref<2x2x128xf32, #tpu.memory_space<vmem>>, vector<1x2x128xf32>,
    %c0_172 = arith.constant 0 : index
    %c0_173 = arith.constant 0 : index
    %c0_174 = arith.constant 0 : index
    %563 = vector.load %arg13[%c0_172, %c0_173, %c0_174] : memref<2x2x128xf32, #tpu.memory_space<vmem>>, vector<1x2x128xf32>
    %564 = vector.shape_cast %563 : vector<1x2x128xf32> to vector<2x128xf32>
    %565 = vector.shape_cast %517 : vector<2x128xf32> to vector<1x2x128xf32>
    tpu.vector_store %arg13[%c0_172, %c0_173, %c0_174], %565 {strides = array<i32>} : memref<2x2x128xf32, #tpu.memory_space<vmem>>, vector<1x2x128xf32>,
    %c1_175 = arith.constant 1 : index
    %c0_176 = arith.constant 0 : index
    %c0_177 = arith.constant 0 : index
    %566 = vector.load %arg13[%c1_175, %c0_176, %c0_177] : memref<2x2x128xf32, #tpu.memory_space<vmem>>, vector<1x2x128xf32>
    %567 = vector.shape_cast %566 : vector<1x2x128xf32> to vector<2x128xf32>
    %568 = vector.shape_cast %552 : vector<2x128xf32> to vector<1x2x128xf32>
    tpu.vector_store %arg13[%c1_175, %c0_176, %c0_177], %568 {strides = array<i32>} : memref<2x2x128xf32, #tpu.memory_space<vmem>>, vector<1x2x128xf32>,
    return
  }
}

module attributes {stable_mosaic.version = 11 : i64} {
  func.func @_attn_readout_kernel(%arg0: memref<16x128xbf16, #tpu.memory_space<vmem>>, %arg1: memref<2x6x300xbf16, #tpu.memory_space<vmem>>, %arg2: memref<2x1x6xf32, #tpu.memory_space<vmem>>, %arg3: memref<16x300xf32, #tpu.memory_space<vmem>>, %arg4: memref<2x6x3xi32, #tpu.memory_space<vmem>>, %arg5: memref<2x6x3xf32, #tpu.memory_space<vmem>>, %arg6: memref<128x300xbf16, #tpu.memory_space<vmem>>, %arg7: memref<300x128xbf16, #tpu.memory_space<vmem>>, %arg8: memref<128x128xbf16, #tpu.memory_space<vmem>>, %arg9: memref<128x128xbf16, #tpu.memory_space<vmem>>, %arg10: memref<1x128xf32, #tpu.memory_space<vmem>>, %arg11: memref<1x300xf32, #tpu.memory_space<vmem>>, %arg12: memref<1x128xf32, #tpu.memory_space<vmem>>, %arg13: memref<1x300xf32, #tpu.memory_space<vmem>>, %arg14: memref<1x1xf32, #tpu.memory_space<vmem>>, %arg15: memref<2x8x6xf32, #tpu.memory_space<vmem>>, %arg16: memref<2x8x128xf32, #tpu.memory_space<vmem>>, %arg17: memref<2x8x128xf32, #tpu.memory_space<vmem>>) attributes {dimension_semantics = [], scalar_prefetch = 0 : i64, scratch_operands = 0 : i64, tpu.core_type = #tpu.core_type<tc>} {
    %c0 = arith.constant 0 : index
    %c0_0 = arith.constant 0 : index
    %0 = vector.load %arg0[%c0, %c0_0] : memref<16x128xbf16, #tpu.memory_space<vmem>>, vector<16x128xbf16>
    %c0_1 = arith.constant 0 : index
    %c0_2 = arith.constant 0 : index
    %c0_3 = arith.constant 0 : index
    %1 = vector.load %arg1[%c0_1, %c0_2, %c0_3] : memref<2x6x300xbf16, #tpu.memory_space<vmem>>, vector<2x6x300xbf16>
    %c0_4 = arith.constant 0 : index
    %c0_5 = arith.constant 0 : index
    %2 = vector.load %arg6[%c0_4, %c0_5] : memref<128x300xbf16, #tpu.memory_space<vmem>>, vector<128x300xbf16>
    %cst = arith.constant dense<0.000000e+00> : vector<16x300xf32>
    %3 = tpu.matmul %0, %2, %cst {dimension_numbers = #tpu.dot_dimension_numbers<[1], [0], [0], [1], [0, 0, 1, 1], [], []>} : vector<16x128xbf16>, vector<128x300xbf16>, vector<16x300xf32> -> vector<16x300xf32>
    %4 = vector.shape_cast %3 : vector<16x300xf32> to vector<2x8x300xf32>
    %5 = arith.truncf %4 : vector<2x8x300xf32> to vector<2x8x300xbf16>
    "tpu.trace_start"() <{level = 10 : i32, message = "btk,bsk->bts"}> : () -> ()
    %cst_6 = arith.constant dense<0.000000e+00> : vector<2x8x6xf32>
    %6 = tpu.matmul %5, %1, %cst_6 {dimension_numbers = #tpu.dot_dimension_numbers<[2], [2], [1], [1], [0, 0, 0, 1, 1, 1], [0], [0]>} : vector<2x8x300xbf16>, vector<2x6x300xbf16>, vector<2x8x6xf32> -> vector<2x8x6xf32>
    "tpu.trace_stop"() : () -> ()
    %c0_7 = arith.constant 0 : index
    %c0_8 = arith.constant 0 : index
    %c0_9 = arith.constant 0 : index
    %7 = vector.load %arg2[%c0_7, %c0_8, %c0_9] : memref<2x1x6xf32, #tpu.memory_space<vmem>>, vector<2x1x6xf32>
    %8 = vector.broadcast %7 : vector<2x1x6xf32> to vector<2x8x6xf32>
    %9 = arith.addf %6, %8 : vector<2x8x6xf32>
    %cst_10 = arith.constant dense<0xFF800000> : vector<2x8xf32>
    %10 = vector.multi_reduction <maximumf>, %9, %cst_10 [2] : vector<2x8x6xf32> to vector<2x8xf32>
    %11 = vector.shape_cast %10 : vector<2x8xf32> to vector<2x8x1xf32>
    %12 = vector.broadcast %11 : vector<2x8x1xf32> to vector<2x8x6xf32>
    %13 = arith.subf %9, %12 : vector<2x8x6xf32>
    %14 = math.exp %13 : vector<2x8x6xf32>
    %cst_11 = arith.constant dense<0.000000e+00> : vector<2x8xf32>
    %15 = vector.multi_reduction <add>, %14, %cst_11 [2] : vector<2x8x6xf32> to vector<2x8xf32>
    %16 = vector.shape_cast %15 : vector<2x8xf32> to vector<2x8x1xf32>
    %17 = vector.broadcast %16 : vector<2x8x1xf32> to vector<2x8x6xf32>
    %18 = arith.divf %14, %17 : vector<2x8x6xf32>
    %c0_12 = arith.constant 0 : index
    %c0_13 = arith.constant 0 : index
    %c0_14 = arith.constant 0 : index
    %19 = vector.load %arg15[%c0_12, %c0_13, %c0_14] : memref<2x8x6xf32, #tpu.memory_space<vmem>>, vector<2x8x6xf32>
    tpu.vector_store %arg15[%c0_12, %c0_13, %c0_14], %18 {strides = array<i32>} : memref<2x8x6xf32, #tpu.memory_space<vmem>>, vector<2x8x6xf32>,
    %20 = arith.truncf %18 : vector<2x8x6xf32> to vector<2x8x6xbf16>
    "tpu.trace_start"() <{level = 10 : i32, message = "bts,bsk->btk"}> : () -> ()
    %cst_15 = arith.constant dense<0.000000e+00> : vector<2x8x300xf32>
    %21 = tpu.matmul %20, %1, %cst_15 {dimension_numbers = #tpu.dot_dimension_numbers<[2], [1], [1], [2], [0, 0, 0, 1, 1, 2], [0], [0]>} : vector<2x8x6xbf16>, vector<2x6x300xbf16>, vector<2x8x300xf32> -> vector<2x8x300xf32>
    "tpu.trace_stop"() : () -> ()
    %22 = vector.shape_cast %21 : vector<2x8x300xf32> to vector<16x300xf32>
    %23 = arith.truncf %22 : vector<16x300xf32> to vector<16x300xbf16>
    %c0_16 = arith.constant 0 : index
    %c0_17 = arith.constant 0 : index
    %24 = vector.load %arg7[%c0_16, %c0_17] : memref<300x128xbf16, #tpu.memory_space<vmem>>, vector<300x128xbf16>
    %cst_18 = arith.constant dense<0.000000e+00> : vector<16x128xf32>
    %25 = tpu.matmul %23, %24, %cst_18 {dimension_numbers = #tpu.dot_dimension_numbers<[1], [0], [0], [1], [0, 0, 1, 1], [], []>} : vector<16x300xbf16>, vector<300x128xbf16>, vector<16x128xf32> -> vector<16x128xf32>
    %c0_19 = arith.constant 0 : index
    %c0_20 = arith.constant 0 : index
    %26 = vector.load %arg8[%c0_19, %c0_20] : memref<128x128xbf16, #tpu.memory_space<vmem>>, vector<128x128xbf16>
    %cst_21 = arith.constant dense<0.000000e+00> : vector<16x128xf32>
    %27 = tpu.matmul %0, %26, %cst_21 {dimension_numbers = #tpu.dot_dimension_numbers<[1], [0], [0], [1], [0, 0, 1, 1], [], []>} : vector<16x128xbf16>, vector<128x128xbf16>, vector<16x128xf32> -> vector<16x128xf32>
    %28 = arith.addf %25, %27 : vector<16x128xf32>
    %29 = math.tanh %28 : vector<16x128xf32>
    %30 = arith.truncf %29 : vector<16x128xf32> to vector<16x128xbf16>
    %c0_22 = arith.constant 0 : index
    %c0_23 = arith.constant 0 : index
    %31 = vector.load %arg9[%c0_22, %c0_23] : memref<128x128xbf16, #tpu.memory_space<vmem>>, vector<128x128xbf16>
    %cst_24 = arith.constant dense<0.000000e+00> : vector<16x128xf32>
    %32 = tpu.matmul %30, %31, %cst_24 {dimension_numbers = #tpu.dot_dimension_numbers<[1], [0], [0], [1], [0, 0, 1, 1], [], []>} : vector<16x128xbf16>, vector<128x128xbf16>, vector<16x128xf32> -> vector<16x128xf32>
    %c0_25 = arith.constant 0 : index
    %c0_26 = arith.constant 0 : index
    %33 = vector.load %arg10[%c0_25, %c0_26] : memref<1x128xf32, #tpu.memory_space<vmem>>, vector<1x128xf32>
    %34 = vector.broadcast %33 : vector<1x128xf32> to vector<16x128xf32>
    %35 = arith.addf %32, %34 : vector<16x128xf32>
    %36 = vector.shape_cast %35 : vector<16x128xf32> to vector<2x8x128xf32>
    %c0_27 = arith.constant 0 : index
    %c0_28 = arith.constant 0 : index
    %c0_29 = arith.constant 0 : index
    %37 = vector.load %arg16[%c0_27, %c0_28, %c0_29] : memref<2x8x128xf32, #tpu.memory_space<vmem>>, vector<2x8x128xf32>
    tpu.vector_store %arg16[%c0_27, %c0_28, %c0_29], %36 {strides = array<i32>} : memref<2x8x128xf32, #tpu.memory_space<vmem>>, vector<2x8x128xf32>,
    %cst_30 = arith.constant dense<0xFF800000> : vector<16xf32>
    %38 = vector.multi_reduction <maximumf>, %35, %cst_30 [1] : vector<16x128xf32> to vector<16xf32>
    %39 = vector.shape_cast %38 : vector<16xf32> to vector<16x1xf32>
    %40 = vector.broadcast %39 : vector<16x1xf32> to vector<16x128xf32>
    %41 = arith.subf %35, %40 : vector<16x128xf32>
    %42 = math.exp %41 : vector<16x128xf32>
    %cst_31 = arith.constant dense<0.000000e+00> : vector<16xf32>
    %43 = vector.multi_reduction <add>, %42, %cst_31 [1] : vector<16x128xf32> to vector<16xf32>
    %44 = vector.shape_cast %43 : vector<16xf32> to vector<16x1xf32>
    %45 = vector.broadcast %44 : vector<16x1xf32> to vector<16x128xf32>
    %46 = arith.divf %42, %45 : vector<16x128xf32>
    %c0_32 = arith.constant 0 : index
    %c0_33 = arith.constant 0 : index
    %47 = vector.load %arg11[%c0_32, %c0_33] : memref<1x300xf32, #tpu.memory_space<vmem>>, vector<1x300xf32>
    %48 = vector.broadcast %47 : vector<1x300xf32> to vector<16x300xf32>
    %49 = arith.mulf %22, %48 : vector<16x300xf32>
    %cst_34 = arith.constant dense<0.000000e+00> : vector<16xf32>
    %50 = vector.multi_reduction <add>, %49, %cst_34 [1] : vector<16x300xf32> to vector<16xf32>
    %51 = vector.shape_cast %50 : vector<16xf32> to vector<16x1xf32>
    %52 = arith.extf %0 : vector<16x128xbf16> to vector<16x128xf32>
    %c0_35 = arith.constant 0 : index
    %c0_36 = arith.constant 0 : index
    %53 = vector.load %arg12[%c0_35, %c0_36] : memref<1x128xf32, #tpu.memory_space<vmem>>, vector<1x128xf32>
    %54 = vector.broadcast %53 : vector<1x128xf32> to vector<16x128xf32>
    %55 = arith.mulf %52, %54 : vector<16x128xf32>
    %cst_37 = arith.constant dense<0.000000e+00> : vector<16xf32>
    %56 = vector.multi_reduction <add>, %55, %cst_37 [1] : vector<16x128xf32> to vector<16xf32>
    %57 = vector.shape_cast %56 : vector<16xf32> to vector<16x1xf32>
    %58 = arith.addf %51, %57 : vector<16x1xf32>
    %c0_38 = arith.constant 0 : index
    %c0_39 = arith.constant 0 : index
    %59 = vector.load %arg3[%c0_38, %c0_39] : memref<16x300xf32, #tpu.memory_space<vmem>>, vector<16x300xf32>
    %c0_40 = arith.constant 0 : index
    %c0_41 = arith.constant 0 : index
    %60 = vector.load %arg13[%c0_40, %c0_41] : memref<1x300xf32, #tpu.memory_space<vmem>>, vector<1x300xf32>
    %61 = vector.broadcast %60 : vector<1x300xf32> to vector<16x300xf32>
    %62 = arith.mulf %59, %61 : vector<16x300xf32>
    %cst_42 = arith.constant dense<0.000000e+00> : vector<16xf32>
    %63 = vector.multi_reduction <add>, %62, %cst_42 [1] : vector<16x300xf32> to vector<16xf32>
    %64 = vector.shape_cast %63 : vector<16xf32> to vector<16x1xf32>
    %65 = arith.addf %58, %64 : vector<16x1xf32>
    %c0_43 = arith.constant 0 : index
    %c0_44 = arith.constant 0 : index
    %66 = vector.load %arg14[%c0_43, %c0_44] : memref<1x1xf32, #tpu.memory_space<vmem>>, vector<1x1xf32>
    %67 = vector.broadcast %66 : vector<1x1xf32> to vector<16x1xf32>
    %68 = arith.addf %65, %67 : vector<16x1xf32>
    %69 = arith.negf %68 : vector<16x1xf32>
    %70 = math.exp %69 : vector<16x1xf32>
    %cst_45 = arith.constant 1.000000e+00 : f32
    %71 = vector.broadcast %cst_45 : f32 to vector<16x1xf32>
    %72 = arith.addf %71, %70 : vector<16x1xf32>
    %73 = arith.divf %71, %72 : vector<16x1xf32>
    %74 = vector.broadcast %73 : vector<16x1xf32> to vector<16x128xf32>
    %75 = arith.mulf %74, %46 : vector<16x128xf32>
    %76 = vector.shape_cast %75 : vector<16x128xf32> to vector<2x8x128xf32>
    %cst_46 = arith.constant 1.000000e+00 : f32
    %77 = vector.broadcast %cst_46 : f32 to vector<16x1xf32>
    %78 = arith.subf %77, %73 : vector<16x1xf32>
    %79 = vector.shape_cast %78 : vector<16x1xf32> to vector<2x8x1xf32>
    %80 = vector.broadcast %79 : vector<2x8x1xf32> to vector<2x8x6xf32>
    %81 = arith.mulf %80, %18 : vector<2x8x6xf32>
    %c0_47 = arith.constant 0 : index
    %c0_48 = arith.constant 0 : index
    %c0_49 = arith.constant 0 : index
    %82 = vector.load %arg4[%c0_47, %c0_48, %c0_49] : memref<2x6x3xi32, #tpu.memory_space<vmem>>, vector<2x6x3xi32>
    %c0_50 = arith.constant 0 : index
    %c0_51 = arith.constant 0 : index
    %c0_52 = arith.constant 0 : index
    %83 = vector.load %arg5[%c0_50, %c0_51, %c0_52] : memref<2x6x3xf32, #tpu.memory_space<vmem>>, vector<2x6x3xf32>
    %cst_53 = arith.constant dense<0.000000e+00> : vector<2x6xf32>
    %84 = vector.multi_reduction <add>, %83, %cst_53 [2] : vector<2x6x3xf32> to vector<2x6xf32>
    %85 = vector.shape_cast %84 : vector<2x6xf32> to vector<2x6x1xf32>
    %cst_54 = arith.constant 9.99999993E-9 : f32
    %86 = vector.broadcast %cst_54 : f32 to vector<2x6x1xf32>
    %87 = arith.addf %85, %86 : vector<2x6x1xf32>
    %cst_55 = arith.constant 1.000000e+00 : f32
    %88 = vector.broadcast %cst_55 : f32 to vector<2x6x1xf32>
    %89 = arith.divf %88, %87 : vector<2x6x1xf32>
    %90 = vector.broadcast %89 : vector<2x6x1xf32> to vector<2x6x3xf32>
    %91 = arith.mulf %83, %90 : vector<2x6x3xf32>
    %92 = tpu.iota {dimensions = array<i32: 2>} : vector<2x6x128xi32>
    %cst_56 = arith.constant 0.000000e+00 : f32
    %93 = vector.broadcast %cst_56 : f32 to vector<2x6x128xf32>
    %94 = vector.extract_strided_slice %91 {offsets = [0, 0, 0], sizes = [2, 6, 1], strides = [1, 1, 1]} : vector<2x6x3xf32> to vector<2x6x1xf32>
    %95 = vector.extract_strided_slice %82 {offsets = [0, 0, 0], sizes = [2, 6, 1], strides = [1, 1, 1]} : vector<2x6x3xi32> to vector<2x6x1xi32>
    %96 = vector.broadcast %95 : vector<2x6x1xi32> to vector<2x6x128xi32>
    %97 = arith.cmpi eq, %96, %92 : vector<2x6x128xi32>
    %98 = arith.extui %97 : vector<2x6x128xi1> to vector<2x6x128xi32>
    %99 = arith.sitofp %98 : vector<2x6x128xi32> to vector<2x6x128xf32>
    %100 = vector.broadcast %94 : vector<2x6x1xf32> to vector<2x6x128xf32>
    %101 = arith.mulf %100, %99 : vector<2x6x128xf32>
    %102 = arith.addf %93, %101 : vector<2x6x128xf32>
    %103 = vector.extract_strided_slice %91 {offsets = [0, 0, 1], sizes = [2, 6, 1], strides = [1, 1, 1]} : vector<2x6x3xf32> to vector<2x6x1xf32>
    %104 = vector.extract_strided_slice %82 {offsets = [0, 0, 1], sizes = [2, 6, 1], strides = [1, 1, 1]} : vector<2x6x3xi32> to vector<2x6x1xi32>
    %105 = vector.broadcast %104 : vector<2x6x1xi32> to vector<2x6x128xi32>
    %106 = arith.cmpi eq, %105, %92 : vector<2x6x128xi32>
    %107 = arith.extui %106 : vector<2x6x128xi1> to vector<2x6x128xi32>
    %108 = arith.sitofp %107 : vector<2x6x128xi32> to vector<2x6x128xf32>
    %109 = vector.broadcast %103 : vector<2x6x1xf32> to vector<2x6x128xf32>
    %110 = arith.mulf %109, %108 : vector<2x6x128xf32>
    %111 = arith.addf %102, %110 : vector<2x6x128xf32>
    %112 = vector.extract_strided_slice %91 {offsets = [0, 0, 2], sizes = [2, 6, 1], strides = [1, 1, 1]} : vector<2x6x3xf32> to vector<2x6x1xf32>
    %113 = vector.extract_strided_slice %82 {offsets = [0, 0, 2], sizes = [2, 6, 1], strides = [1, 1, 1]} : vector<2x6x3xi32> to vector<2x6x1xi32>
    %114 = vector.broadcast %113 : vector<2x6x1xi32> to vector<2x6x128xi32>
    %115 = arith.cmpi eq, %114, %92 : vector<2x6x128xi32>
    %116 = arith.extui %115 : vector<2x6x128xi1> to vector<2x6x128xi32>
    %117 = arith.sitofp %116 : vector<2x6x128xi32> to vector<2x6x128xf32>
    %118 = vector.broadcast %112 : vector<2x6x1xf32> to vector<2x6x128xf32>
    %119 = arith.mulf %118, %117 : vector<2x6x128xf32>
    %120 = arith.addf %111, %119 : vector<2x6x128xf32>
    %121 = arith.truncf %81 : vector<2x8x6xf32> to vector<2x8x6xbf16>
    %122 = arith.truncf %120 : vector<2x6x128xf32> to vector<2x6x128xbf16>
    "tpu.trace_start"() <{level = 10 : i32, message = "bts,bsv->btv"}> : () -> ()
    %cst_57 = arith.constant dense<0.000000e+00> : vector<2x8x128xf32>
    %123 = tpu.matmul %121, %122, %cst_57 {dimension_numbers = #tpu.dot_dimension_numbers<[2], [1], [1], [2], [0, 0, 0, 1, 1, 2], [0], [0]>} : vector<2x8x6xbf16>, vector<2x6x128xbf16>, vector<2x8x128xf32> -> vector<2x8x128xf32>
    "tpu.trace_stop"() : () -> ()
    %124 = arith.addf %76, %123 : vector<2x8x128xf32>
    %c0_58 = arith.constant 0 : index
    %c0_59 = arith.constant 0 : index
    %c0_60 = arith.constant 0 : index
    %125 = vector.load %arg17[%c0_58, %c0_59, %c0_60] : memref<2x8x128xf32, #tpu.memory_space<vmem>>, vector<2x8x128xf32>
    tpu.vector_store %arg17[%c0_58, %c0_59, %c0_60], %124 {strides = array<i32>} : memref<2x8x128xf32, #tpu.memory_space<vmem>>, vector<2x8x128xf32>,
    return
  }
}

</mosaic_0001>

<bundles_post_ra>
// kernel: word_decoder_forward.3
= control target key start
LH: loop header
LB: loop body
LE: loop exit
PB: predicated region body
PF: predicated region fallthrough
CT: control target
= control target key end

     0   :  { %s2584_s0 = inlined_call_operand.vmem [shape: bf16[16,128], index: 0, kind: input, shape index: {}]   ;;  %s2585_s1 = inlined_call_operand.vmem [shape: bf16[2,6,300], index: 1, kind: input, shape index: {}]   ;;  %s2586_s2 = inlined_call_operand.vmem [shape: f32[2,1,6], index: 2, kind: input, shape index: {}]   ;;  %s2587_s3 = inlined_call_operand.vmem [shape: f32[16,300], index: 3, kind: input, shape index: {}]   ;;  %s2588_s4 = inlined_call_operand.vmem [shape: s32[2,6,3], index: 4, kind: input, shape index: {}]   ;;  %s2589_s5 = inlined_call_operand.vmem [shape: f32[2,6,3], index: 5, kind: input, shape index: {}]   ;;  %s2590_s6 = inlined_call_operand.vmem [shape: bf16[128,300], index: 6, kind: input, shape index: {}]   ;;  %s2591_s7 = inlined_call_operand.vmem [shape: bf16[300,128], index: 7, kind: input, shape index: {}]   ;;  %s2592_s8 = inlined_call_operand.vmem [shape: bf16[128,128], index: 8, kind: input, shape index: {}]   ;;  %s2593_s9 = inlined_call_operand.vmem [shape: bf16[128,128], index: 9, kind: input, shape index: {}]   ;;  %s2594_s10 = inlined_call_operand.vmem [shape: f32[1,128], index: 10, kind: input, shape index: {}]   ;;  %s2595_s11 = inlined_call_operand.vmem [shape: f32[1,300], index: 11, kind: input, shape index: {}]   ;;  %s2596_s12 = inlined_call_operand.vmem [shape: f32[1,128], index: 12, kind: input, shape index: {}]   ;;  %s2597_s13 = inlined_call_operand.vmem [shape: f32[1,300], index: 13, kind: input, shape index: {}]   ;;  %s2598_s14 = inlined_call_operand.<no memory space> [shape: f32[1,1], index: 14, kind: input, shape index: {}]   ;;  %s2599_s15 = inlined_call_operand.vmem [shape: f32[2,8,6], index: 15, kind: output, shape index: {0}]   ;;  %s2600_s16 = inlined_call_operand.hbm [shape: f32[2,8,128], index: 16, kind: output, shape index: {1}]   ;;  %s2601_s17 = inlined_call_operand.hbm [shape: f32[2,8,128], index: 17, kind: output, shape index: {2}]  }
   0x1   :  { %2603 = sst [smem:[#allocation9_spill]] %s2584_s0  ;;  %v23_v0 = vstv %s2598_s14 }
   0x2   :  { %2604 = sst [smem:[#allocation10_spill]] %s2585_s1  ;;  %24 = vst [vmem:[#allocation2] sm:$0x1] %v23_v0 }
   0x3   :  { %25 = vsyncpa [#allocation4], 0  ;;  %v1890_v1 = vld [vmem:[%s2590_s6 + $0x4] ss:$12 sps:$4 sm:$0xff]   ;;  %v1892_v2 = vld [vmem:[%s2590_s6] ss:$12 sps:$4 sm:$0xff]  }
   0x4   :  { %v2045_v3 = vmov 0.0   ;;  %v2046_v4 = vmov 0   ;;  %230 = vmatprep.subr.bf16.mxu0 %v1890_v1  ;;  %v1893_v5 = vld [vmem:[%s2590_s6 + $0x1c] ss:$12 sps:$4 sm:$0xff]   ;;  %vm2047_vm0 = vmmov 0   ;;  %s2605_s22 = sld [smem:[#allocation10_spill]] }
   0x5   :  { %1746 = vmatprep.subr.bf16.mxu1 %v2045_v3  ;;  %262 = vmatprep.mubr.bf16.mxu0 %v2046_v4  ;;  %v1895_v6 = vld [vmem:[%s2590_s6 + $0x18] ss:$12 sps:$4 sm:$0xff]   ;;  %v1896_v7 = vld [vmem:[%s2590_s6 + $0x34] ss:$12 sps:$4 sm:$0xff]   ;;  %v1898_v9 = vld [vmem:[%s2590_s6 + $0x30] ss:$12 sps:$4 sm:$0xff]  }
   0x6   :  { %1762 = vmatprep.mubr.msk.bf16.mxu1 %vm2047_vm0, %v2045_v3  ;;  %231 = vmatpush1.bf16.msra.mxu0 %v1892_v2  ;;  %v1901_v8 = vld [vmem:[%s2590_s6 + $0x8] ss:$12 sps:$4 sm:$0xff]   ;;  %v1899_v10 = vld [vmem:[%s2590_s6 + $0x4c] ss:$12 sps:$4 sm:$0xff]   ;;  %v1903_v14 = vld [vmem:[%s2590_s6 + $0x64] ss:$12 sps:$4 sm:$0xff]  }
   0x7   :  { %1877 = vset.pattern.permute.xlu0 %v2046_v4  ;;  %232 = vmatprep.subr.bf16.mxu0 %v1893_v5  ;;  %v1905_v11 = vld [vmem:[%s2590_s6 + $0x20] ss:$12 sps:$4 sm:$0xff]   ;;  %v1902_v12 = vld [vmem:[%s2590_s6 + $0x48] ss:$12 sps:$4 sm:$0xff]   ;;  %v1909_v13 = vld [vmem:[%s2590_s6 + $0x38] ss:$12 sps:$4 sm:$0xff]  }
   0x8   :  { %1747 = vmatpush3.bf16.msra.mxu1 %v1901_v8  ;;  %v1906_v15 = vld [vmem:[%s2590_s6 + $0x60] ss:$12 sps:$4 sm:$0xff]   ;;  %v1913_v16 = vld [vmem:[%s2590_s6 + $0x50] ss:$12 sps:$4 sm:$0xff]   ;;  %v1910_v18 = vld [vmem:[%s2590_s6 + $0x78] ss:$12 sps:$4 sm:$0xff]  }
   0x9   :  { %1748 = vmatprep.subr.bf16.mxu1 %v2045_v3  ;;  %v1907_v17 = vld [vmem:[%s2590_s6 + $0x7c] ss:$12 sps:$4 sm:$0xff]   ;;  %v1911_v19 = vld [vmem:[%s2590_s6 + $0x94] ss:$12 sps:$4 sm:$0xff]   ;;  %v1915_v23 = vld [vmem:[%s2590_s6 + $0xac] ss:$12 sps:$4 sm:$0xff]  }
   0xa   :  { %233 = vmatpush1.bf16.msra.mxu0 %v1895_v6  ;;  %v1917_v20 = vld [vmem:[%s2590_s6 + $0x68] ss:$12 sps:$4 sm:$0xff]   ;;  %v1914_v21 = vld [vmem:[%s2590_s6 + $0x90] ss:$12 sps:$4 sm:$0xff]   ;;  %v1920_v22 = vld [vmem:[%s2590_s6 + $0x80] ss:$12 sps:$4 sm:$0xff]  }
   0xb   :  { %234 = vmatprep.subr.bf16.mxu0 %v1896_v7  ;;  %v60_v24 = vld [vmem:[%s2605_s22] sm:$0x77]  ;;  %v1918_v25 = vld [vmem:[%s2590_s6 + $0xa8] ss:$12 sps:$4 sm:$0xff]   ;;  %s2606_s27 = sld [smem:[#allocation9_spill]] }
   0xc   :  { %1749 = vmatpush3.bf16.msra.mxu1 %v1905_v11  ;;  %v1921_v27 = vld [vmem:[%s2590_s6 + $0x98] ss:$12 sps:$4 sm:$0xff]   ;;  %v62_v28 = vld [vmem:[%s2605_s22 + $0xc] sm:$0x77]  ;;  %v2238_v29 = vcombine.high %v60_v24, %v60_v24  ;;  %v2248_v32 = vcombine.low %v60_v24, %v60_v24 }
   0xd   :  { %1750 = vmatprep.subr.bf16.mxu1 %v2045_v3  ;;  %v1922_v30 = vld [vmem:[%s2590_s6 + $0xb0] ss:$12 sps:$4 sm:$0xff]   ;;  %v2245_v31 = vcombine.high %v62_v28, %v62_v28  ;;  %v2253_v33 = vcombine.low %v62_v28, %v62_v28 }
   0xe   :  { %235 = vmatpush1.bf16.msra.mxu0 %v1898_v9 }
   0xf   :  { %236 = vmatprep.subr.bf16.mxu0 %v1899_v10 }
  0x10   :  { %1751 = vmatpush3.bf16.msra.mxu1 %v1909_v13 }
  0x11   :  { %1752 = vmatprep.subr.bf16.mxu1 %v2045_v3  ;;  %v2229_v26 = vld [vmem:[%s2606_s27] sm:$0xff]  }
  0x12   :  { %237 = vmatpush1.bf16.msra.mxu0 %v1902_v12 }
  0x13   :  { %238 = vmatprep.subr.bf16.mxu0 %v1903_v14 }
  0x14   :  { %1753 = vmatpush3.bf16.msra.mxu1 %v1913_v16 }
  0x15   :  { %1754 = vmatprep.subr.bf16.mxu1 %v2045_v3 }
  0x16   :  { %239 = vmatpush1.bf16.msra.mxu0 %v1906_v15 }
  0x17   :  { %240 = vmatprep.subr.bf16.mxu0 %v1907_v17 }
  0x18   :  { %1755 = vmatpush3.bf16.msra.mxu1 %v1917_v20 }
  0x19   :  { %1756 = vmatprep.subr.bf16.mxu1 %v2045_v3 }
  0x1a   :  { %241 = vmatpush1.bf16.msra.mxu0 %v1910_v18 }
  0x1b   :  { %242 = vmatprep.subr.bf16.mxu0 %v1911_v19 }
  0x1c   :  { %1757 = vmatpush3.bf16.msra.mxu1 %v1920_v22 }
  0x1d   :  { %1758 = vmatprep.subr.bf16.mxu1 %v2045_v3 }
  0x1e   :  { %243 = vmatpush1.bf16.msra.mxu0 %v1914_v21 }
  0x1f   :  { %244 = vmatprep.subr.bf16.mxu0 %v1915_v23 }
  0x20   :  { %1759 = vmatpush3.bf16.msra.mxu1 %v1921_v27 }
  0x21   :  { %1760 = vmatprep.subr.bf16.mxu1 %v2045_v3 }
  0x22   :  { %245 = vmatpush1.bf16.msra.mxu0 %v1918_v25 }
  0x23   :  { %351 = vmatprep.subr.bf16.mxu0 %v2238_v29 }
  0x24   :  { %1761 = vmatpush3.bf16.msra.mxu1 %v1922_v30 }
  0x25   :  { %263 = vmatmul.mubr.bf16.vlgmr.msra.gmra.mrb[0].mxu0 %v2229_v26  ;;  %447 = vmatprep.subr.bf16.mxu1 %v2245_v31 }
  0x27   :  { %1763 = vmatmul.mubr.bf16.vlgmr.msra.gmra.mrb[0].mxu1 %v2229_v26 }
  0x2b   :  { %352 = vmatpush1.bf16.xpose.msra.mxu0 %v2248_v32 }
  0x2c   :  { %1766 = vmatprep.subr.bf16.mxu0 %v2045_v3 }
  0x2d   :  { %26 = vsyncpa [#allocation6], 0  ;;  %448 = vmatpush1.bf16.xpose.msra.mxu1 %v2253_v33  ;;  %v2261_v34 = vld [vmem:[%s2605_s22 + $0x8] ss:$0 sps:$4 sm:$0x77]   ;;  %vm344_vm1 = vcmask 359424  }
  0x2e   :  { %1772 = vmatprep.subr.bf16.mxu1 %v2045_v3  ;;  %v2266_v37 = vld [vmem:[%s2605_s22 + $0x14] ss:$0 sps:$4 sm:$0x77]   ;;  %v349_v42 = vsel %vm344_vm1, %v2261_v34, 0  ;;  %v1616_v52 = vld [vmem:[%s2586_s2] ss:$0 sm:$0xff] }
  0x2f   :  { %v445_v47 = vsel %vm344_vm1, %v2266_v37, 0  ;;  %v1617_v54 = vld [vmem:[%s2586_s2 + $0x1] ss:$0 sm:$0xff]  ;;  %vm527_vm2 = vcmask 48128   ;;  %vm557_vm3 = vcmask 1042432   ;;  %v1936_v30 = vld [vmem:[%s2591_s7 + $0x48] sm:$0xff]  }
  0x30   :  { %v559_v14 = vsel %vm557_vm3, %v2248_v32, 0  ;;  %v564_v15 = vsel %vm557_vm3, %v2261_v34, 0  ;;  %v651_v21 = vsel %vm557_vm3, %v2253_v33, 0  ;;  %v656_v22 = vsel %vm557_vm3, %v2266_v37, 0  ;;  %v1933_v24 = vld [vmem:[%s2591_s7 + $0x40] sm:$0xff]   ;;  %v1937_v32 = vld [vmem:[%s2591_s7 + $0x8] sm:$0xff]  }
  0x31   :  { %v1929_v27 = vld [vmem:[%s2592_s8] sm:$0xff]   ;;  %v1939_v33 = vld [vmem:[%s2591_s7 + $0x50] sm:$0xff]   ;;  %v1932_v37 = vld [vmem:[%s2592_s8 + $0x18] sm:$0xff]   ;;  %vm1001_vm4 = vcmask 1045504   ;;  %vm1364_vm5 = vcmask 21504  }
  0x32   :  { %v1934_v28 = vld [vmem:[%s2591_s7] sm:$0xff]   ;;  %v1931_v34 = vld [vmem:[%s2592_s8 + $0x10] sm:$0xff]  }
  0xf8   :  { %v264_v35 = vpop.f32.mrb[0].mxu0 }
  0xf9   :  { %v266_v36 = vpop.f32.mrb[1].mxu0  ;;  %v314_v40 = vpack.c.bf16 %v264_v35, %v264_v35  ;;  %v1940_v35 = vld [vmem:[%s2591_s7 + $0x10] sm:$0xff]  }
  0xfa   :  { %v315_v38 = vpack.c.bf16 %v266_v36, %v266_v36  ;;  %v268_v39 = vpop.f32.mrb[2].mxu0  ;;  %v307_v44 = vpop.f32.mrb[0].mxu1  ;;  %v1942_v36 = vld [vmem:[%s2591_s7 + $0x58] sm:$0xff]  }
  0xfb   :  { %v270_v41 = vpop.f32.mrb[3].mxu0  ;;  %v317_v45 = vpack.c.bf16 %v268_v39, %v268_v39  ;;  %v1764_v46 = vpop.f32.mrb[1].mxu1  ;;  %v316_v50 = vpack.c.bf16 %v307_v44, %v307_v44  ;;  %v1945_v39 = vld [vmem:[%s2591_s7 + $0x60] sm:$0xff]   ;;  %v1944_v44 = vld [vmem:[%s2592_s8 + $0x38] sm:$0xff]  }
  0xfc   :  { %v318_v43 = vpack.c.bf16 %v270_v41, %v270_v41  ;;  %383 = vmatprep.mubr.bf16.mxu0 %v315_v38  ;;  %v310_v48 = vpop.f32.mrb[2].mxu1  ;;  %v1943_v38 = vld [vmem:[%s2591_s7 + $0x18] sm:$0xff]   ;;  %v1946_v41 = vld [vmem:[%s2591_s7 + $0x20] sm:$0xff]   ;;  %v1948_v46 = vld [vmem:[%s2591_s7 + $0x68] sm:$0xff]  }
  0xfd   :  { %384 = vmatmul.mubr.bf16.vlgmr.msra.gmra.mrb[4].mxu0 %v314_v40  ;;  %v1765_v49 = vpop.f32.mrb[3].mxu1  ;;  %v319_v51 = vpack.c.bf16 %v310_v48, %v310_v48  ;;  %v1935_v40 = vld [vmem:[%s2592_s8 + $0x20] sm:$0xff]   ;;  %v1950_v48 = vld [vmem:[%s2591_s7 + $0x88] sm:$0xff]  }
  0xfe   :  { %1767 = vmatpush3.bf16.xpose.msra.mxu0 %v349_v42  ;;  %479 = vmatprep.mubr.bf16.mxu1 %v318_v43  ;;  %v1938_v42 = vld [vmem:[%s2592_s8 + $0x28] sm:$0xff]   ;;  %v1941_v43 = vld [vmem:[%s2592_s8 + $0x30] sm:$0xff]  }
  0xff   :  { %480 = vmatmul.mubr.bf16.vlgmr.msra.gmra.mrb[4].mxu1 %v317_v45  ;;  %1768 = vmatprep.mubr.msk.bf16.mxu0 %vm2047_vm0, %v2045_v3  ;;  %v1947_v45 = vld [vmem:[%s2591_s7 + $0x80] sm:$0xff]   ;;  %v1951_v49 = vld [vmem:[%s2591_s7 + $0x70] sm:$0xff]  }
 0x100   :  { %1773 = vmatpush3.bf16.xpose.msra.mxu1 %v445_v47  ;;  %1774 = vmatprep.mubr.msk.bf16.mxu1 %vm2047_vm0, %v2045_v3  ;;  %v1949_v47 = vld [vmem:[%s2591_s7 + $0x28] sm:$0xff]  }
 0x101   :  { %1778 = vmatprep.subr.bf16.mxu1 %v2045_v3  ;;  %1626 = vmatprep.subr.msk.bf16.mxu0 %vm557_vm3, %v2238_v29 }
 0x109   :  { %1769 = vmatmul.mubr.msk.bf16.vlgmr.msra.gmra.mrb[4].mxu0 %vm344_vm1, %v316_v50  ;;  %v1952_v50 = vld [vmem:[%s2591_s7 + $0x30] sm:$0xff]  }
 0x10a   :  { %598 = vmatprep.mubr.bf16.mxu0 %v2046_v4  ;;  %567 = vmatpush1.bf16.msra.mxu0 %v559_v14 }
 0x10b   :  { %1775 = vmatmul.mubr.msk.bf16.vlgmr.msra.gmra.mrb[4].mxu1 %vm344_vm1, %v319_v51  ;;  %1629 = vmatprep.subr.msk.bf16.mxu0 %vm557_vm3, %v2245_v31  ;;  %v1930_v31 = vld [vmem:[%s2592_s8 + $0x8] sm:$0xff]   ;;  %v1255_v51 = vunpack.c.l.bf16 %v2229_v26 }
 0x10c   :  { %1780 = vmatprep.mubr.msk.bf16.mxu1 %vm2047_vm0, %v2045_v3  ;;  %1779 = vmatpush3.bf16.msra.mxu1 %v564_v15 }
 0x10d   :  { %1784 = vmatprep.subr.bf16.mxu1 %v2045_v3 }
 0x1dc   :  { %v425_v53 = vpop.f32.mrb[4].mxu0 }
 0x1dd   :  { %v1852_v55 = vadd.f32 %v1616_v52, %v425_v53  ;;  %v1770_v56 = vpop.f32.mrb[5].mxu0  ;;  %v2421_v52 = vld [vmem:[%s2596_s12] ss:$0 sm:$0xff] }
 0x1de   :  { %v428_v57 = vpop.f32.mrb[6].mxu0  ;;  %v521_v58 = vpop.f32.mrb[4].mxu1  ;;  %v1264_v53 = vmul.f32 %v2421_v52, %v1255_v51  ;;  %v1954_v56 = vld [vmem:[%s2591_s7 + $0x78] sm:$0xff]  }
 0x1df   :  { %v1853_v59 = vadd.f32 %v1617_v54, %v521_v58  ;;  %v1771_v60 = vpop.f32.mrb[7].mxu0  ;;  %v1776_v61 = vpop.f32.mrb[5].mxu1  ;;  %v528_v62 = vsel %vm527_vm2, %v1852_v55, -inf  ;;  %v1953_v54 = vld [vmem:[%s2591_s7 + $0x90] sm:$0x3f]   ;;  %v1955_v57 = vld [vmem:[%s2591_s7 + $0x38] sm:$0xff]   ;;  %v1224_v58 = vlaneseq }
 0x1e0   :  { %529 = vmax.xlane.f32.xlu0 %v528_v62  ;;  %v524_v63 = vpop.f32.mrb[6].mxu1  ;;  %v1278_v60 = vld [vmem:[%s2597_s13] sm:$0x7] }
 0x1e1   :  { %v1777_v0 = vpop.f32.mrb[7].mxu1  ;;  %v531_v1 = vsel %vm527_vm2, %v1853_v59, -inf }
 0x1e2   :  { %v1222_v0 = vld [vmem:[%s2595_s11] sm:$0x7] }
 0x1e4   :  { %532 = vmax.xlane.f32.xlu0 %v531_v1 }
 0x26d   :  { %v530_v2 = vpop.xlane.xlu0 %529 }
 0x26e   :  { %v534_v5 = vsub.f32 %v1852_v55, %v530_v2  ;;  %v1003_v55 = vsel %vm1001_vm4, %v1953_v54, 0 }
 0x270   :  { %v536_v6 = vmul.f32 1.442695, %v534_v5  ;;  %v1272_v5 = vld [vmem:[%s2587_s3] sm:$0xff] }
 0x271   :  { %v533_v7 = vpop.xlane.xlu0 %532 }
 0x272   :  { %1965 = vpow2.f32 %v536_v6  ;;  %v535_v8 = vsub.f32 %v1853_v59, %v533_v7  ;;  %v1225_v59 = vshrl.u32 %v1224_v58, 7  ;;  %v1273_v6 = vld [vmem:[%s2587_s3 + $0x8] sm:$0xff] }
 0x274   :  { %v538_v9 = vmul.f32 1.442695, %v535_v8  ;;  %v1226_v61 = vsub.s32 0, %v1225_v59  ;;  %v1234_v62 = vsub.s32 2, %v1225_v59  ;;  %v1230_v63 = vsub.s32 1, %v1225_v59 }
 0x276   :  { %1967 = vpow2.f32 %v538_v9  ;;  %v1283_v1 = vrot.slane %v1278_v60, %v1226_v61  ;;  %v1287_v2 = vrot.slane %v1278_v60, %v1230_v63  ;;  %v1291_v7 = vrot.slane %v1278_v60, %v1234_v62 }
 0x277   :  { %v1227_v8 = vrot.slane %v1222_v0, %v1226_v61  ;;  %v1235_v9 = vrot.slane %v1222_v0, %v1234_v62 }
 0x27c   :  { %v1966_v10 = vpop.eup %1965 }
 0x27d   :  { %v540_v11 = vsel %vm527_vm2, %v1966_v10, 0.0 }
 0x27e   :  { %541 = vadd.xlane.f32.xlu1 %v540_v11  ;;  %v1231_v11 = vrot.slane %v1222_v0, %v1230_v63  ;;  %v1362_v63 = vld [vmem:[%s2589_s5] sm:$0x3f] }
 0x27f   :  { %v1365_v0 = vsel %vm1364_vm5, %v1362_v63, 0.0 }
 0x280   :  { %v1968_v12 = vpop.eup %1967 }
 0x281   :  { %v543_v13 = vsel %vm527_vm2, %v1968_v12, 0.0 }
 0x282   :  { %544 = vadd.xlane.f32.xlu1 %v543_v13  ;;  %v1296_v13 = vmul.f32 %v1287_v2, %v1273_v6  ;;  %v1360_v6 = vld [vmem:[%s2588_s4] sm:$0x3f] }
 0x286   :  { %1266 = vadd.xlane.f32.xlu1 %v1264_v53 }
 0x30b   :  { %v542_v16 = vpop.xlane.xlu1 %541 }
 0x30c   :  { %1969 = vrcp.f32 %v542_v16 }
 0x30f   :  { %v545_v17 = vpop.xlane.xlu1 %544 }
 0x310   :  { %1971 = vrcp.f32 %v545_v17 }
 0x316   :  { %v1970_v18 = vpop.eup %1969 }
 0x317   :  { %v2301_v19 = vmul.f32 %v1970_v18, %v1966_v10  ;;  %v1274_v10 = vld [vmem:[%s2587_s3 + $0x10] sm:$0xff] }
 0x318   :  { %v1297_v16 = vmul.f32 %v1291_v7, %v1274_v10  ;;  %v1959_v10 = vld [vmem:[%s2593_s9 + $0x18] sm:$0xff]  }
 0x319   :  { %550 = vst.msk [vmem:[%s2599_s15] sm:$0xff] %vm527_vm2, %v2301_v19  ;;  %v552_v20 = vpack.c.bf16 %v2301_v19, %v2301_v19 }
 0x31a   :  { %v1972_v23 = vpop.eup %1971 }
 0x31b   :  { %v2317_v25 = vmul.f32 %v1972_v23, %v1968_v12  ;;  %1627 = vmatmul.mubr.msk.bf16.vlgmr.msra.gmra.mrb[8].mxu0 %vm527_vm2, %v552_v20  ;;  %1781 = vmatmul.mubr.msk.bf16.vlgmr.msra.gmra.mrb[8].mxu1 %vm527_vm2, %v552_v20  ;;  %v1295_v12 = vmul.f32 %v1283_v1, %v1272_v5  ;;  %v2048_v5 = vmov 1  }
 0x31c   :  { %659 = vmatpush1.bf16.msra.mxu0 %v651_v21  ;;  %1785 = vmatpush3.bf16.msra.mxu1 %v656_v22 }
 0x31d   :  { %551 = vst.msk [vmem:[%s2599_s15 + $0x8] sm:$0xff] %vm527_vm2, %v2317_v25  ;;  %690 = vmatprep.mubr.bf16.mxu0 %v2046_v4  ;;  %1786 = vmatprep.mubr.msk.bf16.mxu1 %vm2047_vm0, %v2045_v3  ;;  %v553_v29 = vpack.c.bf16 %v2317_v25, %v2317_v25 }
 0x31e   :  { %1790 = vmatprep.subr.bf16.mxu0 %v2045_v3  ;;  %1707 = vmatprep.subr.bf16.mxu1 %v1933_v24 }
 0x31f   :  { %1878 = vset.pattern.permute.xlu1 %v2048_v5 }
 0x323   :  { %1630 = vmatmul.mubr.msk.bf16.vlgmr.msra.gmra.mrb[12].mxu0 %vm527_vm2, %v553_v29  ;;  %1787 = vmatmul.mubr.msk.bf16.vlgmr.msra.gmra.mrb[12].mxu1 %vm527_vm2, %v553_v29  ;;  %v1301_v29 = vadd.f32 %v1296_v13, %v1295_v12  ;;  %v1961_v12 = vld [vmem:[%s2593_s9 + $0x28] sm:$0xff]   ;;  %v1962_v13 = vld [vmem:[%s2593_s9 + $0x30] sm:$0xff]  }
 0x324   :  { %1791 = vmatpush3.bf16.msra.mxu0 %v1929_v27  ;;  %1708 = vmatpush3.bf16.msra.mxu1 %v1934_v28 }
 0x325   :  { %1792 = vmatprep.subr.bf16.mxu0 %v2045_v3  ;;  %1709 = vmatprep.subr.bf16.mxu1 %v1936_v30 }
 0x326   :  { %1806 = vmatprep.mubr.msk.bf16.mxu0 %vm2047_vm0, %v2045_v3 }
 0x328   :  { %1793 = vmatpush3.bf16.msra.mxu0 %v1930_v31  ;;  %1710 = vmatpush3.bf16.msra.mxu1 %v1937_v32  ;;  %v1302_v31 = vsel %vm344_vm1, %v1297_v16, 0.0  ;;  %v1267_v16 = vpop.xlane.xlu1 %1266 }
 0x329   :  { %1794 = vmatprep.subr.bf16.mxu0 %v2045_v3  ;;  %1711 = vmatprep.subr.bf16.mxu1 %v1939_v33  ;;  %v1275_v33 = vld [vmem:[%s2587_s3 + $0x18] sm:$0xff] }
 0x32c   :  { %1795 = vmatpush3.bf16.msra.mxu0 %v1931_v34  ;;  %1712 = vmatpush3.bf16.msra.mxu1 %v1940_v35  ;;  %v1276_v34 = vld [vmem:[%s2587_s3 + $0x20] sm:$0xff]  ;;  %v1277_v35 = vld [vmem:[%s2587_s3 + $0x28] sm:$0xff] }
 0x32d   :  { %1796 = vmatprep.subr.bf16.mxu0 %v2045_v3  ;;  %1713 = vmatprep.subr.bf16.mxu1 %v1942_v36 }
 0x330   :  { %1797 = vmatpush3.bf16.msra.mxu0 %v1932_v37  ;;  %1714 = vmatpush3.bf16.msra.mxu1 %v1943_v38  ;;  %v1303_v37 = vadd.f32 %v1302_v31, %v1301_v29 }
 0x331   :  { %1798 = vmatprep.subr.bf16.mxu0 %v2045_v3  ;;  %1715 = vmatprep.subr.bf16.mxu1 %v1945_v39 }
 0x334   :  { %1799 = vmatpush3.bf16.msra.mxu0 %v1935_v40  ;;  %1716 = vmatpush3.bf16.msra.mxu1 %v1946_v41  ;;  %v1256_v40 = vunpack.c.h.bf16 %v2229_v26  ;;  %v1298_v41 = vmul.f32 %v1283_v1, %v1275_v33  ;;  %v1363_v1 = vld [vmem:[%s2589_s5 + $0x8] sm:$0x3f] }
 0x335   :  { %1800 = vmatprep.subr.bf16.mxu0 %v2045_v3  ;;  %1717 = vmatprep.subr.bf16.mxu1 %v1948_v46 }
 0x338   :  { %1801 = vmatpush3.bf16.msra.mxu0 %v1938_v42  ;;  %1718 = vmatpush3.bf16.msra.mxu1 %v1949_v47  ;;  %v1299_v42 = vmul.f32 %v1287_v2, %v1276_v34  ;;  %v1368_v2 = vsel %vm1364_vm5, %v1363_v1, 0.0 }
 0x339   :  { %1802 = vmatprep.subr.bf16.mxu0 %v2045_v3  ;;  %1719 = vmatprep.subr.bf16.mxu1 %v1951_v49 }
 0x33a   :  { %v1306_v59 = vadd.f32 %v1299_v42, %v1298_v41  ;;  %v2049_v41 = vmov 2   ;;  %v1361_v42 = vld [vmem:[%s2588_s4 + $0x8] sm:$0x3f] }
 0x33c   :  { %1803 = vmatpush3.bf16.msra.mxu0 %v1941_v43  ;;  %1720 = vmatpush3.bf16.msra.mxu1 %v1952_v50  ;;  %v1300_v43 = vmul.f32 %v1291_v7, %v1277_v35  ;;  %v1956_v7 = vld [vmem:[%s2593_s9] sm:$0xff]  }
 0x33d   :  { %1804 = vmatprep.subr.bf16.mxu0 %v2045_v3  ;;  %1721 = vmatprep.subr.bf16.mxu1 %v1954_v56 }
 0x33e   :  { %v1307_v61 = vsel %vm344_vm1, %v1300_v43, 0.0 }
 0x340   :  { %1805 = vmatpush3.bf16.msra.mxu0 %v1944_v44  ;;  %1722 = vmatpush3.bf16.msra.mxu1 %v1955_v57 }
 0x341   :  { %1810 = vmatprep.subr.bf16.mxu0 %v2045_v3  ;;  %1820 = vmatprep.subr.bf16.mxu1 %v2045_v3 }
 0x343   :  { %1807 = vmatmul.mubr.bf16.vlgmr.msra.gmra.mrb[16].mxu0 %v2229_v26  ;;  %v1265_v26 = vmul.f32 %v2421_v52, %v1256_v40  ;;  %v1308_v52 = vadd.f32 %v1307_v61, %v1306_v59 }
 0x344   :  { %1816 = vmatprep.mubr.msk.bf16.mxu0 %vm2047_vm0, %v2045_v3  ;;  %1811 = vmatpush3.bf16.msra.mxu0 %v1947_v45 }
 0x345   :  { %1812 = vmatprep.subr.bf16.mxu0 %v2045_v3 }
 0x348   :  { %1813 = vmatpush3.bf16.msra.mxu0 %v1950_v48 }
 0x349   :  { %1814 = vmatprep.subr.bf16.mxu0 %v2045_v3 }
 0x34c   :  { %1815 = vmatpush3.bf16.msra.mxu0 %v1003_v55 }
 0x34d   :  { %1840 = vmatprep.subr.bf16.mxu0 %v2045_v3 }
 0x3ee   :  { %v600_v14 = vpop.f32.mrb[8].mxu0  ;;  %v641_v15 = vpop.f32.mrb[8].mxu1 }
 0x3ef   :  { %v1239_v17 = vmul.f32 %v1227_v8, %v600_v14  ;;  %v1241_v18 = vmul.f32 %v1235_v9, %v641_v15  ;;  %v602_v20 = vpop.f32.mrb[9].mxu0  ;;  %v1782_v21 = vpop.f32.mrb[9].mxu1 }
 0x3f0   :  { %v1240_v22 = vmul.f32 %v1231_v11, %v602_v20  ;;  %v604_v23 = vpop.f32.mrb[10].mxu0  ;;  %v644_v24 = vpop.f32.mrb[10].mxu1 }
 0x3f1   :  { %v605_v27 = vpop.f32.mrb[11].mxu0  ;;  %v1783_v28 = vpop.f32.mrb[11].mxu1  ;;  %v1246_v32 = vsel %vm344_vm1, %v1241_v18, 0.0 }
 0x3f2   :  { %v1245_v30 = vadd.f32 %v1240_v22, %v1239_v17 }
 0x3f4   :  { %v1247_v36 = vadd.f32 %v1246_v32, %v1245_v30  ;;  %v1670_v30 = vld [vmem:[#allocation2] ss:$0 sm:$0xff] }
 0x3f6   :  { %v692_v38 = vpop.f32.mrb[12].mxu0  ;;  %1248 = vadd.xlane.f32.xlu0 %v1247_v36  ;;  %v733_v39 = vpop.f32.mrb[12].mxu1 }
 0x3f7   :  { %v739_v44 = vpack.c.bf16 %v692_v38, %v600_v14  ;;  %v1242_v45 = vmul.f32 %v1227_v8, %v692_v38  ;;  %v741_v46 = vpack.c.bf16 %v733_v39, %v641_v15  ;;  %v1244_v47 = vmul.f32 %v1235_v9, %v733_v39  ;;  %v694_v48 = vpop.f32.mrb[13].mxu0  ;;  %v1788_v49 = vpop.f32.mrb[13].mxu1  ;;  %v1957_v8 = vld [vmem:[%s2593_s9 + $0x8] sm:$0xff]   ;;  %v1958_v9 = vld [vmem:[%s2593_s9 + $0x10] sm:$0xff]   ;;  %v1963_v14 = vld [vmem:[%s2593_s9 + $0x38] sm:$0xff]  }
 0x3f8   :  { %v740_v50 = vpack.c.bf16 %v694_v48, %v602_v20  ;;  %v1243_v51 = vmul.f32 %v1231_v11, %v694_v48  ;;  %v696_v53 = vpop.f32.mrb[14].mxu0  ;;  %v736_v54 = vpop.f32.mrb[14].mxu1  ;;  %v1960_v11 = vld [vmem:[%s2593_s9 + $0x20] sm:$0xff]  }
 0x3f9   :  { %v697_v55 = vpop.f32.mrb[15].mxu0  ;;  %v1789_v56 = vpop.f32.mrb[15].mxu1  ;;  %1817 = vmatmul.mubr.msk.bf16.vlgmr.msra.gmra.mrb[16].mxu0 %vm344_vm1, %v741_v46  ;;  %v1251_v60 = vsel %vm344_vm1, %v1244_v47, 0.0 }
 0x3fa   :  { %1037 = vmatprep.mubr.bf16.mxu1 %v740_v50  ;;  %1304 = vadd.xlane.f32.xlu0 %v1303_v37  ;;  %v1250_v57 = vadd.f32 %v1243_v51, %v1242_v45 }
 0x3fb   :  { %1038 = vmatmul.mubr.bf16.vlgmr.msra.gmra.mrb[16].mxu1 %v739_v44  ;;  %1842 = vmatprep.mubr.msk.bf16.mxu0 %vm2047_vm0, %v2045_v3 }
 0x3fc   :  { %v1252_v62 = vadd.f32 %v1251_v60, %v1250_v57  ;;  %1836 = vmatprep.mubr.msk.bf16.mxu1 %vm2047_vm0, %v2045_v3  ;;  %1821 = vmatpush3.bf16.msra.mxu1 %v1956_v7 }
 0x3fd   :  { %1822 = vmatprep.subr.bf16.mxu1 %v2045_v3 }
 0x3fe   :  { %1268 = vadd.xlane.f32.xlu0 %v1265_v26  ;;  %1253 = vadd.xlane.f32.xlu1 %v1252_v62 }
 0x400   :  { %1823 = vmatpush3.bf16.msra.mxu1 %v1957_v8 }
 0x401   :  { %1824 = vmatprep.subr.bf16.mxu1 %v2045_v3 }
 0x402   :  { %1366 = vadd.xlane.f32.xlu0 %v1365_v0  ;;  %1309 = vadd.xlane.f32.xlu1 %v1308_v52 }
 0x404   :  { %1825 = vmatpush3.bf16.msra.mxu1 %v1958_v9 }
 0x405   :  { %1826 = vmatprep.subr.bf16.mxu1 %v2045_v3 }
 0x406   :  { %1369 = vadd.xlane.f32.xlu1 %v1368_v2  ;;  %v1380_v2 = vand.u32 127, %v1224_v58 }
 0x408   :  { %1827 = vmatpush3.bf16.msra.mxu1 %v1959_v10 }
 0x409   :  { %1828 = vmatprep.subr.bf16.mxu1 %v2045_v3 }
 0x40c   :  { %1829 = vmatpush3.bf16.msra.mxu1 %v1960_v11 }
 0x40d   :  { %1830 = vmatprep.subr.bf16.mxu1 %v2045_v3 }
 0x410   :  { %1831 = vmatpush3.bf16.msra.mxu1 %v1961_v12 }
 0x411   :  { %1832 = vmatprep.subr.bf16.mxu1 %v2045_v3 }
 0x414   :  { %1833 = vmatpush3.bf16.msra.mxu1 %v1962_v13 }
 0x415   :  { %1834 = vmatprep.subr.bf16.mxu1 %v2045_v3 }
 0x417   :  { %1408 = vperm.xlu1 %1878, %v1360_v6  }
 0x418   :  { %1382 = vperm.xlu0 %1877, %v1360_v6   ;;  %1835 = vmatpush3.bf16.msra.mxu1 %v1963_v14 }
 0x41b   :  { %1879 = vset.pattern.permute.xlu1 %v2046_v4 }
 0x483   :  { %v1249_v15 = vpop.xlane.xlu0 %1248 }
 0x484   :  { %v1270_v24 = vadd.f32 %v1267_v16, %v1249_v15 }
 0x487   :  { %v1305_v17 = vpop.xlane.xlu0 %1304 }
 0x488   :  { %v1311_v28 = vadd.f32 %v1305_v17, %v1270_v24 }
 0x48a   :  { %v1320_v31 = vadd.f32 %v1670_v30, %v1311_v28 }
 0x48b   :  { %v1269_v18 = vpop.xlane.xlu0 %1268  ;;  %v1254_v20 = vpop.xlane.xlu1 %1253 }
 0x48c   :  { %v1671_v33 = vmul.f32 -1.442695, %v1320_v31  ;;  %v1271_v34 = vadd.f32 %v1269_v18, %v1254_v20 }
 0x48f   :  { %v1367_v21 = vpop.xlane.xlu0 %1366  ;;  %v1310_v22 = vpop.xlane.xlu1 %1309 }
 0x490   :  { %v1371_v23 = vadd.f32 1e-08, %v1367_v21  ;;  %v1312_v36 = vadd.f32 %v1310_v22, %v1271_v34 }
 0x492   :  { %1973 = vrcp.f32 %v1371_v23  ;;  %v1321_v38 = vadd.f32 %v1670_v30, %v1312_v36 }
 0x493   :  { %v1370_v27 = vpop.xlane.xlu1 %1369 }
 0x494   :  { %v1372_v29 = vadd.f32 1e-08, %v1370_v27  ;;  %v1672_v40 = vmul.f32 -1.442695, %v1321_v38 }
 0x496   :  { %1975 = vrcp.f32 %v1372_v29 }
 0x497   :  { %1977 = vpow2.f32 %v1671_v33 }
 0x498   :  { %1979 = vpow2.f32 %v1672_v40 }
 0x49c   :  { %v1974_v32 = vpop.eup %1973 }
 0x49d   :  { %v1377_v35 = vmul.f32 %v1974_v32, %v1362_v63 }
 0x49f   :  { %1395 = vperm.xlu1 %1879, %v1377_v35  }
 0x4a0   :  { %v1976_v37 = vpop.eup %1975 }
 0x4a1   :  { %v1378_v39 = vmul.f32 %v1976_v37, %v1363_v1  ;;  %v1978_v43 = vpop.eup %1977 }
 0x4a2   :  { %v1328_v44 = vadd.f32 1.0, %v1978_v43  ;;  %v1980_v45 = vpop.eup %1979 }
 0x4a3   :  { %1880 = vset.pattern.permute.xlu1 %v2048_v5  ;;  %1400 = vperm.xlu0 %1877, %v1378_v39   ;;  %v1329_v46 = vadd.f32 1.0, %v1980_v45 }
 0x4a4   :  { %1420 = vperm.xlu1 %1880, %v1377_v35   ;;  %1981 = vrcp.f32 %v1328_v44 }
 0x4a5   :  { %1983 = vrcp.f32 %v1329_v46 }
 0x4a7   :  { %1884 = vset.pattern.permute.xlu0 %v2049_v41 }
 0x4a8   :  { %1881 = vset.pattern.permute.xlu1 %v2049_v41  ;;  %1435 = vperm.xlu0 %1884, %v1361_v42  }
 0x4a9   :  { %1432 = vperm.xlu1 %1881, %v1360_v6   ;;  %v1383_v6 = vpop.permute.xlu0 %1382 }
 0x4aa   :  { %vm1387_vm7 = vcmp.eq.s32.totalorder %v1383_v6, %v1380_v2 }
 0x4ab   :  { %v1673_v9 = vsel %vm1387_vm7, 1.0, %v2045_v3 }
 0x4ac   :  { %1888 = vset.pattern.permute.xlu0 %v2046_v4 }
 0x4ad   :  { %1444 = vperm.xlu1 %1881, %v1377_v35  }
 0x4ae   :  { %v2523_v47 = vpop.eup %1981 }
 0x4af   :  { %v1346_v48 = vsub.f32 1.0, %v2523_v47  ;;  %v2528_v49 = vpop.eup %1983 }
 0x4b0   :  { %v1347_v50 = vsub.f32 1.0, %v2528_v49 }
 0x4b1   :  { %1882 = vset.pattern.permute.xlu1 %v2046_v4 }
 0x4b2   :  { %1385 = vperm.xlu1 %1882, %v1361_v42  }
 0x4b6   :  { %1883 = vset.pattern.permute.xlu1 %v2048_v5 }
 0x4b7   :  { %1411 = vperm.xlu1 %1883, %v1361_v42  }
 0x4bb   :  { %1424 = vperm.xlu1 %1883, %v1378_v39  }
 0x4bf   :  { %1885 = vset.pattern.permute.xlu1 %v2046_v4 }
 0x4c0   :  { %1350 = vperm.xlu1 %1885, %v1346_v48  }
 0x4c4   :  { %1886 = vset.pattern.permute.xlu1 %v2049_v41 }
 0x4c5   :  { %1448 = vperm.xlu1 %1886, %v1378_v39  }
 0x4c9   :  { %1887 = vset.pattern.permute.xlu1 %v2046_v4  ;;  %v1409_v4 = vpop.permute.xlu1 %1408 }
 0x4ca   :  { %1355 = vperm.xlu1 %1887, %v1347_v50   ;;  %vm1413_vm6 = vcmp.eq.s32.totalorder %v1409_v4, %v1380_v2 }
 0x4cb   :  { %v1675_v8 = vsel %vm1413_vm6, 1.0, %v2045_v3 }
 0x4cc   :  { %v1080_v51 = vpop.f32.mrb[16].mxu0 }
 0x4cd   :  { %v1818_v53 = vpop.f32.mrb[17].mxu0 }
 0x4ce   :  { %v1723_v54 = vpop.f32.mrb[16].mxu1  ;;  %v1083_v55 = vpop.f32.mrb[18].mxu0 }
 0x4cf   :  { %v1724_v56 = vpop.f32.mrb[17].mxu1  ;;  %v1819_v26 = vpop.f32.mrb[19].mxu0 }
 0x4d0   :  { %v1725_v57 = vadd.f32 %v1724_v56, %v1723_v54  ;;  %v1726_v59 = vpop.f32.mrb[18].mxu1 }
 0x4d1   :  { %v1727_v60 = vpop.f32.mrb[19].mxu1 }
 0x4d2   :  { %v1854_v61 = vadd.f32 %v1725_v57, %v1080_v51  ;;  %v1728_v62 = vadd.f32 %v1727_v60, %v1726_v59 }
 0x4d4   :  { %v1855_v63 = vadd.f32 %v1728_v62, %v1083_v55  ;;  %1985 = vtanh.f32 %v1854_v61 }
 0x4d6   :  { %1987 = vtanh.f32 %v1855_v63 }
 0x4de   :  { %v1986_v52 = vpop.eup %1985 }
 0x4e0   :  { %v1988_v0 = vpop.eup %1987 }
 0x4e1   :  { %v1089_v1 = vpack.c.bf16 %v1988_v0, %v1986_v52 }
 0x4e3   :  { %1837 = vmatmul.mubr.bf16.vlgmr.msra.gmra.mrb[20].mxu1 %v1089_v1 }
 0x51e   :  { %v1396_v5 = vpop.permute.xlu1 %1395 }
 0x51f   :  { %v1403_v11 = vmul.f32 %v1673_v9, %v1396_v5 }
 0x522   :  { %v1401_v22 = vpop.permute.xlu0 %1400 }
 0x523   :  { %v1421_v7 = vpop.permute.xlu1 %1420 }
 0x524   :  { %v1427_v10 = vmul.f32 %v1675_v8, %v1421_v7 }
 0x526   :  { %v1429_v14 = vadd.f32 %v1427_v10, %v1403_v11 }
 0x527   :  { %v1436_v28 = vpop.permute.xlu0 %1435 }
 0x528   :  { %v1433_v12 = vpop.permute.xlu1 %1432  ;;  %vm1438_vm11 = vcmp.eq.s32.totalorder %v1436_v28, %v1380_v2 }
 0x529   :  { %vm1437_vm8 = vcmp.eq.s32.totalorder %v1433_v12, %v1380_v2  ;;  %v1678_v34 = vsel %vm1438_vm11, 1.0, %v2045_v3 }
 0x52a   :  { %v1677_v13 = vsel %vm1437_vm8, 1.0, %v2045_v3 }
 0x52c   :  { %v1445_v15 = vpop.permute.xlu1 %1444 }
 0x52d   :  { %v1451_v16 = vmul.f32 %v1677_v13, %v1445_v15 }
 0x52f   :  { %v1453_v17 = vadd.f32 %v1451_v16, %v1429_v14 }
 0x531   :  { %v1386_v58 = vpop.permute.xlu1 %1385  ;;  %v1457_v18 = vpack.c.bf16 %v1453_v17, %v1453_v17 }
 0x532   :  { %vm1388_vm9 = vcmp.eq.s32.totalorder %v1386_v58, %v1380_v2 }
 0x533   :  { %v1463_v20 = vsel %vm557_vm3, %v1457_v18, 0  ;;  %v1674_v27 = vsel %vm1388_vm9, 1.0, %v2045_v3 }
 0x534   :  { %1841 = vmatpush3.bf16.msra.mxu0 %v1463_v20  ;;  %v1404_v30 = vmul.f32 %v1674_v27, %v1401_v22 }
 0x535   :  { %1846 = vmatprep.subr.bf16.mxu0 %v2045_v3 }
 0x536   :  { %v1412_v21 = vpop.permute.xlu1 %1411 }
 0x537   :  { %vm1414_vm10 = vcmp.eq.s32.totalorder %v1412_v21, %v1380_v2 }
 0x538   :  { %v1676_v24 = vsel %vm1414_vm10, 1.0, %v2045_v3 }
 0x53a   :  { %v1425_v23 = vpop.permute.xlu1 %1424 }
 0x53b   :  { %v1428_v29 = vmul.f32 %v1676_v24, %v1425_v23 }
 0x53d   :  { %v1430_v35 = vadd.f32 %v1428_v29, %v1404_v30 }
 0x53f   :  { %v1351_v31 = vpop.permute.xlu1 %1350 }
 0x540   :  { %v1358_v32 = vmul.f32 %v1351_v31, %v2301_v19  ;;  %v1660_v19 = vld [vmem:[%s2594_s10] ss:$0 sm:$0xff]  ;;  %s2050_s10 = smov [#allocation3]  }
 0x541   :  { %s1562_s6 = sshll.u32 %s2050_s10, 4  ;;  %s1563_s6 = int_to_ptr.vmem [resolvable:$true] %s1562_s6 }
 0x542   :  { %v1455_v33 = vpack.c.bf16 %v1358_v32, %v1358_v32  ;;  %s1997_s19 = scalar_lea.vmem %s1563_s6, 256  ;;  %p2002_p1 = scmp.lt.s32.totalorder %s1563_s6, %s1563_s6 }
 0x543   :  { %p1998_p0 = scmp.ne.s32.totalorder %s1563_s6, %s1997_s19  ;;  %p2003_p2 = scmp.lt.s32.totalorder %s1997_s19, %s1997_s19 }
 0x544   :  { %v1449_v36 = vpop.permute.xlu1 %1448  ;;  %1843 = vmatmul.mubr.msk.bf16.vlgmr.msra.gmra.mrb[20].mxu0 %vm527_vm2, %v1455_v33 }
 0x545   :  { %v1452_v37 = vmul.f32 %v1678_v34, %v1449_v36  ;;  %1848 = vmatprep.mubr.msk.bf16.mxu0 %vm2047_vm0, %v2045_v3  ;;  %p2004_p3 = por %p2003_p2, %p2002_p1 }
 0x547   :  { %v1454_v38 = vadd.f32 %v1452_v37, %v1430_v35  ;;  %p2005_p4 = pnand %p2004_p3, %p1998_p0 }
 0x549   :  { %v1458_v39 = vpack.c.bf16 %v1454_v38, %v1454_v38  ;;  %v1356_v40 = vpop.permute.xlu1 %1355 }
 0x54a   :  { %v1359_v42 = vmul.f32 %v1356_v40, %v2317_v25 }
 0x54b   :  { %v1509_v43 = vsel %vm557_vm3, %v1458_v39, 0 }
 0x54c   :  { %v1456_v44 = vpack.c.bf16 %v1359_v42, %v1359_v42  ;;  %1847 = vmatpush3.bf16.msra.mxu0 %v1509_v43 }
 0x54f   :  { %1849 = vmatmul.mubr.msk.bf16.vlgmr.msra.gmra.mrb[24].mxu0 %vm527_vm2, %v1456_v44 }
 0x5b6   :  { %v1195_v45 = vpop.f32.mrb[20].mxu1 }
 0x5b7   :  { %v1196_v46 = vadd.f32 %v1660_v19, %v1195_v45  ;;  %v1838_v48 = vpop.f32.mrb[21].mxu1 }
 0x5b8   :  { %v1198_v50 = vpop.f32.mrb[22].mxu1 }
 0x5b9   :  { %1202 = vst [vmem:[#allocation3] sm:$0xff] %v1196_v46  ;;  %v1199_v3 = vadd.f32 %v1660_v19, %v1198_v50  ;;  %1204 = vmax.xlane.f32.xlu0 %v1196_v46  ;;  %v1839_v51 = vpop.f32.mrb[23].mxu1 }
 0x5bb   :  { %1203 = vst [vmem:[#allocation3 + $0x8] sm:$0xff] %v1199_v3  ;;  %1206 = vmax.xlane.f32.xlu1 %v1199_v3 }
 0x5cc   :  { %1336 = vperm.xlu1 %1887, %v2523_v47  }
 0x617   :  { %v1499_v25 = vpop.f32.mrb[20].mxu0 }
 0x618   :  { %v1844_v53 = vpop.f32.mrb[21].mxu0 }
 0x619   :  { %v1502_v54 = vpop.f32.mrb[22].mxu0 }
 0x61a   :  { %v1845_v55 = vpop.f32.mrb[23].mxu0 }
 0x622   :  { %v1545_v56 = vpop.f32.mrb[24].mxu0 }
 0x623   :  { %v1850_v26 = vpop.f32.mrb[25].mxu0 }
 0x624   :  { %v1548_v57 = vpop.f32.mrb[26].mxu0 }
 0x625   :  { %v1851_v59 = vpop.f32.mrb[27].mxu0 }
 0x646   :  { %v1205_v60 = vpop.xlane.xlu0 %1204 }
 0x647   :  { %v1208_v61 = vsub.f32 %v1196_v46, %v1205_v60 }
 0x648   :  { %v1207_v62 = vpop.xlane.xlu1 %1206 }
 0x649   :  { %v1210_v63 = vmul.f32 1.442695, %v1208_v61  ;;  %v1209_v52 = vsub.f32 %v1199_v3, %v1207_v62 }
 0x64b   :  { %1989 = vpow2.f32 %v1210_v63  ;;  %v1212_v0 = vmul.f32 1.442695, %v1209_v52 }
 0x64d   :  { %1991 = vpow2.f32 %v1212_v0 }
 0x655   :  { %v1990_v1 = vpop.eup %1989 }
 0x656   :  { %1214 = vadd.xlane.f32.xlu0 %v1990_v1 }
 0x657   :  { %v1992_v4 = vpop.eup %1991 }
 0x65a   :  { %1216 = vadd.xlane.f32.xlu0 %v1992_v4 }
 0x670   :  { %1341 = vperm.xlu0 %1888, %v2528_v49  }
 0x674   :  { %1889 = vset.pattern.permute.xlu0 %v2049_v41 }
 0x675   :  { %2008 = shalt.err (!%p2005_p4)
}
 0x676   :  { %s2009_s20 = scalar_lea.hbm %s2600_s16, 256 }
 0x677   :  { %p2010_p5 = scmp.ne.s32.totalorder %s2600_s16, %s2009_s20  ;;  %p2013_p6 = scmp.lt.u32.totalorder %s2009_s20, %s2600_s16 }
 0x679   :  { %p2015_p7 = pnand %p2013_p6, %p2010_p5 }
 0x67b   :  { %2018 = shalt.err (!%p2015_p7)
}
 0x67c   :  { %s2051_s12 = smov 128   ;;  %s2052_s5 = smov 8   ;;  %v1337_v5 = vpop.permute.xlu1 %1336 }
 0x67d   :  { %1568 = dma.vmem_to_hbm [thread:$0]  %s1563_s6, 256, %s2600_s16, [#allocation4], %s2051_s12, %s2051_s12, %s2052_s5  }
 0x67e   :  { %s2053_s26 = smov [#allocation5]  }
 0x67f   :  { %s1574_s27 = sshll.u32 %s2053_s26, 4  ;;  %s1575_s27 = int_to_ptr.vmem [resolvable:$true] %s1574_s27 }
 0x680   :  { %s2019_s16 = scalar_lea.vmem %s1575_s27, 256  ;;  %p2024_p9 = scmp.lt.s32.totalorder %s1575_s27, %s1575_s27 }
 0x681   :  { %p2020_p8 = scmp.ne.s32.totalorder %s1575_s27, %s2019_s16  ;;  %p2025_p10 = scmp.lt.s32.totalorder %s2019_s16, %s2019_s16 }
 0x683   :  { %p2026_p11 = por %p2025_p10, %p2024_p9 }
 0x685   :  { %p2027_p12 = pnand %p2026_p11, %p2020_p8 }
 0x6e3   :  { %v1215_v41 = vpop.xlane.xlu0 %1214 }
 0x6e4   :  { %1993 = vrcp.f32 %v1215_v41 }
 0x6e7   :  { %v1217_v47 = vpop.xlane.xlu0 %1216 }
 0x6e8   :  { %1995 = vrcp.f32 %v1217_v47 }
 0x6ee   :  { %v1994_v49 = vpop.eup %1993 }
 0x6ef   :  { %v1219_v2 = vmul.f32 %v1994_v49, %v1990_v1  ;;  %v1342_v10 = vpop.permute.xlu0 %1341 }
 0x6f1   :  { %v1344_v6 = vmul.f32 %v1337_v5, %v1219_v2 }
 0x6f2   :  { %v1996_v7 = vpop.eup %1995 }
 0x6f3   :  { %v1221_v8 = vmul.f32 %v1996_v7, %v1992_v4  ;;  %v1551_v9 = vadd.f32 %v1499_v25, %v1344_v6 }
 0x6f5   :  { %v1345_v11 = vmul.f32 %v1342_v10, %v1221_v8  ;;  %1553 = vst [vmem:[#allocation5] sm:$0xff] %v1551_v9 }
 0x6f7   :  { %v1552_v12 = vadd.f32 %v1545_v56, %v1345_v11 }
 0x6f9   :  { %1554 = vst [vmem:[#allocation5 + $0x8] sm:$0xff] %v1552_v12 }
 0x6fa   :  { %2030 = shalt.err (!%p2027_p12)
}
 0x6fb   :  { %s2031_s29 = scalar_lea.hbm %s2601_s17, 256 }
 0x6fc   :  { %p2032_p13 = scmp.ne.s32.totalorder %s2601_s17, %s2031_s29  ;;  %p2035_p0 = scmp.lt.u32.totalorder %s2031_s29, %s2601_s17 }
 0x6fe   :  { %p2037_p1 = pnand %p2035_p0, %p2032_p13 }
 0x700   :  { %2040 = shalt.err (!%p2037_p1)
}
 0x701   :  { %1580 = dma.vmem_to_hbm [thread:$0]  %s1575_s27, 256, %s2601_s17, [#allocation6], %s2051_s12, %s2051_s12, %s2052_s5  }
 0x702   :  { %2041 = dma.done.wait [#allocation4], 256  }
 0x703   :  { %2042 = vsyncadd [#allocation4], 4294967040 }
 0x704   :  { %2043 = dma.done.wait [#allocation6], 256  }
 0x705   :  { %2044 = vsyncadd [#allocation6], 4294967040 }
 0x706   :  { %1589 = vsyncpa [#allocation4], 1 }
 0x707   :  { %1590 = vsyncpa [#allocation6], 1 }

// kernel: word_decoder_forward.2
= control target key start
LH: loop header
LB: loop body
LE: loop exit
PB: predicated region body
PF: predicated region fallthrough
CT: control target
= control target key end

     0   :  { %19 = vsyncpa [#allocation3], 0  ;;  %v14445_v2 = vmov 0   ;;  %vm501_vm0 = vcmask 1045504   ;;  %vm497_vm1 = vcmask 621568   ;;  %v10912_v60 = vmov 0.0   ;;  %s14431_s0 = inlined_call_operand.vmem [shape: bf16[16,332], index: 0, kind: input, shape index: {}]   ;;  %s14432_s1 = inlined_call_operand.vmem [shape: bf16[332,300], index: 1, kind: input, shape index: {}]   ;;  %s14433_s2 = inlined_call_operand.vmem [shape: f32[1,300], index: 2, kind: input, shape index: {}]   ;;  %s14434_s3 = inlined_call_operand.vmem [shape: bf16[300,512], index: 3, kind: input, shape index: {}]   ;;  %s14435_s4 = inlined_call_operand.vmem [shape: bf16[128,512], index: 4, kind: input, shape index: {}]   ;;  %s14436_s5 = inlined_call_operand.vmem [shape: f32[1,512], index: 5, kind: input, shape index: {}]   ;;  %s14437_s6 = inlined_call_operand.vmem [shape: bf16[128,512], index: 6, kind: input, shape index: {}]   ;;  %s14438_s7 = inlined_call_operand.vmem [shape: bf16[128,512], index: 7, kind: input, shape index: {}]   ;;  %s14439_s8 = inlined_call_operand.vmem [shape: f32[1,512], index: 8, kind: input, shape index: {}]   ;;  %s14440_s9 = inlined_call_operand.vmem [shape: f32[2,2,128], index: 9, kind: input, shape index: {}]   ;;  %s14441_s10 = inlined_call_operand.vmem [shape: f32[2,2,128], index: 10, kind: input, shape index: {}]   ;;  %s14442_s11 = inlined_call_operand.vmem [shape: bf16[16,128], index: 11, kind: output, shape index: {0}]   ;;  %s14443_s12 = inlined_call_operand.hbm [shape: f32[2,2,128], index: 12, kind: output, shape index: {1}]   ;;  %s14444_s13 = inlined_call_operand.hbm [shape: f32[2,2,128], index: 13, kind: output, shape index: {2}]  }
   0x1   :  { %v9817_v0 = vld [vmem:[%s14432_s1 + $0x4] ss:$12 sps:$4 sm:$0xff]   ;;  %586 = vmatprep.mubr.bf16.mxu1 %v14445_v2  ;;  %v9821_v3 = vld [vmem:[%s14432_s1] ss:$12 sps:$4 sm:$0xff]   ;;  %v9823_v5 = vld [vmem:[%s14432_s1 + $0x1c] ss:$12 sps:$4 sm:$0xff]  }
   0x2   :  { %v9819_v1 = vld [vmem:[%s14432_s1 + $0x184] ss:$12 sps:$4 sm:$0xff]   ;;  %511 = vmatprep.subr.bf16.mxu0 %v9817_v0  ;;  %v9822_v4 = vld [vmem:[%s14432_s1 + $0x180] ss:$12 sps:$4 sm:$0xff]   ;;  %v9825_v6 = vld [vmem:[%s14432_s1 + $0x19c] ss:$12 sps:$4 sm:$0xff]  }
   0x3   :  { %554 = vmatprep.subr.bf16.mxu1 %v9819_v1  ;;  %512 = vmatpush1.bf16.msra.mxu0 %v9821_v3  ;;  %v9827_v7 = vld [vmem:[%s14432_s1 + $0x18] ss:$12 sps:$4 sm:$0xff]   ;;  %v9829_v9 = vld [vmem:[%s14432_s1 + $0x34] ss:$12 sps:$4 sm:$0xff]   ;;  %v9833_v11 = vld [vmem:[%s14432_s1 + $0x30] ss:$12 sps:$4 sm:$0xff]  }
   0x4   :  { %555 = vmatpush1.bf16.msra.mxu1 %v9822_v4  ;;  %513 = vmatprep.subr.bf16.mxu0 %v9823_v5  ;;  %v9828_v8 = vld [vmem:[%s14432_s1 + $0x198] ss:$12 sps:$4 sm:$0xff]   ;;  %v9831_v10 = vld [vmem:[%s14432_s1 + $0x1b4] ss:$12 sps:$4 sm:$0xff]   ;;  %v9834_v12 = vld [vmem:[%s14432_s1 + $0x1b0] ss:$12 sps:$4 sm:$0xff]  }
   0x5   :  { %556 = vmatprep.subr.bf16.mxu1 %v9825_v6  ;;  %v9835_v13 = vld [vmem:[%s14432_s1 + $0x4c] ss:$12 sps:$4 sm:$0xff]   ;;  %v9839_v15 = vld [vmem:[%s14432_s1 + $0x48] ss:$12 sps:$4 sm:$0xff]   ;;  %v9841_v18 = vld [vmem:[%s14432_s1 + $0x64] ss:$12 sps:$4 sm:$0xff]  }
   0x6   :  { %v9837_v14 = vld [vmem:[%s14432_s1 + $0x1cc] ss:$12 sps:$4 sm:$0xff]   ;;  %v9840_v16 = vld [vmem:[%s14432_s1 + $0x1c8] ss:$12 sps:$4 sm:$0xff]   ;;  %v9856_v29 = vld [vmem:[%s14432_s1 + $0x90] ss:$12 sps:$4 sm:$0xff]  }
   0x7   :  { %514 = vmatpush1.bf16.msra.mxu0 %v9827_v7  ;;  %v9843_v17 = vld [vmem:[%s14432_s1 + $0x1e4] ss:$12 sps:$4 sm:$0x3f]   ;;  %v9846_v19 = vld [vmem:[%s14432_s1 + $0x1e0] ss:$12 sps:$4 sm:$0x3f]  }
   0x8   :  { %557 = vmatpush1.bf16.msra.mxu1 %v9828_v8  ;;  %515 = vmatprep.subr.bf16.mxu0 %v9829_v9  ;;  %v9845_v20 = vld [vmem:[%s14432_s1 + $0x60] ss:$12 sps:$4 sm:$0xff]   ;;  %v9847_v21 = vld [vmem:[%s14432_s1 + $0x7c] ss:$12 sps:$4 sm:$0xff]   ;;  %v503_v22 = vsel %vm501_vm0, %v9846_v19, 0  ;;  %vm10913_vm2 = vmmov 0  }
   0x9   :  { %558 = vmatprep.subr.bf16.mxu1 %v9831_v10  ;;  %v9849_v23 = vld [vmem:[%s14432_s1 + $0xc8] ss:$12 sps:$4 sm:$0xff]   ;;  %v9850_v24 = vld [vmem:[%s14432_s1 + $0x78] ss:$12 sps:$4 sm:$0xff]   ;;  %v9855_v28 = vld [vmem:[%s14432_s1 + $0xe0] ss:$12 sps:$4 sm:$0xff]  }
   0xa   :  { %v11063_v25 = vld [vmem:[%s14431_s0 + $0x8] ss:$12 sps:$4 sm:$0xff]   ;;  %v9857_v30 = vld [vmem:[%s14432_s1 + $0x20] ss:$12 sps:$4 sm:$0xff]   ;;  %v9860_v32 = vld [vmem:[%s14432_s1 + $0xf8] ss:$12 sps:$4 sm:$0xff]  }
   0xb   :  { %516 = vmatpush1.bf16.msra.mxu0 %v9833_v11  ;;  %v9852_v26 = vld [vmem:[%s14432_s1 + $0x8] ss:$12 sps:$4 sm:$0xff]   ;;  %v9858_v31 = vld [vmem:[%s14432_s1 + $0xac] ss:$12 sps:$4 sm:$0xff]   ;;  %v9863_v35 = vld [vmem:[%s14432_s1 + $0xc4] ss:$12 sps:$4 sm:$0xff]  }
   0xc   :  { %559 = vmatpush1.bf16.msra.mxu1 %v9834_v12  ;;  %517 = vmatprep.subr.bf16.mxu0 %v9835_v13  ;;  %v9853_v27 = vld [vmem:[%s14432_s1 + $0x94] ss:$12 sps:$4 sm:$0xff]   ;;  %v9862_v34 = vld [vmem:[%s14432_s1 + $0x38] ss:$12 sps:$4 sm:$0xff]   ;;  %v9865_v36 = vld [vmem:[%s14432_s1 + $0x110] ss:$12 sps:$4 sm:$0xff]  }
   0xd   :  { %560 = vmatprep.subr.bf16.mxu1 %v9837_v14  ;;  %v9861_v33 = vld [vmem:[%s14432_s1 + $0xa8] ss:$12 sps:$4 sm:$0xff]   ;;  %v9866_v37 = vld [vmem:[%s14432_s1 + $0xc0] ss:$12 sps:$4 sm:$0xff]   ;;  %v9867_v38 = vld [vmem:[%s14432_s1 + $0x50] ss:$12 sps:$4 sm:$0xff]  }
   0xe   :  { %v9868_v39 = vld [vmem:[%s14432_s1 + $0xdc] ss:$12 sps:$4 sm:$0xff]   ;;  %v9871_v41 = vld [vmem:[%s14432_s1 + $0xd8] ss:$12 sps:$4 sm:$0xff]   ;;  %v9873_v43 = vld [vmem:[%s14432_s1 + $0xf4] ss:$12 sps:$4 sm:$0xff]  }
   0xf   :  { %518 = vmatpush1.bf16.msra.mxu0 %v9839_v15  ;;  %v9870_v40 = vld [vmem:[%s14432_s1 + $0x128] ss:$12 sps:$4 sm:$0xff]   ;;  %v9875_v44 = vld [vmem:[%s14432_s1 + $0x140] ss:$12 sps:$4 sm:$0xff]   ;;  %v9876_v45 = vld [vmem:[%s14432_s1 + $0xf0] ss:$12 sps:$4 sm:$0xff]  }
  0x10   :  { %561 = vmatpush1.bf16.msra.mxu1 %v9840_v16  ;;  %519 = vmatprep.subr.bf16.mxu0 %v9841_v18  ;;  %v9872_v42 = vld [vmem:[%s14432_s1 + $0x68] ss:$12 sps:$4 sm:$0xff]   ;;  %v9877_v46 = vld [vmem:[%s14432_s1 + $0x80] ss:$12 sps:$4 sm:$0xff]   ;;  %v9880_v48 = vld [vmem:[%s14432_s1 + $0x158] ss:$12 sps:$4 sm:$0xff]  }
  0x11   :  { %8831 = vmatprep.subr.msk.bf16.mxu1 %vm501_vm0, %v9843_v17  ;;  %v9878_v47 = vld [vmem:[%s14432_s1 + $0x10c] ss:$12 sps:$4 sm:$0xff]   ;;  %v9881_v49 = vld [vmem:[%s14432_s1 + $0x108] ss:$12 sps:$4 sm:$0xff]   ;;  %v9892_v50 = vld [vmem:[%s14431_s0 + $0x4] ss:$12 sps:$4 sm:$0xff]  }
  0x12   :  { %v9882_v51 = vld [vmem:[%s14432_s1 + $0x98] ss:$12 sps:$4 sm:$0xff]   ;;  %v9885_v53 = vld [vmem:[%s14432_s1 + $0x170] ss:$12 sps:$4 sm:$0xff]   ;;  %543 = vmatprep.mubr.bf16.mxu0 %v9892_v50  ;;  %v9886_v54 = vld [vmem:[%s14432_s1 + $0x120] ss:$12 sps:$4 sm:$0xff]  }
  0x13   :  { %520 = vmatpush1.bf16.msra.mxu0 %v9845_v20  ;;  %v9883_v52 = vld [vmem:[%s14432_s1 + $0x124] ss:$12 sps:$4 sm:$0xff]   ;;  %v9888_v56 = vld [vmem:[%s14432_s1 + $0x13c] ss:$12 sps:$4 sm:$0xff]   ;;  %v9890_v57 = vld [vmem:[%s14431_s0] ss:$12 sps:$4 sm:$0xff]  }
  0x14   :  { %563 = vmatpush1.bf16.msra.mxu1 %v503_v22  ;;  %521 = vmatprep.subr.bf16.mxu0 %v9847_v21  ;;  %v9887_v55 = vld [vmem:[%s14432_s1 + $0xb0] ss:$12 sps:$4 sm:$0xff]   ;;  %v9893_v58 = vld [vmem:[%s14432_s1 + $0x138] ss:$12 sps:$4 sm:$0xff]   ;;  %v9894_v59 = vld [vmem:[%s14432_s1 + $0x188] ss:$12 sps:$4 sm:$0xff]  }
  0x15   :  { %9744 = vmatprep.subr.bf16.mxu1 %v9849_v23  ;;  %v9895_v61 = vld [vmem:[%s14432_s1 + $0x154] ss:$12 sps:$4 sm:$0xff]   ;;  %v9897_v62 = vld [vmem:[%s14432_s1 + $0x150] ss:$12 sps:$4 sm:$0xff]   ;;  %v9899_v0 = vld [vmem:[%s14432_s1 + $0x16c] ss:$12 sps:$4 sm:$0xff]  }
  0x16   :  { %v9898_v63 = vld [vmem:[%s14432_s1 + $0x1a0] ss:$12 sps:$4 sm:$0xff]   ;;  %v9901_v1 = vld [vmem:[%s14432_s1 + $0x168] ss:$12 sps:$4 sm:$0xff]   ;;  %v9902_v3 = vld [vmem:[%s14432_s1 + $0x1b8] ss:$12 sps:$4 sm:$0xff]  }
  0x17   :  { %8832 = vmatmul.mubr.msk.bf16.vlgmr.msra.gmra.mrb[0].mxu1 %vm497_vm1, %v11063_v25  ;;  %522 = vmatpush1.bf16.msra.mxu0 %v9850_v24  ;;  %v9910_v4 = vld [vmem:[%s14434_s3 + $0xc] ss:$16 sps:$4 sm:$0xff]   ;;  %v9908_v6 = vld [vmem:[%s14434_s3 + $0x8] ss:$16 sps:$4 sm:$0xff]   ;;  %v9907_v10 = vld [vmem:[%s14434_s3 + $0x4] ss:$16 sps:$4 sm:$0xff]  }
  0x18   :  { %9745 = vmatpush3.bf16.msra.mxu1 %v9852_v26  ;;  %523 = vmatprep.subr.bf16.mxu0 %v9853_v27  ;;  %v9903_v5 = vld [vmem:[%s14432_s1 + $0x1d0] ss:$12 sps:$4 sm:$0xff]   ;;  %v9904_v7 = vld [vmem:[%s14432_s1 + $0x1e8] ss:$12 sps:$4 sm:$0x3f]  }
  0x19   :  { %9746 = vmatprep.subr.bf16.mxu1 %v9855_v28  ;;  %629 = vmatprep.mubr.bf16.mxu1 %v9892_v50  ;;  %v9916_v8 = vld [vmem:[%s14434_s3 + $0x2c] ss:$16 sps:$4 sm:$0xff]   ;;  %v9914_v9 = vld [vmem:[%s14434_s3 + $0x28] ss:$16 sps:$4 sm:$0xff]   ;;  %v509_v11 = vsel %vm501_vm0, %v9904_v7, 0 }
  0x1a   :  { %v9905_v12 = vld [vmem:[%s14434_s3] ss:$16 sps:$4 sm:$0xff]   ;;  %v9913_v13 = vld [vmem:[%s14434_s3 + $0x24] ss:$16 sps:$4 sm:$0xff]   ;;  %v9920_v17 = vld [vmem:[%s14434_s3 + $0x48] ss:$16 sps:$4 sm:$0xff]  }
  0x1b   :  { %524 = vmatpush1.bf16.msra.mxu0 %v9856_v29  ;;  %v9911_v14 = vld [vmem:[%s14434_s3 + $0x20] ss:$16 sps:$4 sm:$0xff]   ;;  %v9919_v16 = vld [vmem:[%s14434_s3 + $0x44] ss:$16 sps:$4 sm:$0xff]   ;;  %v9922_v18 = vld [vmem:[%s14434_s3 + $0x4c] ss:$16 sps:$4 sm:$0xff]  }
  0x1c   :  { %9747 = vmatpush3.bf16.msra.mxu1 %v9857_v30  ;;  %525 = vmatprep.subr.bf16.mxu0 %v9858_v31  ;;  %v9917_v15 = vld [vmem:[%s14434_s3 + $0x40] ss:$16 sps:$4 sm:$0xff]   ;;  %v9925_v19 = vld [vmem:[%s14434_s3 + $0x64] ss:$16 sps:$4 sm:$0xff]   ;;  %v9928_v20 = vld [vmem:[%s14434_s3 + $0x6c] ss:$16 sps:$4 sm:$0xff]  }
  0x1d   :  { %9748 = vmatprep.subr.bf16.mxu1 %v9860_v32  ;;  %v9923_v21 = vld [vmem:[%s14434_s3 + $0x60] ss:$16 sps:$4 sm:$0xff]   ;;  %v9926_v22 = vld [vmem:[%s14434_s3 + $0x68] ss:$16 sps:$4 sm:$0xff]   ;;  %v9931_v23 = vld [vmem:[%s14434_s3 + $0x84] ss:$16 sps:$4 sm:$0xff]  }
  0x1e   :  { %v9934_v24 = vld [vmem:[%s14434_s3 + $0x8c] ss:$16 sps:$4 sm:$0xff]   ;;  %v9932_v26 = vld [vmem:[%s14434_s3 + $0x88] ss:$16 sps:$4 sm:$0xff]   ;;  %v9937_v27 = vld [vmem:[%s14434_s3 + $0xa4] ss:$16 sps:$4 sm:$0xff]  }
  0x1f   :  { %526 = vmatpush1.bf16.msra.mxu0 %v9861_v33  ;;  %v9935_v28 = vld [vmem:[%s14434_s3 + $0xa0] ss:$16 sps:$4 sm:$0xff]   ;;  %v9940_v29 = vld [vmem:[%s14434_s3 + $0xac] ss:$16 sps:$4 sm:$0xff]   ;;  %v9938_v30 = vld [vmem:[%s14434_s3 + $0xa8] ss:$16 sps:$4 sm:$0xff]  }
  0x20   :  { %9749 = vmatpush3.bf16.msra.mxu1 %v9862_v34  ;;  %527 = vmatprep.subr.bf16.mxu0 %v9863_v35  ;;  %v9943_v31 = vld [vmem:[%s14434_s3 + $0xc4] ss:$16 sps:$4 sm:$0xff]   ;;  %v9946_v32 = vld [vmem:[%s14434_s3 + $0xcc] ss:$16 sps:$4 sm:$0xff]   ;;  %v9941_v33 = vld [vmem:[%s14434_s3 + $0xc0] ss:$16 sps:$4 sm:$0xff]  }
  0x21   :  { %9750 = vmatprep.subr.bf16.mxu1 %v9865_v36  ;;  %v9944_v34 = vld [vmem:[%s14434_s3 + $0xc8] ss:$16 sps:$4 sm:$0xff]   ;;  %v9949_v35 = vld [vmem:[%s14434_s3 + $0xe4] ss:$16 sps:$4 sm:$0xff]   ;;  %v9952_v36 = vld [vmem:[%s14434_s3 + $0xec] ss:$16 sps:$4 sm:$0xff]  }
  0x22   :  { %v9970_v50 = vld [vmem:[%s14434_s3 + $0x14c] ss:$16 sps:$4 sm:$0xff]  }
  0x23   :  { %528 = vmatpush1.bf16.msra.mxu0 %v9866_v37  ;;  %v9947_v37 = vld [vmem:[%s14434_s3 + $0xe0] ss:$16 sps:$4 sm:$0xff]   ;;  %v10000_v7 = vld [vmem:[%s14434_s3 + $0x1ec] ss:$16 sps:$4 sm:$0xff]  }
  0x24   :  { %9751 = vmatpush3.bf16.msra.mxu1 %v9867_v38  ;;  %529 = vmatprep.subr.bf16.mxu0 %v9868_v39  ;;  %v9950_v38 = vld [vmem:[%s14434_s3 + $0xe8] ss:$16 sps:$4 sm:$0xff]   ;;  %v9955_v39 = vld [vmem:[%s14434_s3 + $0x104] ss:$16 sps:$4 sm:$0xff]  }
  0x25   :  { %9752 = vmatprep.subr.bf16.mxu1 %v9870_v40  ;;  %v9958_v40 = vld [vmem:[%s14434_s3 + $0x10c] ss:$16 sps:$4 sm:$0xff]  }
  0x27   :  { %530 = vmatpush1.bf16.msra.mxu0 %v9871_v41  ;;  %v9953_v41 = vld [vmem:[%s14434_s3 + $0x100] ss:$16 sps:$4 sm:$0xff]  }
  0x28   :  { %9753 = vmatpush3.bf16.msra.mxu1 %v9872_v42  ;;  %531 = vmatprep.subr.bf16.mxu0 %v9873_v43  ;;  %v9956_v42 = vld [vmem:[%s14434_s3 + $0x108] ss:$16 sps:$4 sm:$0xff]   ;;  %v9961_v43 = vld [vmem:[%s14434_s3 + $0x124] ss:$16 sps:$4 sm:$0xff]  }
  0x29   :  { %9754 = vmatprep.subr.bf16.mxu1 %v9875_v44  ;;  %v9964_v44 = vld [vmem:[%s14434_s3 + $0x12c] ss:$16 sps:$4 sm:$0xff]  }
  0x2b   :  { %532 = vmatpush1.bf16.msra.mxu0 %v9876_v45  ;;  %v9959_v45 = vld [vmem:[%s14434_s3 + $0x120] ss:$16 sps:$4 sm:$0xff]  }
  0x2c   :  { %9755 = vmatpush3.bf16.msra.mxu1 %v9877_v46  ;;  %533 = vmatprep.subr.bf16.mxu0 %v9878_v47  ;;  %v9962_v46 = vld [vmem:[%s14434_s3 + $0x128] ss:$16 sps:$4 sm:$0xff]   ;;  %v9965_v47 = vld [vmem:[%s14434_s3 + $0x140] ss:$16 sps:$4 sm:$0xff]  }
  0x2d   :  { %9756 = vmatprep.subr.bf16.mxu1 %v9880_v48  ;;  %v9967_v48 = vld [vmem:[%s14434_s3 + $0x144] ss:$16 sps:$4 sm:$0xff]  }
  0x2f   :  { %534 = vmatpush1.bf16.msra.mxu0 %v9881_v49  ;;  %v9968_v49 = vld [vmem:[%s14434_s3 + $0x148] ss:$16 sps:$4 sm:$0xff]  }
  0x30   :  { %9757 = vmatpush3.bf16.msra.mxu1 %v9882_v51  ;;  %535 = vmatprep.subr.bf16.mxu0 %v9883_v52  ;;  %v9973_v51 = vld [vmem:[%s14434_s3 + $0x164] ss:$16 sps:$4 sm:$0xff]   ;;  %v9976_v52 = vld [vmem:[%s14434_s3 + $0x16c] ss:$16 sps:$4 sm:$0xff]  }
  0x31   :  { %9758 = vmatprep.subr.bf16.mxu1 %v9885_v53  ;;  %v9971_v53 = vld [vmem:[%s14434_s3 + $0x160] ss:$16 sps:$4 sm:$0xff]  }
  0x33   :  { %536 = vmatpush1.bf16.msra.mxu0 %v9886_v54  ;;  %v9974_v54 = vld [vmem:[%s14434_s3 + $0x168] ss:$16 sps:$4 sm:$0xff]  }
  0x34   :  { %9759 = vmatpush3.bf16.msra.mxu1 %v9887_v55  ;;  %537 = vmatprep.subr.bf16.mxu0 %v9888_v56  ;;  %v9979_v55 = vld [vmem:[%s14434_s3 + $0x184] ss:$16 sps:$4 sm:$0xff]   ;;  %v9982_v56 = vld [vmem:[%s14434_s3 + $0x18c] ss:$16 sps:$4 sm:$0xff]  }
  0x35   :  { %9772 = vmatprep.subr.bf16.mxu1 %v10912_v60 }
  0x37   :  { %630 = vmatmul.mubr.bf16.vlgmr.msra.gmra.mrb[4].mxu1 %v9890_v57  ;;  %538 = vmatpush1.bf16.msra.mxu0 %v9893_v58  ;;  %v9980_v58 = vld [vmem:[%s14434_s3 + $0x188] ss:$16 sps:$4 sm:$0xff]  }
  0x38   :  { %9773 = vmatpush3.bf16.msra.mxu1 %v9894_v59  ;;  %539 = vmatprep.subr.bf16.mxu0 %v9895_v61  ;;  %v9985_v59 = vld [vmem:[%s14434_s3 + $0x1a4] ss:$16 sps:$4 sm:$0xff]   ;;  %v9983_v61 = vld [vmem:[%s14434_s3 + $0x1a0] ss:$16 sps:$4 sm:$0xff]  }
  0x39   :  { %9774 = vmatprep.subr.bf16.mxu1 %v10912_v60  ;;  %9782 = vmatprep.mubr.msk.bf16.mxu1 %vm10913_vm2, %v10912_v60 }
  0x3b   :  { %540 = vmatpush1.bf16.msra.mxu0 %v9897_v62  ;;  %v9986_v62 = vld [vmem:[%s14434_s3 + $0x1a8] ss:$16 sps:$4 sm:$0xff]  }
  0x3c   :  { %9775 = vmatpush3.bf16.msra.mxu1 %v9898_v63  ;;  %541 = vmatprep.subr.bf16.mxu0 %v9899_v0  ;;  %v9991_v63 = vld [vmem:[%s14434_s3 + $0x1c4] ss:$16 sps:$4 sm:$0xff]   ;;  %v9994_v0 = vld [vmem:[%s14434_s3 + $0x1cc] ss:$16 sps:$4 sm:$0xff]  }
  0x3d   :  { %9776 = vmatprep.subr.bf16.mxu1 %v10912_v60 }
  0x3f   :  { %542 = vmatpush1.bf16.msra.mxu0 %v9901_v1  ;;  %v9989_v1 = vld [vmem:[%s14434_s3 + $0x1c0] ss:$16 sps:$4 sm:$0xff]  }
  0x40   :  { %9777 = vmatpush3.bf16.msra.mxu1 %v9902_v3  ;;  %1264 = vmatprep.subr.bf16.mxu0 %v9910_v4  ;;  %v9992_v3 = vld [vmem:[%s14434_s3 + $0x1c8] ss:$16 sps:$4 sm:$0xff]   ;;  %v9995_v4 = vld [vmem:[%s14434_s3 + $0x1e0] ss:$16 sps:$4 sm:$0xff]  }
  0x41   :  { %9778 = vmatprep.subr.bf16.mxu1 %v10912_v60 }
  0x42   :  { %544 = vmatmul.mubr.bf16.vlgmr.msra.gmra.mrb[0].mxu0 %v9890_v57  ;;  %v9977_v57 = vld [vmem:[%s14434_s3 + $0x180] ss:$16 sps:$4 sm:$0xff]  }
  0x43   :  { %1265 = vmatpush1.bf16.msra.mxu0 %v9908_v6  ;;  %v9998_v6 = vld [vmem:[%s14434_s3 + $0x1e8] ss:$16 sps:$4 sm:$0xff]  }
  0x44   :  { %9779 = vmatpush3.bf16.msra.mxu1 %v9903_v5  ;;  %1266 = vmatprep.subr.bf16.mxu0 %v9916_v8  ;;  %v9997_v5 = vld [vmem:[%s14434_s3 + $0x1e4] ss:$16 sps:$4 sm:$0xff]  }
  0x45   :  { %9780 = vmatprep.subr.bf16.mxu1 %v10912_v60  ;;  %v9988_v60 = vld [vmem:[%s14434_s3 + $0x1ac] ss:$16 sps:$4 sm:$0xff]   ;;  %v10003_v8 = vld [vmem:[%s14434_s3 + $0x204] ss:$16 sps:$4 sm:$0xff]  }
  0x47   :  { %1267 = vmatpush1.bf16.msra.mxu0 %v9914_v9  ;;  %v10006_v9 = vld [vmem:[%s14434_s3 + $0x20c] ss:$16 sps:$4 sm:$0xff]  }
  0x48   :  { %9781 = vmatpush3.bf16.msra.mxu1 %v509_v11  ;;  %1268 = vmatprep.subr.bf16.mxu0 %v9922_v18 }
  0x49   :  { %1178 = vmatprep.subr.bf16.mxu1 %v9907_v10 }
  0x4b   :  { %9783 = vmatmul.mubr.msk.bf16.vlgmr.msra.gmra.mrb[8].mxu1 %vm497_vm1, %v11063_v25  ;;  %1269 = vmatpush1.bf16.msra.mxu0 %v9920_v17  ;;  %v9929_v25 = vld [vmem:[%s14434_s3 + $0x80] ss:$16 sps:$4 sm:$0xff]  }
  0x4c   :  { %1179 = vmatpush1.bf16.msra.mxu1 %v9905_v12  ;;  %1270 = vmatprep.subr.bf16.mxu0 %v9928_v20 }
  0x4d   :  { %1180 = vmatprep.subr.bf16.mxu1 %v9913_v13 }
  0x4f   :  { %1271 = vmatpush1.bf16.msra.mxu0 %v9926_v22 }
  0x50   :  { %1181 = vmatpush1.bf16.msra.mxu1 %v9911_v14  ;;  %1272 = vmatprep.subr.bf16.mxu0 %v9934_v24 }
  0x51   :  { %1182 = vmatprep.subr.bf16.mxu1 %v9919_v16 }
  0x53   :  { %1273 = vmatpush1.bf16.msra.mxu0 %v9932_v26 }
  0x54   :  { %1183 = vmatpush1.bf16.msra.mxu1 %v9917_v15  ;;  %1274 = vmatprep.subr.bf16.mxu0 %v9940_v29 }
  0x55   :  { %1184 = vmatprep.subr.bf16.mxu1 %v9925_v19 }
  0x57   :  { %1275 = vmatpush1.bf16.msra.mxu0 %v9938_v30 }
  0x58   :  { %1185 = vmatpush1.bf16.msra.mxu1 %v9923_v21  ;;  %1276 = vmatprep.subr.bf16.mxu0 %v9946_v32 }
  0x59   :  { %1186 = vmatprep.subr.bf16.mxu1 %v9931_v23 }
  0x5b   :  { %1277 = vmatpush1.bf16.msra.mxu0 %v9944_v34 }
  0x5c   :  { %1187 = vmatpush1.bf16.msra.mxu1 %v9929_v25  ;;  %1278 = vmatprep.subr.bf16.mxu0 %v9952_v36 }
  0x5d   :  { %1188 = vmatprep.subr.bf16.mxu1 %v9937_v27 }
  0x5f   :  { %1279 = vmatpush1.bf16.msra.mxu0 %v9950_v38 }
  0x60   :  { %1189 = vmatpush1.bf16.msra.mxu1 %v9935_v28  ;;  %1280 = vmatprep.subr.bf16.mxu0 %v9958_v40 }
  0x61   :  { %1190 = vmatprep.subr.bf16.mxu1 %v9943_v31 }
  0x63   :  { %1281 = vmatpush1.bf16.msra.mxu0 %v9956_v42 }
  0x64   :  { %1191 = vmatpush1.bf16.msra.mxu1 %v9941_v33  ;;  %1282 = vmatprep.subr.bf16.mxu0 %v9964_v44 }
  0x65   :  { %1192 = vmatprep.subr.bf16.mxu1 %v9949_v35 }
  0x67   :  { %1283 = vmatpush1.bf16.msra.mxu0 %v9962_v46 }
  0x68   :  { %1193 = vmatpush1.bf16.msra.mxu1 %v9947_v37  ;;  %1284 = vmatprep.subr.bf16.mxu0 %v9970_v50 }
  0x69   :  { %1194 = vmatprep.subr.bf16.mxu1 %v9955_v39 }
  0x6b   :  { %1285 = vmatpush1.bf16.msra.mxu0 %v9968_v49 }
  0x6c   :  { %1195 = vmatpush1.bf16.msra.mxu1 %v9953_v41  ;;  %1286 = vmatprep.subr.bf16.mxu0 %v9976_v52 }
  0x6d   :  { %1196 = vmatprep.subr.bf16.mxu1 %v9961_v43 }
  0x6f   :  { %1287 = vmatpush1.bf16.msra.mxu0 %v9974_v54 }
  0x70   :  { %1197 = vmatpush1.bf16.msra.mxu1 %v9959_v45  ;;  %1288 = vmatprep.subr.bf16.mxu0 %v9982_v56 }
  0x71   :  { %1198 = vmatprep.subr.bf16.mxu1 %v9967_v48 }
  0x73   :  { %1289 = vmatpush1.bf16.msra.mxu0 %v9980_v58 }
  0x74   :  { %1199 = vmatpush1.bf16.msra.mxu1 %v9965_v47  ;;  %1290 = vmatprep.subr.bf16.mxu0 %v9988_v60 }
  0x75   :  { %1200 = vmatprep.subr.bf16.mxu1 %v9973_v51 }
  0x77   :  { %1291 = vmatpush1.bf16.msra.mxu0 %v9986_v62 }
  0x78   :  { %1201 = vmatpush1.bf16.msra.mxu1 %v9971_v53  ;;  %1292 = vmatprep.subr.bf16.mxu0 %v9994_v0 }
  0x79   :  { %1202 = vmatprep.subr.bf16.mxu1 %v9979_v55 }
  0x7b   :  { %1293 = vmatpush1.bf16.msra.mxu0 %v9992_v3 }
  0x7c   :  { %1203 = vmatpush1.bf16.msra.mxu1 %v9977_v57  ;;  %1294 = vmatprep.subr.bf16.mxu0 %v10000_v7 }
  0x7d   :  { %1204 = vmatprep.subr.bf16.mxu1 %v9985_v59 }
  0x7f   :  { %1295 = vmatpush1.bf16.msra.mxu0 %v9998_v6 }
  0x80   :  { %1205 = vmatpush1.bf16.msra.mxu1 %v9983_v61  ;;  %1307 = vmatprep.subr.bf16.mxu0 %v10006_v9 }
  0x81   :  { %1206 = vmatprep.subr.bf16.mxu1 %v9991_v63 }
  0x84   :  { %1207 = vmatpush1.bf16.msra.mxu1 %v9989_v1 }
  0x85   :  { %1208 = vmatprep.subr.bf16.mxu1 %v9997_v5 }
  0x88   :  { %1209 = vmatpush1.bf16.msra.mxu1 %v9995_v4 }
  0x89   :  { %1221 = vmatprep.subr.bf16.mxu1 %v10003_v8 }
  0xea   :  { %v588_v10 = vpop.f32.mrb[0].mxu1 }
  0xeb   :  { %v590_v11 = vpop.f32.mrb[1].mxu1 }
  0xec   :  { %v592_v12 = vpop.f32.mrb[2].mxu1 }
  0xed   :  { %v594_v13 = vpop.f32.mrb[3].mxu1 }
  0xee   :  { %20 = vsyncpa [#allocation5], 0  ;;  %v134_v14 = vlaneseq  ;;  %v132_v23 = vld [vmem:[%s14433_s2] sm:$0x7]  ;;  %v10004_v56 = vld [vmem:[%s14434_s3 + $0x208] ss:$16 sps:$4 sm:$0xff]  }
  0xef   :  { %v10001_v55 = vld [vmem:[%s14434_s3 + $0x200] ss:$16 sps:$4 sm:$0xff]   ;;  %v10009_v57 = vld [vmem:[%s14434_s3 + $0x224] ss:$16 sps:$4 sm:$0xff]   ;;  %v10012_v58 = vld [vmem:[%s14434_s3 + $0x22c] ss:$16 sps:$4 sm:$0xff]  }
  0xf0   :  { %v11394_v17 = vshrl.u32 %v134_v14, 7  ;;  %v10007_v60 = vld [vmem:[%s14434_s3 + $0x220] ss:$16 sps:$4 sm:$0xff]   ;;  %v10010_v61 = vld [vmem:[%s14434_s3 + $0x228] ss:$16 sps:$4 sm:$0xff]   ;;  %vm1162_vm3 = vcmask 359424  }
  0xf1   :  { %v10013_v63 = vld [vmem:[%s14434_s3 + $0x244] ss:$16 sps:$4 sm:$0x3f]   ;;  %v10015_v0 = vld [vmem:[%s14434_s3 + $0x24c] ss:$16 sps:$4 sm:$0x3f]  }
  0xf2   :  { %v11397_v22 = vsub.s32 0, %v11394_v17  ;;  %v11403_v24 = vsub.s32 1, %v11394_v17  ;;  %v11408_v27 = vsub.s32 2, %v11394_v17  ;;  %v10017_v1 = vld [vmem:[%s14434_s3 + $0x240] ss:$16 sps:$4 sm:$0x3f]  }
  0xf3   :  { %v10018_v3 = vld [vmem:[%s14434_s3 + $0x248] ss:$16 sps:$4 sm:$0x3f]   ;;  %v1167_v5 = vsel %vm501_vm0, %v10017_v1, 0  ;;  %v11450_v7 = vld [vmem:[%s14435_s4 + $0x4] ss:$16 sps:$4 sm:$0xff]  }
  0xf4   :  { %14657 = vst [vmem:[#allocation8_spill] sm:$0xff] %v11397_v22  ;;  %14658 = vst [vmem:[#allocation9_spill] sm:$0xff] %v11403_v24  ;;  %v137_v25 = vrot.slane %v132_v23, %v11397_v22  ;;  %v141_v26 = vrot.slane %v132_v23, %v11403_v24  ;;  %v145_v36 = vrot.slane %v132_v23, %v11408_v27  ;;  %v1173_v6 = vsel %vm501_vm0, %v10018_v3, 0  ;;  %v11455_v8 = vld [vmem:[%s14435_s4 + $0xc] ss:$16 sps:$4 sm:$0xff]  }
  0xf5   :  { %14659 = vst [vmem:[#allocation10_spill] sm:$0xff] %v11408_v27  ;;  %v11460_v9 = vld [vmem:[%s14435_s4] ss:$16 sps:$4 sm:$0xff]   ;;  %v11489_v14 = vld [vmem:[%s14435_s4 + $0x28] ss:$16 sps:$4 sm:$0xff]  }
  0xf6   :  { %v11534_v23 = vld [vmem:[%s14435_s4 + $0x60] ss:$16 sps:$4 sm:$0xff]   ;;  %v11769_v1 = vld [vmem:[%s14438_s7 + $0xa4] ss:$16 sps:$4 sm:$0xff]  }
  0xf7   :  { %14671 = vst [vmem:[#allocation22_spill] sm:$0xff] %v11769_v1  ;;  %v11774_v3 = vld [vmem:[%s14438_s7 + $0xa0] ss:$16 sps:$4 sm:$0xff]  }
  0xf8   :  { %14672 = vst [vmem:[#allocation23_spill] sm:$0xff] %v11774_v3 }
 0x10a   :  { %v9760_v15 = vpop.f32.mrb[4].mxu1 }
 0x10b   :  { %v9761_v16 = vpop.f32.mrb[5].mxu1 }
 0x10c   :  { %v9762_v18 = vadd.f32 %v9761_v16, %v9760_v15  ;;  %v9763_v19 = vpop.f32.mrb[6].mxu1  ;;  %v11496_v15 = vld [vmem:[%s14435_s4 + $0x44] ss:$16 sps:$4 sm:$0xff]   ;;  %v11501_v16 = vld [vmem:[%s14435_s4 + $0x4c] ss:$16 sps:$4 sm:$0xff]  }
 0x10d   :  { %v9764_v20 = vpop.f32.mrb[7].mxu1 }
 0x10e   :  { %v9765_v21 = vadd.f32 %v9764_v20, %v9763_v19  ;;  %v632_v41 = vadd.f32 %v9762_v18, %v145_v36  ;;  %v11510_v18 = vld [vmem:[%s14435_s4 + $0x40] ss:$16 sps:$4 sm:$0xff]   ;;  %v11515_v19 = vld [vmem:[%s14435_s4 + $0x48] ss:$16 sps:$4 sm:$0xff]   ;;  %v11522_v20 = vld [vmem:[%s14435_s4 + $0x64] ss:$16 sps:$4 sm:$0xff]  }
 0x110   :  { %v635_v45 = vadd.f32 %v9765_v21, %v145_v36  ;;  %v11527_v21 = vld [vmem:[%s14435_s4 + $0x6c] ss:$16 sps:$4 sm:$0xff]  }
 0x111   :  { %v11599_v36 = vld [vmem:[%s14435_s4 + $0xcc] ss:$16 sps:$4 sm:$0xff]  }
 0x115   :  { %v545_v28 = vpop.f32.mrb[0].mxu0 }
 0x116   :  { %v546_v29 = vadd.f32 %v545_v28, %v137_v25  ;;  %v547_v30 = vpop.f32.mrb[1].mxu0  ;;  %v11551_v28 = vld [vmem:[%s14435_s4 + $0x8c] ss:$16 sps:$4 sm:$0xff]  }
 0x117   :  { %v548_v31 = vadd.f32 %v547_v30, %v141_v26  ;;  %v549_v32 = vpop.f32.mrb[2].mxu0  ;;  %v11563_v30 = vld [vmem:[%s14435_s4 + $0x88] ss:$16 sps:$4 sm:$0xff]  }
 0x118   :  { %v589_v33 = vadd.f32 %v588_v10, %v546_v29  ;;  %v550_v34 = vadd.f32 %v549_v32, %v137_v25  ;;  %v551_v35 = vpop.f32.mrb[3].mxu0  ;;  %v11465_v10 = vld [vmem:[%s14435_s4 + $0x8] ss:$16 sps:$4 sm:$0xff]   ;;  %v11558_v29 = vld [vmem:[%s14435_s4 + $0x80] ss:$16 sps:$4 sm:$0xff]  }
 0x119   :  { %v591_v37 = vadd.f32 %v590_v11, %v548_v31  ;;  %v552_v38 = vadd.f32 %v551_v35, %v141_v26  ;;  %v11472_v11 = vld [vmem:[%s14435_s4 + $0x24] ss:$16 sps:$4 sm:$0xff]   ;;  %v11539_v25 = vld [vmem:[%s14435_s4 + $0x68] ss:$16 sps:$4 sm:$0xff]   ;;  %v11575_v32 = vld [vmem:[%s14435_s4 + $0xac] ss:$16 sps:$4 sm:$0xff]  }
 0x11a   :  { %10595 = vtanh.f32 %v589_v33  ;;  %v593_v39 = vadd.f32 %v592_v12, %v550_v34  ;;  %v11477_v12 = vld [vmem:[%s14435_s4 + $0x2c] ss:$16 sps:$4 sm:$0xff]   ;;  %v11546_v26 = vld [vmem:[%s14435_s4 + $0x84] ss:$16 sps:$4 sm:$0xff]   ;;  %v11582_v33 = vld [vmem:[%s14435_s4 + $0xa0] ss:$16 sps:$4 sm:$0xff]  }
 0x11b   :  { %10597 = vtanh.f32 %v591_v37  ;;  %v595_v40 = vadd.f32 %v594_v13, %v552_v38  ;;  %v11484_v13 = vld [vmem:[%s14435_s4 + $0x20] ss:$16 sps:$4 sm:$0xff]   ;;  %v11570_v31 = vld [vmem:[%s14435_s4 + $0xa4] ss:$16 sps:$4 sm:$0xff]   ;;  %v11587_v34 = vld [vmem:[%s14435_s4 + $0xa8] ss:$16 sps:$4 sm:$0xff]  }
 0x11c   :  { %10599 = vtanh.f32 %v593_v39  ;;  %v11594_v35 = vld [vmem:[%s14435_s4 + $0xc4] ss:$16 sps:$4 sm:$0xff]   ;;  %v11606_v37 = vld [vmem:[%s14435_s4 + $0xc0] ss:$16 sps:$4 sm:$0xff]   ;;  %v11611_v38 = vld [vmem:[%s14435_s4 + $0xc8] ss:$16 sps:$4 sm:$0xff]  }
 0x11d   :  { %10601 = vtanh.f32 %v595_v40  ;;  %v11618_v39 = vld [vmem:[%s14435_s4 + $0xe4] ss:$16 sps:$4 sm:$0xff]   ;;  %v11623_v40 = vld [vmem:[%s14435_s4 + $0xec] ss:$16 sps:$4 sm:$0xff]  }
 0x11e   :  { %v672_v42 = vpop.f32.mrb[8].mxu1 }
 0x11f   :  { %v673_v43 = vadd.f32 %v672_v42, %v632_v41  ;;  %v9784_v44 = vpop.f32.mrb[9].mxu1  ;;  %v11630_v41 = vld [vmem:[%s14435_s4 + $0xe0] ss:$16 sps:$4 sm:$0xff]   ;;  %v11635_v42 = vld [vmem:[%s14435_s4 + $0xe8] ss:$16 sps:$4 sm:$0xff]  }
 0x120   :  { %v675_v46 = vpop.f32.mrb[10].mxu1 }
 0x121   :  { %v676_v47 = vadd.f32 %v675_v46, %v635_v45  ;;  %v9785_v48 = vpop.f32.mrb[11].mxu1  ;;  %10603 = vtanh.f32 %v673_v43  ;;  %v1350_v43 = vld [vmem:[%s14440_s9] sm:$0x3]  ;;  %v11654_v46 = vld [vmem:[%s14438_s7 + $0x4] ss:$16 sps:$4 sm:$0xff]  }
 0x122   :  { %v1356_v44 = vpack.c.bf16 %v1350_v43, %v1350_v43  ;;  %v11649_v45 = vld [vmem:[%s14438_s7] ss:$16 sps:$4 sm:$0xff]   ;;  %v11664_v48 = vld [vmem:[%s14438_s7 + $0xc] ss:$16 sps:$4 sm:$0xff]  }
 0x123   :  { %10605 = vtanh.f32 %v676_v47  ;;  %v11659_v47 = vld [vmem:[%s14438_s7 + $0x8] ss:$16 sps:$4 sm:$0xff]   ;;  %v11798_v43 = vld [vmem:[%s14438_s7 + $0xc0] ss:$16 sps:$4 sm:$0xff]  }
 0x124   :  { %v10596_v49 = vpop.eup %10595  ;;  %14676 = vst [vmem:[#allocation27_spill] sm:$0xff] %v11798_v43 }
 0x125   :  { %v10598_v50 = vpop.eup %10597 }
 0x126   :  { %v10600_v51 = vpop.eup %10599 }
 0x127   :  { %v10602_v52 = vpop.eup %10601  ;;  %v685_v53 = vpack.c.bf16 %v10600_v51, %v10596_v49  ;;  %v11669_v49 = vld [vmem:[%s14438_s7 + $0x24] ss:$16 sps:$4 sm:$0xff]   ;;  %v11682_v51 = vld [vmem:[%s14438_s7 + $0x20] ss:$16 sps:$4 sm:$0xff]  }
 0x128   :  { %v686_v54 = vpack.c.bf16 %v10602_v52, %v10598_v50  ;;  %v11675_v50 = vld [vmem:[%s14438_s7 + $0x2c] ss:$16 sps:$4 sm:$0xff]   ;;  %v11689_v52 = vld [vmem:[%s14438_s7 + $0x28] ss:$16 sps:$4 sm:$0xff]  }
 0x12a   :  { %1210 = vmatprep.mubr.bf16.mxu1 %v686_v54  ;;  %1296 = vmatprep.mubr.bf16.mxu0 %v686_v54  ;;  %v11700_v54 = vld [vmem:[%s14438_s7 + $0x4c] ss:$16 sps:$4 sm:$0xff]  }
 0x12b   :  { %v10604_v59 = vpop.eup %10603  ;;  %1211 = vmatmul.mubr.bf16.vlgmr.msra.gmra.mrb[12].mxu1 %v685_v53  ;;  %1297 = vmatmul.mubr.bf16.vlgmr.msra.gmra.mrb[4].mxu0 %v685_v53  ;;  %v11694_v53 = vld [vmem:[%s14438_s7 + $0x44] ss:$16 sps:$4 sm:$0xff]   ;;  %14660 = vst [vmem:[#allocation11_spill] sm:$0xff] %v11700_v54 }
 0x12c   :  { %1222 = vmatpush1.bf16.msra.mxu1 %v10001_v55  ;;  %1308 = vmatpush1.bf16.msra.mxu0 %v10004_v56  ;;  %v11706_v55 = vld [vmem:[%s14438_s7 + $0x40] ss:$16 sps:$4 sm:$0xff]   ;;  %v11713_v56 = vld [vmem:[%s14438_s7 + $0x48] ss:$16 sps:$4 sm:$0xff]  }
 0x12d   :  { %v10606_v62 = vpop.eup %10605  ;;  %1223 = vmatprep.subr.bf16.mxu1 %v10009_v57  ;;  %1309 = vmatprep.subr.bf16.mxu0 %v10012_v58  ;;  %14661 = vst [vmem:[#allocation12_spill] sm:$0xff] %v11706_v55  ;;  %14662 = vst [vmem:[#allocation13_spill] sm:$0xff] %v11713_v56  ;;  %v11718_v57 = vld [vmem:[%s14438_s7 + $0x64] ss:$16 sps:$4 sm:$0xff]   ;;  %v11724_v58 = vld [vmem:[%s14438_s7 + $0x6c] ss:$16 sps:$4 sm:$0xff]  }
 0x12e   :  { %v687_v4 = vpack.c.bf16 %v10606_v62, %v10604_v59  ;;  %1253 = vmatprep.mubr.bf16.mxu1 %v14445_v2  ;;  %1339 = vmatprep.mubr.bf16.mxu0 %v14445_v2  ;;  %14663 = vst [vmem:[#allocation14_spill] sm:$0xff] %v11718_v57  ;;  %14664 = vst [vmem:[#allocation15_spill] sm:$0xff] %v11724_v58  ;;  %v11730_v59 = vld [vmem:[%s14438_s7 + $0x60] ss:$16 sps:$4 sm:$0xff]  }
 0x12f   :  { %14665 = vst [vmem:[#allocation16_spill] sm:$0xff] %v11730_v59  ;;  %v11749_v62 = vld [vmem:[%s14438_s7 + $0x80] ss:$16 sps:$4 sm:$0xff]  }
 0x130   :  { %1224 = vmatpush1.bf16.msra.mxu1 %v10007_v60  ;;  %1310 = vmatpush1.bf16.msra.mxu0 %v10010_v61  ;;  %v11737_v60 = vld [vmem:[%s14438_s7 + $0x68] ss:$16 sps:$4 sm:$0xff]   ;;  %v11742_v61 = vld [vmem:[%s14438_s7 + $0x84] ss:$16 sps:$4 sm:$0xff]   ;;  %14668 = vst [vmem:[#allocation19_spill] sm:$0xff] %v11749_v62 }
 0x131   :  { %8910 = vmatprep.subr.msk.bf16.mxu1 %vm501_vm0, %v10013_v63  ;;  %8912 = vmatprep.subr.msk.bf16.mxu0 %vm501_vm0, %v10015_v0  ;;  %14666 = vst [vmem:[#allocation17_spill] sm:$0xff] %v11737_v60  ;;  %14667 = vst [vmem:[#allocation18_spill] sm:$0xff] %v11742_v61  ;;  %v11757_v63 = vld [vmem:[%s14438_s7 + $0x8c] ss:$16 sps:$4 sm:$0xff]   ;;  %v11762_v0 = vld [vmem:[%s14438_s7 + $0x88] ss:$16 sps:$4 sm:$0xff]  }
 0x132   :  { %14669 = vst [vmem:[#allocation20_spill] sm:$0xff] %v11757_v63  ;;  %14670 = vst [vmem:[#allocation21_spill] sm:$0xff] %v11762_v0 }
 0x134   :  { %1226 = vmatpush1.bf16.msra.mxu1 %v1167_v5  ;;  %1312 = vmatpush1.bf16.msra.mxu0 %v1173_v6  ;;  %v11786_v5 = vld [vmem:[%s14438_s7 + $0xa8] ss:$16 sps:$4 sm:$0xff]   ;;  %v11792_v6 = vld [vmem:[%s14438_s7 + $0xc4] ss:$16 sps:$4 sm:$0xff]  }
 0x135   :  { %1549 = vmatprep.subr.bf16.mxu1 %v11450_v7  ;;  %1590 = vmatprep.subr.bf16.mxu0 %v11455_v8  ;;  %14674 = vst [vmem:[#allocation25_spill] sm:$0xff] %v11786_v5  ;;  %14675 = vst [vmem:[#allocation26_spill] sm:$0xff] %v11792_v6 }
 0x137   :  { %8911 = vmatmul.mubr.msk.bf16.vlgmr.msra.gmra.mrb[12].mxu1 %vm1162_vm3, %v687_v4  ;;  %8913 = vmatmul.mubr.msk.bf16.vlgmr.msra.gmra.mrb[4].mxu0 %vm1162_vm3, %v687_v4  ;;  %v11780_v4 = vld [vmem:[%s14438_s7 + $0xac] ss:$16 sps:$4 sm:$0xff]  }
 0x138   :  { %1550 = vmatpush1.bf16.msra.mxu1 %v11460_v9  ;;  %1591 = vmatpush1.bf16.msra.mxu0 %v11465_v10  ;;  %14673 = vst [vmem:[#allocation24_spill] sm:$0xff] %v11780_v4 }
 0x139   :  { %1551 = vmatprep.subr.bf16.mxu1 %v11472_v11  ;;  %1592 = vmatprep.subr.bf16.mxu0 %v11477_v12 }
 0x13a   :  { %1581 = vmatprep.mubr.bf16.mxu1 %v14445_v2  ;;  %1622 = vmatprep.mubr.bf16.mxu0 %v14445_v2 }
 0x13c   :  { %1552 = vmatpush1.bf16.msra.mxu1 %v11484_v13  ;;  %1593 = vmatpush1.bf16.msra.mxu0 %v11489_v14 }
 0x13d   :  { %1553 = vmatprep.subr.bf16.mxu1 %v11496_v15  ;;  %1594 = vmatprep.subr.bf16.mxu0 %v11501_v16 }
 0x140   :  { %1554 = vmatpush1.bf16.msra.mxu1 %v11510_v18  ;;  %1595 = vmatpush1.bf16.msra.mxu0 %v11515_v19 }
 0x141   :  { %1555 = vmatprep.subr.bf16.mxu1 %v11522_v20  ;;  %1596 = vmatprep.subr.bf16.mxu0 %v11527_v21 }
 0x144   :  { %1556 = vmatpush1.bf16.msra.mxu1 %v11534_v23  ;;  %1597 = vmatpush1.bf16.msra.mxu0 %v11539_v25 }
 0x145   :  { %1557 = vmatprep.subr.bf16.mxu1 %v11546_v26  ;;  %1598 = vmatprep.subr.bf16.mxu0 %v11551_v28 }
 0x148   :  { %1558 = vmatpush1.bf16.msra.mxu1 %v11558_v29  ;;  %1599 = vmatpush1.bf16.msra.mxu0 %v11563_v30 }
 0x149   :  { %1559 = vmatprep.subr.bf16.mxu1 %v11570_v31  ;;  %1600 = vmatprep.subr.bf16.mxu0 %v11575_v32 }
 0x14c   :  { %1560 = vmatpush1.bf16.msra.mxu1 %v11582_v33  ;;  %1601 = vmatpush1.bf16.msra.mxu0 %v11587_v34 }
 0x14d   :  { %1561 = vmatprep.subr.bf16.mxu1 %v11594_v35  ;;  %1602 = vmatprep.subr.bf16.mxu0 %v11599_v36 }
 0x150   :  { %1562 = vmatpush1.bf16.msra.mxu1 %v11606_v37  ;;  %1603 = vmatpush1.bf16.msra.mxu0 %v11611_v38 }
 0x151   :  { %1563 = vmatprep.subr.bf16.mxu1 %v11618_v39  ;;  %1604 = vmatprep.subr.bf16.mxu0 %v11623_v40 }
 0x154   :  { %1564 = vmatpush1.bf16.msra.mxu1 %v11630_v41  ;;  %1605 = vmatpush1.bf16.msra.mxu0 %v11635_v42 }
 0x155   :  { %1885 = vmatprep.subr.bf16.mxu1 %v11654_v46  ;;  %1926 = vmatprep.subr.bf16.mxu0 %v11664_v48 }
 0x157   :  { %1582 = vmatmul.mubr.bf16.vlgmr.msra.gmra.mrb[16].mxu1 %v1356_v44  ;;  %1623 = vmatmul.mubr.bf16.vlgmr.msra.gmra.mrb[8].mxu0 %v1356_v44  ;;  %v11804_v44 = vld [vmem:[%s14438_s7 + $0xcc] ss:$16 sps:$4 sm:$0xff]  }
 0x158   :  { %1917 = vmatprep.mubr.bf16.mxu1 %v14445_v2  ;;  %1958 = vmatprep.mubr.bf16.mxu0 %v14445_v2  ;;  %14677 = vst [vmem:[#allocation28_spill] sm:$0xff] %v11804_v44  ;;  %v11810_v2 = vld [vmem:[%s14438_s7 + $0xc8] ss:$16 sps:$4 sm:$0xff]  }
 0x159   :  { %1886 = vmatpush1.bf16.msra.mxu1 %v11649_v45  ;;  %1927 = vmatpush1.bf16.msra.mxu0 %v11659_v47  ;;  %14678 = vst [vmem:[#allocation29_spill] sm:$0xff] %v11810_v2 }
 0x15a   :  { %1887 = vmatprep.subr.bf16.mxu1 %v11669_v49  ;;  %1928 = vmatprep.subr.bf16.mxu0 %v11675_v50 }
 0x15d   :  { %1888 = vmatpush1.bf16.msra.mxu1 %v11682_v51  ;;  %1929 = vmatpush1.bf16.msra.mxu0 %v11689_v52 }
 0x15e   :  { %1889 = vmatprep.subr.bf16.mxu1 %v11694_v53  ;;  %1930 = vmatprep.subr.bf16.mxu0 %v11700_v54 }
 0x161   :  { %1890 = vmatpush1.bf16.msra.mxu1 %v11706_v55  ;;  %1931 = vmatpush1.bf16.msra.mxu0 %v11713_v56 }
 0x162   :  { %1891 = vmatprep.subr.bf16.mxu1 %v11718_v57  ;;  %1932 = vmatprep.subr.bf16.mxu0 %v11724_v58 }
 0x165   :  { %1892 = vmatpush1.bf16.msra.mxu1 %v11730_v59  ;;  %1933 = vmatpush1.bf16.msra.mxu0 %v11737_v60 }
 0x166   :  { %1893 = vmatprep.subr.bf16.mxu1 %v11742_v61  ;;  %1934 = vmatprep.subr.bf16.mxu0 %v11757_v63 }
 0x169   :  { %1894 = vmatpush1.bf16.msra.mxu1 %v11749_v62  ;;  %1935 = vmatpush1.bf16.msra.mxu0 %v11762_v0 }
 0x16a   :  { %1895 = vmatprep.subr.bf16.mxu1 %v11769_v1  ;;  %1936 = vmatprep.subr.bf16.mxu0 %v11780_v4  ;;  %v11854_v4 = vld [vmem:[%s14437_s6] ss:$16 sps:$4 sm:$0xff]   ;;  %v11874_v1 = vld [vmem:[%s14437_s6 + $0x2c] ss:$16 sps:$4 sm:$0xff]  }
 0x16b   :  { %14685 = vst [vmem:[#allocation36_spill] sm:$0xff] %v11854_v4  ;;  %14689 = vst [vmem:[#allocation39_spill] sm:$0xff] %v11874_v1 }
 0x16d   :  { %1896 = vmatpush1.bf16.msra.mxu1 %v11774_v3  ;;  %1937 = vmatpush1.bf16.msra.mxu0 %v11786_v5  ;;  %v11816_v5 = vld [vmem:[%s14438_s7 + $0xe4] ss:$16 sps:$4 sm:$0xff]  }
 0x16e   :  { %1897 = vmatprep.subr.bf16.mxu1 %v11792_v6  ;;  %1938 = vmatprep.subr.bf16.mxu0 %v11804_v44  ;;  %14679 = vst [vmem:[#allocation30_spill] sm:$0xff] %v11816_v5  ;;  %v11822_v6 = vld [vmem:[%s14438_s7 + $0xe0] ss:$16 sps:$4 sm:$0xff]   ;;  %v11834_v44 = vld [vmem:[%s14438_s7 + $0xe8] ss:$16 sps:$4 sm:$0xff]  }
 0x16f   :  { %14680 = vst [vmem:[#allocation31_spill] sm:$0xff] %v11822_v6  ;;  %14682 = vst [vmem:[#allocation33_spill] sm:$0xff] %v11834_v44 }
 0x171   :  { %1898 = vmatpush1.bf16.msra.mxu1 %v11798_v43  ;;  %1939 = vmatpush1.bf16.msra.mxu0 %v11810_v2  ;;  %v11828_v43 = vld [vmem:[%s14438_s7 + $0xec] ss:$16 sps:$4 sm:$0xff]   ;;  %v8914_v2 = vld [vmem:[%s14440_s9 + $0x2] sm:$0x3] }
 0x172   :  { %1899 = vmatprep.subr.bf16.mxu1 %v11816_v5  ;;  %14681 = vst [vmem:[#allocation32_spill] sm:$0xff] %v11828_v43  ;;  %1940 = vmatprep.subr.bf16.mxu0 %v11828_v43  ;;  %v1692_v3 = vpack.c.bf16 %v8914_v2, %v8914_v2  ;;  %v11844_v5 = vld [vmem:[%s14437_s6 + $0x4] ss:$16 sps:$4 sm:$0xff]   ;;  %v11859_v2 = vld [vmem:[%s14437_s6 + $0x8] ss:$16 sps:$4 sm:$0xff]  }
 0x173   :  { %14683 = vst [vmem:[#allocation34_spill] sm:$0xff] %v11844_v5  ;;  %14686 = vst [vmem:[#allocation37_spill] sm:$0xff] %v11859_v2  ;;  %v11869_v43 = vld [vmem:[%s14437_s6 + $0x24] ss:$16 sps:$4 sm:$0xff]  }
 0x174   :  { %14688 = vst [vmem:[#allocation38_spill] sm:$0xff] %v11869_v43 }
 0x175   :  { %1900 = vmatpush1.bf16.msra.mxu1 %v11822_v6  ;;  %1941 = vmatpush1.bf16.msra.mxu0 %v11834_v44  ;;  %v11849_v6 = vld [vmem:[%s14437_s6 + $0xc] ss:$16 sps:$4 sm:$0xff]   ;;  %v14687_v44 = vmov 0  }
 0x176   :  { %14684 = vst [vmem:[#allocation35_spill] sm:$0xff] %v11849_v6  ;;  %2127 = vmatprep.subr.bf16.mxu1 %v11844_v5  ;;  %2168 = vmatprep.subr.bf16.mxu0 %v11849_v6  ;;  %v11899_v6 = vld [vmem:[%s14437_s6 + $0x4c] ss:$16 sps:$4 sm:$0xff]   ;;  %v11975_v5 = vld [vmem:[%s14437_s6 + $0xa0] ss:$16 sps:$4 sm:$0xff]  }
 0x177   :  { %14693 = vst [vmem:[#allocation43_spill] sm:$0xff] %v11899_v6  ;;  %14706 = vst [vmem:[#allocation56_spill] sm:$0xff] %v11975_v5 }
 0x178   :  { %1918 = vmatmul.mubr.bf16.vlgmr.msra.gmra.mrb[20].mxu1 %v1692_v3  ;;  %1959 = vmatmul.mubr.bf16.vlgmr.msra.gmra.mrb[12].mxu0 %v1692_v3  ;;  %v11880_v3 = vld [vmem:[%s14437_s6 + $0x20] ss:$16 sps:$4 sm:$0xff]  }
 0x179   :  { %2159 = vmatprep.mubr.bf16.mxu1 %v14687_v44  ;;  %2128 = vmatpush1.bf16.msra.mxu1 %v11854_v4  ;;  %14690 = vst [vmem:[#allocation40_spill] sm:$0xff] %v11880_v3  ;;  %v11894_v4 = vld [vmem:[%s14437_s6 + $0x44] ss:$16 sps:$4 sm:$0xff]  }
 0x17a   :  { %2169 = vmatpush1.bf16.msra.mxu0 %v11859_v2  ;;  %2200 = vmatprep.mubr.bf16.mxu0 %v14687_v44  ;;  %v11885_v2 = vld [vmem:[%s14437_s6 + $0x28] ss:$16 sps:$4 sm:$0xff]   ;;  %14692 = vst [vmem:[#allocation42_spill] sm:$0xff] %v11894_v4 }
 0x17b   :  { %14691 = vst [vmem:[#allocation41_spill] sm:$0xff] %v11885_v2  ;;  %2129 = vmatprep.subr.bf16.mxu1 %v11869_v43  ;;  %2170 = vmatprep.subr.bf16.mxu0 %v11874_v1  ;;  %v11904_v43 = vld [vmem:[%s14437_s6 + $0x40] ss:$16 sps:$4 sm:$0xff]   ;;  %v11923_v1 = vld [vmem:[%s14437_s6 + $0x6c] ss:$16 sps:$4 sm:$0xff]  }
 0x17c   :  { %14694 = vst [vmem:[#allocation44_spill] sm:$0xff] %v11904_v43  ;;  %14697 = vst [vmem:[#allocation47_spill] sm:$0xff] %v11923_v1 }
 0x17d   :  { %2130 = vmatpush1.bf16.msra.mxu1 %v11880_v3  ;;  %v11909_v3 = vld [vmem:[%s14437_s6 + $0x48] ss:$16 sps:$4 sm:$0xff]  }
 0x17e   :  { %2171 = vmatpush1.bf16.msra.mxu0 %v11885_v2  ;;  %14695 = vst [vmem:[#allocation45_spill] sm:$0xff] %v11909_v3  ;;  %2131 = vmatprep.subr.bf16.mxu1 %v11894_v4  ;;  %v11918_v2 = vld [vmem:[%s14437_s6 + $0x64] ss:$16 sps:$4 sm:$0xff]   ;;  %v11928_v4 = vld [vmem:[%s14437_s6 + $0x60] ss:$16 sps:$4 sm:$0xff]  }
 0x17f   :  { %2172 = vmatprep.subr.bf16.mxu0 %v11899_v6  ;;  %14696 = vst [vmem:[#allocation46_spill] sm:$0xff] %v11918_v2  ;;  %14698 = vst [vmem:[#allocation48_spill] sm:$0xff] %v11928_v4  ;;  %v11947_v6 = vld [vmem:[%s14437_s6 + $0x8c] ss:$16 sps:$4 sm:$0xff]  }
 0x180   :  { %14701 = vst [vmem:[#allocation51_spill] sm:$0xff] %v11947_v6 }
 0x181   :  { %2132 = vmatpush1.bf16.msra.mxu1 %v11904_v43  ;;  %v11933_v43 = vld [vmem:[%s14437_s6 + $0x68] ss:$16 sps:$4 sm:$0xff]  }
 0x182   :  { %2173 = vmatpush1.bf16.msra.mxu0 %v11909_v3  ;;  %14699 = vst [vmem:[#allocation49_spill] sm:$0xff] %v11933_v43  ;;  %2133 = vmatprep.subr.bf16.mxu1 %v11918_v2  ;;  %v11942_v3 = vld [vmem:[%s14437_s6 + $0x84] ss:$16 sps:$4 sm:$0xff]   ;;  %v11952_v2 = vld [vmem:[%s14437_s6 + $0x80] ss:$16 sps:$4 sm:$0xff]  }
 0x183   :  { %2174 = vmatprep.subr.bf16.mxu0 %v11923_v1  ;;  %14700 = vst [vmem:[#allocation50_spill] sm:$0xff] %v11942_v3  ;;  %14702 = vst [vmem:[#allocation52_spill] sm:$0xff] %v11952_v2  ;;  %v11969_v1 = vld [vmem:[%s14437_s6 + $0xac] ss:$16 sps:$4 sm:$0xff]  }
 0x184   :  { %14705 = vst [vmem:[#allocation55_spill] sm:$0xff] %v11969_v1 }
 0x185   :  { %2134 = vmatpush1.bf16.msra.mxu1 %v11928_v4  ;;  %v11957_v4 = vld [vmem:[%s14437_s6 + $0x88] ss:$16 sps:$4 sm:$0xff]  }
 0x186   :  { %2175 = vmatpush1.bf16.msra.mxu0 %v11933_v43  ;;  %14703 = vst [vmem:[#allocation53_spill] sm:$0xff] %v11957_v4  ;;  %2135 = vmatprep.subr.bf16.mxu1 %v11942_v3  ;;  %v11964_v43 = vld [vmem:[%s14437_s6 + $0xa4] ss:$16 sps:$4 sm:$0xff]  }
 0x187   :  { %2176 = vmatprep.subr.bf16.mxu0 %v11947_v6  ;;  %14704 = vst [vmem:[#allocation54_spill] sm:$0xff] %v11964_v43  ;;  %v11982_v6 = vld [vmem:[%s14437_s6 + $0xa8] ss:$16 sps:$4 sm:$0xff]   ;;  %v11987_v3 = vld [vmem:[%s14437_s6 + $0xc4] ss:$16 sps:$4 sm:$0xff]  }
 0x188   :  { %14707 = vst [vmem:[#allocation57_spill] sm:$0xff] %v11982_v6  ;;  %14708 = vst [vmem:[#allocation58_spill] sm:$0xff] %v11987_v3 }
 0x189   :  { %2136 = vmatpush1.bf16.msra.mxu1 %v11952_v2  ;;  %v11993_v2 = vld [vmem:[%s14437_s6 + $0xcc] ss:$16 sps:$4 sm:$0xff]  }
 0x18a   :  { %2177 = vmatpush1.bf16.msra.mxu0 %v11957_v4  ;;  %2137 = vmatprep.subr.bf16.mxu1 %v11964_v43  ;;  %14709 = vst [vmem:[#allocation59_spill] sm:$0xff] %v11993_v2  ;;  %v11999_v43 = vld [vmem:[%s14437_s6 + $0xc0] ss:$16 sps:$4 sm:$0xff]   ;;  %v12011_v4 = vld [vmem:[%s14437_s6 + $0xe4] ss:$16 sps:$4 sm:$0xff]  }
 0x18b   :  { %2178 = vmatprep.subr.bf16.mxu0 %v11969_v1  ;;  %14710 = vst [vmem:[#allocation60_spill] sm:$0xff] %v11999_v43  ;;  %v12006_v1 = vld [vmem:[%s14437_s6 + $0xc8] ss:$16 sps:$4 sm:$0xff]   ;;  %14712 = vst [vmem:[#allocation62_spill] sm:$0xff] %v12011_v4 }
 0x18c   :  { %14711 = vst [vmem:[#allocation61_spill] sm:$0xff] %v12006_v1 }
 0x18d   :  { %2138 = vmatpush1.bf16.msra.mxu1 %v11975_v5  ;;  %v12017_v5 = vld [vmem:[%s14437_s6 + $0xec] ss:$16 sps:$4 sm:$0xff]  }
 0x18e   :  { %2179 = vmatpush1.bf16.msra.mxu0 %v11982_v6  ;;  %2139 = vmatprep.subr.bf16.mxu1 %v11987_v3  ;;  %14713 = vst [vmem:[#allocation63_spill] sm:$0xff] %v12017_v5  ;;  %v12023_v3 = vld [vmem:[%s14437_s6 + $0xe0] ss:$16 sps:$4 sm:$0xff]  }
 0x18f   :  { %2180 = vmatprep.subr.bf16.mxu0 %v11993_v2  ;;  %14714 = vst [vmem:[#allocation64_spill] sm:$0xff] %v12023_v3  ;;  %v12030_v2 = vld [vmem:[%s14437_s6 + $0xe8] ss:$16 sps:$4 sm:$0xff]  }
 0x190   :  { %14715 = vst [vmem:[#allocation65_spill] sm:$0xff] %v12030_v2 }
 0x191   :  { %2140 = vmatpush1.bf16.msra.mxu1 %v11999_v43 }
 0x192   :  { %2181 = vmatpush1.bf16.msra.mxu0 %v12006_v1  ;;  %2141 = vmatprep.subr.bf16.mxu1 %v12011_v4  ;;  %v764_v1 = vld [vmem:[%s14436_s5] sm:$0xf]  ;;  %v12041_v4 = vsub.s32 3, %v11394_v17 }
 0x193   :  { %2182 = vmatprep.subr.bf16.mxu0 %v12017_v5  ;;  %v769_v0 = vrot.slane %v764_v1, %v11397_v22  ;;  %v777_v5 = vrot.slane %v764_v1, %v11408_v27 }
 0x194   :  { %14716 = vst [vmem:[#allocation66_spill] sm:$0xff] %v12041_v4 }
 0x195   :  { %2142 = vmatpush1.bf16.msra.mxu1 %v12023_v3 }
 0x196   :  { %2183 = vmatpush1.bf16.msra.mxu0 %v12030_v2  ;;  %2453 = vmatprep.subr.bf16.mxu1 %v11450_v7  ;;  %v773_v2 = vrot.slane %v764_v1, %v11403_v24  ;;  %v781_v7 = vrot.slane %v764_v1, %v12041_v4 }
 0x197   :  { %2494 = vmatprep.subr.bf16.mxu0 %v11455_v8 }
 0x20a   :  { %v1255_v43 = vpop.f32.mrb[12].mxu1  ;;  %v1341_v6 = vpop.f32.mrb[4].mxu0 }
 0x20b   :  { %v1257_v3 = vpop.f32.mrb[13].mxu1  ;;  %v1343_v62 = vpop.f32.mrb[5].mxu0  ;;  %v12055_v22 = vadd.f32 %v1255_v43, %v769_v0  ;;  %v12064_v43 = vadd.f32 %v1341_v6, %v777_v5 }
 0x20c   :  { %v1259_v8 = vpop.f32.mrb[14].mxu1  ;;  %v1345_v63 = vpop.f32.mrb[6].mxu0  ;;  %v12057_v27 = vadd.f32 %v1257_v3, %v773_v2 }
 0x20d   :  { %v12047_v61 = vadd.f32 %v1259_v8, %v769_v0  ;;  %v12049_v60 = vadd.f32 %v1345_v63, %v777_v5  ;;  %v1261_v17 = vpop.f32.mrb[15].mxu1  ;;  %v1347_v59 = vpop.f32.mrb[7].mxu0 }
 0x20e   :  { %v12051_v58 = vadd.f32 %v1261_v17, %v773_v2  ;;  %v12053_v57 = vadd.f32 %v1347_v59, %v781_v7  ;;  %v12061_v59 = vadd.f32 %v1343_v62, %v781_v7 }
 0x20f   :  { %14717 = vst [vmem:[#allocation67_spill] sm:$0xff] %v12047_v61  ;;  %14718 = vst [vmem:[#allocation68_spill] sm:$0xff] %v12049_v60 }
 0x210   :  { %14719 = vst [vmem:[#allocation69_spill] sm:$0xff] %v12051_v58  ;;  %14720 = vst [vmem:[#allocation70_spill] sm:$0xff] %v12053_v57 }
 0x22a   :  { %v1583_v56 = vpop.f32.mrb[16].mxu1  ;;  %v1624_v24 = vpop.f32.mrb[8].mxu0 }
 0x22b   :  { %v1631_v1 = vadd.f32 %v12055_v22, %v1583_v56  ;;  %v1585_v4 = vpop.f32.mrb[17].mxu1  ;;  %v1626_v55 = vpop.f32.mrb[9].mxu0  ;;  %v1633_v56 = vadd.f32 %v12064_v43, %v1624_v24 }
 0x22c   :  { %v1632_v8 = vadd.f32 %v12057_v27, %v1585_v4  ;;  %v1587_v63 = vpop.f32.mrb[18].mxu1  ;;  %v1628_v60 = vpop.f32.mrb[10].mxu0  ;;  %v1634_v0 = vadd.f32 %v12061_v59, %v1626_v55 }
 0x22d   :  { %v8948_v61 = vmul.f32 -1.442695, %v1631_v1  ;;  %v1588_v54 = vpop.f32.mrb[19].mxu1  ;;  %v1629_v17 = vpop.f32.mrb[11].mxu0 }
 0x22e   :  { %v8949_v58 = vmul.f32 -1.442695, %v1632_v8  ;;  %v8950_v2 = vmul.f32 -1.442695, %v1634_v0 }
 0x22f   :  { %10607 = vpow2.f32 %v8948_v61 }
 0x230   :  { %10609 = vpow2.f32 %v8949_v58  ;;  %v1351_v58 = vld [vmem:[%s14441_s10] sm:$0x3] }
 0x231   :  { %10611 = vpow2.f32 %v8950_v2 }
 0x232   :  { %10613 = vtanh.f32 %v1633_v56 }
 0x239   :  { %v10608_v3 = vpop.eup %10607 }
 0x23a   :  { %v10610_v57 = vpop.eup %10609  ;;  %v1638_v4 = vadd.f32 1.0, %v10608_v3 }
 0x23b   :  { %v1644_v60 = vadd.f32 1.0, %v10610_v57  ;;  %v10612_v54 = vpop.eup %10611 }
 0x23c   :  { %10615 = vrcp.f32 %v1638_v4  ;;  %v10614_v61 = vpop.eup %10613  ;;  %v1651_v6 = vadd.f32 1.0, %v10612_v54 }
 0x23d   :  { %10617 = vrcp.f32 %v1644_v60 }
 0x23e   :  { %10619 = vrcp.f32 %v1651_v6 }
 0x246   :  { %v10616_v55 = vpop.eup %10615 }
 0x247   :  { %v10618_v62 = vpop.eup %10617  ;;  %v1655_v5 = vmul.f32 %v10616_v55, %v10614_v61 }
 0x248   :  { %v1654_v7 = vmul.f32 %v10618_v62, %v1351_v58  ;;  %v10620_v1 = vpop.eup %10619 }
 0x24a   :  { %v12070_v24 = vadd.f32 %v1655_v5, %v1654_v7 }
 0x24c   :  { %10621 = vtanh.f32 %v12070_v24 }
 0x256   :  { %v10622_v57 = vpop.eup %10621 }
 0x257   :  { %v1658_v8 = vmul.f32 %v10622_v57, %v10620_v1  ;;  %v14748_v1 = vld [vmem:[#allocation66_spill] sm:$0xff] }
 0x259   :  { %v1659_v63 = vpack.c.bf16 %v1658_v8, %v1658_v8 }
 0x25b   :  { %2160 = vmatmul.mubr.bf16.vlgmr.msra.gmra.mrb[24].mxu1 %v1659_v63  ;;  %2201 = vmatmul.mubr.bf16.vlgmr.msra.gmra.mrb[16].mxu0 %v1659_v63 }
 0x25c   :  { %2454 = vmatpush1.bf16.msra.mxu1 %v11460_v9  ;;  %2495 = vmatpush1.bf16.msra.mxu0 %v11465_v10  ;;  %v14721_v9 = vld [vmem:[#allocation11_spill] sm:$0xff]  ;;  %v14722_v10 = vld [vmem:[#allocation12_spill] sm:$0xff] }
 0x25d   :  { %2455 = vmatprep.subr.bf16.mxu1 %v11472_v11  ;;  %2496 = vmatprep.subr.bf16.mxu0 %v11477_v12  ;;  %v14723_v11 = vld [vmem:[#allocation13_spill] sm:$0xff]  ;;  %v14724_v12 = vld [vmem:[#allocation14_spill] sm:$0xff] }
 0x25e   :  { %2485 = vmatprep.mubr.bf16.mxu1 %v14687_v44  ;;  %2526 = vmatprep.mubr.bf16.mxu0 %v14687_v44 }
 0x260   :  { %2456 = vmatpush1.bf16.msra.mxu1 %v11484_v13  ;;  %2497 = vmatpush1.bf16.msra.mxu0 %v11489_v14  ;;  %v14725_v13 = vld [vmem:[#allocation15_spill] sm:$0xff]  ;;  %v14726_v14 = vld [vmem:[#allocation16_spill] sm:$0xff] }
 0x261   :  { %2457 = vmatprep.subr.bf16.mxu1 %v11496_v15  ;;  %2498 = vmatprep.subr.bf16.mxu0 %v11501_v16  ;;  %v14727_v15 = vld [vmem:[#allocation17_spill] sm:$0xff]  ;;  %v14728_v16 = vld [vmem:[#allocation18_spill] sm:$0xff] }
 0x264   :  { %2458 = vmatpush1.bf16.msra.mxu1 %v11510_v18  ;;  %2499 = vmatpush1.bf16.msra.mxu0 %v11515_v19  ;;  %v14729_v18 = vld [vmem:[#allocation20_spill] sm:$0xff]  ;;  %v1919_v19 = vpop.f32.mrb[20].mxu1 }
 0x265   :  { %2459 = vmatprep.subr.bf16.mxu1 %v11522_v20  ;;  %2500 = vmatprep.subr.bf16.mxu0 %v11527_v21  ;;  %v14730_v20 = vld [vmem:[#allocation19_spill] sm:$0xff]  ;;  %v14731_v21 = vld [vmem:[#allocation21_spill] sm:$0xff] }
 0x268   :  { %2460 = vmatpush1.bf16.msra.mxu1 %v11534_v23  ;;  %2501 = vmatpush1.bf16.msra.mxu0 %v11539_v25  ;;  %v1921_v23 = vpop.f32.mrb[21].mxu1  ;;  %v14732_v25 = vld [vmem:[#allocation22_spill] sm:$0xff] }
 0x269   :  { %2461 = vmatprep.subr.bf16.mxu1 %v11546_v26  ;;  %2502 = vmatprep.subr.bf16.mxu0 %v11551_v28  ;;  %v14733_v26 = vld [vmem:[#allocation24_spill] sm:$0xff]  ;;  %v1923_v28 = vpop.f32.mrb[22].mxu1 }
 0x26c   :  { %2462 = vmatpush1.bf16.msra.mxu1 %v11558_v29  ;;  %2503 = vmatpush1.bf16.msra.mxu0 %v11563_v30  ;;  %v1924_v29 = vpop.f32.mrb[23].mxu1  ;;  %v1960_v30 = vpop.f32.mrb[12].mxu0 }
 0x26d   :  { %2463 = vmatprep.subr.bf16.mxu1 %v11570_v31  ;;  %2504 = vmatprep.subr.bf16.mxu0 %v11575_v32  ;;  %v1962_v31 = vpop.f32.mrb[13].mxu0  ;;  %v14734_v32 = vld [vmem:[#allocation23_spill] sm:$0xff] }
 0x270   :  { %2464 = vmatpush1.bf16.msra.mxu1 %v11582_v33  ;;  %2505 = vmatpush1.bf16.msra.mxu0 %v11587_v34  ;;  %v14735_v33 = vld [vmem:[#allocation25_spill] sm:$0xff]  ;;  %v1964_v34 = vpop.f32.mrb[14].mxu0 }
 0x271   :  { %2465 = vmatprep.subr.bf16.mxu1 %v11594_v35  ;;  %2506 = vmatprep.subr.bf16.mxu0 %v11599_v36  ;;  %v14736_v35 = vld [vmem:[#allocation26_spill] sm:$0xff]  ;;  %v14737_v36 = vld [vmem:[#allocation28_spill] sm:$0xff] }
 0x274   :  { %2466 = vmatpush1.bf16.msra.mxu1 %v11606_v37  ;;  %2507 = vmatpush1.bf16.msra.mxu0 %v11611_v38  ;;  %v1965_v37 = vpop.f32.mrb[15].mxu0  ;;  %v14738_v38 = vld [vmem:[#allocation27_spill] sm:$0xff] }
 0x275   :  { %2467 = vmatprep.subr.bf16.mxu1 %v11618_v39  ;;  %2508 = vmatprep.subr.bf16.mxu0 %v11623_v40  ;;  %v14739_v39 = vld [vmem:[#allocation29_spill] sm:$0xff]  ;;  %v14740_v40 = vld [vmem:[#allocation30_spill] sm:$0xff] }
 0x278   :  { %2468 = vmatpush1.bf16.msra.mxu1 %v11630_v41  ;;  %2509 = vmatpush1.bf16.msra.mxu0 %v11635_v42  ;;  %v14741_v41 = vld [vmem:[#allocation32_spill] sm:$0xff]  ;;  %v14742_v42 = vld [vmem:[#allocation31_spill] sm:$0xff] }
 0x279   :  { %2803 = vmatprep.subr.bf16.mxu1 %v11654_v46  ;;  %2844 = vmatprep.subr.bf16.mxu0 %v11664_v48  ;;  %v14744_v46 = vld [vmem:[#allocation34_spill] sm:$0xff]  ;;  %v2209_v48 = vld [vmem:[%s14439_s8] sm:$0xf] }
 0x27a   :  { %v2226_v57 = vrot.slane %v2209_v48, %v14748_v1 }
 0x27b   :  { %2486 = vmatmul.mubr.bf16.vlgmr.msra.gmra.mrb[28].mxu1 %v1659_v63  ;;  %2527 = vmatmul.mubr.bf16.vlgmr.msra.gmra.mrb[20].mxu0 %v1659_v63  ;;  %v14749_v63 = vld [vmem:[#allocation10_spill] sm:$0xff] }
 0x27c   :  { %2804 = vmatpush1.bf16.msra.mxu1 %v11649_v45  ;;  %2845 = vmatpush1.bf16.msra.mxu0 %v11659_v47  ;;  %v14743_v45 = vld [vmem:[#allocation33_spill] sm:$0xff]  ;;  %v14745_v47 = vld [vmem:[#allocation35_spill] sm:$0xff] }
 0x27d   :  { %2805 = vmatprep.subr.bf16.mxu1 %v11669_v49  ;;  %2846 = vmatprep.subr.bf16.mxu0 %v11675_v50  ;;  %v14746_v49 = vld [vmem:[#allocation8_spill] sm:$0xff] }
 0x27e   :  { %2835 = vmatprep.mubr.bf16.mxu1 %v14687_v44  ;;  %2876 = vmatprep.mubr.bf16.mxu0 %v14687_v44  ;;  %v2214_v50 = vrot.slane %v2209_v48, %v14746_v49 }
 0x280   :  { %2806 = vmatpush1.bf16.msra.mxu1 %v11682_v51  ;;  %2847 = vmatpush1.bf16.msra.mxu0 %v11689_v52 }
 0x281   :  { %2807 = vmatprep.subr.bf16.mxu1 %v11694_v53  ;;  %2848 = vmatprep.subr.bf16.mxu0 %v14721_v9  ;;  %v14747_v53 = vld [vmem:[#allocation9_spill] sm:$0xff]  ;;  %v2222_v9 = vrot.slane %v2209_v48, %v14749_v63 }
 0x282   :  { %v2218_v17 = vrot.slane %v2209_v48, %v14747_v53 }
 0x284   :  { %2808 = vmatpush1.bf16.msra.mxu1 %v14722_v10  ;;  %2849 = vmatpush1.bf16.msra.mxu0 %v14723_v11 }
 0x285   :  { %2809 = vmatprep.subr.bf16.mxu1 %v14724_v12  ;;  %2850 = vmatprep.subr.bf16.mxu0 %v14725_v13 }
 0x288   :  { %2810 = vmatpush1.bf16.msra.mxu1 %v14726_v14  ;;  %2851 = vmatpush1.bf16.msra.mxu0 %v14727_v15 }
 0x289   :  { %2811 = vmatprep.subr.bf16.mxu1 %v14728_v16  ;;  %2852 = vmatprep.subr.bf16.mxu0 %v14729_v18 }
 0x28c   :  { %2812 = vmatpush1.bf16.msra.mxu1 %v14730_v20  ;;  %2853 = vmatpush1.bf16.msra.mxu0 %v14731_v21 }
 0x28d   :  { %2813 = vmatprep.subr.bf16.mxu1 %v14732_v25  ;;  %2854 = vmatprep.subr.bf16.mxu0 %v14733_v26 }
 0x290   :  { %2814 = vmatpush1.bf16.msra.mxu1 %v14734_v32  ;;  %2855 = vmatpush1.bf16.msra.mxu0 %v14735_v33 }
 0x291   :  { %2815 = vmatprep.subr.bf16.mxu1 %v14736_v35  ;;  %2856 = vmatprep.subr.bf16.mxu0 %v14737_v36 }
 0x294   :  { %2816 = vmatpush1.bf16.msra.mxu1 %v14738_v38  ;;  %2857 = vmatpush1.bf16.msra.mxu0 %v14739_v39 }
 0x295   :  { %2817 = vmatprep.subr.bf16.mxu1 %v14740_v40  ;;  %2858 = vmatprep.subr.bf16.mxu0 %v14741_v41 }
 0x298   :  { %2818 = vmatpush1.bf16.msra.mxu1 %v14742_v42  ;;  %2859 = vmatpush1.bf16.msra.mxu0 %v14743_v45 }
 0x299   :  { %3048 = vmatprep.subr.bf16.mxu1 %v14744_v46  ;;  %3089 = vmatprep.subr.bf16.mxu0 %v14745_v47 }
 0x32e   :  { %v2161_v51 = vpop.f32.mrb[24].mxu1  ;;  %v2202_v52 = vpop.f32.mrb[16].mxu0 }
 0x32f   :  { %v2162_v0 = vadd.f32 %v2161_v51, %v1919_v19  ;;  %v2203_v2 = vadd.f32 %v2202_v52, %v1960_v30  ;;  %v2163_v56 = vpop.f32.mrb[25].mxu1  ;;  %v2204_v3 = vpop.f32.mrb[17].mxu0  ;;  %v8915_v19 = vld [vmem:[%s14441_s10 + $0x2] sm:$0x3] }
 0x330   :  { %v2164_v4 = vadd.f32 %v2163_v56, %v1921_v23  ;;  %v2205_v60 = vadd.f32 %v2204_v3, %v1962_v31  ;;  %v2165_v54 = vpop.f32.mrb[26].mxu1  ;;  %v2206_v61 = vpop.f32.mrb[18].mxu0 }
 0x331   :  { %v2231_v58 = vadd.f32 %v2214_v50, %v2162_v0  ;;  %v2166_v55 = vpop.f32.mrb[27].mxu1  ;;  %v2207_v62 = vpop.f32.mrb[19].mxu0  ;;  %v2233_v11 = vadd.f32 %v2222_v9, %v2203_v2  ;;  %v14751_v54 = vld [vmem:[#allocation37_spill] sm:$0xff]  ;;  %v14752_v61 = vld [vmem:[#allocation38_spill] sm:$0xff] }
 0x332   :  { %v2232_v5 = vadd.f32 %v2218_v17, %v2164_v4  ;;  %v2234_v8 = vadd.f32 %v2226_v57, %v2205_v60  ;;  %v14750_v60 = vld [vmem:[#allocation36_spill] sm:$0xff]  ;;  %v14755_v62 = vld [vmem:[#allocation41_spill] sm:$0xff] }
 0x333   :  { %v9015_v6 = vmul.f32 -1.442695, %v2231_v58  ;;  %v14753_v58 = vld [vmem:[#allocation39_spill] sm:$0xff]  ;;  %v14754_v55 = vld [vmem:[#allocation40_spill] sm:$0xff] }
 0x334   :  { %v9016_v7 = vmul.f32 -1.442695, %v2232_v5  ;;  %v9017_v10 = vmul.f32 -1.442695, %v2234_v8  ;;  %v14756_v5 = vld [vmem:[#allocation42_spill] sm:$0xff]  ;;  %v14758_v57 = vld [vmem:[#allocation44_spill] sm:$0xff] }
 0x335   :  { %10623 = vpow2.f32 %v9015_v6  ;;  %v14757_v6 = vld [vmem:[#allocation43_spill] sm:$0xff]  ;;  %v14759_v8 = vld [vmem:[#allocation45_spill] sm:$0xff] }
 0x336   :  { %10625 = vpow2.f32 %v9016_v7 }
 0x337   :  { %10627 = vpow2.f32 %v9017_v10  ;;  %v14760_v10 = vld [vmem:[#allocation46_spill] sm:$0xff] }
 0x338   :  { %10629 = vtanh.f32 %v2233_v11  ;;  %v14761_v11 = vld [vmem:[#allocation47_spill] sm:$0xff] }
 0x33f   :  { %v10624_v12 = vpop.eup %10623 }
 0x340   :  { %v10626_v13 = vpop.eup %10625  ;;  %v2238_v14 = vadd.f32 1.0, %v10624_v12 }
 0x341   :  { %v2244_v15 = vadd.f32 1.0, %v10626_v13  ;;  %v10628_v16 = vpop.eup %10627  ;;  %v2571_v13 = vrot.slane %v12070_v24, 6  ;;  %v14768_v24 = vld [vmem:[#allocation54_spill] sm:$0xff] }
 0x342   :  { %10631 = vrcp.f32 %v2238_v14  ;;  %v10630_v18 = vpop.eup %10629  ;;  %v2251_v25 = vadd.f32 1.0, %v10628_v16 }
 0x343   :  { %10633 = vrcp.f32 %v2244_v15 }
 0x344   :  { %10635 = vrcp.f32 %v2251_v25 }
 0x34c   :  { %v10632_v20 = vpop.eup %10631 }
 0x34d   :  { %v10634_v21 = vpop.eup %10633  ;;  %v2255_v23 = vmul.f32 %v10632_v20, %v10630_v18  ;;  %v14763_v20 = vld [vmem:[#allocation49_spill] sm:$0xff] }
 0x34e   :  { %v2254_v26 = vmul.f32 %v10634_v21, %v8915_v19  ;;  %v2487_v28 = vpop.f32.mrb[28].mxu1  ;;  %v2528_v29 = vpop.f32.mrb[20].mxu0  ;;  %v14762_v19 = vld [vmem:[#allocation48_spill] sm:$0xff]  ;;  %v14764_v21 = vld [vmem:[#allocation50_spill] sm:$0xff] }
 0x34f   :  { %v2539_v30 = vrot.slane %v2487_v28, 6  ;;  %v2489_v31 = vpop.f32.mrb[29].mxu1  ;;  %v2530_v32 = vpop.f32.mrb[21].mxu0  ;;  %v2541_v47 = vrot.slane %v2528_v29, 6  ;;  %v14767_v28 = vld [vmem:[#allocation53_spill] sm:$0xff]  ;;  %v14769_v29 = vld [vmem:[#allocation55_spill] sm:$0xff] }
 0x350   :  { %v12151_v33 = vadd.f32 %v2255_v23, %v2254_v26  ;;  %v2540_v34 = vrot.slane %v2489_v31, 6  ;;  %v2491_v35 = vpop.f32.mrb[30].mxu1  ;;  %v2532_v36 = vpop.f32.mrb[22].mxu0  ;;  %v2542_v45 = vrot.slane %v2530_v32, 6  ;;  %v14765_v23 = vld [vmem:[#allocation51_spill] sm:$0xff]  ;;  %v14766_v26 = vld [vmem:[#allocation52_spill] sm:$0xff] }
 0x351   :  { %v2547_v37 = vadd.f32 %v12055_v22, %v2539_v30  ;;  %v2492_v38 = vpop.f32.mrb[31].mxu1  ;;  %v2533_v39 = vpop.f32.mrb[23].mxu0  ;;  %v2549_v52 = vadd.f32 %v12064_v43, %v2541_v47  ;;  %v14770_v30 = vld [vmem:[#allocation56_spill] sm:$0xff]  ;;  %v14771_v31 = vld [vmem:[#allocation57_spill] sm:$0xff]  ;;  %v14772_v32 = vld [vmem:[#allocation58_spill] sm:$0xff] }
 0x352   :  { %v2548_v40 = vadd.f32 %v12057_v27, %v2540_v34  ;;  %10637 = vtanh.f32 %v12151_v33  ;;  %v2550_v46 = vadd.f32 %v12061_v59, %v2542_v45  ;;  %v10636_v48 = vpop.eup %10635  ;;  %v14773_v34 = vld [vmem:[#allocation59_spill] sm:$0xff]  ;;  %v14774_v35 = vld [vmem:[#allocation60_spill] sm:$0xff]  ;;  %v14775_v36 = vld [vmem:[#allocation61_spill] sm:$0xff] }
 0x353   :  { %v9050_v41 = vmul.f32 -1.442695, %v2547_v37  ;;  %v14776_v38 = vld [vmem:[#allocation62_spill] sm:$0xff]  ;;  %v14777_v39 = vld [vmem:[#allocation63_spill] sm:$0xff]  ;;  %v14779_v47 = vld [vmem:[#allocation65_spill] sm:$0xff] }
 0x354   :  { %v9051_v42 = vmul.f32 -1.442695, %v2548_v40  ;;  %v9052_v51 = vmul.f32 -1.442695, %v2550_v46  ;;  %v12198_v40 = vld [vmem:[%s14435_s4 + $0x4] ss:$16 sps:$4 sm:$0xff]  }
 0x355   :  { %10639 = vpow2.f32 %v9050_v41  ;;  %v12203_v41 = vld [vmem:[%s14435_s4 + $0xc] ss:$16 sps:$4 sm:$0xff]  }
 0x356   :  { %10641 = vpow2.f32 %v9051_v42  ;;  %v14778_v46 = vld [vmem:[#allocation64_spill] sm:$0xff] }
 0x357   :  { %10643 = vpow2.f32 %v9052_v51  ;;  %v12217_v51 = vld [vmem:[%s14435_s4 + $0x8] ss:$16 sps:$4 sm:$0xff]  }
 0x358   :  { %10645 = vtanh.f32 %v2549_v52 }
 0x35c   :  { %v10638_v50 = vpop.eup %10637 }
 0x35d   :  { %v2258_v17 = vmul.f32 %v10638_v50, %v10636_v48  ;;  %v12212_v50 = vld [vmem:[%s14435_s4] ss:$16 sps:$4 sm:$0xff]  }
 0x35f   :  { %v10640_v0 = vpop.eup %10639  ;;  %v2259_v2 = vpack.c.bf16 %v2258_v17, %v2258_v17  ;;  %v12224_v17 = vld [vmem:[%s14435_s4 + $0x24] ss:$16 sps:$4 sm:$0xff]  }
 0x360   :  { %v10642_v56 = vpop.eup %10641  ;;  %v2554_v3 = vadd.f32 1.0, %v10640_v0  ;;  %v12229_v0 = vld [vmem:[%s14435_s4 + $0x2c] ss:$16 sps:$4 sm:$0xff]  }
 0x361   :  { %v2560_v4 = vadd.f32 1.0, %v10642_v56  ;;  %2260 = vst [vmem:[%s14442_s11] sm:$0x1] %v2259_v2  ;;  %2836 = vmatmul.mubr.bf16.vlgmr.msra.gmra.mrb[32].mxu1 %v2259_v2  ;;  %2877 = vmatmul.mubr.bf16.vlgmr.msra.gmra.mrb[24].mxu0 %v2259_v2  ;;  %v10644_v7 = vpop.eup %10643  ;;  %v12238_v2 = vld [vmem:[%s14435_s4 + $0x20] ss:$16 sps:$4 sm:$0xff]   ;;  %v12243_v56 = vld [vmem:[%s14435_s4 + $0x28] ss:$16 sps:$4 sm:$0xff]  }
 0x362   :  { %10647 = vrcp.f32 %v2554_v3  ;;  %3049 = vmatpush1.bf16.msra.mxu1 %v14750_v60  ;;  %3090 = vmatpush1.bf16.msra.mxu0 %v14751_v54  ;;  %v10646_v9 = vpop.eup %10645  ;;  %v2567_v16 = vadd.f32 1.0, %v10644_v7  ;;  %v12250_v3 = vld [vmem:[%s14435_s4 + $0x44] ss:$16 sps:$4 sm:$0xff]   ;;  %v12264_v60 = vld [vmem:[%s14435_s4 + $0x40] ss:$16 sps:$4 sm:$0xff]  }
 0x363   :  { %10649 = vrcp.f32 %v2560_v4  ;;  %3050 = vmatprep.subr.bf16.mxu1 %v14752_v61  ;;  %3091 = vmatprep.subr.bf16.mxu0 %v14753_v58  ;;  %v12255_v4 = vld [vmem:[%s14435_s4 + $0x4c] ss:$16 sps:$4 sm:$0xff]   ;;  %v12269_v54 = vld [vmem:[%s14435_s4 + $0x48] ss:$16 sps:$4 sm:$0xff]   ;;  %v12276_v61 = vld [vmem:[%s14435_s4 + $0x64] ss:$16 sps:$4 sm:$0xff]  }
 0x364   :  { %3080 = vmatprep.mubr.bf16.mxu1 %v14687_v44  ;;  %3121 = vmatprep.mubr.bf16.mxu0 %v14687_v44  ;;  %10651 = vrcp.f32 %v2567_v16  ;;  %v12281_v58 = vld [vmem:[%s14435_s4 + $0x6c] ss:$16 sps:$4 sm:$0xff]   ;;  %v12312_v7 = vld [vmem:[%s14435_s4 + $0x80] ss:$16 sps:$4 sm:$0xff]   ;;  %v12372_v16 = vld [vmem:[%s14435_s4 + $0xe4] ss:$16 sps:$4 sm:$0xff]  }
 0x366   :  { %3051 = vmatpush1.bf16.msra.mxu1 %v14754_v55  ;;  %3092 = vmatpush1.bf16.msra.mxu0 %v14755_v62  ;;  %v12288_v55 = vld [vmem:[%s14435_s4 + $0x60] ss:$16 sps:$4 sm:$0xff]   ;;  %v12293_v62 = vld [vmem:[%s14435_s4 + $0x68] ss:$16 sps:$4 sm:$0xff]  }
 0x367   :  { %3052 = vmatprep.subr.bf16.mxu1 %v14756_v5  ;;  %3093 = vmatprep.subr.bf16.mxu0 %v14757_v6  ;;  %v12300_v5 = vld [vmem:[%s14435_s4 + $0x84] ss:$16 sps:$4 sm:$0xff]   ;;  %v12305_v6 = vld [vmem:[%s14435_s4 + $0x8c] ss:$16 sps:$4 sm:$0xff]  }
 0x36a   :  { %3053 = vmatpush1.bf16.msra.mxu1 %v14758_v57  ;;  %3094 = vmatpush1.bf16.msra.mxu0 %v14759_v8  ;;  %v12317_v57 = vld [vmem:[%s14435_s4 + $0x88] ss:$16 sps:$4 sm:$0xff]   ;;  %v12324_v8 = vld [vmem:[%s14435_s4 + $0xa4] ss:$16 sps:$4 sm:$0xff]  }
 0x36b   :  { %3054 = vmatprep.subr.bf16.mxu1 %v14760_v10  ;;  %3095 = vmatprep.subr.bf16.mxu0 %v14761_v11  ;;  %v12336_v10 = vld [vmem:[%s14435_s4 + $0xa0] ss:$16 sps:$4 sm:$0xff]   ;;  %v12341_v11 = vld [vmem:[%s14435_s4 + $0xa8] ss:$16 sps:$4 sm:$0xff]  }
 0x36c   :  { %v10648_v12 = vpop.eup %10647 }
 0x36d   :  { %v10650_v14 = vpop.eup %10649  ;;  %v2574_v15 = vmul.f32 %v10648_v12, %v10646_v9  ;;  %v12329_v9 = vld [vmem:[%s14435_s4 + $0xac] ss:$16 sps:$4 sm:$0xff]   ;;  %v12348_v12 = vld [vmem:[%s14435_s4 + $0xc4] ss:$16 sps:$4 sm:$0xff]  }
 0x36e   :  { %v2573_v18 = vmul.f32 %v10650_v14, %v2571_v13  ;;  %3055 = vmatpush1.bf16.msra.mxu1 %v14762_v19  ;;  %3096 = vmatpush1.bf16.msra.mxu0 %v14763_v20  ;;  %v10652_v37 = vpop.eup %10651  ;;  %v12353_v13 = vld [vmem:[%s14435_s4 + $0xcc] ss:$16 sps:$4 sm:$0xff]   ;;  %v12360_v14 = vld [vmem:[%s14435_s4 + $0xc0] ss:$16 sps:$4 sm:$0xff]   ;;  %v12389_v20 = vld [vmem:[%s14435_s4 + $0xe8] ss:$16 sps:$4 sm:$0xff]  }
 0x36f   :  { %3056 = vmatprep.subr.bf16.mxu1 %v14764_v21  ;;  %3097 = vmatprep.subr.bf16.mxu0 %v14765_v23  ;;  %v12384_v19 = vld [vmem:[%s14435_s4 + $0xe0] ss:$16 sps:$4 sm:$0xff]   ;;  %14782 = vst [vmem:[#allocation13_spill] sm:$0xff] %v12389_v20  ;;  %v12402_v21 = vld [vmem:[%s14438_s7 + $0x4] ss:$16 sps:$4 sm:$0xff]  }
 0x370   :  { %v12180_v25 = vadd.f32 %v2574_v15, %v2573_v18  ;;  %v12365_v15 = vld [vmem:[%s14435_s4 + $0xc8] ss:$16 sps:$4 sm:$0xff]   ;;  %v12377_v18 = vld [vmem:[%s14435_s4 + $0xec] ss:$16 sps:$4 sm:$0xff]   ;;  %14781 = vst [vmem:[#allocation12_spill] sm:$0xff] %v12384_v19  ;;  %14783 = vst [vmem:[#allocation14_spill] sm:$0xff] %v12402_v21 }
 0x371   :  { %14780 = vst [vmem:[#allocation11_spill] sm:$0xff] %v12377_v18  ;;  %v12407_v23 = vld [vmem:[%s14438_s7 + $0xc] ss:$16 sps:$4 sm:$0xff]  }
 0x372   :  { %3057 = vmatpush1.bf16.msra.mxu1 %v14766_v26  ;;  %3098 = vmatpush1.bf16.msra.mxu0 %v14767_v28  ;;  %10653 = vtanh.f32 %v12180_v25  ;;  %14784 = vst [vmem:[#allocation15_spill] sm:$0xff] %v12407_v23  ;;  %v12412_v26 = vld [vmem:[%s14438_s7] ss:$16 sps:$4 sm:$0xff]   ;;  %v12417_v28 = vld [vmem:[%s14438_s7 + $0x8] ss:$16 sps:$4 sm:$0xff]  }
 0x373   :  { %3058 = vmatprep.subr.bf16.mxu1 %v14768_v24  ;;  %3099 = vmatprep.subr.bf16.mxu0 %v14769_v29  ;;  %14785 = vst [vmem:[#allocation16_spill] sm:$0xff] %v12412_v26  ;;  %14786 = vst [vmem:[#allocation17_spill] sm:$0xff] %v12417_v28  ;;  %v12426_v24 = vld [vmem:[%s14438_s7 + $0x24] ss:$16 sps:$4 sm:$0xff]   ;;  %v12431_v29 = vld [vmem:[%s14438_s7 + $0x2c] ss:$16 sps:$4 sm:$0xff]  }
 0x374   :  { %14787 = vst [vmem:[#allocation18_spill] sm:$0xff] %v12426_v24  ;;  %14788 = vst [vmem:[#allocation20_spill] sm:$0xff] %v12431_v29 }
 0x376   :  { %3059 = vmatpush1.bf16.msra.mxu1 %v14770_v30  ;;  %3100 = vmatpush1.bf16.msra.mxu0 %v14771_v31  ;;  %v12436_v30 = vld [vmem:[%s14438_s7 + $0x20] ss:$16 sps:$4 sm:$0xff]   ;;  %v12441_v31 = vld [vmem:[%s14438_s7 + $0x28] ss:$16 sps:$4 sm:$0xff]  }
 0x377   :  { %3060 = vmatprep.subr.bf16.mxu1 %v14772_v32  ;;  %3101 = vmatprep.subr.bf16.mxu0 %v14773_v34  ;;  %14789 = vst [vmem:[#allocation19_spill] sm:$0xff] %v12436_v30  ;;  %14790 = vst [vmem:[#allocation21_spill] sm:$0xff] %v12441_v31  ;;  %v12450_v32 = vld [vmem:[%s14438_s7 + $0x44] ss:$16 sps:$4 sm:$0xff]   ;;  %v12455_v34 = vld [vmem:[%s14438_s7 + $0x4c] ss:$16 sps:$4 sm:$0xff]  }
 0x378   :  { %14791 = vst [vmem:[#allocation22_spill] sm:$0xff] %v12450_v32  ;;  %14792 = vst [vmem:[#allocation24_spill] sm:$0xff] %v12455_v34 }
 0x37a   :  { %3061 = vmatpush1.bf16.msra.mxu1 %v14774_v35  ;;  %3102 = vmatpush1.bf16.msra.mxu0 %v14775_v36  ;;  %v12460_v35 = vld [vmem:[%s14438_s7 + $0x40] ss:$16 sps:$4 sm:$0xff]   ;;  %v12465_v36 = vld [vmem:[%s14438_s7 + $0x48] ss:$16 sps:$4 sm:$0xff]  }
 0x37b   :  { %3062 = vmatprep.subr.bf16.mxu1 %v14776_v38  ;;  %3103 = vmatprep.subr.bf16.mxu0 %v14777_v39  ;;  %14793 = vst [vmem:[#allocation23_spill] sm:$0xff] %v12460_v35  ;;  %14794 = vst [vmem:[#allocation25_spill] sm:$0xff] %v12465_v36  ;;  %v12479_v38 = vld [vmem:[%s14438_s7 + $0x6c] ss:$16 sps:$4 sm:$0xff]   ;;  %v12484_v39 = vld [vmem:[%s14438_s7 + $0x60] ss:$16 sps:$4 sm:$0xff]  }
 0x37c   :  { %v10654_v42 = vpop.eup %10653  ;;  %14796 = vst [vmem:[#allocation28_spill] sm:$0xff] %v12479_v38  ;;  %14797 = vst [vmem:[#allocation27_spill] sm:$0xff] %v12484_v39 }
 0x37d   :  { %v2577_v45 = vmul.f32 %v10654_v42, %v10652_v37  ;;  %v12474_v37 = vld [vmem:[%s14438_s7 + $0x64] ss:$16 sps:$4 sm:$0xff]   ;;  %v12489_v42 = vld [vmem:[%s14438_s7 + $0x68] ss:$16 sps:$4 sm:$0xff]  }
 0x37e   :  { %3063 = vmatpush1.bf16.msra.mxu1 %v14778_v46  ;;  %3104 = vmatpush1.bf16.msra.mxu0 %v14779_v47  ;;  %14795 = vst [vmem:[#allocation26_spill] sm:$0xff] %v12474_v37  ;;  %14798 = vst [vmem:[#allocation29_spill] sm:$0xff] %v12489_v42  ;;  %v12503_v46 = vld [vmem:[%s14438_s7 + $0x8c] ss:$16 sps:$4 sm:$0xff]   ;;  %v12508_v47 = vld [vmem:[%s14438_s7 + $0x80] ss:$16 sps:$4 sm:$0xff]  }
 0x37f   :  { %3379 = vmatprep.subr.bf16.mxu1 %v12198_v40  ;;  %3420 = vmatprep.subr.bf16.mxu0 %v12203_v41  ;;  %v2578_v48 = vpack.c.bf16 %v2577_v45, %v2577_v45  ;;  %v12498_v45 = vld [vmem:[%s14438_s7 + $0x84] ss:$16 sps:$4 sm:$0xff]   ;;  %14800 = vst [vmem:[#allocation32_spill] sm:$0xff] %v12503_v46  ;;  %14801 = vst [vmem:[#allocation31_spill] sm:$0xff] %v12508_v47 }
 0x380   :  { %14799 = vst [vmem:[#allocation30_spill] sm:$0xff] %v12498_v45 }
 0x381   :  { %v12219_v52 = vrot.slane %v2578_v48, 1  ;;  %v12513_v48 = vld [vmem:[%s14438_s7 + $0x88] ss:$16 sps:$4 sm:$0xff]  }
 0x382   :  { %14802 = vst [vmem:[#allocation33_spill] sm:$0xff] %v12513_v48 }
 0x383   :  { %3081 = vmatmul.mubr.bf16.vlgmr.msra.gmra.mrb[36].mxu1 %v12219_v52  ;;  %3122 = vmatmul.mubr.bf16.vlgmr.msra.gmra.mrb[28].mxu0 %v12219_v52 }
 0x384   :  { %3380 = vmatpush1.bf16.msra.mxu1 %v12212_v50  ;;  %3421 = vmatpush1.bf16.msra.mxu0 %v12217_v51 }
 0x385   :  { %3381 = vmatprep.subr.bf16.mxu1 %v12224_v17  ;;  %3422 = vmatprep.subr.bf16.mxu0 %v12229_v0 }
 0x386   :  { %3411 = vmatprep.mubr.bf16.mxu1 %v14687_v44  ;;  %3452 = vmatprep.mubr.bf16.mxu0 %v14687_v44 }
 0x388   :  { %3382 = vmatpush1.bf16.msra.mxu1 %v12238_v2  ;;  %3423 = vmatpush1.bf16.msra.mxu0 %v12243_v56 }
 0x389   :  { %3383 = vmatprep.subr.bf16.mxu1 %v12250_v3  ;;  %3424 = vmatprep.subr.bf16.mxu0 %v12255_v4 }
 0x38c   :  { %3384 = vmatpush1.bf16.msra.mxu1 %v12264_v60  ;;  %3425 = vmatpush1.bf16.msra.mxu0 %v12269_v54 }
 0x38d   :  { %3385 = vmatprep.subr.bf16.mxu1 %v12276_v61  ;;  %3426 = vmatprep.subr.bf16.mxu0 %v12281_v58 }
 0x390   :  { %3386 = vmatpush1.bf16.msra.mxu1 %v12288_v55  ;;  %3427 = vmatpush1.bf16.msra.mxu0 %v12293_v62 }
 0x391   :  { %3387 = vmatprep.subr.bf16.mxu1 %v12300_v5  ;;  %3428 = vmatprep.subr.bf16.mxu0 %v12305_v6 }
 0x394   :  { %3388 = vmatpush1.bf16.msra.mxu1 %v12312_v7  ;;  %3429 = vmatpush1.bf16.msra.mxu0 %v12317_v57 }
 0x395   :  { %3389 = vmatprep.subr.bf16.mxu1 %v12324_v8  ;;  %3430 = vmatprep.subr.bf16.mxu0 %v12329_v9 }
 0x398   :  { %3390 = vmatpush1.bf16.msra.mxu1 %v12336_v10  ;;  %3431 = vmatpush1.bf16.msra.mxu0 %v12341_v11 }
 0x399   :  { %3391 = vmatprep.subr.bf16.mxu1 %v12348_v12  ;;  %3432 = vmatprep.subr.bf16.mxu0 %v12353_v13 }
 0x39c   :  { %3392 = vmatpush1.bf16.msra.mxu1 %v12360_v14  ;;  %3433 = vmatpush1.bf16.msra.mxu0 %v12365_v15 }
 0x39d   :  { %3393 = vmatprep.subr.bf16.mxu1 %v12372_v16  ;;  %3434 = vmatprep.subr.bf16.mxu0 %v12377_v18 }
 0x3a0   :  { %3394 = vmatpush1.bf16.msra.mxu1 %v12384_v19  ;;  %3435 = vmatpush1.bf16.msra.mxu0 %v12389_v20 }
 0x3a1   :  { %3729 = vmatprep.subr.bf16.mxu1 %v12402_v21  ;;  %3770 = vmatprep.subr.bf16.mxu0 %v12407_v23 }
 0x3a3   :  { %3412 = vmatmul.mubr.bf16.vlgmr.msra.gmra.mrb[40].mxu1 %v12219_v52  ;;  %3453 = vmatmul.mubr.bf16.vlgmr.msra.gmra.mrb[32].mxu0 %v12219_v52  ;;  %v12522_v52 = vld [vmem:[%s14438_s7 + $0xa4] ss:$16 sps:$4 sm:$0xff]  }
 0x3a4   :  { %3761 = vmatprep.mubr.bf16.mxu1 %v14687_v44  ;;  %3802 = vmatprep.mubr.bf16.mxu0 %v14687_v44  ;;  %14803 = vst [vmem:[#allocation34_spill] sm:$0xff] %v12522_v52 }
 0x3a5   :  { %3730 = vmatpush1.bf16.msra.mxu1 %v12412_v26  ;;  %3771 = vmatpush1.bf16.msra.mxu0 %v12417_v28 }
 0x3a6   :  { %3731 = vmatprep.subr.bf16.mxu1 %v12426_v24  ;;  %3772 = vmatprep.subr.bf16.mxu0 %v12431_v29 }
 0x3a9   :  { %3732 = vmatpush1.bf16.msra.mxu1 %v12436_v30  ;;  %3773 = vmatpush1.bf16.msra.mxu0 %v12441_v31 }
 0x3aa   :  { %3733 = vmatprep.subr.bf16.mxu1 %v12450_v32  ;;  %3774 = vmatprep.subr.bf16.mxu0 %v12455_v34 }
 0x3ad   :  { %3734 = vmatpush1.bf16.msra.mxu1 %v12460_v35  ;;  %3775 = vmatpush1.bf16.msra.mxu0 %v12465_v36  ;;  %v3130_v35 = vld [vmem:[%s14439_s8] sm:$0xf] }
 0x3ae   :  { %3735 = vmatprep.subr.bf16.mxu1 %v12474_v37  ;;  %3776 = vmatprep.subr.bf16.mxu0 %v12479_v38  ;;  %v3135_v34 = vrot.slane %v3130_v35, %v14746_v49  ;;  %v3147_v49 = vrot.slane %v3130_v35, %v14748_v1 }
 0x3b1   :  { %3736 = vmatpush1.bf16.msra.mxu1 %v12484_v39  ;;  %3777 = vmatpush1.bf16.msra.mxu0 %v12489_v42  ;;  %v12527_v42 = vld [vmem:[%s14438_s7 + $0xac] ss:$16 sps:$4 sm:$0xff]  }
 0x3b2   :  { %3737 = vmatprep.subr.bf16.mxu1 %v12498_v45  ;;  %3778 = vmatprep.subr.bf16.mxu0 %v12503_v46  ;;  %14804 = vst [vmem:[#allocation35_spill] sm:$0xff] %v12527_v42  ;;  %v12532_v45 = vld [vmem:[%s14438_s7 + $0xa0] ss:$16 sps:$4 sm:$0xff]   ;;  %v12551_v46 = vld [vmem:[%s14438_s7 + $0xcc] ss:$16 sps:$4 sm:$0xff]  }
 0x3b3   :  { %14805 = vst [vmem:[#allocation9_spill] sm:$0xff] %v12532_v45  ;;  %14808 = vst [vmem:[#allocation36_spill] sm:$0xff] %v12551_v46 }
 0x3b5   :  { %3738 = vmatpush1.bf16.msra.mxu1 %v12508_v47  ;;  %3779 = vmatpush1.bf16.msra.mxu0 %v12513_v48  ;;  %v12537_v47 = vld [vmem:[%s14438_s7 + $0xa8] ss:$16 sps:$4 sm:$0xff]   ;;  %v12546_v48 = vld [vmem:[%s14438_s7 + $0xc4] ss:$16 sps:$4 sm:$0xff]  }
 0x3b6   :  { %14806 = vst [vmem:[#allocation66_spill] sm:$0xff] %v12537_v47  ;;  %3739 = vmatprep.subr.bf16.mxu1 %v12522_v52  ;;  %3780 = vmatprep.subr.bf16.mxu0 %v12527_v42  ;;  %14807 = vst [vmem:[#allocation10_spill] sm:$0xff] %v12546_v48  ;;  %v12556_v52 = vld [vmem:[%s14438_s7 + $0xc0] ss:$16 sps:$4 sm:$0xff]   ;;  %v12575_v42 = vld [vmem:[%s14438_s7 + $0xec] ss:$16 sps:$4 sm:$0xff]  }
 0x3b7   :  { %14809 = vst [vmem:[#allocation37_spill] sm:$0xff] %v12556_v52  ;;  %14812 = vst [vmem:[#allocation40_spill] sm:$0xff] %v12575_v42 }
 0x3b9   :  { %3740 = vmatpush1.bf16.msra.mxu1 %v12532_v45  ;;  %3781 = vmatpush1.bf16.msra.mxu0 %v12537_v47  ;;  %v12561_v45 = vld [vmem:[%s14438_s7 + $0xc8] ss:$16 sps:$4 sm:$0xff]   ;;  %v12570_v47 = vld [vmem:[%s14438_s7 + $0xe4] ss:$16 sps:$4 sm:$0xff]  }
 0x3ba   :  { %14810 = vst [vmem:[#allocation38_spill] sm:$0xff] %v12561_v45  ;;  %3741 = vmatprep.subr.bf16.mxu1 %v12546_v48  ;;  %3782 = vmatprep.subr.bf16.mxu0 %v12551_v46  ;;  %14811 = vst [vmem:[#allocation39_spill] sm:$0xff] %v12570_v47  ;;  %v12580_v48 = vld [vmem:[%s14438_s7 + $0xe0] ss:$16 sps:$4 sm:$0xff]   ;;  %v12599_v46 = vld [vmem:[%s14437_s6 + $0xc] ss:$16 sps:$4 sm:$0xff]  }
 0x3bb   :  { %14813 = vst [vmem:[#allocation41_spill] sm:$0xff] %v12580_v48  ;;  %14816 = vst [vmem:[#allocation44_spill] sm:$0xff] %v12599_v46 }
 0x3bd   :  { %3742 = vmatpush1.bf16.msra.mxu1 %v12556_v52  ;;  %3783 = vmatpush1.bf16.msra.mxu0 %v12561_v45  ;;  %v12585_v52 = vld [vmem:[%s14438_s7 + $0xe8] ss:$16 sps:$4 sm:$0xff]   ;;  %v12594_v45 = vld [vmem:[%s14437_s6 + $0x4] ss:$16 sps:$4 sm:$0xff]  }
 0x3be   :  { %14814 = vst [vmem:[#allocation42_spill] sm:$0xff] %v12585_v52  ;;  %3743 = vmatprep.subr.bf16.mxu1 %v12570_v47  ;;  %3784 = vmatprep.subr.bf16.mxu0 %v12575_v42  ;;  %14815 = vst [vmem:[#allocation43_spill] sm:$0xff] %v12594_v45 }
 0x3c1   :  { %3744 = vmatpush1.bf16.msra.mxu1 %v12580_v48  ;;  %3785 = vmatpush1.bf16.msra.mxu0 %v12585_v52 }
 0x3c2   :  { %3974 = vmatprep.subr.bf16.mxu1 %v12594_v45  ;;  %4015 = vmatprep.subr.bf16.mxu0 %v12599_v46  ;;  %v3139_v45 = vrot.slane %v3130_v35, %v14747_v53 }
 0x434   :  { %v2837_v47 = vpop.f32.mrb[32].mxu1  ;;  %v2878_v42 = vpop.f32.mrb[24].mxu0 }
 0x435   :  { %v2839_v39 = vpop.f32.mrb[33].mxu1  ;;  %v2880_v48 = vpop.f32.mrb[25].mxu0 }
 0x436   :  { %v2841_v38 = vpop.f32.mrb[34].mxu1  ;;  %v2882_v52 = vpop.f32.mrb[26].mxu0 }
 0x437   :  { %v2842_v37 = vpop.f32.mrb[35].mxu1  ;;  %v2883_v36 = vpop.f32.mrb[27].mxu0 }
 0x456   :  { %v3082_v32 = vpop.f32.mrb[36].mxu1  ;;  %v3123_v31 = vpop.f32.mrb[28].mxu0 }
 0x457   :  { %v3083_v30 = vadd.f32 %v3082_v32, %v2837_v47  ;;  %v3124_v46 = vadd.f32 %v3123_v31, %v2878_v42  ;;  %v3084_v29 = vpop.f32.mrb[37].mxu1  ;;  %v3125_v24 = vpop.f32.mrb[29].mxu0  ;;  %v3143_v32 = vrot.slane %v3130_v35, %v14749_v63 }
 0x458   :  { %v3085_v28 = vadd.f32 %v3084_v29, %v2839_v39  ;;  %v3126_v26 = vadd.f32 %v3125_v24, %v2880_v48  ;;  %v3086_v38 = vpop.f32.mrb[38].mxu1  ;;  %v3127_v52 = vpop.f32.mrb[30].mxu0 }
 0x459   :  { %v3152_v37 = vadd.f32 %v3135_v34, %v3083_v30  ;;  %v3087_v36 = vpop.f32.mrb[39].mxu1  ;;  %v3128_v23 = vpop.f32.mrb[31].mxu0  ;;  %v3154_v42 = vadd.f32 %v3143_v32, %v3124_v46 }
 0x45a   :  { %v3153_v21 = vadd.f32 %v3139_v45, %v3085_v28  ;;  %v3155_v18 = vadd.f32 %v3147_v49, %v3126_v26 }
 0x45b   :  { %v9117_v20 = vmul.f32 -1.442695, %v3152_v37 }
 0x45c   :  { %v9118_v19 = vmul.f32 -1.442695, %v3153_v21  ;;  %v9119_v31 = vmul.f32 -1.442695, %v3155_v18 }
 0x45d   :  { %10655 = vpow2.f32 %v9117_v20 }
 0x45e   :  { %10657 = vpow2.f32 %v9118_v19 }
 0x45f   :  { %10659 = vpow2.f32 %v9119_v31 }
 0x460   :  { %10661 = vtanh.f32 %v3154_v42 }
 0x467   :  { %v10656_v47 = vpop.eup %10655 }
 0x468   :  { %v10658_v29 = vpop.eup %10657  ;;  %v3159_v24 = vadd.f32 1.0, %v10656_v47 }
 0x469   :  { %v3165_v30 = vadd.f32 1.0, %v10658_v29  ;;  %v10660_v23 = vpop.eup %10659 }
 0x46a   :  { %10663 = vrcp.f32 %v3159_v24  ;;  %v10662_v28 = vpop.eup %10661  ;;  %v3172_v20 = vadd.f32 1.0, %v10660_v23 }
 0x46b   :  { %10665 = vrcp.f32 %v3165_v30 }
 0x46c   :  { %10667 = vrcp.f32 %v3172_v20  ;;  %v12626_v20 = vld [vmem:[%s14437_s6 + $0x8] ss:$16 sps:$4 sm:$0xff]  }
 0x474   :  { %v10664_v21 = vpop.eup %10663 }
 0x475   :  { %v10666_v34 = vpop.eup %10665  ;;  %v3176_v39 = vmul.f32 %v10664_v21, %v10662_v28 }
 0x476   :  { %v3175_v49 = vmul.f32 %v10666_v34, %v12151_v33  ;;  %v3413_v19 = vpop.f32.mrb[40].mxu1  ;;  %v3454_v26 = vpop.f32.mrb[32].mxu0 }
 0x477   :  { %v3465_v18 = vrot.slane %v3413_v19, 4  ;;  %v3415_v35 = vpop.f32.mrb[41].mxu1  ;;  %v3456_v45 = vpop.f32.mrb[33].mxu0  ;;  %v3467_v24 = vrot.slane %v3454_v26, 4  ;;  %v12631_v26 = vld [vmem:[%s14437_s6 + $0x24] ss:$16 sps:$4 sm:$0xff]  }
 0x478   :  { %v12611_v46 = vadd.f32 %v3176_v39, %v3175_v49  ;;  %v3466_v48 = vrot.slane %v3415_v35, 4  ;;  %v3417_v38 = vpop.f32.mrb[42].mxu1  ;;  %v3458_v52 = vpop.f32.mrb[34].mxu0  ;;  %v3468_v47 = vrot.slane %v3456_v45, 4  ;;  %v12621_v39 = vld [vmem:[%s14437_s6] ss:$16 sps:$4 sm:$0xff]  }
 0x479   :  { %v3473_v37 = vadd.f32 %v12055_v22, %v3465_v18  ;;  %v3418_v36 = vpop.f32.mrb[43].mxu1  ;;  %v3459_v32 = vpop.f32.mrb[35].mxu0  ;;  %v3475_v21 = vadd.f32 %v12064_v43, %v3467_v24  ;;  %v12636_v18 = vld [vmem:[%s14437_s6 + $0x2c] ss:$16 sps:$4 sm:$0xff]   ;;  %v12643_v52 = vld [vmem:[%s14437_s6 + $0x20] ss:$16 sps:$4 sm:$0xff]  }
 0x47a   :  { %v3474_v31 = vadd.f32 %v12057_v27, %v3466_v48  ;;  %10669 = vtanh.f32 %v12611_v46  ;;  %v3476_v29 = vadd.f32 %v12061_v59, %v3468_v47  ;;  %v10668_v30 = vpop.eup %10667  ;;  %v12658_v36 = vld [vmem:[%s14437_s6 + $0x44] ss:$16 sps:$4 sm:$0xff]   ;;  %v12663_v32 = vld [vmem:[%s14437_s6 + $0x4c] ss:$16 sps:$4 sm:$0xff]   ;;  %v12696_v24 = vld [vmem:[%s14437_s6 + $0x60] ss:$16 sps:$4 sm:$0xff]  }
 0x47b   :  { %v9153_v33 = vmul.f32 -1.442695, %v3473_v37  ;;  %v12648_v37 = vld [vmem:[%s14437_s6 + $0x28] ss:$16 sps:$4 sm:$0xff]   ;;  %v12689_v47 = vld [vmem:[%s14437_s6 + $0x6c] ss:$16 sps:$4 sm:$0xff]  }
 0x47c   :  { %v9154_v42 = vmul.f32 -1.442695, %v3474_v31  ;;  %v9155_v28 = vmul.f32 -1.442695, %v3476_v29  ;;  %v12672_v31 = vld [vmem:[%s14437_s6 + $0x40] ss:$16 sps:$4 sm:$0xff]  }
 0x47d   :  { %10671 = vpow2.f32 %v9153_v33  ;;  %v12677_v33 = vld [vmem:[%s14437_s6 + $0x48] ss:$16 sps:$4 sm:$0xff]   ;;  %14817 = vst [vmem:[#allocation45_spill] sm:$0xff] %v12689_v47 }
 0x47e   :  { %10673 = vpow2.f32 %v9154_v42  ;;  %v12684_v42 = vld [vmem:[%s14437_s6 + $0x64] ss:$16 sps:$4 sm:$0xff]  }
 0x47f   :  { %10675 = vpow2.f32 %v9155_v28  ;;  %v12708_v28 = vld [vmem:[%s14437_s6 + $0x84] ss:$16 sps:$4 sm:$0xff]  }
 0x480   :  { %10677 = vtanh.f32 %v3475_v21  ;;  %v12713_v21 = vld [vmem:[%s14437_s6 + $0x8c] ss:$16 sps:$4 sm:$0xff]  }
 0x484   :  { %v10670_v23 = vpop.eup %10669 }
 0x485   :  { %v3179_v34 = vmul.f32 %v10670_v23, %v10668_v30  ;;  %v12701_v30 = vld [vmem:[%s14437_s6 + $0x68] ss:$16 sps:$4 sm:$0xff]  }
 0x487   :  { %v10672_v49 = vpop.eup %10671  ;;  %v3180_v19 = vpack.c.bf16 %v3179_v34, %v3179_v34 }
 0x488   :  { %v10674_v35 = vpop.eup %10673  ;;  %v3480_v45 = vadd.f32 1.0, %v10672_v49  ;;  %v3497_v49 = vrot.slane %v12180_v25, 6  ;;  %v12733_v25 = vld [vmem:[%s14437_s6 + $0xa4] ss:$16 sps:$4 sm:$0xff]  }
 0x489   :  { %v3486_v48 = vadd.f32 1.0, %v10674_v35  ;;  %v3184_v38 = vrot.slane %v3180_v19, 7  ;;  %3762 = vmatmul.mubr.bf16.vlgmr.msra.gmra.mrb[44].mxu1 %v3180_v19  ;;  %3803 = vmatmul.mubr.bf16.vlgmr.msra.gmra.mrb[36].mxu0 %v3180_v19  ;;  %v10676_v29 = vpop.eup %10675  ;;  %14819 = vst [vmem:[#allocation47_spill] sm:$0xff] %v12733_v25 }
 0x48a   :  { %10679 = vrcp.f32 %v3480_v45  ;;  %3975 = vmatpush1.bf16.msra.mxu1 %v12621_v39  ;;  %4016 = vmatpush1.bf16.msra.mxu0 %v12626_v20  ;;  %v10678_v23 = vpop.eup %10677  ;;  %v3493_v45 = vadd.f32 1.0, %v10676_v29  ;;  %v12738_v29 = vld [vmem:[%s14437_s6 + $0xac] ss:$16 sps:$4 sm:$0xff]  }
 0x48b   :  { %10681 = vrcp.f32 %v3486_v48  ;;  %3186 = vst [vmem:[%s14442_s11] sm:$0x2] %v3184_v38  ;;  %3976 = vmatprep.subr.bf16.mxu1 %v12631_v26  ;;  %4017 = vmatprep.subr.bf16.mxu0 %v12636_v18  ;;  %v12721_v38 = vld [vmem:[%s14437_s6 + $0x80] ss:$16 sps:$4 sm:$0xff]   ;;  %14820 = vst [vmem:[#allocation48_spill] sm:$0xff] %v12738_v29 }
 0x48c   :  { %4006 = vmatprep.mubr.bf16.mxu1 %v14687_v44  ;;  %4047 = vmatprep.mubr.bf16.mxu0 %v14687_v44  ;;  %10683 = vrcp.f32 %v3493_v45  ;;  %v12772_v45 = vld [vmem:[%s14437_s6 + $0xc0] ss:$16 sps:$4 sm:$0xff]  }
 0x48d   :  { %14825 = vst [vmem:[#allocation53_spill] sm:$0xff] %v12772_v45 }
 0x48e   :  { %3977 = vmatpush1.bf16.msra.mxu1 %v12643_v52  ;;  %4018 = vmatpush1.bf16.msra.mxu0 %v12648_v37 }
 0x48f   :  { %3978 = vmatprep.subr.bf16.mxu1 %v12658_v36  ;;  %4019 = vmatprep.subr.bf16.mxu0 %v12663_v32 }
 0x492   :  { %3979 = vmatpush1.bf16.msra.mxu1 %v12672_v31  ;;  %4020 = vmatpush1.bf16.msra.mxu0 %v12677_v33 }
 0x493   :  { %3980 = vmatprep.subr.bf16.mxu1 %v12684_v42  ;;  %4021 = vmatprep.subr.bf16.mxu0 %v12689_v47  ;;  %v12726_v47 = vld [vmem:[%s14437_s6 + $0x88] ss:$16 sps:$4 sm:$0xff]  }
 0x494   :  { %v10680_v34 = vpop.eup %10679  ;;  %14818 = vst [vmem:[#allocation46_spill] sm:$0xff] %v12726_v47 }
 0x495   :  { %v10682_v19 = vpop.eup %10681  ;;  %v3500_v35 = vmul.f32 %v10680_v34, %v10678_v23  ;;  %v12747_v34 = vld [vmem:[%s14437_s6 + $0xa0] ss:$16 sps:$4 sm:$0xff]  }
 0x496   :  { %v3499_v48 = vmul.f32 %v10682_v19, %v3497_v49  ;;  %3981 = vmatpush1.bf16.msra.mxu1 %v12696_v24  ;;  %4022 = vmatpush1.bf16.msra.mxu0 %v12701_v30  ;;  %14821 = vst [vmem:[#allocation49_spill] sm:$0xff] %v12747_v34  ;;  %v12752_v49 = vld [vmem:[%s14437_s6 + $0xa8] ss:$16 sps:$4 sm:$0xff]   ;;  %v12760_v19 = vld [vmem:[%s14437_s6 + $0xc4] ss:$16 sps:$4 sm:$0xff]  }
 0x497   :  { %3982 = vmatprep.subr.bf16.mxu1 %v12708_v28  ;;  %4023 = vmatprep.subr.bf16.mxu0 %v12713_v21  ;;  %14822 = vst [vmem:[#allocation50_spill] sm:$0xff] %v12752_v49  ;;  %14823 = vst [vmem:[#allocation51_spill] sm:$0xff] %v12760_v19 }
 0x498   :  { %v12740_v23 = vadd.f32 %v3500_v35, %v3499_v48  ;;  %v12765_v35 = vld [vmem:[%s14437_s6 + $0xcc] ss:$16 sps:$4 sm:$0xff]   ;;  %v12777_v48 = vld [vmem:[%s14437_s6 + $0xc8] ss:$16 sps:$4 sm:$0xff]  }
 0x499   :  { %14824 = vst [vmem:[#allocation52_spill] sm:$0xff] %v12765_v35  ;;  %14826 = vst [vmem:[#allocation54_spill] sm:$0xff] %v12777_v48 }
 0x49a   :  { %3983 = vmatpush1.bf16.msra.mxu1 %v12721_v38  ;;  %4024 = vmatpush1.bf16.msra.mxu0 %v12726_v47  ;;  %10685 = vtanh.f32 %v12740_v23 }
 0x49b   :  { %3984 = vmatprep.subr.bf16.mxu1 %v12733_v25  ;;  %4025 = vmatprep.subr.bf16.mxu0 %v12738_v29  ;;  %v10684_v29 = vpop.eup %10683 }
 0x49e   :  { %3985 = vmatpush1.bf16.msra.mxu1 %v12747_v34  ;;  %4026 = vmatpush1.bf16.msra.mxu0 %v12752_v49  ;;  %v12784_v34 = vld [vmem:[%s14437_s6 + $0xe4] ss:$16 sps:$4 sm:$0xff]   ;;  %v12789_v49 = vld [vmem:[%s14437_s6 + $0xec] ss:$16 sps:$4 sm:$0xff]  }
 0x49f   :  { %3986 = vmatprep.subr.bf16.mxu1 %v12760_v19  ;;  %4027 = vmatprep.subr.bf16.mxu0 %v12765_v35  ;;  %v12796_v19 = vld [vmem:[%s14437_s6 + $0xe0] ss:$16 sps:$4 sm:$0xff]   ;;  %v12801_v35 = vld [vmem:[%s14437_s6 + $0xe8] ss:$16 sps:$4 sm:$0xff]  }
 0x4a2   :  { %3987 = vmatpush1.bf16.msra.mxu1 %v12772_v45  ;;  %4028 = vmatpush1.bf16.msra.mxu0 %v12777_v48 }
 0x4a3   :  { %3988 = vmatprep.subr.bf16.mxu1 %v12784_v34  ;;  %4029 = vmatprep.subr.bf16.mxu0 %v12789_v49 }
 0x4a4   :  { %v10686_v25 = vpop.eup %10685 }
 0x4a5   :  { %v3503_v47 = vmul.f32 %v10686_v25, %v10684_v29  ;;  %v14857_v25 = vld [vmem:[#allocation38_spill] sm:$0xff]  ;;  %v14858_v29 = vld [vmem:[#allocation39_spill] sm:$0xff] }
 0x4a6   :  { %3989 = vmatpush1.bf16.msra.mxu1 %v12796_v19  ;;  %4030 = vmatpush1.bf16.msra.mxu0 %v12801_v35 }
 0x4a7   :  { %4305 = vmatprep.subr.bf16.mxu1 %v12198_v40  ;;  %4346 = vmatprep.subr.bf16.mxu0 %v12203_v41  ;;  %v3504_v48 = vpack.c.bf16 %v3503_v47, %v3503_v47  ;;  %v14827_v40 = vld [vmem:[#allocation11_spill] sm:$0xff]  ;;  %v14828_v41 = vld [vmem:[#allocation12_spill] sm:$0xff]  ;;  %v14856_v47 = vld [vmem:[#allocation37_spill] sm:$0xff] }
 0x4a9   :  { %v3812_v45 = vrot.slane %v3504_v48, 2  ;;  %v14860_v48 = vld [vmem:[#allocation41_spill] sm:$0xff] }
 0x4ab   :  { %4007 = vmatmul.mubr.bf16.vlgmr.msra.gmra.mrb[48].mxu1 %v3812_v45  ;;  %4048 = vmatmul.mubr.bf16.vlgmr.msra.gmra.mrb[40].mxu0 %v3812_v45 }
 0x4ac   :  { %4306 = vmatpush1.bf16.msra.mxu1 %v12212_v50  ;;  %4347 = vmatpush1.bf16.msra.mxu0 %v12217_v51  ;;  %v14829_v50 = vld [vmem:[#allocation13_spill] sm:$0xff]  ;;  %v14830_v51 = vld [vmem:[#allocation14_spill] sm:$0xff] }
 0x4ad   :  { %4307 = vmatprep.subr.bf16.mxu1 %v12224_v17  ;;  %4348 = vmatprep.subr.bf16.mxu0 %v12229_v0  ;;  %v14831_v17 = vld [vmem:[#allocation15_spill] sm:$0xff]  ;;  %v14832_v0 = vld [vmem:[#allocation16_spill] sm:$0xff] }
 0x4ae   :  { %4337 = vmatprep.mubr.bf16.mxu1 %v14687_v44  ;;  %4378 = vmatprep.mubr.bf16.mxu0 %v14687_v44 }
 0x4b0   :  { %4308 = vmatpush1.bf16.msra.mxu1 %v12238_v2  ;;  %4349 = vmatpush1.bf16.msra.mxu0 %v12243_v56  ;;  %v14833_v2 = vld [vmem:[#allocation17_spill] sm:$0xff]  ;;  %v14834_v56 = vld [vmem:[#allocation18_spill] sm:$0xff] }
 0x4b1   :  { %4309 = vmatprep.subr.bf16.mxu1 %v12250_v3  ;;  %4350 = vmatprep.subr.bf16.mxu0 %v12255_v4  ;;  %v14835_v3 = vld [vmem:[#allocation20_spill] sm:$0xff]  ;;  %v14836_v4 = vld [vmem:[#allocation19_spill] sm:$0xff] }
 0x4b4   :  { %4310 = vmatpush1.bf16.msra.mxu1 %v12264_v60  ;;  %4351 = vmatpush1.bf16.msra.mxu0 %v12269_v54  ;;  %v14837_v60 = vld [vmem:[#allocation21_spill] sm:$0xff]  ;;  %v14838_v54 = vld [vmem:[#allocation22_spill] sm:$0xff] }
 0x4b5   :  { %4311 = vmatprep.subr.bf16.mxu1 %v12276_v61  ;;  %4352 = vmatprep.subr.bf16.mxu0 %v12281_v58  ;;  %v14839_v61 = vld [vmem:[#allocation24_spill] sm:$0xff]  ;;  %v14840_v58 = vld [vmem:[#allocation23_spill] sm:$0xff] }
 0x4b8   :  { %4312 = vmatpush1.bf16.msra.mxu1 %v12288_v55  ;;  %4353 = vmatpush1.bf16.msra.mxu0 %v12293_v62  ;;  %v14841_v55 = vld [vmem:[#allocation25_spill] sm:$0xff]  ;;  %v14842_v62 = vld [vmem:[#allocation26_spill] sm:$0xff] }
 0x4b9   :  { %4313 = vmatprep.subr.bf16.mxu1 %v12300_v5  ;;  %4354 = vmatprep.subr.bf16.mxu0 %v12305_v6  ;;  %v14843_v5 = vld [vmem:[#allocation28_spill] sm:$0xff]  ;;  %v14844_v6 = vld [vmem:[#allocation27_spill] sm:$0xff] }
 0x4bc   :  { %4314 = vmatpush1.bf16.msra.mxu1 %v12312_v7  ;;  %4355 = vmatpush1.bf16.msra.mxu0 %v12317_v57  ;;  %v14845_v7 = vld [vmem:[#allocation29_spill] sm:$0xff]  ;;  %v14846_v57 = vld [vmem:[#allocation30_spill] sm:$0xff] }
 0x4bd   :  { %4315 = vmatprep.subr.bf16.mxu1 %v12324_v8  ;;  %4356 = vmatprep.subr.bf16.mxu0 %v12329_v9  ;;  %v14847_v8 = vld [vmem:[#allocation32_spill] sm:$0xff]  ;;  %v14848_v9 = vld [vmem:[#allocation31_spill] sm:$0xff] }
 0x4c0   :  { %4316 = vmatpush1.bf16.msra.mxu1 %v12336_v10  ;;  %4357 = vmatpush1.bf16.msra.mxu0 %v12341_v11  ;;  %v14849_v10 = vld [vmem:[#allocation33_spill] sm:$0xff]  ;;  %v14850_v11 = vld [vmem:[#allocation34_spill] sm:$0xff] }
 0x4c1   :  { %4317 = vmatprep.subr.bf16.mxu1 %v12348_v12  ;;  %4358 = vmatprep.subr.bf16.mxu0 %v12353_v13  ;;  %v14851_v12 = vld [vmem:[#allocation35_spill] sm:$0xff]  ;;  %v14852_v13 = vld [vmem:[#allocation9_spill] sm:$0xff] }
 0x4c4   :  { %4318 = vmatpush1.bf16.msra.mxu1 %v12360_v14  ;;  %4359 = vmatpush1.bf16.msra.mxu0 %v12365_v15  ;;  %v14853_v14 = vld [vmem:[#allocation66_spill] sm:$0xff] }
 0x4c5   :  { %4319 = vmatprep.subr.bf16.mxu1 %v12372_v16  ;;  %4360 = vmatprep.subr.bf16.mxu0 %v14827_v40  ;;  %v14854_v15 = vld [vmem:[#allocation10_spill] sm:$0xff]  ;;  %v14855_v16 = vld [vmem:[#allocation36_spill] sm:$0xff] }
 0x4c6   :  { %v14861_v40 = vld [vmem:[#allocation42_spill] sm:$0xff] }
 0x4c8   :  { %4320 = vmatpush1.bf16.msra.mxu1 %v14828_v41  ;;  %4361 = vmatpush1.bf16.msra.mxu0 %v14829_v50  ;;  %v14862_v41 = vld [vmem:[#allocation43_spill] sm:$0xff]  ;;  %v14863_v50 = vld [vmem:[#allocation44_spill] sm:$0xff] }
 0x4c9   :  { %4655 = vmatprep.subr.bf16.mxu1 %v14830_v51  ;;  %4696 = vmatprep.subr.bf16.mxu0 %v14831_v17 }
 0x4cb   :  { %4338 = vmatmul.mubr.bf16.vlgmr.msra.gmra.mrb[52].mxu1 %v3812_v45  ;;  %4379 = vmatmul.mubr.bf16.vlgmr.msra.gmra.mrb[44].mxu0 %v3812_v45  ;;  %v14859_v45 = vld [vmem:[#allocation40_spill] sm:$0xff] }
 0x4cc   :  { %4656 = vmatpush1.bf16.msra.mxu1 %v14832_v0  ;;  %4697 = vmatpush1.bf16.msra.mxu0 %v14833_v2 }
 0x4cd   :  { %4657 = vmatprep.subr.bf16.mxu1 %v14834_v56  ;;  %4698 = vmatprep.subr.bf16.mxu0 %v14835_v3 }
 0x4ce   :  { %4687 = vmatprep.mubr.bf16.mxu1 %v14687_v44  ;;  %4728 = vmatprep.mubr.bf16.mxu0 %v14687_v44 }
 0x4d0   :  { %4658 = vmatpush1.bf16.msra.mxu1 %v14836_v4  ;;  %4699 = vmatpush1.bf16.msra.mxu0 %v14837_v60 }
 0x4d1   :  { %4659 = vmatprep.subr.bf16.mxu1 %v14838_v54  ;;  %4700 = vmatprep.subr.bf16.mxu0 %v14839_v61  ;;  %v4056_v54 = vld [vmem:[%s14439_s8] sm:$0xf]  ;;  %v14864_v61 = vld [vmem:[#allocation8_spill] sm:$0xff] }
 0x4d4   :  { %4660 = vmatpush1.bf16.msra.mxu1 %v14840_v58  ;;  %4701 = vmatpush1.bf16.msra.mxu0 %v14841_v55  ;;  %v4061_v58 = vrot.slane %v4056_v54, %v14864_v61 }
 0x4d5   :  { %4661 = vmatprep.subr.bf16.mxu1 %v14842_v62  ;;  %4702 = vmatprep.subr.bf16.mxu0 %v14843_v5  ;;  %v4065_v5 = vrot.slane %v4056_v54, %v14747_v53 }
 0x4d8   :  { %4662 = vmatpush1.bf16.msra.mxu1 %v14844_v6  ;;  %4703 = vmatpush1.bf16.msra.mxu0 %v14845_v7 }
 0x4d9   :  { %4663 = vmatprep.subr.bf16.mxu1 %v14846_v57  ;;  %4704 = vmatprep.subr.bf16.mxu0 %v14847_v8 }
 0x4dc   :  { %4664 = vmatpush1.bf16.msra.mxu1 %v14848_v9  ;;  %4705 = vmatpush1.bf16.msra.mxu0 %v14849_v10 }
 0x4dd   :  { %4665 = vmatprep.subr.bf16.mxu1 %v14850_v11  ;;  %4706 = vmatprep.subr.bf16.mxu0 %v14851_v12 }
 0x4e0   :  { %4666 = vmatpush1.bf16.msra.mxu1 %v14852_v13  ;;  %4707 = vmatpush1.bf16.msra.mxu0 %v14853_v14 }
 0x4e1   :  { %4667 = vmatprep.subr.bf16.mxu1 %v14854_v15  ;;  %4708 = vmatprep.subr.bf16.mxu0 %v14855_v16 }
 0x4e4   :  { %4668 = vmatpush1.bf16.msra.mxu1 %v14856_v47  ;;  %4709 = vmatpush1.bf16.msra.mxu0 %v14857_v25 }
 0x4e5   :  { %4669 = vmatprep.subr.bf16.mxu1 %v14858_v29  ;;  %4710 = vmatprep.subr.bf16.mxu0 %v14859_v45  ;;  %v4073_v29 = vrot.slane %v4056_v54, %v14748_v1 }
 0x4e8   :  { %4670 = vmatpush1.bf16.msra.mxu1 %v14860_v48  ;;  %4711 = vmatpush1.bf16.msra.mxu0 %v14861_v40  ;;  %v4069_v48 = vrot.slane %v4056_v54, %v14749_v63 }
 0x4e9   :  { %4900 = vmatprep.subr.bf16.mxu1 %v14862_v41  ;;  %4941 = vmatprep.subr.bf16.mxu0 %v14863_v50 }
 0x55c   :  { %v3763_v51 = vpop.f32.mrb[44].mxu1  ;;  %v3804_v17 = vpop.f32.mrb[36].mxu0 }
 0x55d   :  { %v3765_v0 = vpop.f32.mrb[45].mxu1  ;;  %v3806_v2 = vpop.f32.mrb[37].mxu0 }
 0x55e   :  { %v3767_v56 = vpop.f32.mrb[46].mxu1  ;;  %v3808_v3 = vpop.f32.mrb[38].mxu0 }
 0x55f   :  { %v3768_v4 = vpop.f32.mrb[47].mxu1  ;;  %v3809_v60 = vpop.f32.mrb[39].mxu0 }
 0x57e   :  { %v4008_v55 = vpop.f32.mrb[48].mxu1  ;;  %v4049_v62 = vpop.f32.mrb[40].mxu0 }
 0x57f   :  { %v4009_v6 = vadd.f32 %v4008_v55, %v3763_v51  ;;  %v4050_v7 = vadd.f32 %v4049_v62, %v3804_v17  ;;  %v4010_v57 = vpop.f32.mrb[49].mxu1  ;;  %v4051_v8 = vpop.f32.mrb[41].mxu0 }
 0x580   :  { %v4011_v9 = vadd.f32 %v4010_v57, %v3765_v0  ;;  %v4052_v10 = vadd.f32 %v4051_v8, %v3806_v2  ;;  %v4012_v11 = vpop.f32.mrb[50].mxu1  ;;  %v4053_v12 = vpop.f32.mrb[42].mxu0 }
 0x581   :  { %v4078_v13 = vadd.f32 %v4061_v58, %v4009_v6  ;;  %v4013_v14 = vpop.f32.mrb[51].mxu1  ;;  %v4054_v15 = vpop.f32.mrb[43].mxu0  ;;  %v4080_v41 = vadd.f32 %v4069_v48, %v4050_v7 }
 0x582   :  { %v4079_v16 = vadd.f32 %v4065_v5, %v4011_v9  ;;  %v4081_v45 = vadd.f32 %v4073_v29, %v4052_v10 }
 0x583   :  { %v9220_v47 = vmul.f32 -1.442695, %v4078_v13 }
 0x584   :  { %v9221_v25 = vmul.f32 -1.442695, %v4079_v16  ;;  %v9222_v40 = vmul.f32 -1.442695, %v4081_v45 }
 0x585   :  { %10687 = vpow2.f32 %v9220_v47 }
 0x586   :  { %10689 = vpow2.f32 %v9221_v25 }
 0x587   :  { %10691 = vpow2.f32 %v9222_v40 }
 0x588   :  { %10693 = vtanh.f32 %v4080_v41 }
 0x58f   :  { %v10688_v50 = vpop.eup %10687 }
 0x590   :  { %v10690_v51 = vpop.eup %10689  ;;  %v4085_v17 = vadd.f32 1.0, %v10688_v50 }
 0x591   :  { %v4091_v0 = vadd.f32 1.0, %v10690_v51  ;;  %v10692_v2 = vpop.eup %10691 }
 0x592   :  { %10695 = vrcp.f32 %v4085_v17  ;;  %v10694_v56 = vpop.eup %10693  ;;  %v4098_v58 = vadd.f32 1.0, %v10692_v2 }
 0x593   :  { %10697 = vrcp.f32 %v4091_v0 }
 0x594   :  { %10699 = vrcp.f32 %v4098_v58  ;;  %v12951_v58 = vld [vmem:[%s14435_s4 + $0x8] ss:$16 sps:$4 sm:$0xff]  }
 0x59c   :  { %v10696_v3 = vpop.eup %10695 }
 0x59d   :  { %v10698_v4 = vpop.eup %10697  ;;  %v4102_v60 = vmul.f32 %v10696_v3, %v10694_v56  ;;  %v12932_v56 = vld [vmem:[%s14435_s4 + $0x4] ss:$16 sps:$4 sm:$0xff]   ;;  %v12937_v3 = vld [vmem:[%s14435_s4 + $0xc] ss:$16 sps:$4 sm:$0xff]  }
 0x59e   :  { %v4101_v55 = vmul.f32 %v10698_v4, %v12611_v46  ;;  %v4339_v62 = vpop.f32.mrb[52].mxu1  ;;  %v4380_v54 = vpop.f32.mrb[44].mxu0 }
 0x59f   :  { %v4391_v5 = vrot.slane %v4339_v62, 2  ;;  %v4341_v6 = vpop.f32.mrb[53].mxu1  ;;  %v4382_v7 = vpop.f32.mrb[45].mxu0  ;;  %v4393_v25 = vrot.slane %v4380_v54, 2  ;;  %v12972_v62 = vld [vmem:[%s14435_s4 + $0x20] ss:$16 sps:$4 sm:$0xff]  }
 0x5a0   :  { %v12885_v57 = vadd.f32 %v4102_v60, %v4101_v55  ;;  %v4392_v8 = vrot.slane %v4341_v6, 2  ;;  %v4343_v9 = vpop.f32.mrb[54].mxu1  ;;  %v4384_v10 = vpop.f32.mrb[46].mxu0  ;;  %v4394_v16 = vrot.slane %v4382_v7, 2  ;;  %v12977_v54 = vld [vmem:[%s14435_s4 + $0x28] ss:$16 sps:$4 sm:$0xff]  }
 0x5a1   :  { %v4399_v11 = vadd.f32 %v12055_v22, %v4391_v5  ;;  %v4344_v12 = vpop.f32.mrb[55].mxu1  ;;  %v4385_v13 = vpop.f32.mrb[47].mxu0  ;;  %v4401_v40 = vadd.f32 %v12064_v43, %v4393_v25  ;;  %v12984_v5 = vld [vmem:[%s14435_s4 + $0x44] ss:$16 sps:$4 sm:$0xff]   ;;  %v12989_v6 = vld [vmem:[%s14435_s4 + $0x4c] ss:$16 sps:$4 sm:$0xff]  }
 0x5a2   :  { %v4400_v14 = vadd.f32 %v12057_v27, %v4392_v8  ;;  %10701 = vtanh.f32 %v12885_v57  ;;  %v4402_v47 = vadd.f32 %v12061_v59, %v4394_v16  ;;  %v10700_v29 = vpop.eup %10699  ;;  %v12998_v7 = vld [vmem:[%s14435_s4 + $0x40] ss:$16 sps:$4 sm:$0xff]   ;;  %v13003_v8 = vld [vmem:[%s14435_s4 + $0x48] ss:$16 sps:$4 sm:$0xff]   ;;  %v13010_v9 = vld [vmem:[%s14435_s4 + $0x64] ss:$16 sps:$4 sm:$0xff]  }
 0x5a3   :  { %v9256_v46 = vmul.f32 -1.442695, %v4399_v11  ;;  %v13015_v10 = vld [vmem:[%s14435_s4 + $0x6c] ss:$16 sps:$4 sm:$0xff]   ;;  %v13022_v11 = vld [vmem:[%s14435_s4 + $0x60] ss:$16 sps:$4 sm:$0xff]  }
 0x5a4   :  { %v9257_v15 = vmul.f32 -1.442695, %v4400_v14  ;;  %v9258_v48 = vmul.f32 -1.442695, %v4402_v47  ;;  %v13027_v12 = vld [vmem:[%s14435_s4 + $0x68] ss:$16 sps:$4 sm:$0xff]  }
 0x5a5   :  { %10703 = vpow2.f32 %v9256_v46  ;;  %v13034_v13 = vld [vmem:[%s14435_s4 + $0x84] ss:$16 sps:$4 sm:$0xff]   ;;  %v13039_v14 = vld [vmem:[%s14435_s4 + $0x8c] ss:$16 sps:$4 sm:$0xff]   ;;  %v13046_v46 = vld [vmem:[%s14435_s4 + $0x80] ss:$16 sps:$4 sm:$0xff]  }
 0x5a6   :  { %10705 = vpow2.f32 %v9257_v15  ;;  %v13051_v15 = vld [vmem:[%s14435_s4 + $0x88] ss:$16 sps:$4 sm:$0xff]   ;;  %v13058_v16 = vld [vmem:[%s14435_s4 + $0xa4] ss:$16 sps:$4 sm:$0xff]   ;;  %v13063_v47 = vld [vmem:[%s14435_s4 + $0xac] ss:$16 sps:$4 sm:$0xff]  }
 0x5a7   :  { %10707 = vpow2.f32 %v9258_v48  ;;  %v13070_v25 = vld [vmem:[%s14435_s4 + $0xa0] ss:$16 sps:$4 sm:$0xff]   ;;  %v13087_v48 = vld [vmem:[%s14435_s4 + $0xcc] ss:$16 sps:$4 sm:$0xff]  }
 0x5a8   :  { %10709 = vtanh.f32 %v4401_v40  ;;  %v13094_v40 = vld [vmem:[%s14435_s4 + $0xc0] ss:$16 sps:$4 sm:$0xff]  }
 0x5ac   :  { %v10702_v45 = vpop.eup %10701 }
 0x5ad   :  { %v4105_v22 = vmul.f32 %v10702_v45, %v10700_v29  ;;  %v13075_v29 = vld [vmem:[%s14435_s4 + $0xa8] ss:$16 sps:$4 sm:$0xff]   ;;  %v13082_v45 = vld [vmem:[%s14435_s4 + $0xc4] ss:$16 sps:$4 sm:$0xff]  }
 0x5af   :  { %v10704_v41 = vpop.eup %10703  ;;  %v4106_v50 = vpack.c.bf16 %v4105_v22, %v4105_v22  ;;  %v13099_v22 = vld [vmem:[%s14435_s4 + $0xc8] ss:$16 sps:$4 sm:$0xff]  }
 0x5b0   :  { %v10706_v51 = vpop.eup %10705  ;;  %v4406_v27 = vadd.f32 1.0, %v10704_v41  ;;  %v13106_v41 = vld [vmem:[%s14435_s4 + $0xe4] ss:$16 sps:$4 sm:$0xff]  }
 0x5b1   :  { %v4412_v17 = vadd.f32 1.0, %v10706_v51  ;;  %v4110_v0 = vrot.slane %v4106_v50, 6  ;;  %4688 = vmatmul.mubr.bf16.vlgmr.msra.gmra.mrb[56].mxu1 %v4106_v50  ;;  %4729 = vmatmul.mubr.bf16.vlgmr.msra.gmra.mrb[48].mxu0 %v4106_v50  ;;  %v10708_v59 = vpop.eup %10707  ;;  %v13111_v50 = vld [vmem:[%s14435_s4 + $0xec] ss:$16 sps:$4 sm:$0xff]   ;;  %v13118_v51 = vld [vmem:[%s14435_s4 + $0xe0] ss:$16 sps:$4 sm:$0xff]  }
 0x5b2   :  { %10711 = vrcp.f32 %v4406_v27  ;;  %4901 = vmatpush1.bf16.msra.mxu1 %v12621_v39  ;;  %4942 = vmatpush1.bf16.msra.mxu0 %v12626_v20  ;;  %v10710_v43 = vpop.eup %10709  ;;  %v14865_v39 = vld [vmem:[#allocation45_spill] sm:$0xff]  ;;  %v13123_v27 = vld [vmem:[%s14435_s4 + $0xe8] ss:$16 sps:$4 sm:$0xff]  }
 0x5b3   :  { %10713 = vrcp.f32 %v4412_v17  ;;  %4112 = vst [vmem:[%s14442_s11] sm:$0x4] %v4110_v0  ;;  %4902 = vmatprep.subr.bf16.mxu1 %v12631_v26  ;;  %4943 = vmatprep.subr.bf16.mxu0 %v12636_v18  ;;  %v4423_v26 = vrot.slane %v12740_v23, 6  ;;  %v14874_v23 = vld [vmem:[#allocation54_spill] sm:$0xff]  ;;  %v13136_v17 = vld [vmem:[%s14438_s7 + $0x4] ss:$16 sps:$4 sm:$0xff]  }
 0x5b4   :  { %4932 = vmatprep.mubr.bf16.mxu1 %v14687_v44  ;;  %4973 = vmatprep.mubr.bf16.mxu0 %v14687_v44  ;;  %v13141_v0 = vld [vmem:[%s14438_s7 + $0xc] ss:$16 sps:$4 sm:$0xff]  }
 0x5b5   :  { %14875 = vst [vmem:[#allocation55_spill] sm:$0xff] %v13141_v0 }
 0x5b6   :  { %4903 = vmatpush1.bf16.msra.mxu1 %v12643_v52  ;;  %4944 = vmatpush1.bf16.msra.mxu0 %v12648_v37  ;;  %v4419_v37 = vadd.f32 1.0, %v10708_v59  ;;  %v13146_v59 = vld [vmem:[%s14438_s7] ss:$16 sps:$4 sm:$0xff]  }
 0x5b7   :  { %4904 = vmatprep.subr.bf16.mxu1 %v12658_v36  ;;  %4945 = vmatprep.subr.bf16.mxu0 %v12663_v32  ;;  %v14866_v32 = vld [vmem:[#allocation46_spill] sm:$0xff]  ;;  %14876 = vst [vmem:[#allocation56_spill] sm:$0xff] %v13146_v59 }
 0x5b8   :  { %10715 = vrcp.f32 %v4419_v37  ;;  %v13189_v37 = vld [vmem:[%s14438_s7 + $0x4c] ss:$16 sps:$4 sm:$0xff]  }
 0x5b9   :  { %14883 = vst [vmem:[#allocation63_spill] sm:$0xff] %v13189_v37 }
 0x5ba   :  { %4905 = vmatpush1.bf16.msra.mxu1 %v12672_v31  ;;  %4946 = vmatpush1.bf16.msra.mxu0 %v12677_v33  ;;  %v14867_v31 = vld [vmem:[#allocation47_spill] sm:$0xff]  ;;  %v14868_v33 = vld [vmem:[#allocation48_spill] sm:$0xff] }
 0x5bb   :  { %4906 = vmatprep.subr.bf16.mxu1 %v12684_v42  ;;  %4947 = vmatprep.subr.bf16.mxu0 %v14865_v39  ;;  %v14869_v42 = vld [vmem:[#allocation49_spill] sm:$0xff] }
 0x5bc   :  { %v10712_v20 = vpop.eup %10711  ;;  %v13160_v39 = vld [vmem:[%s14438_s7 + $0x24] ss:$16 sps:$4 sm:$0xff]  }
 0x5bd   :  { %v10714_v18 = vpop.eup %10713  ;;  %v4426_v52 = vmul.f32 %v10712_v20, %v10710_v43  ;;  %v13151_v43 = vld [vmem:[%s14438_s7 + $0x8] ss:$16 sps:$4 sm:$0xff]   ;;  %14878 = vst [vmem:[#allocation58_spill] sm:$0xff] %v13160_v39  ;;  %v13165_v20 = vld [vmem:[%s14438_s7 + $0x2c] ss:$16 sps:$4 sm:$0xff]  }
 0x5be   :  { %v4425_v2 = vmul.f32 %v10714_v18, %v4423_v26  ;;  %4907 = vmatpush1.bf16.msra.mxu1 %v12696_v24  ;;  %4948 = vmatpush1.bf16.msra.mxu0 %v12701_v30  ;;  %v14870_v24 = vld [vmem:[#allocation50_spill] sm:$0xff]  ;;  %v14871_v30 = vld [vmem:[#allocation51_spill] sm:$0xff]  ;;  %14877 = vst [vmem:[#allocation57_spill] sm:$0xff] %v13151_v43  ;;  %14879 = vst [vmem:[#allocation59_spill] sm:$0xff] %v13165_v20 }
 0x5bf   :  { %4908 = vmatprep.subr.bf16.mxu1 %v12708_v28  ;;  %4949 = vmatprep.subr.bf16.mxu0 %v12713_v21  ;;  %v14872_v28 = vld [vmem:[#allocation52_spill] sm:$0xff]  ;;  %v14873_v21 = vld [vmem:[#allocation53_spill] sm:$0xff] }
 0x5c0   :  { %v12914_v36 = vadd.f32 %v4426_v52, %v4425_v2  ;;  %v13170_v26 = vld [vmem:[%s14438_s7 + $0x20] ss:$16 sps:$4 sm:$0xff]   ;;  %v13175_v18 = vld [vmem:[%s14438_s7 + $0x28] ss:$16 sps:$4 sm:$0xff]   ;;  %v13184_v52 = vld [vmem:[%s14438_s7 + $0x44] ss:$16 sps:$4 sm:$0xff]  }
 0x5c1   :  { %14880 = vst [vmem:[#allocation60_spill] sm:$0xff] %v13170_v26  ;;  %14881 = vst [vmem:[#allocation61_spill] sm:$0xff] %v13175_v18  ;;  %v13194_v2 = vld [vmem:[%s14438_s7 + $0x40] ss:$16 sps:$4 sm:$0xff]  }
 0x5c2   :  { %4909 = vmatpush1.bf16.msra.mxu1 %v12721_v38  ;;  %4950 = vmatpush1.bf16.msra.mxu0 %v14866_v32  ;;  %10717 = vtanh.f32 %v12914_v36  ;;  %v10716_v38 = vpop.eup %10715  ;;  %14882 = vst [vmem:[#allocation62_spill] sm:$0xff] %v13184_v52  ;;  %14884 = vst [vmem:[#allocation64_spill] sm:$0xff] %v13194_v2  ;;  %v13199_v32 = vld [vmem:[%s14438_s7 + $0x48] ss:$16 sps:$4 sm:$0xff]  }
 0x5c3   :  { %4910 = vmatprep.subr.bf16.mxu1 %v14867_v31  ;;  %4951 = vmatprep.subr.bf16.mxu0 %v14868_v33  ;;  %14885 = vst [vmem:[#allocation65_spill] sm:$0xff] %v13199_v32  ;;  %v13208_v31 = vld [vmem:[%s14438_s7 + $0x64] ss:$16 sps:$4 sm:$0xff]   ;;  %v13213_v33 = vld [vmem:[%s14438_s7 + $0x6c] ss:$16 sps:$4 sm:$0xff]  }
 0x5c4   :  { %14886 = vst [vmem:[#allocation11_spill] sm:$0xff] %v13208_v31  ;;  %14887 = vst [vmem:[#allocation12_spill] sm:$0xff] %v13213_v33 }
 0x5c6   :  { %4911 = vmatpush1.bf16.msra.mxu1 %v14869_v42  ;;  %4952 = vmatpush1.bf16.msra.mxu0 %v14870_v24  ;;  %v13218_v42 = vld [vmem:[%s14438_s7 + $0x60] ss:$16 sps:$4 sm:$0xff]   ;;  %v13223_v24 = vld [vmem:[%s14438_s7 + $0x68] ss:$16 sps:$4 sm:$0xff]  }
 0x5c7   :  { %4912 = vmatprep.subr.bf16.mxu1 %v14871_v30  ;;  %4953 = vmatprep.subr.bf16.mxu0 %v14872_v28  ;;  %14888 = vst [vmem:[#allocation13_spill] sm:$0xff] %v13218_v42  ;;  %14889 = vst [vmem:[#allocation14_spill] sm:$0xff] %v13223_v24  ;;  %v13232_v30 = vld [vmem:[%s14438_s7 + $0x84] ss:$16 sps:$4 sm:$0xff]   ;;  %v13237_v28 = vld [vmem:[%s14438_s7 + $0x8c] ss:$16 sps:$4 sm:$0xff]  }
 0x5c8   :  { %14890 = vst [vmem:[#allocation15_spill] sm:$0xff] %v13232_v30  ;;  %14891 = vst [vmem:[#allocation16_spill] sm:$0xff] %v13237_v28 }
 0x5ca   :  { %4913 = vmatpush1.bf16.msra.mxu1 %v14873_v21  ;;  %4954 = vmatpush1.bf16.msra.mxu0 %v14874_v23  ;;  %v13242_v21 = vld [vmem:[%s14438_s7 + $0x80] ss:$16 sps:$4 sm:$0xff]   ;;  %v13247_v23 = vld [vmem:[%s14438_s7 + $0x88] ss:$16 sps:$4 sm:$0xff]  }
 0x5cb   :  { %4914 = vmatprep.subr.bf16.mxu1 %v12784_v34  ;;  %4955 = vmatprep.subr.bf16.mxu0 %v12789_v49  ;;  %v12946_v49 = vld [vmem:[%s14435_s4] ss:$16 sps:$4 sm:$0xff]   ;;  %14892 = vst [vmem:[#allocation17_spill] sm:$0xff] %v13242_v21  ;;  %14893 = vst [vmem:[#allocation18_spill] sm:$0xff] %v13247_v23 }
 0x5cc   :  { %v10718_v4 = vpop.eup %10717 }
 0x5cd   :  { %v4429_v60 = vmul.f32 %v10718_v4, %v10716_v38  ;;  %v13256_v38 = vld [vmem:[%s14438_s7 + $0xa4] ss:$16 sps:$4 sm:$0xff]   ;;  %v13261_v4 = vld [vmem:[%s14438_s7 + $0xac] ss:$16 sps:$4 sm:$0xff]  }
 0x5ce   :  { %4915 = vmatpush1.bf16.msra.mxu1 %v12796_v19  ;;  %4956 = vmatpush1.bf16.msra.mxu0 %v12801_v35  ;;  %v12958_v19 = vld [vmem:[%s14435_s4 + $0x24] ss:$16 sps:$4 sm:$0xff]   ;;  %v12963_v35 = vld [vmem:[%s14435_s4 + $0x2c] ss:$16 sps:$4 sm:$0xff]   ;;  %14894 = vst [vmem:[#allocation20_spill] sm:$0xff] %v13256_v38  ;;  %14895 = vst [vmem:[#allocation19_spill] sm:$0xff] %v13261_v4 }
 0x5cf   :  { %5231 = vmatprep.subr.bf16.mxu1 %v12932_v56  ;;  %5272 = vmatprep.subr.bf16.mxu0 %v12937_v3  ;;  %v4430_v34 = vpack.c.bf16 %v4429_v60, %v4429_v60  ;;  %v13266_v60 = vld [vmem:[%s14438_s7 + $0xa0] ss:$16 sps:$4 sm:$0xff]  }
 0x5d0   :  { %14896 = vst [vmem:[#allocation21_spill] sm:$0xff] %v13266_v60 }
 0x5d1   :  { %v12953_v55 = vrot.slane %v4430_v34, 3  ;;  %v13271_v34 = vld [vmem:[%s14438_s7 + $0xa8] ss:$16 sps:$4 sm:$0xff]  }
 0x5d2   :  { %14897 = vst [vmem:[#allocation22_spill] sm:$0xff] %v13271_v34 }
 0x5d3   :  { %4933 = vmatmul.mubr.bf16.vlgmr.msra.gmra.mrb[60].mxu1 %v12953_v55  ;;  %4974 = vmatmul.mubr.bf16.vlgmr.msra.gmra.mrb[52].mxu0 %v12953_v55 }
 0x5d4   :  { %5232 = vmatpush1.bf16.msra.mxu1 %v12946_v49  ;;  %5273 = vmatpush1.bf16.msra.mxu0 %v12951_v58 }
 0x5d5   :  { %5233 = vmatprep.subr.bf16.mxu1 %v12958_v19  ;;  %5274 = vmatprep.subr.bf16.mxu0 %v12963_v35 }
 0x5d6   :  { %5263 = vmatprep.mubr.bf16.mxu1 %v14687_v44  ;;  %5304 = vmatprep.mubr.bf16.mxu0 %v14687_v44 }
 0x5d8   :  { %5234 = vmatpush1.bf16.msra.mxu1 %v12972_v62  ;;  %5275 = vmatpush1.bf16.msra.mxu0 %v12977_v54 }
 0x5d9   :  { %5235 = vmatprep.subr.bf16.mxu1 %v12984_v5  ;;  %5276 = vmatprep.subr.bf16.mxu0 %v12989_v6 }
 0x5dc   :  { %5236 = vmatpush1.bf16.msra.mxu1 %v12998_v7  ;;  %5277 = vmatpush1.bf16.msra.mxu0 %v13003_v8 }
 0x5dd   :  { %5237 = vmatprep.subr.bf16.mxu1 %v13010_v9  ;;  %5278 = vmatprep.subr.bf16.mxu0 %v13015_v10 }
 0x5e0   :  { %5238 = vmatpush1.bf16.msra.mxu1 %v13022_v11  ;;  %5279 = vmatpush1.bf16.msra.mxu0 %v13027_v12 }
 0x5e1   :  { %5239 = vmatprep.subr.bf16.mxu1 %v13034_v13  ;;  %5280 = vmatprep.subr.bf16.mxu0 %v13039_v14 }
 0x5e4   :  { %5240 = vmatpush1.bf16.msra.mxu1 %v13046_v46  ;;  %5281 = vmatpush1.bf16.msra.mxu0 %v13051_v15 }
 0x5e5   :  { %5241 = vmatprep.subr.bf16.mxu1 %v13058_v16  ;;  %5282 = vmatprep.subr.bf16.mxu0 %v13063_v47 }
 0x5e8   :  { %5242 = vmatpush1.bf16.msra.mxu1 %v13070_v25  ;;  %5283 = vmatpush1.bf16.msra.mxu0 %v13075_v29 }
 0x5e9   :  { %5243 = vmatprep.subr.bf16.mxu1 %v13082_v45  ;;  %5284 = vmatprep.subr.bf16.mxu0 %v13087_v48 }
 0x5ec   :  { %5244 = vmatpush1.bf16.msra.mxu1 %v13094_v40  ;;  %5285 = vmatpush1.bf16.msra.mxu0 %v13099_v22 }
 0x5ed   :  { %5245 = vmatprep.subr.bf16.mxu1 %v13106_v41  ;;  %5286 = vmatprep.subr.bf16.mxu0 %v13111_v50 }
 0x5f0   :  { %5246 = vmatpush1.bf16.msra.mxu1 %v13118_v51  ;;  %5287 = vmatpush1.bf16.msra.mxu0 %v13123_v27 }
 0x5f1   :  { %5569 = vmatprep.subr.bf16.mxu1 %v13136_v17  ;;  %5610 = vmatprep.subr.bf16.mxu0 %v13141_v0 }
 0x5f3   :  { %5264 = vmatmul.mubr.bf16.vlgmr.msra.gmra.mrb[64].mxu1 %v12953_v55  ;;  %5305 = vmatmul.mubr.bf16.vlgmr.msra.gmra.mrb[56].mxu0 %v12953_v55  ;;  %v13280_v55 = vld [vmem:[%s14438_s7 + $0xc4] ss:$16 sps:$4 sm:$0xff]  }
 0x5f4   :  { %5601 = vmatprep.mubr.bf16.mxu1 %v14687_v44  ;;  %5642 = vmatprep.mubr.bf16.mxu0 %v14687_v44  ;;  %14898 = vst [vmem:[#allocation24_spill] sm:$0xff] %v13280_v55 }
 0x5f5   :  { %5570 = vmatpush1.bf16.msra.mxu1 %v13146_v59  ;;  %5611 = vmatpush1.bf16.msra.mxu0 %v13151_v43 }
 0x5f6   :  { %5571 = vmatprep.subr.bf16.mxu1 %v13160_v39  ;;  %5612 = vmatprep.subr.bf16.mxu0 %v13165_v20 }
 0x5f9   :  { %5572 = vmatpush1.bf16.msra.mxu1 %v13170_v26  ;;  %5613 = vmatpush1.bf16.msra.mxu0 %v13175_v18 }
 0x5fa   :  { %5573 = vmatprep.subr.bf16.mxu1 %v13184_v52  ;;  %5614 = vmatprep.subr.bf16.mxu0 %v13189_v37 }
 0x5fd   :  { %5574 = vmatpush1.bf16.msra.mxu1 %v13194_v2  ;;  %5615 = vmatpush1.bf16.msra.mxu0 %v13199_v32 }
 0x5fe   :  { %5575 = vmatprep.subr.bf16.mxu1 %v13208_v31  ;;  %5616 = vmatprep.subr.bf16.mxu0 %v13213_v33 }
 0x601   :  { %5576 = vmatpush1.bf16.msra.mxu1 %v13218_v42  ;;  %5617 = vmatpush1.bf16.msra.mxu0 %v13223_v24  ;;  %v4982_v42 = vld [vmem:[%s14439_s8] sm:$0xf] }
 0x602   :  { %5577 = vmatprep.subr.bf16.mxu1 %v13232_v30  ;;  %5618 = vmatprep.subr.bf16.mxu0 %v13237_v28  ;;  %v4987_v33 = vrot.slane %v4982_v42, %v14864_v61  ;;  %v4999_v61 = vrot.slane %v4982_v42, %v14748_v1 }
 0x605   :  { %5578 = vmatpush1.bf16.msra.mxu1 %v13242_v21  ;;  %5619 = vmatpush1.bf16.msra.mxu0 %v13247_v23  ;;  %v13285_v23 = vld [vmem:[%s14438_s7 + $0xcc] ss:$16 sps:$4 sm:$0xff]  }
 0x606   :  { %5579 = vmatprep.subr.bf16.mxu1 %v13256_v38  ;;  %5620 = vmatprep.subr.bf16.mxu0 %v13261_v4  ;;  %14899 = vst [vmem:[#allocation23_spill] sm:$0xff] %v13285_v23  ;;  %v13290_v38 = vld [vmem:[%s14438_s7 + $0xc0] ss:$16 sps:$4 sm:$0xff]   ;;  %v13309_v4 = vld [vmem:[%s14438_s7 + $0xec] ss:$16 sps:$4 sm:$0xff]  }
 0x607   :  { %14900 = vst [vmem:[#allocation25_spill] sm:$0xff] %v13290_v38  ;;  %14903 = vst [vmem:[#allocation27_spill] sm:$0xff] %v13309_v4 }
 0x609   :  { %5580 = vmatpush1.bf16.msra.mxu1 %v13266_v60  ;;  %5621 = vmatpush1.bf16.msra.mxu0 %v13271_v34  ;;  %v13295_v60 = vld [vmem:[%s14438_s7 + $0xc8] ss:$16 sps:$4 sm:$0xff]   ;;  %v13304_v34 = vld [vmem:[%s14438_s7 + $0xe4] ss:$16 sps:$4 sm:$0xff]  }
 0x60a   :  { %14901 = vst [vmem:[#allocation26_spill] sm:$0xff] %v13295_v60  ;;  %5581 = vmatprep.subr.bf16.mxu1 %v13280_v55  ;;  %5622 = vmatprep.subr.bf16.mxu0 %v13285_v23  ;;  %14902 = vst [vmem:[#allocation28_spill] sm:$0xff] %v13304_v34  ;;  %v13314_v55 = vld [vmem:[%s14438_s7 + $0xe0] ss:$16 sps:$4 sm:$0xff]   ;;  %v13333_v23 = vld [vmem:[%s14437_s6 + $0xc] ss:$16 sps:$4 sm:$0xff]  }
 0x60b   :  { %14904 = vst [vmem:[#allocation29_spill] sm:$0xff] %v13314_v55  ;;  %14907 = vst [vmem:[#allocation31_spill] sm:$0xff] %v13333_v23 }
 0x60d   :  { %5582 = vmatpush1.bf16.msra.mxu1 %v13290_v38  ;;  %5623 = vmatpush1.bf16.msra.mxu0 %v13295_v60  ;;  %v13319_v38 = vld [vmem:[%s14438_s7 + $0xe8] ss:$16 sps:$4 sm:$0xff]   ;;  %v13328_v60 = vld [vmem:[%s14437_s6 + $0x4] ss:$16 sps:$4 sm:$0xff]  }
 0x60e   :  { %14905 = vst [vmem:[#allocation30_spill] sm:$0xff] %v13319_v38  ;;  %5583 = vmatprep.subr.bf16.mxu1 %v13304_v34  ;;  %5624 = vmatprep.subr.bf16.mxu0 %v13309_v4  ;;  %14906 = vst [vmem:[#allocation32_spill] sm:$0xff] %v13328_v60 }
 0x611   :  { %5584 = vmatpush1.bf16.msra.mxu1 %v13314_v55  ;;  %5625 = vmatpush1.bf16.msra.mxu0 %v13319_v38 }
 0x612   :  { %5811 = vmatprep.subr.bf16.mxu1 %v13328_v60  ;;  %5852 = vmatprep.subr.bf16.mxu0 %v13333_v23  ;;  %v4991_v60 = vrot.slane %v4982_v42, %v14747_v53 }
 0x684   :  { %v4689_v34 = vpop.f32.mrb[56].mxu1  ;;  %v4730_v4 = vpop.f32.mrb[48].mxu0 }
 0x685   :  { %v4691_v21 = vpop.f32.mrb[57].mxu1  ;;  %v4732_v55 = vpop.f32.mrb[49].mxu0 }
 0x686   :  { %v4693_v28 = vpop.f32.mrb[58].mxu1  ;;  %v4734_v38 = vpop.f32.mrb[50].mxu0 }
 0x687   :  { %v4694_v30 = vpop.f32.mrb[59].mxu1  ;;  %v4735_v24 = vpop.f32.mrb[51].mxu0 }
 0x6a6   :  { %v4934_v31 = vpop.f32.mrb[60].mxu1  ;;  %v4975_v32 = vpop.f32.mrb[52].mxu0 }
 0x6a7   :  { %v4935_v2 = vadd.f32 %v4934_v31, %v4689_v34  ;;  %v4976_v23 = vadd.f32 %v4975_v32, %v4730_v4  ;;  %v4936_v37 = vpop.f32.mrb[61].mxu1  ;;  %v4977_v52 = vpop.f32.mrb[53].mxu0  ;;  %v4995_v31 = vrot.slane %v4982_v42, %v14749_v63 }
 0x6a8   :  { %v4937_v18 = vadd.f32 %v4936_v37, %v4691_v21  ;;  %v4978_v26 = vadd.f32 %v4977_v52, %v4732_v55  ;;  %v4938_v28 = vpop.f32.mrb[62].mxu1  ;;  %v4979_v38 = vpop.f32.mrb[54].mxu0 }
 0x6a9   :  { %v5004_v30 = vadd.f32 %v4987_v33, %v4935_v2  ;;  %v4939_v24 = vpop.f32.mrb[63].mxu1  ;;  %v4980_v20 = vpop.f32.mrb[55].mxu0  ;;  %v5006_v4 = vadd.f32 %v4995_v31, %v4976_v23  ;;  %v14909_v28 = vld [vmem:[#allocation69_spill] sm:$0xff] }
 0x6aa   :  { %v5005_v39 = vadd.f32 %v4991_v60, %v4937_v18  ;;  %v5007_v0 = vadd.f32 %v4999_v61, %v4978_v26 }
 0x6ab   :  { %v9323_v43 = vmul.f32 -1.442695, %v5004_v30 }
 0x6ac   :  { %v9324_v59 = vmul.f32 -1.442695, %v5005_v39  ;;  %v9325_v32 = vmul.f32 -1.442695, %v5007_v0  ;;  %v14908_v0 = vld [vmem:[#allocation67_spill] sm:$0xff] }
 0x6ad   :  { %10719 = vpow2.f32 %v9323_v43 }
 0x6ae   :  { %10721 = vpow2.f32 %v9324_v59 }
 0x6af   :  { %10723 = vpow2.f32 %v9325_v32 }
 0x6b0   :  { %10725 = vtanh.f32 %v5006_v4 }
 0x6b7   :  { %v10720_v34 = vpop.eup %10719 }
 0x6b8   :  { %v10722_v37 = vpop.eup %10721  ;;  %v5011_v52 = vadd.f32 1.0, %v10720_v34 }
 0x6b9   :  { %v5017_v2 = vadd.f32 1.0, %v10722_v37  ;;  %v10724_v20 = vpop.eup %10723 }
 0x6ba   :  { %10727 = vrcp.f32 %v5011_v52  ;;  %v10726_v18 = vpop.eup %10725  ;;  %v5024_v43 = vadd.f32 1.0, %v10724_v20  ;;  %v14911_v20 = vld [vmem:[#allocation68_spill] sm:$0xff] }
 0x6bb   :  { %10729 = vrcp.f32 %v5017_v2 }
 0x6bc   :  { %10731 = vrcp.f32 %v5024_v43  ;;  %v13355_v43 = vld [vmem:[%s14437_s6] ss:$16 sps:$4 sm:$0xff]  }
 0x6c4   :  { %v10728_v39 = vpop.eup %10727 }
 0x6c5   :  { %v10730_v33 = vpop.eup %10729  ;;  %v5028_v21 = vmul.f32 %v10728_v39, %v10726_v18 }
 0x6c6   :  { %v5027_v61 = vmul.f32 %v10730_v33, %v12885_v57  ;;  %v5265_v59 = vpop.f32.mrb[64].mxu1  ;;  %v5306_v26 = vpop.f32.mrb[56].mxu0  ;;  %v14910_v57 = vld [vmem:[#allocation70_spill] sm:$0xff] }
 0x6c7   :  { %v5313_v42 = vadd.f32 %v14908_v0, %v5265_v59  ;;  %v5267_v23 = vpop.f32.mrb[65].mxu1  ;;  %v5308_v60 = vpop.f32.mrb[57].mxu0  ;;  %v5315_v18 = vadd.f32 %v14911_v20, %v5306_v26  ;;  %v13365_v26 = vld [vmem:[%s14437_s6 + $0x24] ss:$16 sps:$4 sm:$0xff]  }
 0x6c8   :  { %v13346_v55 = vadd.f32 %v5028_v21, %v5027_v61  ;;  %v5314_v38 = vadd.f32 %v14909_v28, %v5267_v23  ;;  %v5269_v30 = vpop.f32.mrb[66].mxu1  ;;  %v5310_v24 = vpop.f32.mrb[58].mxu0  ;;  %v5316_v37 = vadd.f32 %v14910_v57, %v5308_v60 }
 0x6c9   :  { %v9359_v31 = vmul.f32 -1.442695, %v5313_v42  ;;  %v5270_v32 = vpop.f32.mrb[67].mxu1  ;;  %v5311_v4 = vpop.f32.mrb[59].mxu0  ;;  %v13360_v42 = vld [vmem:[%s14437_s6 + $0x8] ss:$16 sps:$4 sm:$0xff]  }
 0x6ca   :  { %v9360_v34 = vmul.f32 -1.442695, %v5314_v38  ;;  %10733 = vtanh.f32 %v13346_v55  ;;  %v9361_v52 = vmul.f32 -1.442695, %v5316_v37  ;;  %v10732_v2 = vpop.eup %10731  ;;  %v13370_v38 = vld [vmem:[%s14437_s6 + $0x2c] ss:$16 sps:$4 sm:$0xff]  }
 0x6cb   :  { %10735 = vpow2.f32 %v9359_v31  ;;  %v13377_v24 = vld [vmem:[%s14437_s6 + $0x20] ss:$16 sps:$4 sm:$0xff]   ;;  %v13382_v31 = vld [vmem:[%s14437_s6 + $0x28] ss:$16 sps:$4 sm:$0xff]   ;;  %v13392_v32 = vld [vmem:[%s14437_s6 + $0x44] ss:$16 sps:$4 sm:$0xff]  }
 0x6cc   :  { %10737 = vpow2.f32 %v9360_v34  ;;  %v13397_v4 = vld [vmem:[%s14437_s6 + $0x4c] ss:$16 sps:$4 sm:$0xff]   ;;  %v13406_v34 = vld [vmem:[%s14437_s6 + $0x40] ss:$16 sps:$4 sm:$0xff]   ;;  %v13411_v37 = vld [vmem:[%s14437_s6 + $0x48] ss:$16 sps:$4 sm:$0xff]  }
 0x6cd   :  { %10739 = vpow2.f32 %v9361_v52  ;;  %14912 = vst [vmem:[#allocation33_spill] sm:$0xff] %v13397_v4  ;;  %14913 = vst [vmem:[#allocation34_spill] sm:$0xff] %v13406_v34  ;;  %v13418_v52 = vld [vmem:[%s14437_s6 + $0x64] ss:$16 sps:$4 sm:$0xff]  }
 0x6ce   :  { %10741 = vtanh.f32 %v5315_v18  ;;  %14914 = vst [vmem:[#allocation35_spill] sm:$0xff] %v13411_v37 }
 0x6d4   :  { %v10734_v39 = vpop.eup %10733 }
 0x6d5   :  { %v10736_v33 = vpop.eup %10735  ;;  %v5031_v21 = vmul.f32 %v10734_v39, %v10732_v2  ;;  %v13423_v2 = vld [vmem:[%s14437_s6 + $0x6c] ss:$16 sps:$4 sm:$0xff]  }
 0x6d6   :  { %v10738_v61 = vpop.eup %10737  ;;  %v5320_v59 = vadd.f32 1.0, %v10736_v33 }
 0x6d7   :  { %v5326_v23 = vadd.f32 1.0, %v10738_v61  ;;  %v5032_v60 = vpack.c.bf16 %v5031_v21, %v5031_v21  ;;  %v10740_v18 = vpop.eup %10739  ;;  %v5337_v21 = vrot.slane %v12914_v36, 6  ;;  %v13431_v61 = vld [vmem:[%s14437_s6 + $0x60] ss:$16 sps:$4 sm:$0xff]   ;;  %v13443_v36 = vld [vmem:[%s14437_s6 + $0x84] ss:$16 sps:$4 sm:$0xff]  }
 0x6d8   :  { %10743 = vrcp.f32 %v5320_v59  ;;  %v10742_v39 = vpop.eup %10741  ;;  %v13436_v59 = vld [vmem:[%s14437_s6 + $0x68] ss:$16 sps:$4 sm:$0xff]  }
 0x6d9   :  { %10745 = vrcp.f32 %v5326_v23  ;;  %v5036_v30 = vrot.slane %v5032_v60, 5  ;;  %5602 = vmatmul.mubr.bf16.vlgmr.msra.gmra.mrb[68].mxu1 %v5032_v60  ;;  %5643 = vmatmul.mubr.bf16.vlgmr.msra.gmra.mrb[60].mxu0 %v5032_v60 }
 0x6da   :  { %5812 = vmatpush1.bf16.msra.mxu1 %v13355_v43  ;;  %5853 = vmatpush1.bf16.msra.mxu0 %v13360_v42 }
 0x6db   :  { %5038 = vst [vmem:[%s14442_s11] sm:$0x8] %v5036_v30  ;;  %5813 = vmatprep.subr.bf16.mxu1 %v13365_v26  ;;  %5854 = vmatprep.subr.bf16.mxu0 %v13370_v38  ;;  %v5333_v30 = vadd.f32 1.0, %v10740_v18  ;;  %v13457_v18 = vld [vmem:[%s14437_s6 + $0x80] ss:$16 sps:$4 sm:$0xff]  }
 0x6dc   :  { %5843 = vmatprep.mubr.bf16.mxu1 %v14687_v44  ;;  %5884 = vmatprep.mubr.bf16.mxu0 %v14687_v44  ;;  %14916 = vst [vmem:[#allocation66_spill] sm:$0xff] %v13457_v18 }
 0x6dd   :  { %10747 = vrcp.f32 %v5333_v30  ;;  %v13499_v30 = vld [vmem:[%s14437_s6 + $0xcc] ss:$16 sps:$4 sm:$0xff]  }
 0x6de   :  { %5814 = vmatpush1.bf16.msra.mxu1 %v13377_v24  ;;  %5855 = vmatpush1.bf16.msra.mxu0 %v13382_v31  ;;  %14923 = vst [vmem:[#allocation41_spill] sm:$0xff] %v13499_v30 }
 0x6df   :  { %5815 = vmatprep.subr.bf16.mxu1 %v13392_v32  ;;  %5856 = vmatprep.subr.bf16.mxu0 %v13397_v4 }
 0x6e2   :  { %v10744_v33 = vpop.eup %10743  ;;  %5816 = vmatpush1.bf16.msra.mxu1 %v13406_v34  ;;  %5857 = vmatpush1.bf16.msra.mxu0 %v13411_v37  ;;  %v13448_v37 = vld [vmem:[%s14437_s6 + $0x8c] ss:$16 sps:$4 sm:$0xff]  }
 0x6e3   :  { %v10746_v23 = vpop.eup %10745  ;;  %v5340_v60 = vmul.f32 %v10744_v33, %v10742_v39  ;;  %5817 = vmatprep.subr.bf16.mxu1 %v13418_v52  ;;  %5858 = vmatprep.subr.bf16.mxu0 %v13423_v2  ;;  %14915 = vst [vmem:[#allocation9_spill] sm:$0xff] %v13448_v37  ;;  %v13462_v39 = vld [vmem:[%s14437_s6 + $0x88] ss:$16 sps:$4 sm:$0xff]   ;;  %v13474_v33 = vld [vmem:[%s14437_s6 + $0xac] ss:$16 sps:$4 sm:$0xff]  }
 0x6e4   :  { %v5339_v34 = vmul.f32 %v10746_v23, %v5337_v21  ;;  %14917 = vst [vmem:[#allocation10_spill] sm:$0xff] %v13462_v39  ;;  %14919 = vst [vmem:[#allocation37_spill] sm:$0xff] %v13474_v33  ;;  %v13482_v21 = vld [vmem:[%s14437_s6 + $0xa0] ss:$16 sps:$4 sm:$0xff]   ;;  %v13487_v23 = vld [vmem:[%s14437_s6 + $0xa8] ss:$16 sps:$4 sm:$0xff]  }
 0x6e5   :  { %14920 = vst [vmem:[#allocation38_spill] sm:$0xff] %v13482_v21  ;;  %14921 = vst [vmem:[#allocation39_spill] sm:$0xff] %v13487_v23 }
 0x6e6   :  { %v13450_v4 = vadd.f32 %v5340_v60, %v5339_v34  ;;  %5818 = vmatpush1.bf16.msra.mxu1 %v13431_v61  ;;  %5859 = vmatpush1.bf16.msra.mxu0 %v13436_v59  ;;  %v13469_v34 = vld [vmem:[%s14437_s6 + $0xa4] ss:$16 sps:$4 sm:$0xff]  }
 0x6e7   :  { %5819 = vmatprep.subr.bf16.mxu1 %v13443_v36  ;;  %5860 = vmatprep.subr.bf16.mxu0 %v13448_v37  ;;  %14918 = vst [vmem:[#allocation36_spill] sm:$0xff] %v13469_v34  ;;  %v13494_v60 = vld [vmem:[%s14437_s6 + $0xc4] ss:$16 sps:$4 sm:$0xff]  }
 0x6e8   :  { %10749 = vtanh.f32 %v13450_v4  ;;  %14922 = vst [vmem:[#allocation40_spill] sm:$0xff] %v13494_v60 }
 0x6ea   :  { %5820 = vmatpush1.bf16.msra.mxu1 %v13457_v18  ;;  %5861 = vmatpush1.bf16.msra.mxu0 %v13462_v39  ;;  %v10748_v39 = vpop.eup %10747 }
 0x6eb   :  { %5821 = vmatprep.subr.bf16.mxu1 %v13469_v34  ;;  %5862 = vmatprep.subr.bf16.mxu0 %v13474_v33  ;;  %v13506_v34 = vld [vmem:[%s14437_s6 + $0xc0] ss:$16 sps:$4 sm:$0xff]   ;;  %v13511_v33 = vld [vmem:[%s14437_s6 + $0xc8] ss:$16 sps:$4 sm:$0xff]  }
 0x6ec   :  { %14924 = vst [vmem:[#allocation42_spill] sm:$0xff] %v13511_v33 }
 0x6ee   :  { %5822 = vmatpush1.bf16.msra.mxu1 %v13482_v21  ;;  %5863 = vmatpush1.bf16.msra.mxu0 %v13487_v23  ;;  %v13518_v21 = vld [vmem:[%s14437_s6 + $0xe4] ss:$16 sps:$4 sm:$0xff]   ;;  %v13523_v23 = vld [vmem:[%s14437_s6 + $0xec] ss:$16 sps:$4 sm:$0xff]  }
 0x6ef   :  { %5823 = vmatprep.subr.bf16.mxu1 %v13494_v60  ;;  %5864 = vmatprep.subr.bf16.mxu0 %v13499_v30  ;;  %v13530_v30 = vld [vmem:[%s14437_s6 + $0xe0] ss:$16 sps:$4 sm:$0xff]   ;;  %v13535_v60 = vld [vmem:[%s14437_s6 + $0xe8] ss:$16 sps:$4 sm:$0xff]  }
 0x6f2   :  { %v10750_v18 = vpop.eup %10749  ;;  %5824 = vmatpush1.bf16.msra.mxu1 %v13506_v34  ;;  %5865 = vmatpush1.bf16.msra.mxu0 %v13511_v33 }
 0x6f3   :  { %5825 = vmatprep.subr.bf16.mxu1 %v13518_v21  ;;  %5866 = vmatprep.subr.bf16.mxu0 %v13523_v23  ;;  %v5343_v37 = vmul.f32 %v10750_v18, %v10748_v39 }
 0x6f5   :  { %v5344_v33 = vpack.c.bf16 %v5343_v37, %v5343_v37 }
 0x6f6   :  { %5826 = vmatpush1.bf16.msra.mxu1 %v13530_v30  ;;  %5867 = vmatpush1.bf16.msra.mxu0 %v13535_v60 }
 0x6f7   :  { %6137 = vmatprep.subr.bf16.mxu1 %v12932_v56  ;;  %6178 = vmatprep.subr.bf16.mxu0 %v12937_v3  ;;  %v14925_v56 = vld [vmem:[#allocation55_spill] sm:$0xff]  ;;  %v14926_v3 = vld [vmem:[#allocation56_spill] sm:$0xff] }
 0x6f9   :  { %5844 = vmatmul.mubr.bf16.vlgmr.msra.gmra.mrb[72].mxu1 %v5344_v33  ;;  %5885 = vmatmul.mubr.bf16.vlgmr.msra.gmra.mrb[64].mxu0 %v5344_v33 }
 0x6fa   :  { %6138 = vmatpush1.bf16.msra.mxu1 %v12946_v49  ;;  %6179 = vmatpush1.bf16.msra.mxu0 %v12951_v58  ;;  %v14927_v49 = vld [vmem:[#allocation57_spill] sm:$0xff]  ;;  %v14928_v58 = vld [vmem:[#allocation58_spill] sm:$0xff] }
 0x6fb   :  { %6139 = vmatprep.subr.bf16.mxu1 %v12958_v19  ;;  %6180 = vmatprep.subr.bf16.mxu0 %v12963_v35  ;;  %v14929_v19 = vld [vmem:[#allocation59_spill] sm:$0xff]  ;;  %v14930_v35 = vld [vmem:[#allocation60_spill] sm:$0xff] }
 0x6fc   :  { %6169 = vmatprep.mubr.bf16.mxu1 %v14687_v44  ;;  %6210 = vmatprep.mubr.bf16.mxu0 %v14687_v44 }
 0x6fe   :  { %6140 = vmatpush1.bf16.msra.mxu1 %v12972_v62  ;;  %6181 = vmatpush1.bf16.msra.mxu0 %v12977_v54  ;;  %v14931_v62 = vld [vmem:[#allocation61_spill] sm:$0xff]  ;;  %v14932_v54 = vld [vmem:[#allocation62_spill] sm:$0xff] }
 0x6ff   :  { %6141 = vmatprep.subr.bf16.mxu1 %v12984_v5  ;;  %6182 = vmatprep.subr.bf16.mxu0 %v12989_v6  ;;  %v14933_v5 = vld [vmem:[#allocation63_spill] sm:$0xff]  ;;  %v14934_v6 = vld [vmem:[#allocation64_spill] sm:$0xff] }
 0x702   :  { %6142 = vmatpush1.bf16.msra.mxu1 %v12998_v7  ;;  %6183 = vmatpush1.bf16.msra.mxu0 %v13003_v8  ;;  %v14935_v7 = vld [vmem:[#allocation65_spill] sm:$0xff]  ;;  %v14936_v8 = vld [vmem:[#allocation11_spill] sm:$0xff] }
 0x703   :  { %6143 = vmatprep.subr.bf16.mxu1 %v13010_v9  ;;  %6184 = vmatprep.subr.bf16.mxu0 %v13015_v10  ;;  %v14937_v9 = vld [vmem:[#allocation12_spill] sm:$0xff]  ;;  %v14938_v10 = vld [vmem:[#allocation13_spill] sm:$0xff] }
 0x706   :  { %6144 = vmatpush1.bf16.msra.mxu1 %v13022_v11  ;;  %6185 = vmatpush1.bf16.msra.mxu0 %v13027_v12  ;;  %v14939_v11 = vld [vmem:[#allocation14_spill] sm:$0xff]  ;;  %v14940_v12 = vld [vmem:[#allocation15_spill] sm:$0xff] }
 0x707   :  { %6145 = vmatprep.subr.bf16.mxu1 %v13034_v13  ;;  %6186 = vmatprep.subr.bf16.mxu0 %v13039_v14  ;;  %v14941_v13 = vld [vmem:[#allocation16_spill] sm:$0xff]  ;;  %v14942_v14 = vld [vmem:[#allocation17_spill] sm:$0xff] }
 0x70a   :  { %6146 = vmatpush1.bf16.msra.mxu1 %v13046_v46  ;;  %6187 = vmatpush1.bf16.msra.mxu0 %v13051_v15  ;;  %v14943_v46 = vld [vmem:[#allocation18_spill] sm:$0xff]  ;;  %v14944_v15 = vld [vmem:[#allocation20_spill] sm:$0xff] }
 0x70b   :  { %6147 = vmatprep.subr.bf16.mxu1 %v13058_v16  ;;  %6188 = vmatprep.subr.bf16.mxu0 %v13063_v47  ;;  %v14945_v16 = vld [vmem:[#allocation19_spill] sm:$0xff]  ;;  %v14946_v47 = vld [vmem:[#allocation21_spill] sm:$0xff] }
 0x70e   :  { %6148 = vmatpush1.bf16.msra.mxu1 %v13070_v25  ;;  %6189 = vmatpush1.bf16.msra.mxu0 %v13075_v29  ;;  %v14947_v25 = vld [vmem:[#allocation22_spill] sm:$0xff]  ;;  %v14948_v29 = vld [vmem:[#allocation24_spill] sm:$0xff] }
 0x70f   :  { %6149 = vmatprep.subr.bf16.mxu1 %v13082_v45  ;;  %6190 = vmatprep.subr.bf16.mxu0 %v13087_v48  ;;  %v14949_v45 = vld [vmem:[#allocation23_spill] sm:$0xff]  ;;  %v14950_v48 = vld [vmem:[#allocation25_spill] sm:$0xff] }
 0x712   :  { %6150 = vmatpush1.bf16.msra.mxu1 %v13094_v40  ;;  %6191 = vmatpush1.bf16.msra.mxu0 %v13099_v22  ;;  %v14951_v40 = vld [vmem:[#allocation26_spill] sm:$0xff]  ;;  %v14952_v22 = vld [vmem:[#allocation28_spill] sm:$0xff] }
 0x713   :  { %6151 = vmatprep.subr.bf16.mxu1 %v13106_v41  ;;  %6192 = vmatprep.subr.bf16.mxu0 %v13111_v50  ;;  %v14953_v41 = vld [vmem:[#allocation27_spill] sm:$0xff]  ;;  %v14954_v50 = vld [vmem:[#allocation29_spill] sm:$0xff] }
 0x716   :  { %6152 = vmatpush1.bf16.msra.mxu1 %v13118_v51  ;;  %6193 = vmatpush1.bf16.msra.mxu0 %v13123_v27  ;;  %v14955_v51 = vld [vmem:[#allocation30_spill] sm:$0xff]  ;;  %v14956_v27 = vld [vmem:[#allocation32_spill] sm:$0xff] }
 0x717   :  { %6487 = vmatprep.subr.bf16.mxu1 %v13136_v17  ;;  %6528 = vmatprep.subr.bf16.mxu0 %v14925_v56  ;;  %v14957_v17 = vld [vmem:[#allocation31_spill] sm:$0xff] }
 0x719   :  { %6170 = vmatmul.mubr.bf16.vlgmr.msra.gmra.mrb[76].mxu1 %v5344_v33  ;;  %6211 = vmatmul.mubr.bf16.vlgmr.msra.gmra.mrb[68].mxu0 %v5344_v33 }
 0x71a   :  { %6488 = vmatpush1.bf16.msra.mxu1 %v14926_v3  ;;  %6529 = vmatpush1.bf16.msra.mxu0 %v14927_v49 }
 0x71b   :  { %6489 = vmatprep.subr.bf16.mxu1 %v14928_v58  ;;  %6530 = vmatprep.subr.bf16.mxu0 %v14929_v19  ;;  %v5893_v19 = vld [vmem:[%s14439_s8] sm:$0xf] }
 0x71c   :  { %6519 = vmatprep.mubr.bf16.mxu1 %v14687_v44  ;;  %6560 = vmatprep.mubr.bf16.mxu0 %v14687_v44 }
 0x71e   :  { %6490 = vmatpush1.bf16.msra.mxu1 %v14930_v35  ;;  %6531 = vmatpush1.bf16.msra.mxu0 %v14931_v62  ;;  %v14958_v35 = vld [vmem:[#allocation8_spill] sm:$0xff] }
 0x71f   :  { %6491 = vmatprep.subr.bf16.mxu1 %v14932_v54  ;;  %6532 = vmatprep.subr.bf16.mxu0 %v14933_v5  ;;  %v5898_v62 = vrot.slane %v5893_v19, %v14958_v35 }
 0x722   :  { %6492 = vmatpush1.bf16.msra.mxu1 %v14934_v6  ;;  %6533 = vmatpush1.bf16.msra.mxu0 %v14935_v7  ;;  %v5902_v6 = vrot.slane %v5893_v19, %v14747_v53 }
 0x723   :  { %6493 = vmatprep.subr.bf16.mxu1 %v14936_v8  ;;  %6534 = vmatprep.subr.bf16.mxu0 %v14937_v9 }
 0x726   :  { %6494 = vmatpush1.bf16.msra.mxu1 %v14938_v10  ;;  %6535 = vmatpush1.bf16.msra.mxu0 %v14939_v11 }
 0x727   :  { %6495 = vmatprep.subr.bf16.mxu1 %v14940_v12  ;;  %6536 = vmatprep.subr.bf16.mxu0 %v14941_v13 }
 0x72a   :  { %6496 = vmatpush1.bf16.msra.mxu1 %v14942_v14  ;;  %6537 = vmatpush1.bf16.msra.mxu0 %v14943_v46 }
 0x72b   :  { %6497 = vmatprep.subr.bf16.mxu1 %v14944_v15  ;;  %6538 = vmatprep.subr.bf16.mxu0 %v14945_v16 }
 0x72e   :  { %6498 = vmatpush1.bf16.msra.mxu1 %v14946_v47  ;;  %6539 = vmatpush1.bf16.msra.mxu0 %v14947_v25 }
 0x72f   :  { %6499 = vmatprep.subr.bf16.mxu1 %v14948_v29  ;;  %6540 = vmatprep.subr.bf16.mxu0 %v14949_v45  ;;  %v5910_v45 = vrot.slane %v5893_v19, %v14748_v1 }
 0x732   :  { %6500 = vmatpush1.bf16.msra.mxu1 %v14950_v48  ;;  %6541 = vmatpush1.bf16.msra.mxu0 %v14951_v40  ;;  %v5906_v40 = vrot.slane %v5893_v19, %v14749_v63 }
 0x733   :  { %6501 = vmatprep.subr.bf16.mxu1 %v14952_v22  ;;  %6542 = vmatprep.subr.bf16.mxu0 %v14953_v41 }
 0x736   :  { %6502 = vmatpush1.bf16.msra.mxu1 %v14954_v50  ;;  %6543 = vmatpush1.bf16.msra.mxu0 %v14955_v51 }
 0x737   :  { %6732 = vmatprep.subr.bf16.mxu1 %v14956_v27  ;;  %6773 = vmatprep.subr.bf16.mxu0 %v14957_v17 }
 0x7ac   :  { %v5603_v37 = vpop.f32.mrb[68].mxu1  ;;  %v5644_v18 = vpop.f32.mrb[60].mxu0 }
 0x7ad   :  { %v5605_v39 = vpop.f32.mrb[69].mxu1  ;;  %v5646_v33 = vpop.f32.mrb[61].mxu0 }
 0x7ae   :  { %v5607_v56 = vpop.f32.mrb[70].mxu1  ;;  %v5648_v3 = vpop.f32.mrb[62].mxu0 }
 0x7af   :  { %v5608_v49 = vpop.f32.mrb[71].mxu1  ;;  %v5649_v58 = vpop.f32.mrb[63].mxu0 }
 0x7cc   :  { %v5845_v54 = vpop.f32.mrb[72].mxu1  ;;  %v5886_v5 = vpop.f32.mrb[64].mxu0 }
 0x7cd   :  { %v5846_v7 = vadd.f32 %v5845_v54, %v5603_v37  ;;  %v5887_v8 = vadd.f32 %v5886_v5, %v5644_v18  ;;  %v5847_v9 = vpop.f32.mrb[73].mxu1  ;;  %v5888_v10 = vpop.f32.mrb[65].mxu0 }
 0x7ce   :  { %v5848_v11 = vadd.f32 %v5847_v9, %v5605_v39  ;;  %v5889_v12 = vadd.f32 %v5888_v10, %v5646_v33  ;;  %v5849_v13 = vpop.f32.mrb[74].mxu1  ;;  %v5890_v14 = vpop.f32.mrb[66].mxu0 }
 0x7cf   :  { %v5915_v46 = vadd.f32 %v5898_v62, %v5846_v7  ;;  %v5850_v15 = vpop.f32.mrb[75].mxu1  ;;  %v5891_v16 = vpop.f32.mrb[67].mxu0  ;;  %v5917_v41 = vadd.f32 %v5906_v40, %v5887_v8 }
 0x7d0   :  { %v5916_v47 = vadd.f32 %v5902_v6, %v5848_v11  ;;  %v5918_v48 = vadd.f32 %v5910_v45, %v5889_v12 }
 0x7d1   :  { %v9426_v25 = vmul.f32 -1.442695, %v5915_v46 }
 0x7d2   :  { %v9427_v29 = vmul.f32 -1.442695, %v5916_v47  ;;  %v9428_v22 = vmul.f32 -1.442695, %v5918_v48 }
 0x7d3   :  { %10751 = vpow2.f32 %v9426_v25 }
 0x7d4   :  { %10753 = vpow2.f32 %v9427_v29 }
 0x7d5   :  { %10755 = vpow2.f32 %v9428_v22 }
 0x7d6   :  { %10757 = vtanh.f32 %v5917_v41 }
 0x7dd   :  { %v10752_v50 = vpop.eup %10751 }
 0x7de   :  { %v10754_v51 = vpop.eup %10753  ;;  %v5922_v27 = vadd.f32 1.0, %v10752_v50 }
 0x7df   :  { %v5928_v17 = vadd.f32 1.0, %v10754_v51  ;;  %v10756_v37 = vpop.eup %10755 }
 0x7e0   :  { %10759 = vrcp.f32 %v5922_v27  ;;  %v10758_v18 = vpop.eup %10757  ;;  %v5935_v3 = vadd.f32 1.0, %v10756_v37  ;;  %v14959_v27 = vld [vmem:[#allocation33_spill] sm:$0xff]  ;;  %v6255_v37 = vrot.slane %v13450_v4, 6  ;;  %v14965_v4 = vld [vmem:[#allocation36_spill] sm:$0xff] }
 0x7e1   :  { %10761 = vrcp.f32 %v5928_v17  ;;  %v14960_v17 = vld [vmem:[#allocation34_spill] sm:$0xff] }
 0x7e2   :  { %10763 = vrcp.f32 %v5935_v3  ;;  %v14970_v3 = vld [vmem:[#allocation41_spill] sm:$0xff] }
 0x7ea   :  { %v10760_v39 = vpop.eup %10759 }
 0x7eb   :  { %v10762_v33 = vpop.eup %10761  ;;  %v5939_v56 = vmul.f32 %v10760_v39, %v10758_v18 }
 0x7ec   :  { %v5938_v49 = vmul.f32 %v10762_v33, %v13346_v55  ;;  %v6171_v58 = vpop.f32.mrb[76].mxu1  ;;  %v6212_v19 = vpop.f32.mrb[68].mxu0 }
 0x7ed   :  { %v6223_v62 = vrot.slane %v6171_v58, 6  ;;  %v6173_v54 = vpop.f32.mrb[77].mxu1  ;;  %v6214_v5 = vpop.f32.mrb[69].mxu0  ;;  %v6225_v16 = vrot.slane %v6212_v19, 6  ;;  %v13666_v19 = vld [vmem:[%s14435_s4 + $0x4] ss:$16 sps:$4 sm:$0xff]  }
 0x7ee   :  { %v13619_v6 = vadd.f32 %v5939_v56, %v5938_v49  ;;  %v6224_v7 = vrot.slane %v6173_v54, 6  ;;  %v6175_v8 = vpop.f32.mrb[78].mxu1  ;;  %v6216_v9 = vpop.f32.mrb[70].mxu0  ;;  %v6226_v46 = vrot.slane %v6214_v5, 6  ;;  %v14966_v56 = vld [vmem:[#allocation37_spill] sm:$0xff]  ;;  %v14971_v49 = vld [vmem:[#allocation42_spill] sm:$0xff] }
 0x7ef   :  { %v6231_v10 = vadd.f32 %v14908_v0, %v6223_v62  ;;  %v6176_v11 = vpop.f32.mrb[79].mxu1  ;;  %v6217_v12 = vpop.f32.mrb[71].mxu0  ;;  %v6233_v45 = vadd.f32 %v14911_v20, %v6225_v16  ;;  %v13671_v62 = vld [vmem:[%s14435_s4 + $0xc] ss:$16 sps:$4 sm:$0xff]   ;;  %v13706_v8 = vld [vmem:[%s14435_s4 + $0x20] ss:$16 sps:$4 sm:$0xff]  }
 0x7f0   :  { %v6232_v13 = vadd.f32 %v14909_v28, %v6224_v7  ;;  %10765 = vtanh.f32 %v13619_v6  ;;  %v6234_v15 = vadd.f32 %v14910_v57, %v6226_v46  ;;  %v10764_v47 = vpop.eup %10763  ;;  %v13711_v9 = vld [vmem:[%s14435_s4 + $0x28] ss:$16 sps:$4 sm:$0xff]   ;;  %v13723_v11 = vld [vmem:[%s14435_s4 + $0x4c] ss:$16 sps:$4 sm:$0xff]   ;;  %v13732_v12 = vld [vmem:[%s14435_s4 + $0x40] ss:$16 sps:$4 sm:$0xff]  }
 0x7f1   :  { %v9461_v55 = vmul.f32 -1.442695, %v6231_v10  ;;  %v13718_v10 = vld [vmem:[%s14435_s4 + $0x44] ss:$16 sps:$4 sm:$0xff]   ;;  %v13756_v46 = vld [vmem:[%s14435_s4 + $0x60] ss:$16 sps:$4 sm:$0xff]  }
 0x7f2   :  { %v9462_v14 = vmul.f32 -1.442695, %v6232_v13  ;;  %v9463_v29 = vmul.f32 -1.442695, %v6234_v15  ;;  %v13737_v13 = vld [vmem:[%s14435_s4 + $0x48] ss:$16 sps:$4 sm:$0xff]  }
 0x7f3   :  { %10767 = vpow2.f32 %v9461_v55  ;;  %v13744_v55 = vld [vmem:[%s14435_s4 + $0x64] ss:$16 sps:$4 sm:$0xff]   ;;  %v13761_v15 = vld [vmem:[%s14435_s4 + $0x68] ss:$16 sps:$4 sm:$0xff]  }
 0x7f4   :  { %10769 = vpow2.f32 %v9462_v14  ;;  %v13749_v14 = vld [vmem:[%s14435_s4 + $0x6c] ss:$16 sps:$4 sm:$0xff]   ;;  %v13768_v16 = vld [vmem:[%s14435_s4 + $0x84] ss:$16 sps:$4 sm:$0xff]  }
 0x7f5   :  { %10771 = vpow2.f32 %v9463_v29  ;;  %v13785_v29 = vld [vmem:[%s14435_s4 + $0x88] ss:$16 sps:$4 sm:$0xff]  }
 0x7f6   :  { %10773 = vtanh.f32 %v6233_v45  ;;  %v13792_v45 = vld [vmem:[%s14435_s4 + $0xa4] ss:$16 sps:$4 sm:$0xff]  }
 0x7fa   :  { %v10766_v25 = vpop.eup %10765 }
 0x7fb   :  { %v5942_v48 = vmul.f32 %v10766_v25, %v10764_v47  ;;  %v13773_v47 = vld [vmem:[%s14435_s4 + $0x8c] ss:$16 sps:$4 sm:$0xff]   ;;  %v13780_v25 = vld [vmem:[%s14435_s4 + $0x80] ss:$16 sps:$4 sm:$0xff]  }
 0x7fd   :  { %v10768_v40 = vpop.eup %10767  ;;  %v5943_v22 = vpack.c.bf16 %v5942_v48, %v5942_v48  ;;  %v13797_v48 = vld [vmem:[%s14435_s4 + $0xac] ss:$16 sps:$4 sm:$0xff]  }
 0x7fe   :  { %v10770_v41 = vpop.eup %10769  ;;  %v6238_v50 = vadd.f32 1.0, %v10768_v40  ;;  %v13804_v40 = vld [vmem:[%s14435_s4 + $0xa0] ss:$16 sps:$4 sm:$0xff]  }
 0x7ff   :  { %v6244_v51 = vadd.f32 1.0, %v10770_v41  ;;  %5944 = vst [vmem:[%s14442_s11 + $0x4] sm:$0x1] %v5943_v22  ;;  %6520 = vmatmul.mubr.bf16.vlgmr.msra.gmra.mrb[80].mxu1 %v5943_v22  ;;  %6561 = vmatmul.mubr.bf16.vlgmr.msra.gmra.mrb[72].mxu0 %v5943_v22  ;;  %v13809_v22 = vld [vmem:[%s14435_s4 + $0xa8] ss:$16 sps:$4 sm:$0xff]  }
 0x800   :  { %10775 = vrcp.f32 %v6238_v50  ;;  %6733 = vmatpush1.bf16.msra.mxu1 %v13355_v43  ;;  %6774 = vmatpush1.bf16.msra.mxu0 %v13360_v42  ;;  %v10772_v43 = vpop.eup %10771  ;;  %v14961_v42 = vld [vmem:[#allocation35_spill] sm:$0xff]  ;;  %v13821_v50 = vld [vmem:[%s14435_s4 + $0xcc] ss:$16 sps:$4 sm:$0xff]  }
 0x801   :  { %10777 = vrcp.f32 %v6244_v51  ;;  %6734 = vmatprep.subr.bf16.mxu1 %v13365_v26  ;;  %6775 = vmatprep.subr.bf16.mxu0 %v13370_v38  ;;  %v10774_v26 = vpop.eup %10773  ;;  %v13816_v41 = vld [vmem:[%s14435_s4 + $0xc4] ss:$16 sps:$4 sm:$0xff]   ;;  %v13828_v51 = vld [vmem:[%s14435_s4 + $0xc0] ss:$16 sps:$4 sm:$0xff]  }
 0x802   :  { %6764 = vmatprep.mubr.bf16.mxu1 %v14687_v44  ;;  %6805 = vmatprep.mubr.bf16.mxu0 %v14687_v44 }
 0x804   :  { %6735 = vmatpush1.bf16.msra.mxu1 %v13377_v24  ;;  %6776 = vmatpush1.bf16.msra.mxu0 %v13382_v31  ;;  %v6251_v31 = vadd.f32 1.0, %v10772_v43  ;;  %v13840_v43 = vld [vmem:[%s14435_s4 + $0xe4] ss:$16 sps:$4 sm:$0xff]  }
 0x805   :  { %6736 = vmatprep.subr.bf16.mxu1 %v13392_v32  ;;  %6777 = vmatprep.subr.bf16.mxu0 %v14959_v27  ;;  %v14962_v32 = vld [vmem:[#allocation9_spill] sm:$0xff]  ;;  %v13833_v27 = vld [vmem:[%s14435_s4 + $0xc8] ss:$16 sps:$4 sm:$0xff]  }
 0x806   :  { %10779 = vrcp.f32 %v6251_v31  ;;  %v13894_v31 = vld [vmem:[%s14438_s7 + $0x24] ss:$16 sps:$4 sm:$0xff]  }
 0x807   :  { %14979 = vst [vmem:[#allocation50_spill] sm:$0xff] %v13894_v31 }
 0x808   :  { %6737 = vmatpush1.bf16.msra.mxu1 %v14960_v17  ;;  %6778 = vmatpush1.bf16.msra.mxu0 %v14961_v42  ;;  %v13845_v17 = vld [vmem:[%s14435_s4 + $0xec] ss:$16 sps:$4 sm:$0xff]   ;;  %v13852_v42 = vld [vmem:[%s14435_s4 + $0xe0] ss:$16 sps:$4 sm:$0xff]  }
 0x809   :  { %6738 = vmatprep.subr.bf16.mxu1 %v13418_v52  ;;  %6779 = vmatprep.subr.bf16.mxu0 %v13423_v2  ;;  %v14963_v52 = vld [vmem:[#allocation66_spill] sm:$0xff]  ;;  %14972 = vst [vmem:[#allocation43_spill] sm:$0xff] %v13845_v17  ;;  %14973 = vst [vmem:[#allocation44_spill] sm:$0xff] %v13852_v42 }
 0x80a   :  { %v10776_v38 = vpop.eup %10775  ;;  %v14964_v2 = vld [vmem:[#allocation10_spill] sm:$0xff] }
 0x80b   :  { %v10778_v24 = vpop.eup %10777  ;;  %v6258_v18 = vmul.f32 %v10776_v38, %v10774_v26  ;;  %v13857_v26 = vld [vmem:[%s14435_s4 + $0xe8] ss:$16 sps:$4 sm:$0xff]   ;;  %v13870_v38 = vld [vmem:[%s14438_s7 + $0x4] ss:$16 sps:$4 sm:$0xff]  }
 0x80c   :  { %v6257_v39 = vmul.f32 %v10778_v24, %v6255_v37  ;;  %6739 = vmatpush1.bf16.msra.mxu1 %v13431_v61  ;;  %6780 = vmatpush1.bf16.msra.mxu0 %v13436_v59  ;;  %v14967_v61 = vld [vmem:[#allocation38_spill] sm:$0xff]  ;;  %v14968_v59 = vld [vmem:[#allocation39_spill] sm:$0xff]  ;;  %14974 = vst [vmem:[#allocation45_spill] sm:$0xff] %v13857_v26  ;;  %14975 = vst [vmem:[#allocation46_spill] sm:$0xff] %v13870_v38 }
 0x80d   :  { %6740 = vmatprep.subr.bf16.mxu1 %v13443_v36  ;;  %6781 = vmatprep.subr.bf16.mxu0 %v14962_v32  ;;  %v14969_v36 = vld [vmem:[#allocation40_spill] sm:$0xff]  ;;  %v13880_v24 = vld [vmem:[%s14438_s7] ss:$16 sps:$4 sm:$0xff]  }
 0x80e   :  { %v13648_v33 = vadd.f32 %v6258_v18, %v6257_v39  ;;  %v13875_v37 = vld [vmem:[%s14438_s7 + $0xc] ss:$16 sps:$4 sm:$0xff]   ;;  %14977 = vst [vmem:[#allocation48_spill] sm:$0xff] %v13880_v24  ;;  %v13885_v18 = vld [vmem:[%s14438_s7 + $0x8] ss:$16 sps:$4 sm:$0xff]  }
 0x80f   :  { %14976 = vst [vmem:[#allocation47_spill] sm:$0xff] %v13875_v37  ;;  %14978 = vst [vmem:[#allocation49_spill] sm:$0xff] %v13885_v18  ;;  %v13899_v39 = vld [vmem:[%s14438_s7 + $0x2c] ss:$16 sps:$4 sm:$0xff]   ;;  %v13904_v32 = vld [vmem:[%s14438_s7 + $0x20] ss:$16 sps:$4 sm:$0xff]  }
 0x810   :  { %6741 = vmatpush1.bf16.msra.mxu1 %v14963_v52  ;;  %6782 = vmatpush1.bf16.msra.mxu0 %v14964_v2  ;;  %10781 = vtanh.f32 %v13648_v33  ;;  %v10780_v58 = vpop.eup %10779  ;;  %14980 = vst [vmem:[#allocation51_spill] sm:$0xff] %v13899_v39  ;;  %14981 = vst [vmem:[#allocation52_spill] sm:$0xff] %v13904_v32  ;;  %v13909_v52 = vld [vmem:[%s14438_s7 + $0x28] ss:$16 sps:$4 sm:$0xff]   ;;  %v13918_v2 = vld [vmem:[%s14438_s7 + $0x44] ss:$16 sps:$4 sm:$0xff]  }
 0x811   :  { %6742 = vmatprep.subr.bf16.mxu1 %v14965_v4  ;;  %6783 = vmatprep.subr.bf16.mxu0 %v14966_v56  ;;  %14982 = vst [vmem:[#allocation53_spill] sm:$0xff] %v13909_v52  ;;  %14983 = vst [vmem:[#allocation54_spill] sm:$0xff] %v13918_v2  ;;  %v13923_v4 = vld [vmem:[%s14438_s7 + $0x4c] ss:$16 sps:$4 sm:$0xff]   ;;  %v13928_v56 = vld [vmem:[%s14438_s7 + $0x40] ss:$16 sps:$4 sm:$0xff]  }
 0x812   :  { %14984 = vst [vmem:[#allocation67_spill] sm:$0xff] %v13923_v4  ;;  %14985 = vst [vmem:[#allocation69_spill] sm:$0xff] %v13928_v56 }
 0x814   :  { %6743 = vmatpush1.bf16.msra.mxu1 %v14967_v61  ;;  %6784 = vmatpush1.bf16.msra.mxu0 %v14968_v59  ;;  %v13933_v61 = vld [vmem:[%s14438_s7 + $0x48] ss:$16 sps:$4 sm:$0xff]   ;;  %v13942_v59 = vld [vmem:[%s14438_s7 + $0x64] ss:$16 sps:$4 sm:$0xff]  }
 0x815   :  { %6744 = vmatprep.subr.bf16.mxu1 %v14969_v36  ;;  %6785 = vmatprep.subr.bf16.mxu0 %v14970_v3  ;;  %14986 = vst [vmem:[#allocation70_spill] sm:$0xff] %v13933_v61  ;;  %14987 = vst [vmem:[#allocation68_spill] sm:$0xff] %v13942_v59  ;;  %v13947_v36 = vld [vmem:[%s14438_s7 + $0x6c] ss:$16 sps:$4 sm:$0xff]   ;;  %v13952_v3 = vld [vmem:[%s14438_s7 + $0x60] ss:$16 sps:$4 sm:$0xff]  }
 0x816   :  { %14988 = vst [vmem:[#allocation55_spill] sm:$0xff] %v13947_v36  ;;  %14989 = vst [vmem:[#allocation56_spill] sm:$0xff] %v13952_v3 }
 0x818   :  { %6745 = vmatpush1.bf16.msra.mxu1 %v13506_v34  ;;  %6786 = vmatpush1.bf16.msra.mxu0 %v14971_v49  ;;  %v13957_v49 = vld [vmem:[%s14438_s7 + $0x68] ss:$16 sps:$4 sm:$0xff]  }
 0x819   :  { %6746 = vmatprep.subr.bf16.mxu1 %v13518_v21  ;;  %6787 = vmatprep.subr.bf16.mxu0 %v13523_v23  ;;  %v13680_v21 = vld [vmem:[%s14435_s4] ss:$16 sps:$4 sm:$0xff]   ;;  %v13685_v23 = vld [vmem:[%s14435_s4 + $0x8] ss:$16 sps:$4 sm:$0xff]   ;;  %14990 = vst [vmem:[#allocation57_spill] sm:$0xff] %v13957_v49 }
 0x81a   :  { %v10782_v54 = vpop.eup %10781 }
 0x81b   :  { %v6261_v5 = vmul.f32 %v10782_v54, %v10780_v58  ;;  %v13966_v58 = vld [vmem:[%s14438_s7 + $0x84] ss:$16 sps:$4 sm:$0xff]   ;;  %v13971_v54 = vld [vmem:[%s14438_s7 + $0x8c] ss:$16 sps:$4 sm:$0xff]  }
 0x81c   :  { %6747 = vmatpush1.bf16.msra.mxu1 %v13530_v30  ;;  %6788 = vmatpush1.bf16.msra.mxu0 %v13535_v60  ;;  %v13692_v60 = vld [vmem:[%s14435_s4 + $0x24] ss:$16 sps:$4 sm:$0xff]   ;;  %v13697_v30 = vld [vmem:[%s14435_s4 + $0x2c] ss:$16 sps:$4 sm:$0xff]   ;;  %14991 = vst [vmem:[#allocation58_spill] sm:$0xff] %v13966_v58  ;;  %14992 = vst [vmem:[#allocation59_spill] sm:$0xff] %v13971_v54 }
 0x81d   :  { %7063 = vmatprep.subr.bf16.mxu1 %v13666_v19  ;;  %7104 = vmatprep.subr.bf16.mxu0 %v13671_v62  ;;  %v6262_v34 = vpack.c.bf16 %v6261_v5, %v6261_v5  ;;  %v13976_v5 = vld [vmem:[%s14438_s7 + $0x80] ss:$16 sps:$4 sm:$0xff]  }
 0x81e   :  { %14993 = vst [vmem:[#allocation60_spill] sm:$0xff] %v13976_v5 }
 0x81f   :  { %v13687_v7 = vrot.slane %v6262_v34, 1  ;;  %v13981_v34 = vld [vmem:[%s14438_s7 + $0x88] ss:$16 sps:$4 sm:$0xff]  }
 0x820   :  { %14994 = vst [vmem:[#allocation61_spill] sm:$0xff] %v13981_v34 }
 0x821   :  { %6765 = vmatmul.mubr.bf16.vlgmr.msra.gmra.mrb[84].mxu1 %v13687_v7  ;;  %6806 = vmatmul.mubr.bf16.vlgmr.msra.gmra.mrb[76].mxu0 %v13687_v7 }
 0x822   :  { %7064 = vmatpush1.bf16.msra.mxu1 %v13680_v21  ;;  %7105 = vmatpush1.bf16.msra.mxu0 %v13685_v23 }
 0x823   :  { %7065 = vmatprep.subr.bf16.mxu1 %v13692_v60  ;;  %7106 = vmatprep.subr.bf16.mxu0 %v13697_v30 }
 0x824   :  { %7095 = vmatprep.mubr.bf16.mxu1 %v14687_v44  ;;  %7136 = vmatprep.mubr.bf16.mxu0 %v14687_v44 }
 0x826   :  { %7066 = vmatpush1.bf16.msra.mxu1 %v13706_v8  ;;  %7107 = vmatpush1.bf16.msra.mxu0 %v13711_v9 }
 0x827   :  { %7067 = vmatprep.subr.bf16.mxu1 %v13718_v10  ;;  %7108 = vmatprep.subr.bf16.mxu0 %v13723_v11 }
 0x82a   :  { %7068 = vmatpush1.bf16.msra.mxu1 %v13732_v12  ;;  %7109 = vmatpush1.bf16.msra.mxu0 %v13737_v13 }
 0x82b   :  { %7069 = vmatprep.subr.bf16.mxu1 %v13744_v55  ;;  %7110 = vmatprep.subr.bf16.mxu0 %v13749_v14 }
 0x82e   :  { %7070 = vmatpush1.bf16.msra.mxu1 %v13756_v46  ;;  %7111 = vmatpush1.bf16.msra.mxu0 %v13761_v15 }
 0x82f   :  { %7071 = vmatprep.subr.bf16.mxu1 %v13768_v16  ;;  %7112 = vmatprep.subr.bf16.mxu0 %v13773_v47 }
 0x832   :  { %7072 = vmatpush1.bf16.msra.mxu1 %v13780_v25  ;;  %7113 = vmatpush1.bf16.msra.mxu0 %v13785_v29 }
 0x833   :  { %7073 = vmatprep.subr.bf16.mxu1 %v13792_v45  ;;  %7114 = vmatprep.subr.bf16.mxu0 %v13797_v48 }
 0x836   :  { %7074 = vmatpush1.bf16.msra.mxu1 %v13804_v40  ;;  %7115 = vmatpush1.bf16.msra.mxu0 %v13809_v22 }
 0x837   :  { %7075 = vmatprep.subr.bf16.mxu1 %v13816_v41  ;;  %7116 = vmatprep.subr.bf16.mxu0 %v13821_v50 }
 0x83a   :  { %7076 = vmatpush1.bf16.msra.mxu1 %v13828_v51  ;;  %7117 = vmatpush1.bf16.msra.mxu0 %v13833_v27 }
 0x83b   :  { %7077 = vmatprep.subr.bf16.mxu1 %v13840_v43  ;;  %7118 = vmatprep.subr.bf16.mxu0 %v13845_v17 }
 0x83e   :  { %7078 = vmatpush1.bf16.msra.mxu1 %v13852_v42  ;;  %7119 = vmatpush1.bf16.msra.mxu0 %v13857_v26 }
 0x83f   :  { %7413 = vmatprep.subr.bf16.mxu1 %v13870_v38  ;;  %7454 = vmatprep.subr.bf16.mxu0 %v13875_v37 }
 0x841   :  { %7096 = vmatmul.mubr.bf16.vlgmr.msra.gmra.mrb[88].mxu1 %v13687_v7  ;;  %7137 = vmatmul.mubr.bf16.vlgmr.msra.gmra.mrb[80].mxu0 %v13687_v7  ;;  %v13990_v7 = vld [vmem:[%s14438_s7 + $0xa4] ss:$16 sps:$4 sm:$0xff]  }
 0x842   :  { %7445 = vmatprep.mubr.bf16.mxu1 %v14687_v44  ;;  %7486 = vmatprep.mubr.bf16.mxu0 %v14687_v44  ;;  %14995 = vst [vmem:[#allocation62_spill] sm:$0xff] %v13990_v7 }
 0x843   :  { %7414 = vmatpush1.bf16.msra.mxu1 %v13880_v24  ;;  %7455 = vmatpush1.bf16.msra.mxu0 %v13885_v18 }
 0x844   :  { %7415 = vmatprep.subr.bf16.mxu1 %v13894_v31  ;;  %7456 = vmatprep.subr.bf16.mxu0 %v13899_v39 }
 0x847   :  { %7416 = vmatpush1.bf16.msra.mxu1 %v13904_v32  ;;  %7457 = vmatpush1.bf16.msra.mxu0 %v13909_v52 }
 0x848   :  { %7417 = vmatprep.subr.bf16.mxu1 %v13918_v2  ;;  %7458 = vmatprep.subr.bf16.mxu0 %v13923_v4 }
 0x84b   :  { %7418 = vmatpush1.bf16.msra.mxu1 %v13928_v56  ;;  %7459 = vmatpush1.bf16.msra.mxu0 %v13933_v61  ;;  %v6814_v56 = vld [vmem:[%s14439_s8] sm:$0xf] }
 0x84c   :  { %7419 = vmatprep.subr.bf16.mxu1 %v13942_v59  ;;  %7460 = vmatprep.subr.bf16.mxu0 %v13947_v36  ;;  %v6819_v4 = vrot.slane %v6814_v56, %v14958_v35  ;;  %v6831_v35 = vrot.slane %v6814_v56, %v14748_v1 }
 0x84f   :  { %7420 = vmatpush1.bf16.msra.mxu1 %v13952_v3  ;;  %7461 = vmatpush1.bf16.msra.mxu0 %v13957_v49  ;;  %v13995_v49 = vld [vmem:[%s14438_s7 + $0xac] ss:$16 sps:$4 sm:$0xff]  }
 0x850   :  { %7421 = vmatprep.subr.bf16.mxu1 %v13966_v58  ;;  %7462 = vmatprep.subr.bf16.mxu0 %v13971_v54  ;;  %14996 = vst [vmem:[#allocation63_spill] sm:$0xff] %v13995_v49  ;;  %v14000_v58 = vld [vmem:[%s14438_s7 + $0xa0] ss:$16 sps:$4 sm:$0xff]   ;;  %v14019_v54 = vld [vmem:[%s14438_s7 + $0xcc] ss:$16 sps:$4 sm:$0xff]  }
 0x851   :  { %14997 = vst [vmem:[#allocation64_spill] sm:$0xff] %v14000_v58  ;;  %15000 = vst [vmem:[#allocation12_spill] sm:$0xff] %v14019_v54 }
 0x853   :  { %7422 = vmatpush1.bf16.msra.mxu1 %v13976_v5  ;;  %7463 = vmatpush1.bf16.msra.mxu0 %v13981_v34  ;;  %v14005_v5 = vld [vmem:[%s14438_s7 + $0xa8] ss:$16 sps:$4 sm:$0xff]   ;;  %v14014_v34 = vld [vmem:[%s14438_s7 + $0xc4] ss:$16 sps:$4 sm:$0xff]  }
 0x854   :  { %14998 = vst [vmem:[#allocation65_spill] sm:$0xff] %v14005_v5  ;;  %7423 = vmatprep.subr.bf16.mxu1 %v13990_v7  ;;  %7464 = vmatprep.subr.bf16.mxu0 %v13995_v49  ;;  %14999 = vst [vmem:[#allocation11_spill] sm:$0xff] %v14014_v34  ;;  %v14024_v7 = vld [vmem:[%s14438_s7 + $0xc0] ss:$16 sps:$4 sm:$0xff]   ;;  %v14043_v49 = vld [vmem:[%s14438_s7 + $0xec] ss:$16 sps:$4 sm:$0xff]  }
 0x855   :  { %15001 = vst [vmem:[#allocation13_spill] sm:$0xff] %v14024_v7  ;;  %15004 = vst [vmem:[#allocation16_spill] sm:$0xff] %v14043_v49 }
 0x857   :  { %7424 = vmatpush1.bf16.msra.mxu1 %v14000_v58  ;;  %7465 = vmatpush1.bf16.msra.mxu0 %v14005_v5  ;;  %v14029_v58 = vld [vmem:[%s14438_s7 + $0xc8] ss:$16 sps:$4 sm:$0xff]   ;;  %v14038_v5 = vld [vmem:[%s14438_s7 + $0xe4] ss:$16 sps:$4 sm:$0xff]  }
 0x858   :  { %15002 = vst [vmem:[#allocation14_spill] sm:$0xff] %v14029_v58  ;;  %7425 = vmatprep.subr.bf16.mxu1 %v14014_v34  ;;  %7466 = vmatprep.subr.bf16.mxu0 %v14019_v54  ;;  %15003 = vst [vmem:[#allocation15_spill] sm:$0xff] %v14038_v5  ;;  %v14048_v34 = vld [vmem:[%s14438_s7 + $0xe0] ss:$16 sps:$4 sm:$0xff]   ;;  %v14067_v54 = vld [vmem:[%s14437_s6 + $0xc] ss:$16 sps:$4 sm:$0xff]  }
 0x859   :  { %15005 = vst [vmem:[#allocation17_spill] sm:$0xff] %v14048_v34  ;;  %15008 = vst [vmem:[#allocation19_spill] sm:$0xff] %v14067_v54 }
 0x85b   :  { %7426 = vmatpush1.bf16.msra.mxu1 %v14024_v7  ;;  %7467 = vmatpush1.bf16.msra.mxu0 %v14029_v58  ;;  %v14053_v7 = vld [vmem:[%s14438_s7 + $0xe8] ss:$16 sps:$4 sm:$0xff]   ;;  %v14062_v58 = vld [vmem:[%s14437_s6 + $0x4] ss:$16 sps:$4 sm:$0xff]  }
 0x85c   :  { %15006 = vst [vmem:[#allocation18_spill] sm:$0xff] %v14053_v7  ;;  %7427 = vmatprep.subr.bf16.mxu1 %v14038_v5  ;;  %7468 = vmatprep.subr.bf16.mxu0 %v14043_v49  ;;  %15007 = vst [vmem:[#allocation20_spill] sm:$0xff] %v14062_v58 }
 0x85f   :  { %7428 = vmatpush1.bf16.msra.mxu1 %v14048_v34  ;;  %7469 = vmatpush1.bf16.msra.mxu0 %v14053_v7 }
 0x860   :  { %7658 = vmatprep.subr.bf16.mxu1 %v14062_v58  ;;  %7699 = vmatprep.subr.bf16.mxu0 %v14067_v54  ;;  %v6823_v58 = vrot.slane %v6814_v56, %v14747_v53 }
 0x8d2   :  { %v6521_v5 = vpop.f32.mrb[80].mxu1  ;;  %v6562_v49 = vpop.f32.mrb[72].mxu0 }
 0x8d3   :  { %v6523_v3 = vpop.f32.mrb[81].mxu1  ;;  %v6564_v34 = vpop.f32.mrb[73].mxu0 }
 0x8d4   :  { %v6525_v36 = vpop.f32.mrb[82].mxu1  ;;  %v6566_v7 = vpop.f32.mrb[74].mxu0 }
 0x8d5   :  { %v6526_v59 = vpop.f32.mrb[83].mxu1  ;;  %v6567_v61 = vpop.f32.mrb[75].mxu0 }
 0x8f4   :  { %v6766_v2 = vpop.f32.mrb[84].mxu1  ;;  %v6807_v52 = vpop.f32.mrb[76].mxu0 }
 0x8f5   :  { %v6767_v32 = vadd.f32 %v6766_v2, %v6521_v5  ;;  %v6808_v54 = vadd.f32 %v6807_v52, %v6562_v49  ;;  %v6768_v39 = vpop.f32.mrb[85].mxu1  ;;  %v6809_v31 = vpop.f32.mrb[77].mxu0  ;;  %v6827_v2 = vrot.slane %v6814_v56, %v14749_v63 }
 0x8f6   :  { %v6769_v18 = vadd.f32 %v6768_v39, %v6523_v3  ;;  %v6810_v24 = vadd.f32 %v6809_v31, %v6564_v34  ;;  %v6770_v36 = vpop.f32.mrb[86].mxu1  ;;  %v6811_v7 = vpop.f32.mrb[78].mxu0 }
 0x8f7   :  { %v6836_v59 = vadd.f32 %v6819_v4, %v6767_v32  ;;  %v6771_v61 = vpop.f32.mrb[87].mxu1  ;;  %v6812_v37 = vpop.f32.mrb[79].mxu0  ;;  %v6838_v49 = vadd.f32 %v6827_v2, %v6808_v54 }
 0x8f8   :  { %v6837_v38 = vadd.f32 %v6823_v58, %v6769_v18  ;;  %v6839_v17 = vadd.f32 %v6831_v35, %v6810_v24 }
 0x8f9   :  { %v9528_v26 = vmul.f32 -1.442695, %v6836_v59 }
 0x8fa   :  { %v9529_v42 = vmul.f32 -1.442695, %v6837_v38  ;;  %v9530_v52 = vmul.f32 -1.442695, %v6839_v17 }
 0x8fb   :  { %10783 = vpow2.f32 %v9528_v26 }
 0x8fc   :  { %10785 = vpow2.f32 %v9529_v42 }
 0x8fd   :  { %10787 = vpow2.f32 %v9530_v52 }
 0x8fe   :  { %10789 = vtanh.f32 %v6838_v49 }
 0x905   :  { %v10784_v5 = vpop.eup %10783 }
 0x906   :  { %v10786_v39 = vpop.eup %10785  ;;  %v6843_v31 = vadd.f32 1.0, %v10784_v5 }
 0x907   :  { %v6849_v32 = vadd.f32 1.0, %v10786_v39  ;;  %v10788_v37 = vpop.eup %10787 }
 0x908   :  { %10791 = vrcp.f32 %v6843_v31  ;;  %v10790_v18 = vpop.eup %10789  ;;  %v6856_v26 = vadd.f32 1.0, %v10788_v37 }
 0x909   :  { %10793 = vrcp.f32 %v6849_v32 }
 0x90a   :  { %10795 = vrcp.f32 %v6856_v26  ;;  %v14094_v26 = vld [vmem:[%s14437_s6 + $0x8] ss:$16 sps:$4 sm:$0xff]  }
 0x912   :  { %v10792_v38 = vpop.eup %10791 }
 0x913   :  { %v10794_v4 = vpop.eup %10793  ;;  %v6860_v3 = vmul.f32 %v10792_v38, %v10790_v18 }
 0x914   :  { %v6859_v35 = vmul.f32 %v10794_v4, %v13619_v6  ;;  %v7097_v42 = vpop.f32.mrb[88].mxu1  ;;  %v7138_v24 = vpop.f32.mrb[80].mxu0 }
 0x915   :  { %v7149_v17 = vrot.slane %v7097_v42, 4  ;;  %v7099_v56 = vpop.f32.mrb[89].mxu1  ;;  %v7140_v58 = vpop.f32.mrb[81].mxu0  ;;  %v7151_v31 = vrot.slane %v7138_v24, 4  ;;  %v14099_v24 = vld [vmem:[%s14437_s6 + $0x24] ss:$16 sps:$4 sm:$0xff]  }
 0x916   :  { %v14079_v54 = vadd.f32 %v6860_v3, %v6859_v35  ;;  %v7150_v34 = vrot.slane %v7099_v56, 4  ;;  %v7101_v36 = vpop.f32.mrb[90].mxu1  ;;  %v7142_v7 = vpop.f32.mrb[82].mxu0  ;;  %v7152_v5 = vrot.slane %v7140_v58, 4  ;;  %v14089_v3 = vld [vmem:[%s14437_s6] ss:$16 sps:$4 sm:$0xff]  }
 0x917   :  { %v7157_v59 = vadd.f32 %v14908_v0, %v7149_v17  ;;  %v7102_v61 = vpop.f32.mrb[91].mxu1  ;;  %v7143_v2 = vpop.f32.mrb[83].mxu0  ;;  %v7159_v38 = vadd.f32 %v14911_v20, %v7151_v31  ;;  %v14104_v17 = vld [vmem:[%s14437_s6 + $0x2c] ss:$16 sps:$4 sm:$0xff]   ;;  %v14111_v7 = vld [vmem:[%s14437_s6 + $0x20] ss:$16 sps:$4 sm:$0xff]  }
 0x918   :  { %v7158_v52 = vadd.f32 %v14909_v28, %v7150_v34  ;;  %10797 = vtanh.f32 %v14079_v54  ;;  %v7160_v39 = vadd.f32 %v14910_v57, %v7152_v5  ;;  %v10796_v32 = vpop.eup %10795  ;;  %v14126_v61 = vld [vmem:[%s14437_s6 + $0x44] ss:$16 sps:$4 sm:$0xff]   ;;  %v14131_v2 = vld [vmem:[%s14437_s6 + $0x4c] ss:$16 sps:$4 sm:$0xff]   ;;  %v14164_v31 = vld [vmem:[%s14437_s6 + $0x60] ss:$16 sps:$4 sm:$0xff]  }
 0x919   :  { %v9564_v6 = vmul.f32 -1.442695, %v7157_v59  ;;  %v14116_v59 = vld [vmem:[%s14437_s6 + $0x28] ss:$16 sps:$4 sm:$0xff]   ;;  %v14157_v5 = vld [vmem:[%s14437_s6 + $0x6c] ss:$16 sps:$4 sm:$0xff]  }
 0x91a   :  { %v9565_v49 = vmul.f32 -1.442695, %v7158_v52  ;;  %v9566_v18 = vmul.f32 -1.442695, %v7160_v39  ;;  %v14140_v52 = vld [vmem:[%s14437_s6 + $0x40] ss:$16 sps:$4 sm:$0xff]  }
 0x91b   :  { %10799 = vpow2.f32 %v9564_v6  ;;  %v14145_v6 = vld [vmem:[%s14437_s6 + $0x48] ss:$16 sps:$4 sm:$0xff]   ;;  %15009 = vst [vmem:[#allocation21_spill] sm:$0xff] %v14157_v5 }
 0x91c   :  { %10801 = vpow2.f32 %v9565_v49  ;;  %v14152_v49 = vld [vmem:[%s14437_s6 + $0x64] ss:$16 sps:$4 sm:$0xff]  }
 0x91d   :  { %10803 = vpow2.f32 %v9566_v18  ;;  %v14176_v18 = vld [vmem:[%s14437_s6 + $0x84] ss:$16 sps:$4 sm:$0xff]  }
 0x91e   :  { %10805 = vtanh.f32 %v7159_v38  ;;  %v14181_v38 = vld [vmem:[%s14437_s6 + $0x8c] ss:$16 sps:$4 sm:$0xff]  }
 0x922   :  { %v10798_v37 = vpop.eup %10797 }
 0x923   :  { %v6863_v4 = vmul.f32 %v10798_v37, %v10796_v32  ;;  %v14169_v32 = vld [vmem:[%s14437_s6 + $0x68] ss:$16 sps:$4 sm:$0xff]  }
 0x925   :  { %v10800_v35 = vpop.eup %10799  ;;  %v6864_v42 = vpack.c.bf16 %v6863_v4, %v6863_v4 }
 0x926   :  { %v10802_v56 = vpop.eup %10801  ;;  %v7164_v58 = vadd.f32 1.0, %v10800_v35  ;;  %v7181_v35 = vrot.slane %v13648_v33, 6  ;;  %v14201_v33 = vld [vmem:[%s14437_s6 + $0xa4] ss:$16 sps:$4 sm:$0xff]  }
 0x927   :  { %v7170_v34 = vadd.f32 1.0, %v10802_v56  ;;  %v6868_v36 = vrot.slane %v6864_v42, 7  ;;  %7446 = vmatmul.mubr.bf16.vlgmr.msra.gmra.mrb[92].mxu1 %v6864_v42  ;;  %7487 = vmatmul.mubr.bf16.vlgmr.msra.gmra.mrb[84].mxu0 %v6864_v42  ;;  %v10804_v39 = vpop.eup %10803  ;;  %15011 = vst [vmem:[#allocation24_spill] sm:$0xff] %v14201_v33 }
 0x928   :  { %10807 = vrcp.f32 %v7164_v58  ;;  %7659 = vmatpush1.bf16.msra.mxu1 %v14089_v3  ;;  %7700 = vmatpush1.bf16.msra.mxu0 %v14094_v26  ;;  %v10806_v37 = vpop.eup %10805  ;;  %v7177_v58 = vadd.f32 1.0, %v10804_v39  ;;  %v14206_v39 = vld [vmem:[%s14437_s6 + $0xac] ss:$16 sps:$4 sm:$0xff]  }
 0x929   :  { %10809 = vrcp.f32 %v7170_v34  ;;  %6870 = vst [vmem:[%s14442_s11 + $0x4] sm:$0x2] %v6868_v36  ;;  %7660 = vmatprep.subr.bf16.mxu1 %v14099_v24  ;;  %7701 = vmatprep.subr.bf16.mxu0 %v14104_v17  ;;  %v14189_v36 = vld [vmem:[%s14437_s6 + $0x80] ss:$16 sps:$4 sm:$0xff]   ;;  %15012 = vst [vmem:[#allocation23_spill] sm:$0xff] %v14206_v39 }
 0x92a   :  { %7690 = vmatprep.mubr.bf16.mxu1 %v14687_v44  ;;  %7731 = vmatprep.mubr.bf16.mxu0 %v14687_v44  ;;  %10811 = vrcp.f32 %v7177_v58  ;;  %v14240_v58 = vld [vmem:[%s14437_s6 + $0xc0] ss:$16 sps:$4 sm:$0xff]  }
 0x92b   :  { %15017 = vst [vmem:[#allocation29_spill] sm:$0xff] %v14240_v58 }
 0x92c   :  { %7661 = vmatpush1.bf16.msra.mxu1 %v14111_v7  ;;  %7702 = vmatpush1.bf16.msra.mxu0 %v14116_v59 }
 0x92d   :  { %7662 = vmatprep.subr.bf16.mxu1 %v14126_v61  ;;  %7703 = vmatprep.subr.bf16.mxu0 %v14131_v2 }
 0x930   :  { %7663 = vmatpush1.bf16.msra.mxu1 %v14140_v52  ;;  %7704 = vmatpush1.bf16.msra.mxu0 %v14145_v6 }
 0x931   :  { %7664 = vmatprep.subr.bf16.mxu1 %v14152_v49  ;;  %7705 = vmatprep.subr.bf16.mxu0 %v14157_v5  ;;  %v14194_v5 = vld [vmem:[%s14437_s6 + $0x88] ss:$16 sps:$4 sm:$0xff]  }
 0x932   :  { %v10808_v4 = vpop.eup %10807  ;;  %15010 = vst [vmem:[#allocation22_spill] sm:$0xff] %v14194_v5 }
 0x933   :  { %v10810_v42 = vpop.eup %10809  ;;  %v7184_v56 = vmul.f32 %v10808_v4, %v10806_v37  ;;  %v14215_v4 = vld [vmem:[%s14437_s6 + $0xa0] ss:$16 sps:$4 sm:$0xff]  }
 0x934   :  { %v7183_v34 = vmul.f32 %v10810_v42, %v7181_v35  ;;  %7665 = vmatpush1.bf16.msra.mxu1 %v14164_v31  ;;  %7706 = vmatpush1.bf16.msra.mxu0 %v14169_v32  ;;  %15013 = vst [vmem:[#allocation25_spill] sm:$0xff] %v14215_v4  ;;  %v14220_v35 = vld [vmem:[%s14437_s6 + $0xa8] ss:$16 sps:$4 sm:$0xff]   ;;  %v14228_v42 = vld [vmem:[%s14437_s6 + $0xc4] ss:$16 sps:$4 sm:$0xff]  }
 0x935   :  { %7666 = vmatprep.subr.bf16.mxu1 %v14176_v18  ;;  %7707 = vmatprep.subr.bf16.mxu0 %v14181_v38  ;;  %15014 = vst [vmem:[#allocation26_spill] sm:$0xff] %v14220_v35  ;;  %15015 = vst [vmem:[#allocation28_spill] sm:$0xff] %v14228_v42 }
 0x936   :  { %v14208_v37 = vadd.f32 %v7184_v56, %v7183_v34  ;;  %v14233_v56 = vld [vmem:[%s14437_s6 + $0xcc] ss:$16 sps:$4 sm:$0xff]   ;;  %v14245_v34 = vld [vmem:[%s14437_s6 + $0xc8] ss:$16 sps:$4 sm:$0xff]  }
 0x937   :  { %15016 = vst [vmem:[#allocation27_spill] sm:$0xff] %v14233_v56  ;;  %15018 = vst [vmem:[#allocation30_spill] sm:$0xff] %v14245_v34 }
 0x938   :  { %7667 = vmatpush1.bf16.msra.mxu1 %v14189_v36  ;;  %7708 = vmatpush1.bf16.msra.mxu0 %v14194_v5  ;;  %10813 = vtanh.f32 %v14208_v37 }
 0x939   :  { %7668 = vmatprep.subr.bf16.mxu1 %v14201_v33  ;;  %7709 = vmatprep.subr.bf16.mxu0 %v14206_v39  ;;  %v10812_v39 = vpop.eup %10811 }
 0x93c   :  { %7669 = vmatpush1.bf16.msra.mxu1 %v14215_v4  ;;  %7710 = vmatpush1.bf16.msra.mxu0 %v14220_v35  ;;  %v14252_v4 = vld [vmem:[%s14437_s6 + $0xe4] ss:$16 sps:$4 sm:$0xff]   ;;  %v14257_v35 = vld [vmem:[%s14437_s6 + $0xec] ss:$16 sps:$4 sm:$0xff]  }
 0x93d   :  { %7670 = vmatprep.subr.bf16.mxu1 %v14228_v42  ;;  %7711 = vmatprep.subr.bf16.mxu0 %v14233_v56  ;;  %v14264_v42 = vld [vmem:[%s14437_s6 + $0xe0] ss:$16 sps:$4 sm:$0xff]   ;;  %v14269_v56 = vld [vmem:[%s14437_s6 + $0xe8] ss:$16 sps:$4 sm:$0xff]  }
 0x940   :  { %7671 = vmatpush1.bf16.msra.mxu1 %v14240_v58  ;;  %7712 = vmatpush1.bf16.msra.mxu0 %v14245_v34 }
 0x941   :  { %7672 = vmatprep.subr.bf16.mxu1 %v14252_v4  ;;  %7713 = vmatprep.subr.bf16.mxu0 %v14257_v35 }
 0x942   :  { %v10814_v33 = vpop.eup %10813 }
 0x943   :  { %v7187_v5 = vmul.f32 %v10814_v33, %v10812_v39  ;;  %v15049_v33 = vld [vmem:[#allocation14_spill] sm:$0xff]  ;;  %v15050_v39 = vld [vmem:[#allocation15_spill] sm:$0xff] }
 0x944   :  { %7673 = vmatpush1.bf16.msra.mxu1 %v14264_v42  ;;  %7714 = vmatpush1.bf16.msra.mxu0 %v14269_v56 }
 0x945   :  { %7989 = vmatprep.subr.bf16.mxu1 %v13666_v19  ;;  %8030 = vmatprep.subr.bf16.mxu0 %v13671_v62  ;;  %v7188_v34 = vpack.c.bf16 %v7187_v5, %v7187_v5  ;;  %v15019_v19 = vld [vmem:[#allocation43_spill] sm:$0xff]  ;;  %v15020_v62 = vld [vmem:[#allocation44_spill] sm:$0xff]  ;;  %v15048_v5 = vld [vmem:[#allocation13_spill] sm:$0xff] }
 0x947   :  { %v7496_v58 = vrot.slane %v7188_v34, 2  ;;  %v15052_v34 = vld [vmem:[#allocation17_spill] sm:$0xff] }
 0x949   :  { %7691 = vmatmul.mubr.bf16.vlgmr.msra.gmra.mrb[96].mxu1 %v7496_v58  ;;  %7732 = vmatmul.mubr.bf16.vlgmr.msra.gmra.mrb[88].mxu0 %v7496_v58 }
 0x94a   :  { %7990 = vmatpush1.bf16.msra.mxu1 %v13680_v21  ;;  %8031 = vmatpush1.bf16.msra.mxu0 %v13685_v23  ;;  %v15021_v21 = vld [vmem:[#allocation45_spill] sm:$0xff]  ;;  %v15022_v23 = vld [vmem:[#allocation46_spill] sm:$0xff] }
 0x94b   :  { %7991 = vmatprep.subr.bf16.mxu1 %v13692_v60  ;;  %8032 = vmatprep.subr.bf16.mxu0 %v13697_v30  ;;  %v15023_v60 = vld [vmem:[#allocation47_spill] sm:$0xff]  ;;  %v15024_v30 = vld [vmem:[#allocation48_spill] sm:$0xff] }
 0x94c   :  { %8021 = vmatprep.mubr.bf16.mxu1 %v14687_v44  ;;  %8062 = vmatprep.mubr.bf16.mxu0 %v14687_v44 }
 0x94e   :  { %7992 = vmatpush1.bf16.msra.mxu1 %v13706_v8  ;;  %8033 = vmatpush1.bf16.msra.mxu0 %v13711_v9  ;;  %v15025_v8 = vld [vmem:[#allocation49_spill] sm:$0xff]  ;;  %v15026_v9 = vld [vmem:[#allocation50_spill] sm:$0xff] }
 0x94f   :  { %7993 = vmatprep.subr.bf16.mxu1 %v13718_v10  ;;  %8034 = vmatprep.subr.bf16.mxu0 %v13723_v11  ;;  %v15027_v10 = vld [vmem:[#allocation51_spill] sm:$0xff]  ;;  %v15028_v11 = vld [vmem:[#allocation52_spill] sm:$0xff] }
 0x952   :  { %7994 = vmatpush1.bf16.msra.mxu1 %v13732_v12  ;;  %8035 = vmatpush1.bf16.msra.mxu0 %v13737_v13  ;;  %v15029_v12 = vld [vmem:[#allocation53_spill] sm:$0xff]  ;;  %v15030_v13 = vld [vmem:[#allocation54_spill] sm:$0xff] }
 0x953   :  { %7995 = vmatprep.subr.bf16.mxu1 %v13744_v55  ;;  %8036 = vmatprep.subr.bf16.mxu0 %v13749_v14  ;;  %v15031_v55 = vld [vmem:[#allocation67_spill] sm:$0xff]  ;;  %v15032_v14 = vld [vmem:[#allocation69_spill] sm:$0xff] }
 0x956   :  { %7996 = vmatpush1.bf16.msra.mxu1 %v13756_v46  ;;  %8037 = vmatpush1.bf16.msra.mxu0 %v13761_v15  ;;  %v15033_v46 = vld [vmem:[#allocation70_spill] sm:$0xff]  ;;  %v15034_v15 = vld [vmem:[#allocation68_spill] sm:$0xff] }
 0x957   :  { %7997 = vmatprep.subr.bf16.mxu1 %v13768_v16  ;;  %8038 = vmatprep.subr.bf16.mxu0 %v13773_v47  ;;  %v15035_v16 = vld [vmem:[#allocation55_spill] sm:$0xff]  ;;  %v15036_v47 = vld [vmem:[#allocation56_spill] sm:$0xff] }
 0x95a   :  { %7998 = vmatpush1.bf16.msra.mxu1 %v13780_v25  ;;  %8039 = vmatpush1.bf16.msra.mxu0 %v13785_v29  ;;  %v15037_v25 = vld [vmem:[#allocation57_spill] sm:$0xff]  ;;  %v15038_v29 = vld [vmem:[#allocation58_spill] sm:$0xff] }
 0x95b   :  { %7999 = vmatprep.subr.bf16.mxu1 %v13792_v45  ;;  %8040 = vmatprep.subr.bf16.mxu0 %v13797_v48  ;;  %v15039_v45 = vld [vmem:[#allocation59_spill] sm:$0xff]  ;;  %v15040_v48 = vld [vmem:[#allocation60_spill] sm:$0xff] }
 0x95e   :  { %8000 = vmatpush1.bf16.msra.mxu1 %v13804_v40  ;;  %8041 = vmatpush1.bf16.msra.mxu0 %v13809_v22  ;;  %v15041_v40 = vld [vmem:[#allocation61_spill] sm:$0xff]  ;;  %v15042_v22 = vld [vmem:[#allocation62_spill] sm:$0xff] }
 0x95f   :  { %8001 = vmatprep.subr.bf16.mxu1 %v13816_v41  ;;  %8042 = vmatprep.subr.bf16.mxu0 %v13821_v50  ;;  %v15043_v41 = vld [vmem:[#allocation63_spill] sm:$0xff]  ;;  %v15044_v50 = vld [vmem:[#allocation64_spill] sm:$0xff] }
 0x962   :  { %8002 = vmatpush1.bf16.msra.mxu1 %v13828_v51  ;;  %8043 = vmatpush1.bf16.msra.mxu0 %v13833_v27  ;;  %v15045_v51 = vld [vmem:[#allocation65_spill] sm:$0xff]  ;;  %v15046_v27 = vld [vmem:[#allocation11_spill] sm:$0xff] }
 0x963   :  { %8003 = vmatprep.subr.bf16.mxu1 %v13840_v43  ;;  %8044 = vmatprep.subr.bf16.mxu0 %v15019_v19  ;;  %v15047_v43 = vld [vmem:[#allocation12_spill] sm:$0xff]  ;;  %v15053_v19 = vld [vmem:[#allocation18_spill] sm:$0xff] }
 0x966   :  { %8004 = vmatpush1.bf16.msra.mxu1 %v15020_v62  ;;  %8045 = vmatpush1.bf16.msra.mxu0 %v15021_v21  ;;  %v15054_v62 = vld [vmem:[#allocation20_spill] sm:$0xff]  ;;  %v15055_v21 = vld [vmem:[#allocation19_spill] sm:$0xff] }
 0x967   :  { %8339 = vmatprep.subr.bf16.mxu1 %v15022_v23  ;;  %8380 = vmatprep.subr.bf16.mxu0 %v15023_v60 }
 0x969   :  { %8022 = vmatmul.mubr.bf16.vlgmr.msra.gmra.mrb[100].mxu1 %v7496_v58  ;;  %8063 = vmatmul.mubr.bf16.vlgmr.msra.gmra.mrb[92].mxu0 %v7496_v58  ;;  %v15051_v58 = vld [vmem:[#allocation16_spill] sm:$0xff] }
 0x96a   :  { %8340 = vmatpush1.bf16.msra.mxu1 %v15024_v30  ;;  %8381 = vmatpush1.bf16.msra.mxu0 %v15025_v8 }
 0x96b   :  { %8341 = vmatprep.subr.bf16.mxu1 %v15026_v9  ;;  %8382 = vmatprep.subr.bf16.mxu0 %v15027_v10 }
 0x96c   :  { %8371 = vmatprep.mubr.bf16.mxu1 %v14687_v44  ;;  %8412 = vmatprep.mubr.bf16.mxu0 %v14687_v44 }
 0x96e   :  { %8342 = vmatpush1.bf16.msra.mxu1 %v15028_v11  ;;  %8383 = vmatpush1.bf16.msra.mxu0 %v15029_v12 }
 0x96f   :  { %8343 = vmatprep.subr.bf16.mxu1 %v15030_v13  ;;  %8384 = vmatprep.subr.bf16.mxu0 %v15031_v55  ;;  %v7740_v13 = vld [vmem:[%s14439_s8] sm:$0xf]  ;;  %v15056_v55 = vld [vmem:[#allocation8_spill] sm:$0xff] }
 0x972   :  { %8344 = vmatpush1.bf16.msra.mxu1 %v15032_v14  ;;  %8385 = vmatpush1.bf16.msra.mxu0 %v15033_v46  ;;  %v7745_v14 = vrot.slane %v7740_v13, %v15056_v55 }
 0x973   :  { %8345 = vmatprep.subr.bf16.mxu1 %v15034_v15  ;;  %8386 = vmatprep.subr.bf16.mxu0 %v15035_v16  ;;  %v7749_v16 = vrot.slane %v7740_v13, %v14747_v53 }
 0x976   :  { %8346 = vmatpush1.bf16.msra.mxu1 %v15036_v47  ;;  %8387 = vmatpush1.bf16.msra.mxu0 %v15037_v25 }
 0x977   :  { %8347 = vmatprep.subr.bf16.mxu1 %v15038_v29  ;;  %8388 = vmatprep.subr.bf16.mxu0 %v15039_v45 }
 0x97a   :  { %8348 = vmatpush1.bf16.msra.mxu1 %v15040_v48  ;;  %8389 = vmatpush1.bf16.msra.mxu0 %v15041_v40 }
 0x97b   :  { %8349 = vmatprep.subr.bf16.mxu1 %v15042_v22  ;;  %8390 = vmatprep.subr.bf16.mxu0 %v15043_v41 }
 0x97e   :  { %8350 = vmatpush1.bf16.msra.mxu1 %v15044_v50  ;;  %8391 = vmatpush1.bf16.msra.mxu0 %v15045_v51 }
 0x97f   :  { %8351 = vmatprep.subr.bf16.mxu1 %v15046_v27  ;;  %8392 = vmatprep.subr.bf16.mxu0 %v15047_v43 }
 0x982   :  { %8352 = vmatpush1.bf16.msra.mxu1 %v15048_v5  ;;  %8393 = vmatpush1.bf16.msra.mxu0 %v15049_v33 }
 0x983   :  { %8353 = vmatprep.subr.bf16.mxu1 %v15050_v39  ;;  %8394 = vmatprep.subr.bf16.mxu0 %v15051_v58  ;;  %v7757_v39 = vrot.slane %v7740_v13, %v14748_v1 }
 0x986   :  { %8354 = vmatpush1.bf16.msra.mxu1 %v15052_v34  ;;  %8395 = vmatpush1.bf16.msra.mxu0 %v15053_v19  ;;  %v7753_v34 = vrot.slane %v7740_v13, %v14749_v63 }
 0x987   :  { %8584 = vmatprep.subr.bf16.mxu1 %v15054_v62  ;;  %8625 = vmatprep.subr.bf16.mxu0 %v15055_v21 }
 0x9fa   :  { %v7447_v23 = vpop.f32.mrb[92].mxu1  ;;  %v7488_v60 = vpop.f32.mrb[84].mxu0 }
 0x9fb   :  { %v7449_v30 = vpop.f32.mrb[93].mxu1  ;;  %v7490_v8 = vpop.f32.mrb[85].mxu0 }
 0x9fc   :  { %v7451_v9 = vpop.f32.mrb[94].mxu1  ;;  %v7492_v10 = vpop.f32.mrb[86].mxu0 }
 0x9fd   :  { %v7452_v11 = vpop.f32.mrb[95].mxu1  ;;  %v7493_v12 = vpop.f32.mrb[87].mxu0 }
 0xa1c   :  { %v7692_v46 = vpop.f32.mrb[96].mxu1  ;;  %v7733_v15 = vpop.f32.mrb[88].mxu0 }
 0xa1d   :  { %v7693_v47 = vadd.f32 %v7692_v46, %v7447_v23  ;;  %v7734_v25 = vadd.f32 %v7733_v15, %v7488_v60  ;;  %v7694_v29 = vpop.f32.mrb[97].mxu1  ;;  %v7735_v45 = vpop.f32.mrb[89].mxu0 }
 0xa1e   :  { %v7695_v48 = vadd.f32 %v7694_v29, %v7449_v30  ;;  %v7736_v40 = vadd.f32 %v7735_v45, %v7490_v8  ;;  %v7696_v22 = vpop.f32.mrb[98].mxu1  ;;  %v7737_v41 = vpop.f32.mrb[90].mxu0 }
 0xa1f   :  { %v7762_v50 = vadd.f32 %v7745_v14, %v7693_v47  ;;  %v7697_v51 = vpop.f32.mrb[99].mxu1  ;;  %v7738_v27 = vpop.f32.mrb[91].mxu0  ;;  %v7764_v62 = vadd.f32 %v7753_v34, %v7734_v25 }
 0xa20   :  { %v7763_v43 = vadd.f32 %v7749_v16, %v7695_v48  ;;  %v7765_v58 = vadd.f32 %v7757_v39, %v7736_v40 }
 0xa21   :  { %v9631_v5 = vmul.f32 -1.442695, %v7762_v50 }
 0xa22   :  { %v9632_v33 = vmul.f32 -1.442695, %v7763_v43  ;;  %v9633_v19 = vmul.f32 -1.442695, %v7765_v58 }
 0xa23   :  { %10815 = vpow2.f32 %v9631_v5 }
 0xa24   :  { %10817 = vpow2.f32 %v9632_v33 }
 0xa25   :  { %10819 = vpow2.f32 %v9633_v19 }
 0xa26   :  { %10821 = vtanh.f32 %v7764_v62 }
 0xa2d   :  { %v10816_v21 = vpop.eup %10815 }
 0xa2e   :  { %v10818_v23 = vpop.eup %10817  ;;  %v7769_v60 = vadd.f32 1.0, %v10816_v21 }
 0xa2f   :  { %v7775_v30 = vadd.f32 1.0, %v10818_v23  ;;  %v10820_v8 = vpop.eup %10819 }
 0xa30   :  { %10823 = vrcp.f32 %v7769_v60  ;;  %v10822_v9 = vpop.eup %10821  ;;  %v7782_v14 = vadd.f32 1.0, %v10820_v8 }
 0xa31   :  { %10825 = vrcp.f32 %v7775_v30 }
 0xa32   :  { %10827 = vrcp.f32 %v7782_v14 }
 0xa3a   :  { %v10824_v10 = vpop.eup %10823 }
 0xa3b   :  { %v10826_v11 = vpop.eup %10825  ;;  %v7786_v12 = vmul.f32 %v10824_v10, %v10822_v9 }
 0xa3c   :  { %v7785_v46 = vmul.f32 %v10826_v11, %v14079_v54  ;;  %v8023_v15 = vpop.f32.mrb[100].mxu1  ;;  %v8064_v13 = vpop.f32.mrb[92].mxu0 }
 0xa3d   :  { %v8075_v16 = vrot.slane %v8023_v15, 2  ;;  %v8025_v47 = vpop.f32.mrb[101].mxu1  ;;  %v8066_v25 = vpop.f32.mrb[93].mxu0  ;;  %v8077_v33 = vrot.slane %v8064_v13, 2 }
 0xa3e   :  { %v14353_v29 = vadd.f32 %v7786_v12, %v7785_v46  ;;  %v8076_v45 = vrot.slane %v8025_v47, 2  ;;  %v8027_v48 = vpop.f32.mrb[102].mxu1  ;;  %v8068_v40 = vpop.f32.mrb[94].mxu0  ;;  %v8078_v43 = vrot.slane %v8066_v25, 2 }
 0xa3f   :  { %v8083_v22 = vadd.f32 %v14908_v0, %v8075_v16  ;;  %v8028_v41 = vpop.f32.mrb[103].mxu1  ;;  %v8069_v50 = vpop.f32.mrb[95].mxu0  ;;  %v8085_v19 = vadd.f32 %v14911_v20, %v8077_v33 }
 0xa40   :  { %v8084_v51 = vadd.f32 %v14909_v28, %v8076_v45  ;;  %10829 = vtanh.f32 %v14353_v29  ;;  %v8086_v5 = vadd.f32 %v14910_v57, %v8078_v43  ;;  %v10828_v39 = vpop.eup %10827 }
 0xa41   :  { %v9667_v54 = vmul.f32 -1.442695, %v8083_v22 }
 0xa42   :  { %v9668_v27 = vmul.f32 -1.442695, %v8084_v51  ;;  %v9669_v34 = vmul.f32 -1.442695, %v8086_v5 }
 0xa43   :  { %10831 = vpow2.f32 %v9667_v54 }
 0xa44   :  { %10833 = vpow2.f32 %v9668_v27 }
 0xa45   :  { %10835 = vpow2.f32 %v9669_v34 }
 0xa46   :  { %10837 = vtanh.f32 %v8085_v19 }
 0xa4a   :  { %v10830_v58 = vpop.eup %10829 }
 0xa4b   :  { %v7789_v0 = vmul.f32 %v10830_v58, %v10828_v39 }
 0xa4d   :  { %v10832_v62 = vpop.eup %10831  ;;  %v7790_v21 = vpack.c.bf16 %v7789_v0, %v7789_v0 }
 0xa4e   :  { %v10834_v23 = vpop.eup %10833  ;;  %v8090_v28 = vadd.f32 1.0, %v10832_v62 }
 0xa4f   :  { %v8096_v60 = vadd.f32 1.0, %v10834_v23  ;;  %v7794_v30 = vrot.slane %v7790_v21, 6  ;;  %8372 = vmatmul.mubr.bf16.vlgmr.msra.gmra.mrb[104].mxu1 %v7790_v21  ;;  %8413 = vmatmul.mubr.bf16.vlgmr.msra.gmra.mrb[96].mxu0 %v7790_v21  ;;  %v10836_v57 = vpop.eup %10835 }
 0xa50   :  { %10839 = vrcp.f32 %v8090_v28  ;;  %8585 = vmatpush1.bf16.msra.mxu1 %v14089_v3  ;;  %8626 = vmatpush1.bf16.msra.mxu0 %v14094_v26  ;;  %v10838_v20 = vpop.eup %10837  ;;  %v15057_v3 = vld [vmem:[#allocation21_spill] sm:$0xff] }
 0xa51   :  { %10841 = vrcp.f32 %v8096_v60  ;;  %7796 = vst [vmem:[%s14442_s11 + $0x4] sm:$0x4] %v7794_v30  ;;  %8586 = vmatprep.subr.bf16.mxu1 %v14099_v24  ;;  %8627 = vmatprep.subr.bf16.mxu0 %v14104_v17 }
 0xa52   :  { %8616 = vmatprep.mubr.bf16.mxu1 %v14687_v44  ;;  %8657 = vmatprep.mubr.bf16.mxu0 %v14687_v44  ;;  %v8107_v44 = vrot.slane %v14208_v37, 6  ;;  %v15066_v37 = vld [vmem:[#allocation30_spill] sm:$0xff] }
 0xa54   :  { %8587 = vmatpush1.bf16.msra.mxu1 %v14111_v7  ;;  %8628 = vmatpush1.bf16.msra.mxu0 %v14116_v59  ;;  %v8103_v7 = vadd.f32 1.0, %v10836_v57 }
 0xa55   :  { %8588 = vmatprep.subr.bf16.mxu1 %v14126_v61  ;;  %8629 = vmatprep.subr.bf16.mxu0 %v14131_v2  ;;  %v15058_v2 = vld [vmem:[#allocation22_spill] sm:$0xff] }
 0xa56   :  { %10843 = vrcp.f32 %v8103_v7 }
 0xa58   :  { %8589 = vmatpush1.bf16.msra.mxu1 %v14140_v52  ;;  %8630 = vmatpush1.bf16.msra.mxu0 %v14145_v6  ;;  %v15059_v52 = vld [vmem:[#allocation24_spill] sm:$0xff]  ;;  %v15060_v6 = vld [vmem:[#allocation23_spill] sm:$0xff] }
 0xa59   :  { %8590 = vmatprep.subr.bf16.mxu1 %v14152_v49  ;;  %8631 = vmatprep.subr.bf16.mxu0 %v15057_v3  ;;  %v15061_v49 = vld [vmem:[#allocation25_spill] sm:$0xff] }
 0xa5a   :  { %v10840_v26 = vpop.eup %10839 }
 0xa5b   :  { %v10842_v24 = vpop.eup %10841  ;;  %v8110_v17 = vmul.f32 %v10840_v26, %v10838_v20 }
 0xa5c   :  { %v8109_v59 = vmul.f32 %v10842_v24, %v8107_v44  ;;  %8591 = vmatpush1.bf16.msra.mxu1 %v14164_v31  ;;  %8632 = vmatpush1.bf16.msra.mxu0 %v14169_v32  ;;  %v15062_v31 = vld [vmem:[#allocation26_spill] sm:$0xff]  ;;  %v15063_v32 = vld [vmem:[#allocation28_spill] sm:$0xff] }
 0xa5d   :  { %8592 = vmatprep.subr.bf16.mxu1 %v14176_v18  ;;  %8633 = vmatprep.subr.bf16.mxu0 %v14181_v38  ;;  %v15064_v18 = vld [vmem:[#allocation27_spill] sm:$0xff]  ;;  %v15065_v38 = vld [vmem:[#allocation29_spill] sm:$0xff] }
 0xa5e   :  { %v8111_v61 = vadd.f32 %v8110_v17, %v8109_v59 }
 0xa60   :  { %8726 = vst [vmem:[#allocation4 - $0x6] sm:$0xc0] %v8111_v61  ;;  %8593 = vmatpush1.bf16.msra.mxu1 %v14189_v36  ;;  %8634 = vmatpush1.bf16.msra.mxu0 %v15058_v2  ;;  %10845 = vtanh.f32 %v8111_v61  ;;  %v10844_v36 = vpop.eup %10843 }
 0xa61   :  { %8594 = vmatprep.subr.bf16.mxu1 %v15059_v52  ;;  %8635 = vmatprep.subr.bf16.mxu0 %v15060_v6 }
 0xa64   :  { %8595 = vmatpush1.bf16.msra.mxu1 %v15061_v49  ;;  %8636 = vmatpush1.bf16.msra.mxu0 %v15062_v31 }
 0xa65   :  { %8596 = vmatprep.subr.bf16.mxu1 %v15063_v32  ;;  %8637 = vmatprep.subr.bf16.mxu0 %v15064_v18 }
 0xa68   :  { %8597 = vmatpush1.bf16.msra.mxu1 %v15065_v38  ;;  %8638 = vmatpush1.bf16.msra.mxu0 %v15066_v37 }
 0xa69   :  { %8598 = vmatprep.subr.bf16.mxu1 %v14252_v4  ;;  %8639 = vmatprep.subr.bf16.mxu0 %v14257_v35  ;;  %v8666_v35 = vld [vmem:[%s14439_s8] sm:$0xf]  ;;  %s10914_s8 = smov [#allocation4]  }
 0xa6a   :  { %v10846_v8 = vpop.eup %10845  ;;  %v8675_v45 = vrot.slane %v8666_v35, %v14747_v53  ;;  %v8679_v53 = vrot.slane %v8666_v35, %v14749_v63  ;;  %s8748_s5 = sshll.u32 %s10914_s8, 4  ;;  %s8749_s5 = int_to_ptr.vmem [resolvable:$true] %s8748_s5 }
 0xa6b   :  { %v8113_v9 = vmul.f32 %v10846_v8, %v10844_v36  ;;  %s10863_s0 = scalar_lea.vmem %s8749_s5, 64  ;;  %p10868_p1 = scmp.lt.s32.totalorder %s8749_s5, %s8749_s5 }
 0xa6c   :  { %8599 = vmatpush1.bf16.msra.mxu1 %v14264_v42  ;;  %8640 = vmatpush1.bf16.msra.mxu0 %v14269_v56  ;;  %v8671_v42 = vrot.slane %v8666_v35, %v15056_v55  ;;  %v8683_v55 = vrot.slane %v8666_v35, %v14748_v1  ;;  %p10864_p0 = scmp.ne.s32.totalorder %s8749_s5, %s10863_s0  ;;  %p10869_p2 = scmp.lt.s32.totalorder %s10863_s0, %s10863_s0 }
 0xa6d   :  { %v8114_v10 = vpack.c.bf16 %v8113_v9, %v8113_v9  ;;  %8723 = vst [vmem:[#allocation2 - $0x6] sm:$0xc0] %v8113_v9 }
 0xa6e   :  { %p10870_p3 = por %p10869_p2, %p10868_p1 }
 0xa6f   :  { %v8422_v11 = vrot.slane %v8114_v10, 3 }
 0xa70   :  { %p10871_p4 = pnand %p10870_p3, %p10864_p0 }
 0xa71   :  { %8617 = vmatmul.mubr.bf16.vlgmr.msra.gmra.mrb[108].mxu1 %v8422_v11  ;;  %8658 = vmatmul.mubr.bf16.vlgmr.msra.gmra.mrb[100].mxu0 %v8422_v11 }
 0xb22   :  { %v8373_v12 = vpop.f32.mrb[104].mxu1  ;;  %v8414_v14 = vpop.f32.mrb[96].mxu0 }
 0xb23   :  { %v8375_v46 = vpop.f32.mrb[105].mxu1  ;;  %v8416_v15 = vpop.f32.mrb[97].mxu0 }
 0xb24   :  { %v8377_v13 = vpop.f32.mrb[106].mxu1  ;;  %v8418_v16 = vpop.f32.mrb[98].mxu0 }
 0xb25   :  { %v8378_v4 = vpop.f32.mrb[107].mxu1  ;;  %v8419_v47 = vpop.f32.mrb[99].mxu0 }
 0xb44   :  { %v8618_v56 = vpop.f32.mrb[108].mxu1  ;;  %v8659_v25 = vpop.f32.mrb[100].mxu0 }
 0xb45   :  { %v8619_v48 = vadd.f32 %v8618_v56, %v8373_v12  ;;  %v8660_v40 = vadd.f32 %v8659_v25, %v8414_v14  ;;  %v8620_v22 = vpop.f32.mrb[109].mxu1  ;;  %v8661_v41 = vpop.f32.mrb[101].mxu0 }
 0xb46   :  { %v8621_v50 = vadd.f32 %v8620_v22, %v8375_v46  ;;  %v8662_v51 = vadd.f32 %v8661_v41, %v8416_v15  ;;  %v8622_v54 = vpop.f32.mrb[110].mxu1  ;;  %v8663_v27 = vpop.f32.mrb[102].mxu0 }
 0xb47   :  { %v8688_v43 = vadd.f32 %v8671_v42, %v8619_v48  ;;  %v8623_v5 = vpop.f32.mrb[111].mxu1  ;;  %v8664_v33 = vpop.f32.mrb[103].mxu0  ;;  %v8690_v62 = vadd.f32 %v8679_v53, %v8660_v40 }
 0xb48   :  { %v8689_v39 = vadd.f32 %v8675_v45, %v8621_v50  ;;  %v8691_v19 = vadd.f32 %v8683_v55, %v8662_v51 }
 0xb49   :  { %v9734_v58 = vmul.f32 -1.442695, %v8688_v43 }
 0xb4a   :  { %v9735_v34 = vmul.f32 -1.442695, %v8689_v39  ;;  %v9736_v0 = vmul.f32 -1.442695, %v8691_v19 }
 0xb4b   :  { %10847 = vpow2.f32 %v9734_v58 }
 0xb4c   :  { %10849 = vpow2.f32 %v9735_v34 }
 0xb4d   :  { %10851 = vpow2.f32 %v9736_v0 }
 0xb4e   :  { %10853 = vtanh.f32 %v8690_v62 }
 0xb55   :  { %v10848_v21 = vpop.eup %10847 }
 0xb56   :  { %v10850_v23 = vpop.eup %10849  ;;  %v8695_v28 = vadd.f32 1.0, %v10848_v21 }
 0xb57   :  { %v8701_v60 = vadd.f32 1.0, %v10850_v23  ;;  %v10852_v30 = vpop.eup %10851 }
 0xb58   :  { %10855 = vrcp.f32 %v8695_v28  ;;  %v10854_v57 = vpop.eup %10853  ;;  %v8708_v26 = vadd.f32 1.0, %v10852_v30 }
 0xb59   :  { %10857 = vrcp.f32 %v8701_v60 }
 0xb5a   :  { %10859 = vrcp.f32 %v8708_v26 }
 0xb62   :  { %v10856_v20 = vpop.eup %10855 }
 0xb63   :  { %v10858_v3 = vpop.eup %10857  ;;  %v8712_v1 = vmul.f32 %v10856_v20, %v10854_v57 }
 0xb64   :  { %v8711_v63 = vmul.f32 %v10858_v3, %v14353_v29 }
 0xb66   :  { %v8713_v44 = vadd.f32 %v8712_v1, %v8711_v63 }
 0xb68   :  { %8728 = vst [vmem:[#allocation4 + $0x2] sm:$0x3] %v8713_v44  ;;  %10861 = vtanh.f32 %v8713_v44 }
 0xb69   :  { %10874 = shalt.err (!%p10871_p4)
}
 0xb6a   :  { %s10875_s27 = scalar_lea.hbm %s14444_s13, 64 }
 0xb6b   :  { %p10876_p5 = scmp.ne.s32.totalorder %s14444_s13, %s10875_s27  ;;  %p10879_p6 = scmp.lt.u32.totalorder %s10875_s27, %s14444_s13 }
 0xb6d   :  { %p10881_p7 = pnand %p10879_p6, %p10876_p5 }
 0xb6f   :  { %10884 = shalt.err (!%p10881_p7)
}
 0xb70   :  { %s10915_s7 = smov 32   ;;  %s10916_s29 = smov 2   ;;  %v10860_v29 = vpop.eup %10859 }
 0xb71   :  { %8754 = dma.vmem_to_hbm [thread:$0]  %s8749_s5, 64, %s14444_s13, [#allocation5], %s10915_s7, %s10915_s7, %s10916_s29  }
 0xb72   :  { %s10917_s15 = smov [#allocation2]   ;;  %v10862_v24 = vpop.eup %10861 }
 0xb73   :  { %s8736_s16 = sshll.u32 %s10917_s15, 4  ;;  %v8715_v17 = vmul.f32 %v10862_v24, %v10860_v29  ;;  %s8737_s16 = int_to_ptr.vmem [resolvable:$true] %s8736_s16 }
 0xb74   :  { %s10885_s17 = scalar_lea.vmem %s8737_s16, 64  ;;  %p10890_p9 = scmp.lt.s32.totalorder %s8737_s16, %s8737_s16 }
 0xb75   :  { %v9743_v7 = vpack.c.bf16 %v8715_v17, %v8715_v17  ;;  %8725 = vst [vmem:[#allocation2 + $0x2] sm:$0x3] %v8715_v17  ;;  %p10886_p8 = scmp.ne.s32.totalorder %s8737_s16, %s10885_s17  ;;  %p10891_p10 = scmp.lt.s32.totalorder %s10885_s17, %s10885_s17 }
 0xb77   :  { %p10892_p11 = por %p10891_p10, %p10890_p9 }
 0xb79   :  { %p10893_p12 = pnand %p10892_p11, %p10886_p8 }
 0xb7b   :  { %10896 = shalt.err (!%p10893_p12)
}
 0xb7c   :  { %s10897_s20 = scalar_lea.hbm %s14443_s12, 64 }
 0xb7d   :  { %p10898_p13 = scmp.ne.s32.totalorder %s14443_s12, %s10897_s20  ;;  %p10901_p0 = scmp.lt.u32.totalorder %s10897_s20, %s14443_s12 }
 0xb7f   :  { %p10903_p1 = pnand %p10901_p0, %p10898_p13 }
 0xb81   :  { %10906 = shalt.err (!%p10903_p1)
}
 0xb82   :  { %8742 = dma.vmem_to_hbm [thread:$0]  %s8737_s16, 64, %s14443_s12, [#allocation3], %s10915_s7, %s10915_s7, %s10916_s29   ;;  %v8720_v59 = vrot.slane %v9743_v7, 5 }
 0xb84   :  { %8722 = vst [vmem:[%s14442_s11 + $0x4] sm:$0x8] %v8720_v59 }
 0xb85   :  { %10907 = dma.done.wait [#allocation3], 64  }
 0xb86   :  { %10908 = vsyncadd [#allocation3], 4294967232 }
 0xb87   :  { %10909 = dma.done.wait [#allocation5], 64  }
 0xb88   :  { %10910 = vsyncadd [#allocation5], 4294967232 }
 0xb89   :  { %8763 = vsyncpa [#allocation3], 1 }
 0xb8a   :  { %8764 = vsyncpa [#allocation5], 1 }

</bundles_post_ra>
